<compile_context>
chip_gen: v7x
topology: tpu7x:2x2x1
jax: 0.10.0
libtpu: 0.0.40
codegen_flags: <defaults>
</compile_context>

<pallas_src>
import functools

import jax
import jax.numpy as jnp
import numpy as np
from jax import lax
from jax.experimental import pallas as pl
from jax.experimental.pallas import tpu as pltpu

EPS = 1e-5          # InstanceNorm1d / LayerNorm eps (PyTorch default)
NEG_SLOPE = 0.2     # LeakyReLU negative slope


def _leaky(h):
    return jnp.maximum(h, NEG_SLOPE * h)


# --------------------------------------------------------------------------
# DownBlock: MaskedConv1D(k=3, s=2, p=1) + mask + InstanceNorm1d + LeakyReLU
# --------------------------------------------------------------------------
def _down_block_kernel(x2_ref, mo_ref, w_eo_ref, w0_ref, b_ref, out_ref, *, c_in):
    """One batch element.  x2_ref: (T/2, 2*C_in), row t = [x[2t] | x[2t+1]]."""
    x2 = x2_ref[...]
    th = x2.shape[0]
    # taps k=1 (x[2t]) and k=2 (x[2t+1]) fused into one MXU matmul, K = 2*C_in
    conv = jnp.dot(x2, w_eo_ref[...], preferred_element_type=jnp.float32)
    # tap k=0 needs x[2t-1] = odd[t-1]   (zero row at t == 0)
    odd = x2[:, c_in:]
    prev_odd = jnp.concatenate(
        [jnp.zeros((1, odd.shape[1]), odd.dtype), odd[:th - 1, :]], axis=0)
    conv = conv + jnp.dot(prev_odd, w0_ref[...], preferred_element_type=jnp.float32)
    conv = (conv + b_ref[...]) * mo_ref[...]              # conv bias, then output mask
    # InstanceNorm1d over time (biased variance, no affine)
    mu = jnp.mean(conv, axis=0, keepdims=True)
    r = conv - mu
    var = jnp.mean(r * r, axis=0, keepdims=True)
    out_ref[...] = _leaky(r * lax.rsqrt(var + EPS))


def down_block(x, m_out, w_eo, w0, b):
    """x: (B, T, C_in) channel-last; m_out: (B, T//2) float mask at the output resolution."""
    B, T, c_in = x.shape
    th = T // 2
    c_out = w_eo.shape[1]
    x2 = x.reshape(B, th, 2 * c_in)        # zero-copy repack: row t = [x[2t] | x[2t+1]]
    mo = m_out.reshape(B, th, 1)
    kernel = functools.partial(_down_block_kernel, c_in=c_in)
    return pl.pallas_call(
        kernel,
        out_shape=jax.ShapeDtypeStruct((B, th, c_out), jnp.float32),
        grid_spec=pltpu.PrefetchScalarGridSpec(
            num_scalar_prefetch=0,
            grid=(B,),
            in_specs=[
                pl.BlockSpec((None, th, 2 * c_in), lambda bi: (bi, 0, 0)),
                pl.BlockSpec((None, th, 1), lambda bi: (bi, 0, 0)),
                pl.BlockSpec(w_eo.shape, lambda bi: (0, 0)),
                pl.BlockSpec(w0.shape, lambda bi: (0, 0)),
                pl.BlockSpec(b.shape, lambda bi: (0, 0)),
            ],
            out_specs=pl.BlockSpec((None, th, c_out), lambda bi: (bi, 0, 0)),
        ),
        compiler_params=pltpu.CompilerParams(dimension_semantics=("parallel",)),
    )(x2, mo, w_eo, w0, b)


# --------------------------------------------------------------------------------------
# UpBlock: MaskedConvTranspose1D(k=3, s=2, p=1, op=1) + mask + InstanceNorm1d + LeakyReLU
# --------------------------------------------------------------------------------------
def _up_block_kernel(x_ref, m_ref, wc_ref, w0_ref, b_ref, out_ref, *, c_out):
    """One batch element.  Output packed lane-dense: out[t] = [ y[2t] | y[2t+1] ]."""
    x = x_ref[...]
    t_in = x.shape[0]
    m = m_ref[...]
    bias = b_ref[...]
    # even rows: x[t] @ W[:,:,1];  odd rows: x[t] @ W[:,:,2]  -> one matmul, N = 2*C_out
    eo = jnp.dot(x, wc_ref[...], preferred_element_type=jnp.float32)
    # odd rows also need x[t+1] @ W[:,:,0]   (zero row at t == T_in-1)
    x_next = jnp.concatenate(
        [x[1:, :], jnp.zeros((1, x.shape[1]), x.dtype)], axis=0)
    o_extra = jnp.dot(x_next, w0_ref[...], preferred_element_type=jnp.float32)
    e = (eo[:, :c_out] + bias) * m                  # nearest-upsampled mask is the same
    o = (eo[:, c_out:] + o_extra + bias) * m        # for even and odd output rows
    # InstanceNorm1d over the full 2*T_in time axis, from the two packed halves
    n = 2.0 * t_in
    mu = (jnp.sum(e, axis=0, keepdims=True) + jnp.sum(o, axis=0, keepdims=True)) / n
    re = e - mu
    ro = o - mu
    var = (jnp.sum(re * re, axis=0, keepdims=True) +
           jnp.sum(ro * ro, axis=0, keepdims=True)) / n
    inv = lax.rsqrt(var + EPS)
    out_ref[...] = jnp.concatenate([_leaky(re * inv), _leaky(ro * inv)], axis=-1)


def up_block(x, m_in, wc, w0, b):
    """x: (B, T, C_in); m_in: (B, T) float mask at the *input* resolution."""
    B, T, c_in = x.shape
    c_out = w0.shape[1]
    mi = m_in.reshape(B, T, 1)
    kernel = functools.partial(_up_block_kernel, c_out=c_out)
    out = pl.pallas_call(
        kernel,
        out_shape=jax.ShapeDtypeStruct((B, T, 2 * c_out), jnp.float32),
        grid_spec=pltpu.PrefetchScalarGridSpec(
            num_scalar_prefetch=0,
            grid=(B,),
            in_specs=[
                pl.BlockSpec((None, T, c_in), lambda bi: (bi, 0, 0)),
                pl.BlockSpec((None, T, 1), lambda bi: (bi, 0, 0)),
                pl.BlockSpec(wc.shape, lambda bi: (0, 0)),
                pl.BlockSpec(w0.shape, lambda bi: (0, 0)),
                pl.BlockSpec(b.shape, lambda bi: (0, 0)),
            ],
            out_specs=pl.BlockSpec((None, T, 2 * c_out), lambda bi: (bi, 0, 0)),
        ),
        compiler_params=pltpu.CompilerParams(dimension_semantics=("parallel",)),
    )(x, mi, wc, w0, b)
    return out.reshape(B, 2 * T, c_out)     # interleave even/odd rows (zero-copy)


# ---------------------------------------------------------------------------------------
# Classifier: one fused kernel per batch element.
#   conv0(1x1) -> InstanceNorm -> LeakyReLU -> [max|avg]-pool
#   -> Linear(2H->H) -> channel-LayerNorm -> ReLU -> (Dropout=identity) -> Linear(H->K)
# ---------------------------------------------------------------------------------------
def _classifier_kernel(x_ref, w0_ref, w1_ref, lnw_ref, lnb_ref, w2_ref, b2_ref, out_ref):
    h = jnp.dot(x_ref[...], w0_ref[...], preferred_element_type=jnp.float32)
    mu = jnp.mean(h, axis=0, keepdims=True)
    r = h - mu
    var = jnp.mean(r * r, axis=0, keepdims=True)
    y = _leaky(r * lax.rsqrt(var + EPS))
    # global max / avg pool over time -> (1, 2H), kept in VMEM (never hits HBM)
    pooled = jnp.concatenate([jnp.max(y, axis=0, keepdims=True),
                              jnp.mean(y, axis=0, keepdims=True)], axis=-1)
    z = jnp.dot(pooled, w1_ref[...], preferred_element_type=jnp.float32)
    zmu = jnp.mean(z, axis=-1, keepdims=True)
    zr = z - zmu
    zv = jnp.mean(zr * zr, axis=-1, keepdims=True)
    z = zr * lax.rsqrt(zv + EPS) * lnw_ref[...] + lnb_ref[...]
    z = jnp.maximum(z, 0.0)                 # ReLU; Dropout(0.5) is identity in eval mode
    out_ref[...] = jnp.dot(z, w2_ref[...], preferred_element_type=jnp.float32) + b2_ref[...]


def classifier(feat, w0, w1, ln_w, ln_b, w2, b2):
    B, T, H = feat.shape
    k = w2.shape[1]
    out = pl.pallas_call(
        _classifier_kernel,
        out_shape=jax.ShapeDtypeStruct((B, 1, k), jnp.float32),
        grid_spec=pltpu.PrefetchScalarGridSpec(
            num_scalar_prefetch=0,
            grid=(B,),
            in_specs=[
                pl.BlockSpec((None, T, H), lambda bi: (bi, 0, 0)),
                pl.BlockSpec(w0.shape, lambda bi: (0, 0)),
                pl.BlockSpec(w1.shape, lambda bi: (0, 0)),
                pl.BlockSpec(ln_w.shape, lambda bi: (0, 0)),
                pl.BlockSpec(ln_b.shape, lambda bi: (0, 0)),
                pl.BlockSpec(w2.shape, lambda bi: (0, 0)),
                pl.BlockSpec(b2.shape, lambda bi: (0, 0)),
            ],
            out_specs=pl.BlockSpec((None, 1, k), lambda bi: (bi, 0, 0)),
        ),
        compiler_params=pltpu.CompilerParams(dimension_semantics=("parallel",)),
    )(feat, w0, w1, ln_w, ln_b, w2, b2)
    return out.reshape(B, k)


# -----------------------------------------------------------------------------
# Full forward
# -----------------------------------------------------------------------------
def deep_interpolator_forward(x_bct, mask_bt, params):
    """x_bct: (B, C_in, T) f32; mask_bt: (B, T) bool.
    Returns (normalized_inputs (B,C_in,T), reco (B,C_in,T), cls_scores (B,num_classes))."""
    x = jnp.transpose(x_bct, (0, 2, 1)).astype(jnp.float32)   # channel-last (B, T, C)
    mf = mask_bt.astype(jnp.float32)

    # normalize_batch: global mean / unbiased std of the raw input, then mask.
    # TODO(synk): whole-tensor scalar mean/std has no useful single-kernel tiling; kept in JAX.
    mu = jnp.mean(x_bct)
    sigma = jnp.std(x_bct, ddof=1)
    xn = (x - mu) / sigma * mf[:, :, None]

    # ---- Contraction ----
    h, m = xn, mf
    for lp in params["down"]:
        m_out = m[:, ::2]                       # nearest-downsampled mask
        h = down_block(h, m_out, lp["w_eo"], lp["w0"], lp["b"])
        m = m_out
    feat, feat_mask = h, m

    # ---- Classifier (single fused kernel) ----
    c = params["cls"]
    cls_scores = classifier(feat, c["w0"], c["w1"], c["ln_w"], c["ln_b"], c["w2"], c["b2"])

    # ---- Expansion ----
    h, m = feat, feat_mask
    for lp in params["up"]:
        h = up_block(h, m, lp["wc"], lp["w0"], lp["b"])
        m = jnp.repeat(m, 2, axis=1)            # nearest-upsampled mask
    reco = h

    return (jnp.transpose(xn, (0, 2, 1)),
            jnp.transpose(reco, (0, 2, 1)),
            cls_scores)


# -----------------------------------------------------------------------------
# Parameter handling: raw PyTorch-layout weights -> kernel-packed weights
# -----------------------------------------------------------------------------
def init_raw_params(key, c_in, hidden_channels, num_classes, contraction_hidden, expansion_hidden):
    f32 = jnp.float32
    down_ch = [c_in, contraction_hidden, 2 * contraction_hidden, 4 * contraction_hidden,
               8 * contraction_hidden, hidden_channels]
    up_ch = [hidden_channels, expansion_hidden, expansion_hidden // 2, expansion_hidden // 4,
             expansion_hidden // 8, c_in]
    keys = iter(jax.random.split(key, 32))
    nrm = lambda k, shape, s: (s * jax.random.normal(k, shape)).astype(f32)

    raw = {"down": [], "up": [], "cls": {}}
    for i in range(5):
        ci, co = down_ch[i], down_ch[i + 1]
        raw["down"].append((nrm(next(keys), (co, ci, 3), 0.3),   # Conv1d weight (out,in,k)
                            nrm(next(keys), (co,), 0.1)))
    for i in range(5):
        ci, co = up_ch[i], up_ch[i + 1]
        raw["up"].append((nrm(next(keys), (ci, co, 3), 0.3),     # ConvTranspose1d weight (in,out,k)
                          nrm(next(keys), (co,), 0.1)))
    H = hidden_channels
    raw["cls"] = {
        "conv0_w": nrm(next(keys), (H, H, 1), 0.3),              # Conv1d(H,H,1,bias=False)
        "conv1_w": nrm(next(keys), (H, 2 * H), 0.3),             # Linear(2H,H,bias=False)
        "ln_w": jnp.ones((H,), f32) + nrm(next(keys), (H,), 0.1),
        "ln_b": nrm(next(keys), (H,), 0.1),
        "conv2_w": nrm(next(keys), (num_classes, H), 0.3),       # Linear(H, num_classes)
        "conv2_b": nrm(next(keys), (num_classes,), 0.1),
    }
    return raw


def pack_params(raw):
    params = {"down": [], "up": [], "cls": {}}
    for w, b in raw["down"]:
        wk = [w[:, :, k].T for k in range(3)]                      # (C_in, C_out) each
        params["down"].append({
            "w_eo": jnp.concatenate([wk[1], wk[2]], axis=0),       # (2*C_in, C_out)
            "w0": wk[0],
            "b": b[None, :],
        })
    for w, b in raw["up"]:
        params["up"].append({
            "wc": jnp.concatenate([w[:, :, 1], w[:, :, 2]], axis=1),   # (C_in, 2*C_out)
            "w0": w[:, :, 0],
            "b": b[None, :],
        })
    c = raw["cls"]
    params["cls"] = {
        "w0": c["conv0_w"][:, :, 0].T,
        "w1": c["conv1_w"].T,
        "ln_w": c["ln_w"][None, :],
        "ln_b": c["ln_b"][None, :],
        "w2": c["conv2_w"].T,
        "b2": c["conv2_b"][None, :],
    }
    return params


# -----------------------------------------------------------------------------
# Pure-JAX reference (independent math, channel-last, raw PyTorch weight layout)
# -----------------------------------------------------------------------------
def ref_forward(x_bct, mask_bt, raw):
    x = jnp.transpose(x_bct, (0, 2, 1)).astype(jnp.float32)
    mf = mask_bt.astype(jnp.float32)
    mu = jnp.mean(x_bct)
    sigma = jnp.std(x_bct, ddof=1)
    xn = (x - mu) / sigma * mf[:, :, None]

    def instnorm(h):
        m = jnp.mean(h, axis=1, keepdims=True)
        r = h - m
        v = jnp.mean(r * r, axis=1, keepdims=True)
        return r / jnp.sqrt(v + EPS)

    def leaky(h):
        return jnp.where(h >= 0, h, NEG_SLOPE * h)

    def down(h, m, w, b):
        _, th, _ = h.shape
        to = th // 2
        hp = jnp.pad(h, ((0, 0), (1, 1), (0, 0)))
        out = sum(hp[:, k:k + 2 * to:2, :] @ w[:, :, k].T for k in range(3)) + b
        m_out = m[:, ::2]
        out = out * m_out[:, :, None]
        return leaky(instnorm(out)), m_out

    def up(h, m, w, b):
        bh, th, _ = h.shape
        e = h @ w[:, :, 1] + b
        h_next = jnp.concatenate([h[:, 1:], jnp.zeros_like(h[:, :1])], axis=1)
        o = h @ w[:, :, 2] + h_next @ w[:, :, 0] + b
        out = jnp.stack([e, o], axis=2).reshape(bh, 2 * th, -1)
        m_out = jnp.repeat(m, 2, axis=1)
        out = out * m_out[:, :, None]
        return leaky(instnorm(out)), m_out

    h, m = xn, mf
    for w, b in raw["down"]:
        h, m = down(h, m, w, b)
    feat, fmask = h, m

    c = raw["cls"]
    y = leaky(instnorm(feat @ c["conv0_w"][:, :, 0].T))
    pooled = jnp.concatenate([jnp.max(y, axis=1), jnp.mean(y, axis=1)], axis=-1)
    z = pooled @ c["conv1_w"].T
    zmu = jnp.mean(z, axis=-1, keepdims=True)
    zr = z - zmu
    zv = jnp.mean(zr * zr, axis=-1, keepdims=True)
    z = zr / jnp.sqrt(zv + EPS) * c["ln_w"] + c["ln_b"]
    z = jnp.maximum(z, 0.0)
    cls = z @ c["conv2_w"].T + c["conv2_b"]

    h, m = feat, fmask
    for w, b in raw["up"]:
        h, m = up(h, m, w, b)

    return jnp.transpose(xn, (0, 2, 1)), jnp.transpose(h, (0, 2, 1)), cls


# -----------------------------------------------------------------------------
if __name__ == "__main__":
    jax.config.update("jax_default_matmul_precision", "highest")

    # Small shapes consistent with the module (scaled-down channel widths):
    #   DeepInterpolator(in_channels=4, hidden_channels=16, num_classes=3)
    #   Contraction hidden_dims=8 (4->8->16->32->64->16), Expansion hidden_dims=32
    #   (16->32->16->8->4->4).  T=64 so that 5 stride-2 levels stay even (64..2).
    B, C_IN, T = 2, 4, 64
    HIDDEN = 16
    C_HID = 8
    E_HID = 32
    NUM_CLASSES = 3

    key = jax.random.PRNGKey(0)
    kx, kp = jax.random.split(key)
    x = jax.random.normal(kx, (B, C_IN, T), jnp.float32)
    mask = jnp.stack([jnp.ones((T,), bool),
                      jnp.arange(T) < 30], axis=0)          # batch 1 has padding

    raw = init_raw_params(kp, C_IN, HIDDEN, NUM_CLASSES, C_HID, E_HID)
    params = pack_params(raw)

    fwd = jax.jit(deep_interpolator_forward)
    xn, reco, cls = jax.block_until_ready(fwd(x, mask, params))

    xn_r, reco_r, cls_r = ref_forward(x, mask, raw)
    np.testing.assert_allclose(np.asarray(xn), np.asarray(xn_r), rtol=2e-3, atol=2e-3)
    np.testing.assert_allclose(np.asarray(reco), np.asarray(reco_r), rtol=2e-3, atol=2e-3)
    np.testing.assert_allclose(np.asarray(cls), np.asarray(cls_r), rtol=2e-3, atol=2e-3)

    print("KERNEL_OK")
</pallas_src>

<mosaic_0001>
module attributes {stable_mosaic.version = 11 : i64} {
  func.func @_down_block_kernel(%arg0: i32, %arg1: memref<1x32x8xf32, #tpu.memory_space<vmem>>, %arg2: memref<1x32x1xf32, #tpu.memory_space<vmem>>, %arg3: memref<8x8xf32, #tpu.memory_space<vmem>>, %arg4: memref<4x8xf32, #tpu.memory_space<vmem>>, %arg5: memref<1x8xf32, #tpu.memory_space<vmem>>, %arg6: memref<1x32x8xf32, #tpu.memory_space<vmem>>) attributes {dimension_semantics = [#tpu.dimension_semantics<parallel>], iteration_bounds = array<i64: 2>, scalar_prefetch = 0 : i64, scratch_operands = 0 : i64, tpu.core_type = #tpu.core_type<tc>, window_params = [{transform_indices = @transform_0, window_bounds = array<i64: 1, 32, 8>}, {transform_indices = @transform_1, window_bounds = array<i64: 1, 32, 1>}, {pipeline_mode = #tpu.pipeline_mode<synchronous>, transform_indices = @transform_2, window_bounds = array<i64: 8, 8>}, {pipeline_mode = #tpu.pipeline_mode<synchronous>, transform_indices = @transform_3, window_bounds = array<i64: 4, 8>}, {pipeline_mode = #tpu.pipeline_mode<synchronous>, transform_indices = @transform_4, window_bounds = array<i64: 1, 8>}, {transform_indices = @transform_5, window_bounds = array<i64: 1, 32, 8>}]} {
    %c0 = arith.constant 0 : index
    %c0_0 = arith.constant 0 : index
    %c0_1 = arith.constant 0 : index
    %0 = vector.load %arg1[%c0, %c0_0, %c0_1] : memref<1x32x8xf32, #tpu.memory_space<vmem>>, vector<1x32x8xf32>
    %1 = vector.shape_cast %0 : vector<1x32x8xf32> to vector<32x8xf32>
    %c0_2 = arith.constant 0 : index
    %c0_3 = arith.constant 0 : index
    %2 = vector.load %arg3[%c0_2, %c0_3] : memref<8x8xf32, #tpu.memory_space<vmem>>, vector<8x8xf32>
    %cst = arith.constant dense<0.000000e+00> : vector<32x8xf32>
    %3 = tpu.matmul %1, %2, %cst {dimension_numbers = #tpu.dot_dimension_numbers<[1], [0], [0], [1], [0, 0, 1, 1], [], []>, precision = #tpu.contract_precision<fp32>} : vector<32x8xf32>, vector<8x8xf32>, vector<32x8xf32> -> vector<32x8xf32>
    %4 = vector.extract_strided_slice %1 {offsets = [0, 4], sizes = [32, 4], strides = [1, 1]} : vector<32x8xf32> to vector<32x4xf32>
    %cst_4 = arith.constant 0.000000e+00 : f32
    %5 = vector.broadcast %cst_4 : f32 to vector<1x4xf32>
    %6 = vector.extract_strided_slice %4 {offsets = [0, 0], sizes = [31, 4], strides = [1, 1]} : vector<32x4xf32> to vector<31x4xf32>
    %7 = tpu.concatenate %5, %6 in 0 : vector<1x4xf32>, vector<31x4xf32> -> vector<32x4xf32>
    %c0_5 = arith.constant 0 : index
    %c0_6 = arith.constant 0 : index
    %8 = vector.load %arg4[%c0_5, %c0_6] : memref<4x8xf32, #tpu.memory_space<vmem>>, vector<4x8xf32>
    %cst_7 = arith.constant dense<0.000000e+00> : vector<32x8xf32>
    %9 = tpu.matmul %7, %8, %cst_7 {dimension_numbers = #tpu.dot_dimension_numbers<[1], [0], [0], [1], [0, 0, 1, 1], [], []>, precision = #tpu.contract_precision<fp32>} : vector<32x4xf32>, vector<4x8xf32>, vector<32x8xf32> -> vector<32x8xf32>
    %10 = arith.addf %3, %9 : vector<32x8xf32>
    %c0_8 = arith.constant 0 : index
    %c0_9 = arith.constant 0 : index
    %11 = vector.load %arg5[%c0_8, %c0_9] : memref<1x8xf32, #tpu.memory_space<vmem>>, vector<1x8xf32>
    %12 = vector.broadcast %11 : vector<1x8xf32> to vector<32x8xf32>
    %13 = arith.addf %10, %12 : vector<32x8xf32>
    %c0_10 = arith.constant 0 : index
    %c0_11 = arith.constant 0 : index
    %c0_12 = arith.constant 0 : index
    %14 = vector.load %arg2[%c0_10, %c0_11, %c0_12] : memref<1x32x1xf32, #tpu.memory_space<vmem>>, vector<1x32x1xf32>
    %15 = vector.shape_cast %14 : vector<1x32x1xf32> to vector<32x1xf32>
    %16 = vector.broadcast %15 : vector<32x1xf32> to vector<32x8xf32>
    %17 = arith.mulf %13, %16 : vector<32x8xf32>
    %cst_13 = arith.constant dense<0.000000e+00> : vector<8xf32>
    %18 = vector.multi_reduction <add>, %17, %cst_13 [0] : vector<32x8xf32> to vector<8xf32>
    %19 = vector.shape_cast %18 : vector<8xf32> to vector<1x8xf32>
    %cst_14 = arith.constant 3.200000e+01 : f32
    %20 = vector.broadcast %cst_14 : f32 to vector<1x8xf32>
    %21 = arith.divf %19, %20 : vector<1x8xf32>
    %22 = vector.broadcast %21 : vector<1x8xf32> to vector<32x8xf32>
    %23 = arith.subf %17, %22 : vector<32x8xf32>
    %24 = arith.mulf %23, %23 : vector<32x8xf32>
    %cst_15 = arith.constant dense<0.000000e+00> : vector<8xf32>
    %25 = vector.multi_reduction <add>, %24, %cst_15 [0] : vector<32x8xf32> to vector<8xf32>
    %26 = vector.shape_cast %25 : vector<8xf32> to vector<1x8xf32>
    %cst_16 = arith.constant 3.200000e+01 : f32
    %27 = vector.broadcast %cst_16 : f32 to vector<1x8xf32>
    %28 = arith.divf %26, %27 : vector<1x8xf32>
    %cst_17 = arith.constant 9.99999974E-6 : f32
    %29 = vector.broadcast %cst_17 : f32 to vector<1x8xf32>
    %30 = arith.addf %28, %29 : vector<1x8xf32>
    %31 = math.rsqrt %30 : vector<1x8xf32>
    %32 = vector.broadcast %31 : vector<1x8xf32> to vector<32x8xf32>
    %33 = arith.mulf %23, %32 : vector<32x8xf32>
    %cst_18 = arith.constant 2.000000e-01 : f32
    %34 = vector.broadcast %cst_18 : f32 to vector<32x8xf32>
    %35 = arith.mulf %34, %33 : vector<32x8xf32>
    %36 = arith.maximumf %33, %35 : vector<32x8xf32>
    %c0_19 = arith.constant 0 : index
    %c0_20 = arith.constant 0 : index
    %c0_21 = arith.constant 0 : index
    %37 = vector.load %arg6[%c0_19, %c0_20, %c0_21] : memref<1x32x8xf32, #tpu.memory_space<vmem>>, vector<1x32x8xf32>
    %38 = vector.shape_cast %37 : vector<1x32x8xf32> to vector<32x8xf32>
    %39 = vector.shape_cast %36 : vector<32x8xf32> to vector<1x32x8xf32>
    tpu.vector_store %arg6[%c0_19, %c0_20, %c0_21], %39 {strides = array<i32>} : memref<1x32x8xf32, #tpu.memory_space<vmem>>, vector<1x32x8xf32>,
    return
  }
  func.func @transform_0(%arg0: i32) -> (i32, i32, i32) {
    %c0_i32 = arith.constant 0 : i32
    %c0_i32_0 = arith.constant 0 : i32
    %c0_i32_1 = arith.constant 0 : i32
    return %arg0, %c0_i32, %c0_i32_0 : i32, i32, i32
  }
  func.func @transform_1(%arg0: i32) -> (i32, i32, i32) {
    %c0_i32 = arith.constant 0 : i32
    %c0_i32_0 = arith.constant 0 : i32
    %c0_i32_1 = arith.constant 0 : i32
    return %arg0, %c0_i32, %c0_i32_0 : i32, i32, i32
  }
  func.func @transform_2(%arg0: i32) -> (i32, i32) {
    %c0_i32 = arith.constant 0 : i32
    %c0_i32_0 = arith.constant 0 : i32
    %c0_i32_1 = arith.constant 0 : i32
    return %c0_i32, %c0_i32_0 : i32, i32
  }
  func.func @transform_3(%arg0: i32) -> (i32, i32) {
    %c0_i32 = arith.constant 0 : i32
    %c0_i32_0 = arith.constant 0 : i32
    %c0_i32_1 = arith.constant 0 : i32
    return %c0_i32, %c0_i32_0 : i32, i32
  }
  func.func @transform_4(%arg0: i32) -> (i32, i32) {
    %c0_i32 = arith.constant 0 : i32
    %c0_i32_0 = arith.constant 0 : i32
    %c0_i32_1 = arith.constant 0 : i32
    return %c0_i32, %c0_i32_0 : i32, i32
  }
  func.func @transform_5(%arg0: i32) -> (i32, i32, i32) {
    %c0_i32 = arith.constant 0 : i32
    %c0_i32_0 = arith.constant 0 : i32
    %c0_i32_1 = arith.constant 0 : i32
    return %arg0, %c0_i32, %c0_i32_0 : i32, i32, i32
  }
}

module attributes {stable_mosaic.version = 11 : i64} {
  func.func @_down_block_kernel(%arg0: i32, %arg1: memref<1x16x16xf32, #tpu.memory_space<vmem>>, %arg2: memref<1x16x1xf32, #tpu.memory_space<vmem>>, %arg3: memref<16x16xf32, #tpu.memory_space<vmem>>, %arg4: memref<8x16xf32, #tpu.memory_space<vmem>>, %arg5: memref<1x16xf32, #tpu.memory_space<vmem>>, %arg6: memref<1x16x16xf32, #tpu.memory_space<vmem>>) attributes {dimension_semantics = [#tpu.dimension_semantics<parallel>], iteration_bounds = array<i64: 2>, scalar_prefetch = 0 : i64, scratch_operands = 0 : i64, tpu.core_type = #tpu.core_type<tc>, window_params = [{transform_indices = @transform_0, window_bounds = array<i64: 1, 16, 16>}, {transform_indices = @transform_1, window_bounds = array<i64: 1, 16, 1>}, {pipeline_mode = #tpu.pipeline_mode<synchronous>, transform_indices = @transform_2, window_bounds = array<i64: 16, 16>}, {pipeline_mode = #tpu.pipeline_mode<synchronous>, transform_indices = @transform_3, window_bounds = array<i64: 8, 16>}, {pipeline_mode = #tpu.pipeline_mode<synchronous>, transform_indices = @transform_4, window_bounds = array<i64: 1, 16>}, {transform_indices = @transform_5, window_bounds = array<i64: 1, 16, 16>}]} {
    %c0 = arith.constant 0 : index
    %c0_0 = arith.constant 0 : index
    %c0_1 = arith.constant 0 : index
    %0 = vector.load %arg1[%c0, %c0_0, %c0_1] : memref<1x16x16xf32, #tpu.memory_space<vmem>>, vector<1x16x16xf32>
    %1 = vector.shape_cast %0 : vector<1x16x16xf32> to vector<16x16xf32>
    %c0_2 = arith.constant 0 : index
    %c0_3 = arith.constant 0 : index
    %2 = vector.load %arg3[%c0_2, %c0_3] : memref<16x16xf32, #tpu.memory_space<vmem>>, vector<16x16xf32>
    %cst = arith.constant dense<0.000000e+00> : vector<16x16xf32>
    %3 = tpu.matmul %1, %2, %cst {dimension_numbers = #tpu.dot_dimension_numbers<[1], [0], [0], [1], [0, 0, 1, 1], [], []>, precision = #tpu.contract_precision<fp32>} : vector<16x16xf32>, vector<16x16xf32>, vector<16x16xf32> -> vector<16x16xf32>
    %4 = vector.extract_strided_slice %1 {offsets = [0, 8], sizes = [16, 8], strides = [1, 1]} : vector<16x16xf32> to vector<16x8xf32>
    %cst_4 = arith.constant 0.000000e+00 : f32
    %5 = vector.broadcast %cst_4 : f32 to vector<1x8xf32>
    %6 = vector.extract_strided_slice %4 {offsets = [0, 0], sizes = [15, 8], strides = [1, 1]} : vector<16x8xf32> to vector<15x8xf32>
    %7 = tpu.concatenate %5, %6 in 0 : vector<1x8xf32>, vector<15x8xf32> -> vector<16x8xf32>
    %c0_5 = arith.constant 0 : index
    %c0_6 = arith.constant 0 : index
    %8 = vector.load %arg4[%c0_5, %c0_6] : memref<8x16xf32, #tpu.memory_space<vmem>>, vector<8x16xf32>
    %cst_7 = arith.constant dense<0.000000e+00> : vector<16x16xf32>
    %9 = tpu.matmul %7, %8, %cst_7 {dimension_numbers = #tpu.dot_dimension_numbers<[1], [0], [0], [1], [0, 0, 1, 1], [], []>, precision = #tpu.contract_precision<fp32>} : vector<16x8xf32>, vector<8x16xf32>, vector<16x16xf32> -> vector<16x16xf32>
    %10 = arith.addf %3, %9 : vector<16x16xf32>
    %c0_8 = arith.constant 0 : index
    %c0_9 = arith.constant 0 : index
    %11 = vector.load %arg5[%c0_8, %c0_9] : memref<1x16xf32, #tpu.memory_space<vmem>>, vector<1x16xf32>
    %12 = vector.broadcast %11 : vector<1x16xf32> to vector<16x16xf32>
    %13 = arith.addf %10, %12 : vector<16x16xf32>
    %c0_10 = arith.constant 0 : index
    %c0_11 = arith.constant 0 : index
    %c0_12 = arith.constant 0 : index
    %14 = vector.load %arg2[%c0_10, %c0_11, %c0_12] : memref<1x16x1xf32, #tpu.memory_space<vmem>>, vector<1x16x1xf32>
    %15 = vector.shape_cast %14 : vector<1x16x1xf32> to vector<16x1xf32>
    %16 = vector.broadcast %15 : vector<16x1xf32> to vector<16x16xf32>
    %17 = arith.mulf %13, %16 : vector<16x16xf32>
    %cst_13 = arith.constant dense<0.000000e+00> : vector<16xf32>
    %18 = vector.multi_reduction <add>, %17, %cst_13 [0] : vector<16x16xf32> to vector<16xf32>
    %19 = vector.shape_cast %18 : vector<16xf32> to vector<1x16xf32>
    %cst_14 = arith.constant 1.600000e+01 : f32
    %20 = vector.broadcast %cst_14 : f32 to vector<1x16xf32>
    %21 = arith.divf %19, %20 : vector<1x16xf32>
    %22 = vector.broadcast %21 : vector<1x16xf32> to vector<16x16xf32>
    %23 = arith.subf %17, %22 : vector<16x16xf32>
    %24 = arith.mulf %23, %23 : vector<16x16xf32>
    %cst_15 = arith.constant dense<0.000000e+00> : vector<16xf32>
    %25 = vector.multi_reduction <add>, %24, %cst_15 [0] : vector<16x16xf32> to vector<16xf32>
    %26 = vector.shape_cast %25 : vector<16xf32> to vector<1x16xf32>
    %cst_16 = arith.constant 1.600000e+01 : f32
    %27 = vector.broadcast %cst_16 : f32 to vector<1x16xf32>
    %28 = arith.divf %26, %27 : vector<1x16xf32>
    %cst_17 = arith.constant 9.99999974E-6 : f32
    %29 = vector.broadcast %cst_17 : f32 to vector<1x16xf32>
    %30 = arith.addf %28, %29 : vector<1x16xf32>
    %31 = math.rsqrt %30 : vector<1x16xf32>
    %32 = vector.broadcast %31 : vector<1x16xf32> to vector<16x16xf32>
    %33 = arith.mulf %23, %32 : vector<16x16xf32>
    %cst_18 = arith.constant 2.000000e-01 : f32
    %34 = vector.broadcast %cst_18 : f32 to vector<16x16xf32>
    %35 = arith.mulf %34, %33 : vector<16x16xf32>
    %36 = arith.maximumf %33, %35 : vector<16x16xf32>
    %c0_19 = arith.constant 0 : index
    %c0_20 = arith.constant 0 : index
    %c0_21 = arith.constant 0 : index
    %37 = vector.load %arg6[%c0_19, %c0_20, %c0_21] : memref<1x16x16xf32, #tpu.memory_space<vmem>>, vector<1x16x16xf32>
    %38 = vector.shape_cast %37 : vector<1x16x16xf32> to vector<16x16xf32>
    %39 = vector.shape_cast %36 : vector<16x16xf32> to vector<1x16x16xf32>
    tpu.vector_store %arg6[%c0_19, %c0_20, %c0_21], %39 {strides = array<i32>} : memref<1x16x16xf32, #tpu.memory_space<vmem>>, vector<1x16x16xf32>,
    return
  }
  func.func @transform_0(%arg0: i32) -> (i32, i32, i32) {
    %c0_i32 = arith.constant 0 : i32
    %c0_i32_0 = arith.constant 0 : i32
    %c0_i32_1 = arith.constant 0 : i32
    return %arg0, %c0_i32, %c0_i32_0 : i32, i32, i32
  }
  func.func @transform_1(%arg0: i32) -> (i32, i32, i32) {
    %c0_i32 = arith.constant 0 : i32
    %c0_i32_0 = arith.constant 0 : i32
    %c0_i32_1 = arith.constant 0 : i32
    return %arg0, %c0_i32, %c0_i32_0 : i32, i32, i32
  }
  func.func @transform_2(%arg0: i32) -> (i32, i32) {
    %c0_i32 = arith.constant 0 : i32
    %c0_i32_0 = arith.constant 0 : i32
    %c0_i32_1 = arith.constant 0 : i32
    return %c0_i32, %c0_i32_0 : i32, i32
  }
  func.func @transform_3(%arg0: i32) -> (i32, i32) {
    %c0_i32 = arith.constant 0 : i32
    %c0_i32_0 = arith.constant 0 : i32
    %c0_i32_1 = arith.constant 0 : i32
    return %c0_i32, %c0_i32_0 : i32, i32
  }
  func.func @transform_4(%arg0: i32) -> (i32, i32) {
    %c0_i32 = arith.constant 0 : i32
    %c0_i32_0 = arith.constant 0 : i32
    %c0_i32_1 = arith.constant 0 : i32
    return %c0_i32, %c0_i32_0 : i32, i32
  }
  func.func @transform_5(%arg0: i32) -> (i32, i32, i32) {
    %c0_i32 = arith.constant 0 : i32
    %c0_i32_0 = arith.constant 0 : i32
    %c0_i32_1 = arith.constant 0 : i32
    return %arg0, %c0_i32, %c0_i32_0 : i32, i32, i32
  }
}

module attributes {stable_mosaic.version = 11 : i64} {
  func.func @_down_block_kernel(%arg0: i32, %arg1: memref<1x8x32xf32, #tpu.memory_space<vmem>>, %arg2: memref<1x8x1xf32, #tpu.memory_space<vmem>>, %arg3: memref<32x32xf32, #tpu.memory_space<vmem>>, %arg4: memref<16x32xf32, #tpu.memory_space<vmem>>, %arg5: memref<1x32xf32, #tpu.memory_space<vmem>>, %arg6: memref<1x8x32xf32, #tpu.memory_space<vmem>>) attributes {dimension_semantics = [#tpu.dimension_semantics<parallel>], iteration_bounds = array<i64: 2>, scalar_prefetch = 0 : i64, scratch_operands = 0 : i64, tpu.core_type = #tpu.core_type<tc>, window_params = [{transform_indices = @transform_0, window_bounds = array<i64: 1, 8, 32>}, {transform_indices = @transform_1, window_bounds = array<i64: 1, 8, 1>}, {pipeline_mode = #tpu.pipeline_mode<synchronous>, transform_indices = @transform_2, window_bounds = array<i64: 32, 32>}, {pipeline_mode = #tpu.pipeline_mode<synchronous>, transform_indices = @transform_3, window_bounds = array<i64: 16, 32>}, {pipeline_mode = #tpu.pipeline_mode<synchronous>, transform_indices = @transform_4, window_bounds = array<i64: 1, 32>}, {transform_indices = @transform_5, window_bounds = array<i64: 1, 8, 32>}]} {
    %c0 = arith.constant 0 : index
    %c0_0 = arith.constant 0 : index
    %c0_1 = arith.constant 0 : index
    %0 = vector.load %arg1[%c0, %c0_0, %c0_1] : memref<1x8x32xf32, #tpu.memory_space<vmem>>, vector<1x8x32xf32>
    %1 = vector.shape_cast %0 : vector<1x8x32xf32> to vector<8x32xf32>
    %c0_2 = arith.constant 0 : index
    %c0_3 = arith.constant 0 : index
    %2 = vector.load %arg3[%c0_2, %c0_3] : memref<32x32xf32, #tpu.memory_space<vmem>>, vector<32x32xf32>
    %cst = arith.constant dense<0.000000e+00> : vector<8x32xf32>
    %3 = tpu.matmul %1, %2, %cst {dimension_numbers = #tpu.dot_dimension_numbers<[1], [0], [0], [1], [0, 0, 1, 1], [], []>, precision = #tpu.contract_precision<fp32>} : vector<8x32xf32>, vector<32x32xf32>, vector<8x32xf32> -> vector<8x32xf32>
    %4 = vector.extract_strided_slice %1 {offsets = [0, 16], sizes = [8, 16], strides = [1, 1]} : vector<8x32xf32> to vector<8x16xf32>
    %cst_4 = arith.constant 0.000000e+00 : f32
    %5 = vector.broadcast %cst_4 : f32 to vector<1x16xf32>
    %6 = vector.extract_strided_slice %4 {offsets = [0, 0], sizes = [7, 16], strides = [1, 1]} : vector<8x16xf32> to vector<7x16xf32>
    %7 = tpu.concatenate %5, %6 in 0 : vector<1x16xf32>, vector<7x16xf32> -> vector<8x16xf32>
    %c0_5 = arith.constant 0 : index
    %c0_6 = arith.constant 0 : index
    %8 = vector.load %arg4[%c0_5, %c0_6] : memref<16x32xf32, #tpu.memory_space<vmem>>, vector<16x32xf32>
    %cst_7 = arith.constant dense<0.000000e+00> : vector<8x32xf32>
    %9 = tpu.matmul %7, %8, %cst_7 {dimension_numbers = #tpu.dot_dimension_numbers<[1], [0], [0], [1], [0, 0, 1, 1], [], []>, precision = #tpu.contract_precision<fp32>} : vector<8x16xf32>, vector<16x32xf32>, vector<8x32xf32> -> vector<8x32xf32>
    %10 = arith.addf %3, %9 : vector<8x32xf32>
    %c0_8 = arith.constant 0 : index
    %c0_9 = arith.constant 0 : index
    %11 = vector.load %arg5[%c0_8, %c0_9] : memref<1x32xf32, #tpu.memory_space<vmem>>, vector<1x32xf32>
    %12 = vector.broadcast %11 : vector<1x32xf32> to vector<8x32xf32>
    %13 = arith.addf %10, %12 : vector<8x32xf32>
    %c0_10 = arith.constant 0 : index
    %c0_11 = arith.constant 0 : index
    %c0_12 = arith.constant 0 : index
    %14 = vector.load %arg2[%c0_10, %c0_11, %c0_12] : memref<1x8x1xf32, #tpu.memory_space<vmem>>, vector<1x8x1xf32>
    %15 = vector.shape_cast %14 : vector<1x8x1xf32> to vector<8x1xf32>
    %16 = vector.broadcast %15 : vector<8x1xf32> to vector<8x32xf32>
    %17 = arith.mulf %13, %16 : vector<8x32xf32>
    %cst_13 = arith.constant dense<0.000000e+00> : vector<32xf32>
    %18 = vector.multi_reduction <add>, %17, %cst_13 [0] : vector<8x32xf32> to vector<32xf32>
    %19 = vector.shape_cast %18 : vector<32xf32> to vector<1x32xf32>
    %cst_14 = arith.constant 8.000000e+00 : f32
    %20 = vector.broadcast %cst_14 : f32 to vector<1x32xf32>
    %21 = arith.divf %19, %20 : vector<1x32xf32>
    %22 = vector.broadcast %21 : vector<1x32xf32> to vector<8x32xf32>
    %23 = arith.subf %17, %22 : vector<8x32xf32>
    %24 = arith.mulf %23, %23 : vector<8x32xf32>
    %cst_15 = arith.constant dense<0.000000e+00> : vector<32xf32>
    %25 = vector.multi_reduction <add>, %24, %cst_15 [0] : vector<8x32xf32> to vector<32xf32>
    %26 = vector.shape_cast %25 : vector<32xf32> to vector<1x32xf32>
    %cst_16 = arith.constant 8.000000e+00 : f32
    %27 = vector.broadcast %cst_16 : f32 to vector<1x32xf32>
    %28 = arith.divf %26, %27 : vector<1x32xf32>
    %cst_17 = arith.constant 9.99999974E-6 : f32
    %29 = vector.broadcast %cst_17 : f32 to vector<1x32xf32>
    %30 = arith.addf %28, %29 : vector<1x32xf32>
    %31 = math.rsqrt %30 : vector<1x32xf32>
    %32 = vector.broadcast %31 : vector<1x32xf32> to vector<8x32xf32>
    %33 = arith.mulf %23, %32 : vector<8x32xf32>
    %cst_18 = arith.constant 2.000000e-01 : f32
    %34 = vector.broadcast %cst_18 : f32 to vector<8x32xf32>
    %35 = arith.mulf %34, %33 : vector<8x32xf32>
    %36 = arith.maximumf %33, %35 : vector<8x32xf32>
    %c0_19 = arith.constant 0 : index
    %c0_20 = arith.constant 0 : index
    %c0_21 = arith.constant 0 : index
    %37 = vector.load %arg6[%c0_19, %c0_20, %c0_21] : memref<1x8x32xf32, #tpu.memory_space<vmem>>, vector<1x8x32xf32>
    %38 = vector.shape_cast %37 : vector<1x8x32xf32> to vector<8x32xf32>
    %39 = vector.shape_cast %36 : vector<8x32xf32> to vector<1x8x32xf32>
    tpu.vector_store %arg6[%c0_19, %c0_20, %c0_21], %39 {strides = array<i32>} : memref<1x8x32xf32, #tpu.memory_space<vmem>>, vector<1x8x32xf32>,
    return
  }
  func.func @transform_0(%arg0: i32) -> (i32, i32, i32) {
    %c0_i32 = arith.constant 0 : i32
    %c0_i32_0 = arith.constant 0 : i32
    %c0_i32_1 = arith.constant 0 : i32
    return %arg0, %c0_i32, %c0_i32_0 : i32, i32, i32
  }
  func.func @transform_1(%arg0: i32) -> (i32, i32, i32) {
    %c0_i32 = arith.constant 0 : i32
    %c0_i32_0 = arith.constant 0 : i32
    %c0_i32_1 = arith.constant 0 : i32
    return %arg0, %c0_i32, %c0_i32_0 : i32, i32, i32
  }
  func.func @transform_2(%arg0: i32) -> (i32, i32) {
    %c0_i32 = arith.constant 0 : i32
    %c0_i32_0 = arith.constant 0 : i32
    %c0_i32_1 = arith.constant 0 : i32
    return %c0_i32, %c0_i32_0 : i32, i32
  }
  func.func @transform_3(%arg0: i32) -> (i32, i32) {
    %c0_i32 = arith.constant 0 : i32
    %c0_i32_0 = arith.constant 0 : i32
    %c0_i32_1 = arith.constant 0 : i32
    return %c0_i32, %c0_i32_0 : i32, i32
  }
  func.func @transform_4(%arg0: i32) -> (i32, i32) {
    %c0_i32 = arith.constant 0 : i32
    %c0_i32_0 = arith.constant 0 : i32
    %c0_i32_1 = arith.constant 0 : i32
    return %c0_i32, %c0_i32_0 : i32, i32
  }
  func.func @transform_5(%arg0: i32) -> (i32, i32, i32) {
    %c0_i32 = arith.constant 0 : i32
    %c0_i32_0 = arith.constant 0 : i32
    %c0_i32_1 = arith.constant 0 : i32
    return %arg0, %c0_i32, %c0_i32_0 : i32, i32, i32
  }
}

module attributes {stable_mosaic.version = 11 : i64} {
  func.func @_down_block_kernel(%arg0: i32, %arg1: memref<1x4x64xf32, #tpu.memory_space<vmem>>, %arg2: memref<1x4x1xf32, #tpu.memory_space<vmem>>, %arg3: memref<64x64xf32, #tpu.memory_space<vmem>>, %arg4: memref<32x64xf32, #tpu.memory_space<vmem>>, %arg5: memref<1x64xf32, #tpu.memory_space<vmem>>, %arg6: memref<1x4x64xf32, #tpu.memory_space<vmem>>) attributes {dimension_semantics = [#tpu.dimension_semantics<parallel>], iteration_bounds = array<i64: 2>, scalar_prefetch = 0 : i64, scratch_operands = 0 : i64, tpu.core_type = #tpu.core_type<tc>, window_params = [{transform_indices = @transform_0, window_bounds = array<i64: 1, 4, 64>}, {transform_indices = @transform_1, window_bounds = array<i64: 1, 4, 1>}, {pipeline_mode = #tpu.pipeline_mode<synchronous>, transform_indices = @transform_2, window_bounds = array<i64: 64, 64>}, {pipeline_mode = #tpu.pipeline_mode<synchronous>, transform_indices = @transform_3, window_bounds = array<i64: 32, 64>}, {pipeline_mode = #tpu.pipeline_mode<synchronous>, transform_indices = @transform_4, window_bounds = array<i64: 1, 64>}, {transform_indices = @transform_5, window_bounds = array<i64: 1, 4, 64>}]} {
    %c0 = arith.constant 0 : index
    %c0_0 = arith.constant 0 : index
    %c0_1 = arith.constant 0 : index
    %0 = vector.load %arg1[%c0, %c0_0, %c0_1] : memref<1x4x64xf32, #tpu.memory_space<vmem>>, vector<1x4x64xf32>
    %1 = vector.shape_cast %0 : vector<1x4x64xf32> to vector<4x64xf32>
    %c0_2 = arith.constant 0 : index
    %c0_3 = arith.constant 0 : index
    %2 = vector.load %arg3[%c0_2, %c0_3] : memref<64x64xf32, #tpu.memory_space<vmem>>, vector<64x64xf32>
    %cst = arith.constant dense<0.000000e+00> : vector<4x64xf32>
    %3 = tpu.matmul %1, %2, %cst {dimension_numbers = #tpu.dot_dimension_numbers<[1], [0], [0], [1], [0, 0, 1, 1], [], []>, precision = #tpu.contract_precision<fp32>} : vector<4x64xf32>, vector<64x64xf32>, vector<4x64xf32> -> vector<4x64xf32>
    %4 = vector.extract_strided_slice %1 {offsets = [0, 32], sizes = [4, 32], strides = [1, 1]} : vector<4x64xf32> to vector<4x32xf32>
    %cst_4 = arith.constant 0.000000e+00 : f32
    %5 = vector.broadcast %cst_4 : f32 to vector<1x32xf32>
    %6 = vector.extract_strided_slice %4 {offsets = [0, 0], sizes = [3, 32], strides = [1, 1]} : vector<4x32xf32> to vector<3x32xf32>
    %7 = tpu.concatenate %5, %6 in 0 : vector<1x32xf32>, vector<3x32xf32> -> vector<4x32xf32>
    %c0_5 = arith.constant 0 : index
    %c0_6 = arith.constant 0 : index
    %8 = vector.load %arg4[%c0_5, %c0_6] : memref<32x64xf32, #tpu.memory_space<vmem>>, vector<32x64xf32>
    %cst_7 = arith.constant dense<0.000000e+00> : vector<4x64xf32>
    %9 = tpu.matmul %7, %8, %cst_7 {dimension_numbers = #tpu.dot_dimension_numbers<[1], [0], [0], [1], [0, 0, 1, 1], [], []>, precision = #tpu.contract_precision<fp32>} : vector<4x32xf32>, vector<32x64xf32>, vector<4x64xf32> -> vector<4x64xf32>
    %10 = arith.addf %3, %9 : vector<4x64xf32>
    %c0_8 = arith.constant 0 : index
    %c0_9 = arith.constant 0 : index
    %11 = vector.load %arg5[%c0_8, %c0_9] : memref<1x64xf32, #tpu.memory_space<vmem>>, vector<1x64xf32>
    %12 = vector.broadcast %11 : vector<1x64xf32> to vector<4x64xf32>
    %13 = arith.addf %10, %12 : vector<4x64xf32>
    %c0_10 = arith.constant 0 : index
    %c0_11 = arith.constant 0 : index
    %c0_12 = arith.constant 0 : index
    %14 = vector.load %arg2[%c0_10, %c0_11, %c0_12] : memref<1x4x1xf32, #tpu.memory_space<vmem>>, vector<1x4x1xf32>
    %15 = vector.shape_cast %14 : vector<1x4x1xf32> to vector<4x1xf32>
    %16 = vector.broadcast %15 : vector<4x1xf32> to vector<4x64xf32>
    %17 = arith.mulf %13, %16 : vector<4x64xf32>
    %cst_13 = arith.constant dense<0.000000e+00> : vector<64xf32>
    %18 = vector.multi_reduction <add>, %17, %cst_13 [0] : vector<4x64xf32> to vector<64xf32>
    %19 = vector.shape_cast %18 : vector<64xf32> to vector<1x64xf32>
    %cst_14 = arith.constant 4.000000e+00 : f32
    %20 = vector.broadcast %cst_14 : f32 to vector<1x64xf32>
    %21 = arith.divf %19, %20 : vector<1x64xf32>
    %22 = vector.broadcast %21 : vector<1x64xf32> to vector<4x64xf32>
    %23 = arith.subf %17, %22 : vector<4x64xf32>
    %24 = arith.mulf %23, %23 : vector<4x64xf32>
    %cst_15 = arith.constant dense<0.000000e+00> : vector<64xf32>
    %25 = vector.multi_reduction <add>, %24, %cst_15 [0] : vector<4x64xf32> to vector<64xf32>
    %26 = vector.shape_cast %25 : vector<64xf32> to vector<1x64xf32>
    %cst_16 = arith.constant 4.000000e+00 : f32
    %27 = vector.broadcast %cst_16 : f32 to vector<1x64xf32>
    %28 = arith.divf %26, %27 : vector<1x64xf32>
    %cst_17 = arith.constant 9.99999974E-6 : f32
    %29 = vector.broadcast %cst_17 : f32 to vector<1x64xf32>
    %30 = arith.addf %28, %29 : vector<1x64xf32>
    %31 = math.rsqrt %30 : vector<1x64xf32>
    %32 = vector.broadcast %31 : vector<1x64xf32> to vector<4x64xf32>
    %33 = arith.mulf %23, %32 : vector<4x64xf32>
    %cst_18 = arith.constant 2.000000e-01 : f32
    %34 = vector.broadcast %cst_18 : f32 to vector<4x64xf32>
    %35 = arith.mulf %34, %33 : vector<4x64xf32>
    %36 = arith.maximumf %33, %35 : vector<4x64xf32>
    %c0_19 = arith.constant 0 : index
    %c0_20 = arith.constant 0 : index
    %c0_21 = arith.constant 0 : index
    %37 = vector.load %arg6[%c0_19, %c0_20, %c0_21] : memref<1x4x64xf32, #tpu.memory_space<vmem>>, vector<1x4x64xf32>
    %38 = vector.shape_cast %37 : vector<1x4x64xf32> to vector<4x64xf32>
    %39 = vector.shape_cast %36 : vector<4x64xf32> to vector<1x4x64xf32>
    tpu.vector_store %arg6[%c0_19, %c0_20, %c0_21], %39 {strides = array<i32>} : memref<1x4x64xf32, #tpu.memory_space<vmem>>, vector<1x4x64xf32>,
    return
  }
  func.func @transform_0(%arg0: i32) -> (i32, i32, i32) {
    %c0_i32 = arith.constant 0 : i32
    %c0_i32_0 = arith.constant 0 : i32
    %c0_i32_1 = arith.constant 0 : i32
    return %arg0, %c0_i32, %c0_i32_0 : i32, i32, i32
  }
  func.func @transform_1(%arg0: i32) -> (i32, i32, i32) {
    %c0_i32 = arith.constant 0 : i32
    %c0_i32_0 = arith.constant 0 : i32
    %c0_i32_1 = arith.constant 0 : i32
    return %arg0, %c0_i32, %c0_i32_0 : i32, i32, i32
  }
  func.func @transform_2(%arg0: i32) -> (i32, i32) {
    %c0_i32 = arith.constant 0 : i32
    %c0_i32_0 = arith.constant 0 : i32
    %c0_i32_1 = arith.constant 0 : i32
    return %c0_i32, %c0_i32_0 : i32, i32
  }
  func.func @transform_3(%arg0: i32) -> (i32, i32) {
    %c0_i32 = arith.constant 0 : i32
    %c0_i32_0 = arith.constant 0 : i32
    %c0_i32_1 = arith.constant 0 : i32
    return %c0_i32, %c0_i32_0 : i32, i32
  }
  func.func @transform_4(%arg0: i32) -> (i32, i32) {
    %c0_i32 = arith.constant 0 : i32
    %c0_i32_0 = arith.constant 0 : i32
    %c0_i32_1 = arith.constant 0 : i32
    return %c0_i32, %c0_i32_0 : i32, i32
  }
  func.func @transform_5(%arg0: i32) -> (i32, i32, i32) {
    %c0_i32 = arith.constant 0 : i32
    %c0_i32_0 = arith.constant 0 : i32
    %c0_i32_1 = arith.constant 0 : i32
    return %arg0, %c0_i32, %c0_i32_0 : i32, i32, i32
  }
}

module attributes {stable_mosaic.version = 11 : i64} {
  func.func @_up_block_kernel(%arg0: i32, %arg1: memref<1x2x16xf32, #tpu.memory_space<vmem>>, %arg2: memref<1x2x1xf32, #tpu.memory_space<vmem>>, %arg3: memref<16x64xf32, #tpu.memory_space<vmem>>, %arg4: memref<16x32xf32, #tpu.memory_space<vmem>>, %arg5: memref<1x32xf32, #tpu.memory_space<vmem>>, %arg6: memref<1x2x64xf32, #tpu.memory_space<vmem>>) attributes {dimension_semantics = [#tpu.dimension_semantics<parallel>], iteration_bounds = array<i64: 2>, scalar_prefetch = 0 : i64, scratch_operands = 0 : i64, tpu.core_type = #tpu.core_type<tc>, window_params = [{transform_indices = @transform_0, window_bounds = array<i64: 1, 2, 16>}, {transform_indices = @transform_1, window_bounds = array<i64: 1, 2, 1>}, {pipeline_mode = #tpu.pipeline_mode<synchronous>, transform_indices = @transform_2, window_bounds = array<i64: 16, 64>}, {pipeline_mode = #tpu.pipeline_mode<synchronous>, transform_indices = @transform_3, window_bounds = array<i64: 16, 32>}, {pipeline_mode = #tpu.pipeline_mode<synchronous>, transform_indices = @transform_4, window_bounds = array<i64: 1, 32>}, {transform_indices = @transform_5, window_bounds = array<i64: 1, 2, 64>}]} {
    %c0 = arith.constant 0 : index
    %c0_0 = arith.constant 0 : index
    %c0_1 = arith.constant 0 : index
    %0 = vector.load %arg1[%c0, %c0_0, %c0_1] : memref<1x2x16xf32, #tpu.memory_space<vmem>>, vector<1x2x16xf32>
    %1 = vector.shape_cast %0 : vector<1x2x16xf32> to vector<2x16xf32>
    %c0_2 = arith.constant 0 : index
    %c0_3 = arith.constant 0 : index
    %c0_4 = arith.constant 0 : index
    %2 = vector.load %arg2[%c0_2, %c0_3, %c0_4] : memref<1x2x1xf32, #tpu.memory_space<vmem>>, vector<1x2x1xf32>
    %3 = vector.shape_cast %2 : vector<1x2x1xf32> to vector<2x1xf32>
    %c0_5 = arith.constant 0 : index
    %c0_6 = arith.constant 0 : index
    %4 = vector.load %arg5[%c0_5, %c0_6] : memref<1x32xf32, #tpu.memory_space<vmem>>, vector<1x32xf32>
    %c0_7 = arith.constant 0 : index
    %c0_8 = arith.constant 0 : index
    %5 = vector.load %arg3[%c0_7, %c0_8] : memref<16x64xf32, #tpu.memory_space<vmem>>, vector<16x64xf32>
    %cst = arith.constant dense<0.000000e+00> : vector<2x64xf32>
    %6 = tpu.matmul %1, %5, %cst {dimension_numbers = #tpu.dot_dimension_numbers<[1], [0], [0], [1], [0, 0, 1, 1], [], []>, precision = #tpu.contract_precision<fp32>} : vector<2x16xf32>, vector<16x64xf32>, vector<2x64xf32> -> vector<2x64xf32>
    %7 = vector.extract_strided_slice %1 {offsets = [1, 0], sizes = [1, 16], strides = [1, 1]} : vector<2x16xf32> to vector<1x16xf32>
    %cst_9 = arith.constant 0.000000e+00 : f32
    %8 = vector.broadcast %cst_9 : f32 to vector<1x16xf32>
    %9 = tpu.concatenate %7, %8 in 0 : vector<1x16xf32>, vector<1x16xf32> -> vector<2x16xf32>
    %c0_10 = arith.constant 0 : index
    %c0_11 = arith.constant 0 : index
    %10 = vector.load %arg4[%c0_10, %c0_11] : memref<16x32xf32, #tpu.memory_space<vmem>>, vector<16x32xf32>
    %cst_12 = arith.constant dense<0.000000e+00> : vector<2x32xf32>
    %11 = tpu.matmul %9, %10, %cst_12 {dimension_numbers = #tpu.dot_dimension_numbers<[1], [0], [0], [1], [0, 0, 1, 1], [], []>, precision = #tpu.contract_precision<fp32>} : vector<2x16xf32>, vector<16x32xf32>, vector<2x32xf32> -> vector<2x32xf32>
    %12 = vector.extract_strided_slice %6 {offsets = [0, 0], sizes = [2, 32], strides = [1, 1]} : vector<2x64xf32> to vector<2x32xf32>
    %13 = vector.broadcast %4 : vector<1x32xf32> to vector<2x32xf32>
    %14 = arith.addf %12, %13 : vector<2x32xf32>
    %15 = vector.broadcast %3 : vector<2x1xf32> to vector<2x32xf32>
    %16 = arith.mulf %14, %15 : vector<2x32xf32>
    %17 = vector.extract_strided_slice %6 {offsets = [0, 32], sizes = [2, 32], strides = [1, 1]} : vector<2x64xf32> to vector<2x32xf32>
    %18 = arith.addf %17, %11 : vector<2x32xf32>
    %19 = vector.broadcast %4 : vector<1x32xf32> to vector<2x32xf32>
    %20 = arith.addf %18, %19 : vector<2x32xf32>
    %21 = vector.broadcast %3 : vector<2x1xf32> to vector<2x32xf32>
    %22 = arith.mulf %20, %21 : vector<2x32xf32>
    %cst_13 = arith.constant dense<0.000000e+00> : vector<32xf32>
    %23 = vector.multi_reduction <add>, %16, %cst_13 [0] : vector<2x32xf32> to vector<32xf32>
    %24 = vector.shape_cast %23 : vector<32xf32> to vector<1x32xf32>
    %cst_14 = arith.constant dense<0.000000e+00> : vector<32xf32>
    %25 = vector.multi_reduction <add>, %22, %cst_14 [0] : vector<2x32xf32> to vector<32xf32>
    %26 = vector.shape_cast %25 : vector<32xf32> to vector<1x32xf32>
    %27 = arith.addf %24, %26 : vector<1x32xf32>
    %cst_15 = arith.constant 4.000000e+00 : f32
    %28 = vector.broadcast %cst_15 : f32 to vector<1x32xf32>
    %29 = arith.divf %27, %28 : vector<1x32xf32>
    %30 = vector.broadcast %29 : vector<1x32xf32> to vector<2x32xf32>
    %31 = arith.subf %16, %30 : vector<2x32xf32>
    %32 = vector.broadcast %29 : vector<1x32xf32> to vector<2x32xf32>
    %33 = arith.subf %22, %32 : vector<2x32xf32>
    %34 = arith.mulf %31, %31 : vector<2x32xf32>
    %cst_16 = arith.constant dense<0.000000e+00> : vector<32xf32>
    %35 = vector.multi_reduction <add>, %34, %cst_16 [0] : vector<2x32xf32> to vector<32xf32>
    %36 = vector.shape_cast %35 : vector<32xf32> to vector<1x32xf32>
    %37 = arith.mulf %33, %33 : vector<2x32xf32>
    %cst_17 = arith.constant dense<0.000000e+00> : vector<32xf32>
    %38 = vector.multi_reduction <add>, %37, %cst_17 [0] : vector<2x32xf32> to vector<32xf32>
    %39 = vector.shape_cast %38 : vector<32xf32> to vector<1x32xf32>
    %40 = arith.addf %36, %39 : vector<1x32xf32>
    %cst_18 = arith.constant 4.000000e+00 : f32
    %41 = vector.broadcast %cst_18 : f32 to vector<1x32xf32>
    %42 = arith.divf %40, %41 : vector<1x32xf32>
    %cst_19 = arith.constant 9.99999974E-6 : f32
    %43 = vector.broadcast %cst_19 : f32 to vector<1x32xf32>
    %44 = arith.addf %42, %43 : vector<1x32xf32>
    %45 = math.rsqrt %44 : vector<1x32xf32>
    %46 = vector.broadcast %45 : vector<1x32xf32> to vector<2x32xf32>
    %47 = arith.mulf %31, %46 : vector<2x32xf32>
    %cst_20 = arith.constant 2.000000e-01 : f32
    %48 = vector.broadcast %cst_20 : f32 to vector<2x32xf32>
    %49 = arith.mulf %48, %47 : vector<2x32xf32>
    %50 = arith.maximumf %47, %49 : vector<2x32xf32>
    %51 = vector.broadcast %45 : vector<1x32xf32> to vector<2x32xf32>
    %52 = arith.mulf %33, %51 : vector<2x32xf32>
    %cst_21 = arith.constant 2.000000e-01 : f32
    %53 = vector.broadcast %cst_21 : f32 to vector<2x32xf32>
    %54 = arith.mulf %53, %52 : vector<2x32xf32>
    %55 = arith.maximumf %52, %54 : vector<2x32xf32>
    %56 = tpu.concatenate %50, %55 in 1 : vector<2x32xf32>, vector<2x32xf32> -> vector<2x64xf32>
    %c0_22 = arith.constant 0 : index
    %c0_23 = arith.constant 0 : index
    %c0_24 = arith.constant 0 : index
    %57 = vector.load %arg6[%c0_22, %c0_23, %c0_24] : memref<1x2x64xf32, #tpu.memory_space<vmem>>, vector<1x2x64xf32>
    %58 = vector.shape_cast %57 : vector<1x2x64xf32> to vector<2x64xf32>
    %59 = vector.shape_cast %56 : vector<2x64xf32> to vector<1x2x64xf32>
    tpu.vector_store %arg6[%c0_22, %c0_23, %c0_24], %59 {strides = array<i32>} : memref<1x2x64xf32, #tpu.memory_space<vmem>>, vector<1x2x64xf32>,
    return
  }
  func.func @transform_0(%arg0: i32) -> (i32, i32, i32) {
    %c0_i32 = arith.constant 0 : i32
    %c0_i32_0 = arith.constant 0 : i32
    %c0_i32_1 = arith.constant 0 : i32
    return %arg0, %c0_i32, %c0_i32_0 : i32, i32, i32
  }
  func.func @transform_1(%arg0: i32) -> (i32, i32, i32) {
    %c0_i32 = arith.constant 0 : i32
    %c0_i32_0 = arith.constant 0 : i32
    %c0_i32_1 = arith.constant 0 : i32
    return %arg0, %c0_i32, %c0_i32_0 : i32, i32, i32
  }
  func.func @transform_2(%arg0: i32) -> (i32, i32) {
    %c0_i32 = arith.constant 0 : i32
    %c0_i32_0 = arith.constant 0 : i32
    %c0_i32_1 = arith.constant 0 : i32
    return %c0_i32, %c0_i32_0 : i32, i32
  }
  func.func @transform_3(%arg0: i32) -> (i32, i32) {
    %c0_i32 = arith.constant 0 : i32
    %c0_i32_0 = arith.constant 0 : i32
    %c0_i32_1 = arith.constant 0 : i32
    return %c0_i32, %c0_i32_0 : i32, i32
  }
  func.func @transform_4(%arg0: i32) -> (i32, i32) {
    %c0_i32 = arith.constant 0 : i32
    %c0_i32_0 = arith.constant 0 : i32
    %c0_i32_1 = arith.constant 0 : i32
    return %c0_i32, %c0_i32_0 : i32, i32
  }
  func.func @transform_5(%arg0: i32) -> (i32, i32, i32) {
    %c0_i32 = arith.constant 0 : i32
    %c0_i32_0 = arith.constant 0 : i32
    %c0_i32_1 = arith.constant 0 : i32
    return %arg0, %c0_i32, %c0_i32_0 : i32, i32, i32
  }
}

module attributes {stable_mosaic.version = 11 : i64} {
  func.func @_down_block_kernel(%arg0: i32, %arg1: memref<1x2x128xf32, #tpu.memory_space<vmem>>, %arg2: memref<1x2x1xf32, #tpu.memory_space<vmem>>, %arg3: memref<128x16xf32, #tpu.memory_space<vmem>>, %arg4: memref<64x16xf32, #tpu.memory_space<vmem>>, %arg5: memref<1x16xf32, #tpu.memory_space<vmem>>, %arg6: memref<1x2x16xf32, #tpu.memory_space<vmem>>) attributes {dimension_semantics = [#tpu.dimension_semantics<parallel>], iteration_bounds = array<i64: 2>, scalar_prefetch = 0 : i64, scratch_operands = 0 : i64, tpu.core_type = #tpu.core_type<tc>, window_params = [{transform_indices = @transform_0, window_bounds = array<i64: 1, 2, 128>}, {transform_indices = @transform_1, window_bounds = array<i64: 1, 2, 1>}, {pipeline_mode = #tpu.pipeline_mode<synchronous>, transform_indices = @transform_2, window_bounds = array<i64: 128, 16>}, {pipeline_mode = #tpu.pipeline_mode<synchronous>, transform_indices = @transform_3, window_bounds = array<i64: 64, 16>}, {pipeline_mode = #tpu.pipeline_mode<synchronous>, transform_indices = @transform_4, window_bounds = array<i64: 1, 16>}, {transform_indices = @transform_5, window_bounds = array<i64: 1, 2, 16>}]} {
    %c0 = arith.constant 0 : index
    %c0_0 = arith.constant 0 : index
    %c0_1 = arith.constant 0 : index
    %0 = vector.load %arg1[%c0, %c0_0, %c0_1] : memref<1x2x128xf32, #tpu.memory_space<vmem>>, vector<1x2x128xf32>
    %1 = vector.shape_cast %0 : vector<1x2x128xf32> to vector<2x128xf32>
    %c0_2 = arith.constant 0 : index
    %c0_3 = arith.constant 0 : index
    %2 = vector.load %arg3[%c0_2, %c0_3] : memref<128x16xf32, #tpu.memory_space<vmem>>, vector<128x16xf32>
    %cst = arith.constant dense<0.000000e+00> : vector<2x16xf32>
    %3 = tpu.matmul %1, %2, %cst {dimension_numbers = #tpu.dot_dimension_numbers<[1], [0], [0], [1], [0, 0, 1, 1], [], []>, precision = #tpu.contract_precision<fp32>} : vector<2x128xf32>, vector<128x16xf32>, vector<2x16xf32> -> vector<2x16xf32>
    %4 = vector.extract_strided_slice %1 {offsets = [0, 64], sizes = [2, 64], strides = [1, 1]} : vector<2x128xf32> to vector<2x64xf32>
    %cst_4 = arith.constant 0.000000e+00 : f32
    %5 = vector.broadcast %cst_4 : f32 to vector<1x64xf32>
    %6 = vector.extract_strided_slice %4 {offsets = [0, 0], sizes = [1, 64], strides = [1, 1]} : vector<2x64xf32> to vector<1x64xf32>
    %7 = tpu.concatenate %5, %6 in 0 : vector<1x64xf32>, vector<1x64xf32> -> vector<2x64xf32>
    %c0_5 = arith.constant 0 : index
    %c0_6 = arith.constant 0 : index
    %8 = vector.load %arg4[%c0_5, %c0_6] : memref<64x16xf32, #tpu.memory_space<vmem>>, vector<64x16xf32>
    %cst_7 = arith.constant dense<0.000000e+00> : vector<2x16xf32>
    %9 = tpu.matmul %7, %8, %cst_7 {dimension_numbers = #tpu.dot_dimension_numbers<[1], [0], [0], [1], [0, 0, 1, 1], [], []>, precision = #tpu.contract_precision<fp32>} : vector<2x64xf32>, vector<64x16xf32>, vector<2x16xf32> -> vector<2x16xf32>
    %10 = arith.addf %3, %9 : vector<2x16xf32>
    %c0_8 = arith.constant 0 : index
    %c0_9 = arith.constant 0 : index
    %11 = vector.load %arg5[%c0_8, %c0_9] : memref<1x16xf32, #tpu.memory_space<vmem>>, vector<1x16xf32>
    %12 = vector.broadcast %11 : vector<1x16xf32> to vector<2x16xf32>
    %13 = arith.addf %10, %12 : vector<2x16xf32>
    %c0_10 = arith.constant 0 : index
    %c0_11 = arith.constant 0 : index
    %c0_12 = arith.constant 0 : index
    %14 = vector.load %arg2[%c0_10, %c0_11, %c0_12] : memref<1x2x1xf32, #tpu.memory_space<vmem>>, vector<1x2x1xf32>
    %15 = vector.shape_cast %14 : vector<1x2x1xf32> to vector<2x1xf32>
    %16 = vector.broadcast %15 : vector<2x1xf32> to vector<2x16xf32>
    %17 = arith.mulf %13, %16 : vector<2x16xf32>
    %cst_13 = arith.constant dense<0.000000e+00> : vector<16xf32>
    %18 = vector.multi_reduction <add>, %17, %cst_13 [0] : vector<2x16xf32> to vector<16xf32>
    %19 = vector.shape_cast %18 : vector<16xf32> to vector<1x16xf32>
    %cst_14 = arith.constant 2.000000e+00 : f32
    %20 = vector.broadcast %cst_14 : f32 to vector<1x16xf32>
    %21 = arith.divf %19, %20 : vector<1x16xf32>
    %22 = vector.broadcast %21 : vector<1x16xf32> to vector<2x16xf32>
    %23 = arith.subf %17, %22 : vector<2x16xf32>
    %24 = arith.mulf %23, %23 : vector<2x16xf32>
    %cst_15 = arith.constant dense<0.000000e+00> : vector<16xf32>
    %25 = vector.multi_reduction <add>, %24, %cst_15 [0] : vector<2x16xf32> to vector<16xf32>
    %26 = vector.shape_cast %25 : vector<16xf32> to vector<1x16xf32>
    %cst_16 = arith.constant 2.000000e+00 : f32
    %27 = vector.broadcast %cst_16 : f32 to vector<1x16xf32>
    %28 = arith.divf %26, %27 : vector<1x16xf32>
    %cst_17 = arith.constant 9.99999974E-6 : f32
    %29 = vector.broadcast %cst_17 : f32 to vector<1x16xf32>
    %30 = arith.addf %28, %29 : vector<1x16xf32>
    %31 = math.rsqrt %30 : vector<1x16xf32>
    %32 = vector.broadcast %31 : vector<1x16xf32> to vector<2x16xf32>
    %33 = arith.mulf %23, %32 : vector<2x16xf32>
    %cst_18 = arith.constant 2.000000e-01 : f32
    %34 = vector.broadcast %cst_18 : f32 to vector<2x16xf32>
    %35 = arith.mulf %34, %33 : vector<2x16xf32>
    %36 = arith.maximumf %33, %35 : vector<2x16xf32>
    %c0_19 = arith.constant 0 : index
    %c0_20 = arith.constant 0 : index
    %c0_21 = arith.constant 0 : index
    %37 = vector.load %arg6[%c0_19, %c0_20, %c0_21] : memref<1x2x16xf32, #tpu.memory_space<vmem>>, vector<1x2x16xf32>
    %38 = vector.shape_cast %37 : vector<1x2x16xf32> to vector<2x16xf32>
    %39 = vector.shape_cast %36 : vector<2x16xf32> to vector<1x2x16xf32>
    tpu.vector_store %arg6[%c0_19, %c0_20, %c0_21], %39 {strides = array<i32>} : memref<1x2x16xf32, #tpu.memory_space<vmem>>, vector<1x2x16xf32>,
    return
  }
  func.func @transform_0(%arg0: i32) -> (i32, i32, i32) {
    %c0_i32 = arith.constant 0 : i32
    %c0_i32_0 = arith.constant 0 : i32
    %c0_i32_1 = arith.constant 0 : i32
    return %arg0, %c0_i32, %c0_i32_0 : i32, i32, i32
  }
  func.func @transform_1(%arg0: i32) -> (i32, i32, i32) {
    %c0_i32 = arith.constant 0 : i32
    %c0_i32_0 = arith.constant 0 : i32
    %c0_i32_1 = arith.constant 0 : i32
    return %arg0, %c0_i32, %c0_i32_0 : i32, i32, i32
  }
  func.func @transform_2(%arg0: i32) -> (i32, i32) {
    %c0_i32 = arith.constant 0 : i32
    %c0_i32_0 = arith.constant 0 : i32
    %c0_i32_1 = arith.constant 0 : i32
    return %c0_i32, %c0_i32_0 : i32, i32
  }
  func.func @transform_3(%arg0: i32) -> (i32, i32) {
    %c0_i32 = arith.constant 0 : i32
    %c0_i32_0 = arith.constant 0 : i32
    %c0_i32_1 = arith.constant 0 : i32
    return %c0_i32, %c0_i32_0 : i32, i32
  }
  func.func @transform_4(%arg0: i32) -> (i32, i32) {
    %c0_i32 = arith.constant 0 : i32
    %c0_i32_0 = arith.constant 0 : i32
    %c0_i32_1 = arith.constant 0 : i32
    return %c0_i32, %c0_i32_0 : i32, i32
  }
  func.func @transform_5(%arg0: i32) -> (i32, i32, i32) {
    %c0_i32 = arith.constant 0 : i32
    %c0_i32_0 = arith.constant 0 : i32
    %c0_i32_1 = arith.constant 0 : i32
    return %arg0, %c0_i32, %c0_i32_0 : i32, i32, i32
  }
}

module attributes {stable_mosaic.version = 11 : i64} {
  func.func @_up_block_kernel(%arg0: i32, %arg1: memref<1x4x32xf32, #tpu.memory_space<vmem>>, %arg2: memref<1x4x1xf32, #tpu.memory_space<vmem>>, %arg3: memref<32x32xf32, #tpu.memory_space<vmem>>, %arg4: memref<32x16xf32, #tpu.memory_space<vmem>>, %arg5: memref<1x16xf32, #tpu.memory_space<vmem>>, %arg6: memref<1x4x32xf32, #tpu.memory_space<vmem>>) attributes {dimension_semantics = [#tpu.dimension_semantics<parallel>], iteration_bounds = array<i64: 2>, scalar_prefetch = 0 : i64, scratch_operands = 0 : i64, tpu.core_type = #tpu.core_type<tc>, window_params = [{transform_indices = @transform_0, window_bounds = array<i64: 1, 4, 32>}, {transform_indices = @transform_1, window_bounds = array<i64: 1, 4, 1>}, {pipeline_mode = #tpu.pipeline_mode<synchronous>, transform_indices = @transform_2, window_bounds = array<i64: 32, 32>}, {pipeline_mode = #tpu.pipeline_mode<synchronous>, transform_indices = @transform_3, window_bounds = array<i64: 32, 16>}, {pipeline_mode = #tpu.pipeline_mode<synchronous>, transform_indices = @transform_4, window_bounds = array<i64: 1, 16>}, {transform_indices = @transform_5, window_bounds = array<i64: 1, 4, 32>}]} {
    %c0 = arith.constant 0 : index
    %c0_0 = arith.constant 0 : index
    %c0_1 = arith.constant 0 : index
    %0 = vector.load %arg1[%c0, %c0_0, %c0_1] : memref<1x4x32xf32, #tpu.memory_space<vmem>>, vector<1x4x32xf32>
    %1 = vector.shape_cast %0 : vector<1x4x32xf32> to vector<4x32xf32>
    %c0_2 = arith.constant 0 : index
    %c0_3 = arith.constant 0 : index
    %c0_4 = arith.constant 0 : index
    %2 = vector.load %arg2[%c0_2, %c0_3, %c0_4] : memref<1x4x1xf32, #tpu.memory_space<vmem>>, vector<1x4x1xf32>
    %3 = vector.shape_cast %2 : vector<1x4x1xf32> to vector<4x1xf32>
    %c0_5 = arith.constant 0 : index
    %c0_6 = arith.constant 0 : index
    %4 = vector.load %arg5[%c0_5, %c0_6] : memref<1x16xf32, #tpu.memory_space<vmem>>, vector<1x16xf32>
    %c0_7 = arith.constant 0 : index
    %c0_8 = arith.constant 0 : index
    %5 = vector.load %arg3[%c0_7, %c0_8] : memref<32x32xf32, #tpu.memory_space<vmem>>, vector<32x32xf32>
    %cst = arith.constant dense<0.000000e+00> : vector<4x32xf32>
    %6 = tpu.matmul %1, %5, %cst {dimension_numbers = #tpu.dot_dimension_numbers<[1], [0], [0], [1], [0, 0, 1, 1], [], []>, precision = #tpu.contract_precision<fp32>} : vector<4x32xf32>, vector<32x32xf32>, vector<4x32xf32> -> vector<4x32xf32>
    %7 = vector.extract_strided_slice %1 {offsets = [1, 0], sizes = [3, 32], strides = [1, 1]} : vector<4x32xf32> to vector<3x32xf32>
    %cst_9 = arith.constant 0.000000e+00 : f32
    %8 = vector.broadcast %cst_9 : f32 to vector<1x32xf32>
    %9 = tpu.concatenate %7, %8 in 0 : vector<3x32xf32>, vector<1x32xf32> -> vector<4x32xf32>
    %c0_10 = arith.constant 0 : index
    %c0_11 = arith.constant 0 : index
    %10 = vector.load %arg4[%c0_10, %c0_11] : memref<32x16xf32, #tpu.memory_space<vmem>>, vector<32x16xf32>
    %cst_12 = arith.constant dense<0.000000e+00> : vector<4x16xf32>
    %11 = tpu.matmul %9, %10, %cst_12 {dimension_numbers = #tpu.dot_dimension_numbers<[1], [0], [0], [1], [0, 0, 1, 1], [], []>, precision = #tpu.contract_precision<fp32>} : vector<4x32xf32>, vector<32x16xf32>, vector<4x16xf32> -> vector<4x16xf32>
    %12 = vector.extract_strided_slice %6 {offsets = [0, 0], sizes = [4, 16], strides = [1, 1]} : vector<4x32xf32> to vector<4x16xf32>
    %13 = vector.broadcast %4 : vector<1x16xf32> to vector<4x16xf32>
    %14 = arith.addf %12, %13 : vector<4x16xf32>
    %15 = vector.broadcast %3 : vector<4x1xf32> to vector<4x16xf32>
    %16 = arith.mulf %14, %15 : vector<4x16xf32>
    %17 = vector.extract_strided_slice %6 {offsets = [0, 16], sizes = [4, 16], strides = [1, 1]} : vector<4x32xf32> to vector<4x16xf32>
    %18 = arith.addf %17, %11 : vector<4x16xf32>
    %19 = vector.broadcast %4 : vector<1x16xf32> to vector<4x16xf32>
    %20 = arith.addf %18, %19 : vector<4x16xf32>
    %21 = vector.broadcast %3 : vector<4x1xf32> to vector<4x16xf32>
    %22 = arith.mulf %20, %21 : vector<4x16xf32>
    %cst_13 = arith.constant dense<0.000000e+00> : vector<16xf32>
    %23 = vector.multi_reduction <add>, %16, %cst_13 [0] : vector<4x16xf32> to vector<16xf32>
    %24 = vector.shape_cast %23 : vector<16xf32> to vector<1x16xf32>
    %cst_14 = arith.constant dense<0.000000e+00> : vector<16xf32>
    %25 = vector.multi_reduction <add>, %22, %cst_14 [0] : vector<4x16xf32> to vector<16xf32>
    %26 = vector.shape_cast %25 : vector<16xf32> to vector<1x16xf32>
    %27 = arith.addf %24, %26 : vector<1x16xf32>
    %cst_15 = arith.constant 8.000000e+00 : f32
    %28 = vector.broadcast %cst_15 : f32 to vector<1x16xf32>
    %29 = arith.divf %27, %28 : vector<1x16xf32>
    %30 = vector.broadcast %29 : vector<1x16xf32> to vector<4x16xf32>
    %31 = arith.subf %16, %30 : vector<4x16xf32>
    %32 = vector.broadcast %29 : vector<1x16xf32> to vector<4x16xf32>
    %33 = arith.subf %22, %32 : vector<4x16xf32>
    %34 = arith.mulf %31, %31 : vector<4x16xf32>
    %cst_16 = arith.constant dense<0.000000e+00> : vector<16xf32>
    %35 = vector.multi_reduction <add>, %34, %cst_16 [0] : vector<4x16xf32> to vector<16xf32>
    %36 = vector.shape_cast %35 : vector<16xf32> to vector<1x16xf32>
    %37 = arith.mulf %33, %33 : vector<4x16xf32>
    %cst_17 = arith.constant dense<0.000000e+00> : vector<16xf32>
    %38 = vector.multi_reduction <add>, %37, %cst_17 [0] : vector<4x16xf32> to vector<16xf32>
    %39 = vector.shape_cast %38 : vector<16xf32> to vector<1x16xf32>
    %40 = arith.addf %36, %39 : vector<1x16xf32>
    %cst_18 = arith.constant 8.000000e+00 : f32
    %41 = vector.broadcast %cst_18 : f32 to vector<1x16xf32>
    %42 = arith.divf %40, %41 : vector<1x16xf32>
    %cst_19 = arith.constant 9.99999974E-6 : f32
    %43 = vector.broadcast %cst_19 : f32 to vector<1x16xf32>
    %44 = arith.addf %42, %43 : vector<1x16xf32>
    %45 = math.rsqrt %44 : vector<1x16xf32>
    %46 = vector.broadcast %45 : vector<1x16xf32> to vector<4x16xf32>
    %47 = arith.mulf %31, %46 : vector<4x16xf32>
    %cst_20 = arith.constant 2.000000e-01 : f32
    %48 = vector.broadcast %cst_20 : f32 to vector<4x16xf32>
    %49 = arith.mulf %48, %47 : vector<4x16xf32>
    %50 = arith.maximumf %47, %49 : vector<4x16xf32>
    %51 = vector.broadcast %45 : vector<1x16xf32> to vector<4x16xf32>
    %52 = arith.mulf %33, %51 : vector<4x16xf32>
    %cst_21 = arith.constant 2.000000e-01 : f32
    %53 = vector.broadcast %cst_21 : f32 to vector<4x16xf32>
    %54 = arith.mulf %53, %52 : vector<4x16xf32>
    %55 = arith.maximumf %52, %54 : vector<4x16xf32>
    %56 = tpu.concatenate %50, %55 in 1 : vector<4x16xf32>, vector<4x16xf32> -> vector<4x32xf32>
    %c0_22 = arith.constant 0 : index
    %c0_23 = arith.constant 0 : index
    %c0_24 = arith.constant 0 : index
    %57 = vector.load %arg6[%c0_22, %c0_23, %c0_24] : memref<1x4x32xf32, #tpu.memory_space<vmem>>, vector<1x4x32xf32>
    %58 = vector.shape_cast %57 : vector<1x4x32xf32> to vector<4x32xf32>
    %59 = vector.shape_cast %56 : vector<4x32xf32> to vector<1x4x32xf32>
    tpu.vector_store %arg6[%c0_22, %c0_23, %c0_24], %59 {strides = array<i32>} : memref<1x4x32xf32, #tpu.memory_space<vmem>>, vector<1x4x32xf32>,
    return
  }
  func.func @transform_0(%arg0: i32) -> (i32, i32, i32) {
    %c0_i32 = arith.constant 0 : i32
    %c0_i32_0 = arith.constant 0 : i32
    %c0_i32_1 = arith.constant 0 : i32
    return %arg0, %c0_i32, %c0_i32_0 : i32, i32, i32
  }
  func.func @transform_1(%arg0: i32) -> (i32, i32, i32) {
    %c0_i32 = arith.constant 0 : i32
    %c0_i32_0 = arith.constant 0 : i32
    %c0_i32_1 = arith.constant 0 : i32
    return %arg0, %c0_i32, %c0_i32_0 : i32, i32, i32
  }
  func.func @transform_2(%arg0: i32) -> (i32, i32) {
    %c0_i32 = arith.constant 0 : i32
    %c0_i32_0 = arith.constant 0 : i32
    %c0_i32_1 = arith.constant 0 : i32
    return %c0_i32, %c0_i32_0 : i32, i32
  }
  func.func @transform_3(%arg0: i32) -> (i32, i32) {
    %c0_i32 = arith.constant 0 : i32
    %c0_i32_0 = arith.constant 0 : i32
    %c0_i32_1 = arith.constant 0 : i32
    return %c0_i32, %c0_i32_0 : i32, i32
  }
  func.func @transform_4(%arg0: i32) -> (i32, i32) {
    %c0_i32 = arith.constant 0 : i32
    %c0_i32_0 = arith.constant 0 : i32
    %c0_i32_1 = arith.constant 0 : i32
    return %c0_i32, %c0_i32_0 : i32, i32
  }
  func.func @transform_5(%arg0: i32) -> (i32, i32, i32) {
    %c0_i32 = arith.constant 0 : i32
    %c0_i32_0 = arith.constant 0 : i32
    %c0_i32_1 = arith.constant 0 : i32
    return %arg0, %c0_i32, %c0_i32_0 : i32, i32, i32
  }
}

module attributes {stable_mosaic.version = 11 : i64} {
  func.func @_up_block_kernel(%arg0: i32, %arg1: memref<1x8x16xf32, #tpu.memory_space<vmem>>, %arg2: memref<1x8x1xf32, #tpu.memory_space<vmem>>, %arg3: memref<16x16xf32, #tpu.memory_space<vmem>>, %arg4: memref<16x8xf32, #tpu.memory_space<vmem>>, %arg5: memref<1x8xf32, #tpu.memory_space<vmem>>, %arg6: memref<1x8x16xf32, #tpu.memory_space<vmem>>) attributes {dimension_semantics = [#tpu.dimension_semantics<parallel>], iteration_bounds = array<i64: 2>, scalar_prefetch = 0 : i64, scratch_operands = 0 : i64, tpu.core_type = #tpu.core_type<tc>, window_params = [{transform_indices = @transform_0, window_bounds = array<i64: 1, 8, 16>}, {transform_indices = @transform_1, window_bounds = array<i64: 1, 8, 1>}, {pipeline_mode = #tpu.pipeline_mode<synchronous>, transform_indices = @transform_2, window_bounds = array<i64: 16, 16>}, {pipeline_mode = #tpu.pipeline_mode<synchronous>, transform_indices = @transform_3, window_bounds = array<i64: 16, 8>}, {pipeline_mode = #tpu.pipeline_mode<synchronous>, transform_indices = @transform_4, window_bounds = array<i64: 1, 8>}, {transform_indices = @transform_5, window_bounds = array<i64: 1, 8, 16>}]} {
    %c0 = arith.constant 0 : index
    %c0_0 = arith.constant 0 : index
    %c0_1 = arith.constant 0 : index
    %0 = vector.load %arg1[%c0, %c0_0, %c0_1] : memref<1x8x16xf32, #tpu.memory_space<vmem>>, vector<1x8x16xf32>
    %1 = vector.shape_cast %0 : vector<1x8x16xf32> to vector<8x16xf32>
    %c0_2 = arith.constant 0 : index
    %c0_3 = arith.constant 0 : index
    %c0_4 = arith.constant 0 : index
    %2 = vector.load %arg2[%c0_2, %c0_3, %c0_4] : memref<1x8x1xf32, #tpu.memory_space<vmem>>, vector<1x8x1xf32>
    %3 = vector.shape_cast %2 : vector<1x8x1xf32> to vector<8x1xf32>
    %c0_5 = arith.constant 0 : index
    %c0_6 = arith.constant 0 : index
    %4 = vector.load %arg5[%c0_5, %c0_6] : memref<1x8xf32, #tpu.memory_space<vmem>>, vector<1x8xf32>
    %c0_7 = arith.constant 0 : index
    %c0_8 = arith.constant 0 : index
    %5 = vector.load %arg3[%c0_7, %c0_8] : memref<16x16xf32, #tpu.memory_space<vmem>>, vector<16x16xf32>
    %cst = arith.constant dense<0.000000e+00> : vector<8x16xf32>
    %6 = tpu.matmul %1, %5, %cst {dimension_numbers = #tpu.dot_dimension_numbers<[1], [0], [0], [1], [0, 0, 1, 1], [], []>, precision = #tpu.contract_precision<fp32>} : vector<8x16xf32>, vector<16x16xf32>, vector<8x16xf32> -> vector<8x16xf32>
    %7 = vector.extract_strided_slice %1 {offsets = [1, 0], sizes = [7, 16], strides = [1, 1]} : vector<8x16xf32> to vector<7x16xf32>
    %cst_9 = arith.constant 0.000000e+00 : f32
    %8 = vector.broadcast %cst_9 : f32 to vector<1x16xf32>
    %9 = tpu.concatenate %7, %8 in 0 : vector<7x16xf32>, vector<1x16xf32> -> vector<8x16xf32>
    %c0_10 = arith.constant 0 : index
    %c0_11 = arith.constant 0 : index
    %10 = vector.load %arg4[%c0_10, %c0_11] : memref<16x8xf32, #tpu.memory_space<vmem>>, vector<16x8xf32>
    %cst_12 = arith.constant dense<0.000000e+00> : vector<8x8xf32>
    %11 = tpu.matmul %9, %10, %cst_12 {dimension_numbers = #tpu.dot_dimension_numbers<[1], [0], [0], [1], [0, 0, 1, 1], [], []>, precision = #tpu.contract_precision<fp32>} : vector<8x16xf32>, vector<16x8xf32>, vector<8x8xf32> -> vector<8x8xf32>
    %12 = vector.extract_strided_slice %6 {offsets = [0, 0], sizes = [8, 8], strides = [1, 1]} : vector<8x16xf32> to vector<8x8xf32>
    %13 = vector.broadcast %4 : vector<1x8xf32> to vector<8x8xf32>
    %14 = arith.addf %12, %13 : vector<8x8xf32>
    %15 = vector.broadcast %3 : vector<8x1xf32> to vector<8x8xf32>
    %16 = arith.mulf %14, %15 : vector<8x8xf32>
    %17 = vector.extract_strided_slice %6 {offsets = [0, 8], sizes = [8, 8], strides = [1, 1]} : vector<8x16xf32> to vector<8x8xf32>
    %18 = arith.addf %17, %11 : vector<8x8xf32>
    %19 = vector.broadcast %4 : vector<1x8xf32> to vector<8x8xf32>
    %20 = arith.addf %18, %19 : vector<8x8xf32>
    %21 = vector.broadcast %3 : vector<8x1xf32> to vector<8x8xf32>
    %22 = arith.mulf %20, %21 : vector<8x8xf32>
    %cst_13 = arith.constant dense<0.000000e+00> : vector<8xf32>
    %23 = vector.multi_reduction <add>, %16, %cst_13 [0] : vector<8x8xf32> to vector<8xf32>
    %24 = vector.shape_cast %23 : vector<8xf32> to vector<1x8xf32>
    %cst_14 = arith.constant dense<0.000000e+00> : vector<8xf32>
    %25 = vector.multi_reduction <add>, %22, %cst_14 [0] : vector<8x8xf32> to vector<8xf32>
    %26 = vector.shape_cast %25 : vector<8xf32> to vector<1x8xf32>
    %27 = arith.addf %24, %26 : vector<1x8xf32>
    %cst_15 = arith.constant 1.600000e+01 : f32
    %28 = vector.broadcast %cst_15 : f32 to vector<1x8xf32>
    %29 = arith.divf %27, %28 : vector<1x8xf32>
    %30 = vector.broadcast %29 : vector<1x8xf32> to vector<8x8xf32>
    %31 = arith.subf %16, %30 : vector<8x8xf32>
    %32 = vector.broadcast %29 : vector<1x8xf32> to vector<8x8xf32>
    %33 = arith.subf %22, %32 : vector<8x8xf32>
    %34 = arith.mulf %31, %31 : vector<8x8xf32>
    %cst_16 = arith.constant dense<0.000000e+00> : vector<8xf32>
    %35 = vector.multi_reduction <add>, %34, %cst_16 [0] : vector<8x8xf32> to vector<8xf32>
    %36 = vector.shape_cast %35 : vector<8xf32> to vector<1x8xf32>
    %37 = arith.mulf %33, %33 : vector<8x8xf32>
    %cst_17 = arith.constant dense<0.000000e+00> : vector<8xf32>
    %38 = vector.multi_reduction <add>, %37, %cst_17 [0] : vector<8x8xf32> to vector<8xf32>
    %39 = vector.shape_cast %38 : vector<8xf32> to vector<1x8xf32>
    %40 = arith.addf %36, %39 : vector<1x8xf32>
    %cst_18 = arith.constant 1.600000e+01 : f32
    %41 = vector.broadcast %cst_18 : f32 to vector<1x8xf32>
    %42 = arith.divf %40, %41 : vector<1x8xf32>
    %cst_19 = arith.constant 9.99999974E-6 : f32
    %43 = vector.broadcast %cst_19 : f32 to vector<1x8xf32>
    %44 = arith.addf %42, %43 : vector<1x8xf32>
    %45 = math.rsqrt %44 : vector<1x8xf32>
    %46 = vector.broadcast %45 : vector<1x8xf32> to vector<8x8xf32>
    %47 = arith.mulf %31, %46 : vector<8x8xf32>
    %cst_20 = arith.constant 2.000000e-01 : f32
    %48 = vector.broadcast %cst_20 : f32 to vector<8x8xf32>
    %49 = arith.mulf %48, %47 : vector<8x8xf32>
    %50 = arith.maximumf %47, %49 : vector<8x8xf32>
    %51 = vector.broadcast %45 : vector<1x8xf32> to vector<8x8xf32>
    %52 = arith.mulf %33, %51 : vector<8x8xf32>
    %cst_21 = arith.constant 2.000000e-01 : f32
    %53 = vector.broadcast %cst_21 : f32 to vector<8x8xf32>
    %54 = arith.mulf %53, %52 : vector<8x8xf32>
    %55 = arith.maximumf %52, %54 : vector<8x8xf32>
    %56 = tpu.concatenate %50, %55 in 1 : vector<8x8xf32>, vector<8x8xf32> -> vector<8x16xf32>
    %c0_22 = arith.constant 0 : index
    %c0_23 = arith.constant 0 : index
    %c0_24 = arith.constant 0 : index
    %57 = vector.load %arg6[%c0_22, %c0_23, %c0_24] : memref<1x8x16xf32, #tpu.memory_space<vmem>>, vector<1x8x16xf32>
    %58 = vector.shape_cast %57 : vector<1x8x16xf32> to vector<8x16xf32>
    %59 = vector.shape_cast %56 : vector<8x16xf32> to vector<1x8x16xf32>
    tpu.vector_store %arg6[%c0_22, %c0_23, %c0_24], %59 {strides = array<i32>} : memref<1x8x16xf32, #tpu.memory_space<vmem>>, vector<1x8x16xf32>,
    return
  }
  func.func @transform_0(%arg0: i32) -> (i32, i32, i32) {
    %c0_i32 = arith.constant 0 : i32
    %c0_i32_0 = arith.constant 0 : i32
    %c0_i32_1 = arith.constant 0 : i32
    return %arg0, %c0_i32, %c0_i32_0 : i32, i32, i32
  }
  func.func @transform_1(%arg0: i32) -> (i32, i32, i32) {
    %c0_i32 = arith.constant 0 : i32
    %c0_i32_0 = arith.constant 0 : i32
    %c0_i32_1 = arith.constant 0 : i32
    return %arg0, %c0_i32, %c0_i32_0 : i32, i32, i32
  }
  func.func @transform_2(%arg0: i32) -> (i32, i32) {
    %c0_i32 = arith.constant 0 : i32
    %c0_i32_0 = arith.constant 0 : i32
    %c0_i32_1 = arith.constant 0 : i32
    return %c0_i32, %c0_i32_0 : i32, i32
  }
  func.func @transform_3(%arg0: i32) -> (i32, i32) {
    %c0_i32 = arith.constant 0 : i32
    %c0_i32_0 = arith.constant 0 : i32
    %c0_i32_1 = arith.constant 0 : i32
    return %c0_i32, %c0_i32_0 : i32, i32
  }
  func.func @transform_4(%arg0: i32) -> (i32, i32) {
    %c0_i32 = arith.constant 0 : i32
    %c0_i32_0 = arith.constant 0 : i32
    %c0_i32_1 = arith.constant 0 : i32
    return %c0_i32, %c0_i32_0 : i32, i32
  }
  func.func @transform_5(%arg0: i32) -> (i32, i32, i32) {
    %c0_i32 = arith.constant 0 : i32
    %c0_i32_0 = arith.constant 0 : i32
    %c0_i32_1 = arith.constant 0 : i32
    return %arg0, %c0_i32, %c0_i32_0 : i32, i32, i32
  }
}

module attributes {stable_mosaic.version = 11 : i64} {
  func.func @_up_block_kernel(%arg0: i32, %arg1: memref<1x16x8xf32, #tpu.memory_space<vmem>>, %arg2: memref<1x16x1xf32, #tpu.memory_space<vmem>>, %arg3: memref<8x8xf32, #tpu.memory_space<vmem>>, %arg4: memref<8x4xf32, #tpu.memory_space<vmem>>, %arg5: memref<1x4xf32, #tpu.memory_space<vmem>>, %arg6: memref<1x16x8xf32, #tpu.memory_space<vmem>>) attributes {dimension_semantics = [#tpu.dimension_semantics<parallel>], iteration_bounds = array<i64: 2>, scalar_prefetch = 0 : i64, scratch_operands = 0 : i64, tpu.core_type = #tpu.core_type<tc>, window_params = [{transform_indices = @transform_0, window_bounds = array<i64: 1, 16, 8>}, {transform_indices = @transform_1, window_bounds = array<i64: 1, 16, 1>}, {pipeline_mode = #tpu.pipeline_mode<synchronous>, transform_indices = @transform_2, window_bounds = array<i64: 8, 8>}, {pipeline_mode = #tpu.pipeline_mode<synchronous>, transform_indices = @transform_3, window_bounds = array<i64: 8, 4>}, {pipeline_mode = #tpu.pipeline_mode<synchronous>, transform_indices = @transform_4, window_bounds = array<i64: 1, 4>}, {transform_indices = @transform_5, window_bounds = array<i64: 1, 16, 8>}]} {
    %c0 = arith.constant 0 : index
    %c0_0 = arith.constant 0 : index
    %c0_1 = arith.constant 0 : index
    %0 = vector.load %arg1[%c0, %c0_0, %c0_1] : memref<1x16x8xf32, #tpu.memory_space<vmem>>, vector<1x16x8xf32>
    %1 = vector.shape_cast %0 : vector<1x16x8xf32> to vector<16x8xf32>
    %c0_2 = arith.constant 0 : index
    %c0_3 = arith.constant 0 : index
    %c0_4 = arith.constant 0 : index
    %2 = vector.load %arg2[%c0_2, %c0_3, %c0_4] : memref<1x16x1xf32, #tpu.memory_space<vmem>>, vector<1x16x1xf32>
    %3 = vector.shape_cast %2 : vector<1x16x1xf32> to vector<16x1xf32>
    %c0_5 = arith.constant 0 : index
    %c0_6 = arith.constant 0 : index
    %4 = vector.load %arg5[%c0_5, %c0_6] : memref<1x4xf32, #tpu.memory_space<vmem>>, vector<1x4xf32>
    %c0_7 = arith.constant 0 : index
    %c0_8 = arith.constant 0 : index
    %5 = vector.load %arg3[%c0_7, %c0_8] : memref<8x8xf32, #tpu.memory_space<vmem>>, vector<8x8xf32>
    %cst = arith.constant dense<0.000000e+00> : vector<16x8xf32>
    %6 = tpu.matmul %1, %5, %cst {dimension_numbers = #tpu.dot_dimension_numbers<[1], [0], [0], [1], [0, 0, 1, 1], [], []>, precision = #tpu.contract_precision<fp32>} : vector<16x8xf32>, vector<8x8xf32>, vector<16x8xf32> -> vector<16x8xf32>
    %7 = vector.extract_strided_slice %1 {offsets = [1, 0], sizes = [15, 8], strides = [1, 1]} : vector<16x8xf32> to vector<15x8xf32>
    %cst_9 = arith.constant 0.000000e+00 : f32
    %8 = vector.broadcast %cst_9 : f32 to vector<1x8xf32>
    %9 = tpu.concatenate %7, %8 in 0 : vector<15x8xf32>, vector<1x8xf32> -> vector<16x8xf32>
    %c0_10 = arith.constant 0 : index
    %c0_11 = arith.constant 0 : index
    %10 = vector.load %arg4[%c0_10, %c0_11] : memref<8x4xf32, #tpu.memory_space<vmem>>, vector<8x4xf32>
    %cst_12 = arith.constant dense<0.000000e+00> : vector<16x4xf32>
    %11 = tpu.matmul %9, %10, %cst_12 {dimension_numbers = #tpu.dot_dimension_numbers<[1], [0], [0], [1], [0, 0, 1, 1], [], []>, precision = #tpu.contract_precision<fp32>} : vector<16x8xf32>, vector<8x4xf32>, vector<16x4xf32> -> vector<16x4xf32>
    %12 = vector.extract_strided_slice %6 {offsets = [0, 0], sizes = [16, 4], strides = [1, 1]} : vector<16x8xf32> to vector<16x4xf32>
    %13 = vector.broadcast %4 : vector<1x4xf32> to vector<16x4xf32>
    %14 = arith.addf %12, %13 : vector<16x4xf32>
    %15 = vector.broadcast %3 : vector<16x1xf32> to vector<16x4xf32>
    %16 = arith.mulf %14, %15 : vector<16x4xf32>
    %17 = vector.extract_strided_slice %6 {offsets = [0, 4], sizes = [16, 4], strides = [1, 1]} : vector<16x8xf32> to vector<16x4xf32>
    %18 = arith.addf %17, %11 : vector<16x4xf32>
    %19 = vector.broadcast %4 : vector<1x4xf32> to vector<16x4xf32>
    %20 = arith.addf %18, %19 : vector<16x4xf32>
    %21 = vector.broadcast %3 : vector<16x1xf32> to vector<16x4xf32>
    %22 = arith.mulf %20, %21 : vector<16x4xf32>
    %cst_13 = arith.constant dense<0.000000e+00> : vector<4xf32>
    %23 = vector.multi_reduction <add>, %16, %cst_13 [0] : vector<16x4xf32> to vector<4xf32>
    %24 = vector.shape_cast %23 : vector<4xf32> to vector<1x4xf32>
    %cst_14 = arith.constant dense<0.000000e+00> : vector<4xf32>
    %25 = vector.multi_reduction <add>, %22, %cst_14 [0] : vector<16x4xf32> to vector<4xf32>
    %26 = vector.shape_cast %25 : vector<4xf32> to vector<1x4xf32>
    %27 = arith.addf %24, %26 : vector<1x4xf32>
    %cst_15 = arith.constant 3.200000e+01 : f32
    %28 = vector.broadcast %cst_15 : f32 to vector<1x4xf32>
    %29 = arith.divf %27, %28 : vector<1x4xf32>
    %30 = vector.broadcast %29 : vector<1x4xf32> to vector<16x4xf32>
    %31 = arith.subf %16, %30 : vector<16x4xf32>
    %32 = vector.broadcast %29 : vector<1x4xf32> to vector<16x4xf32>
    %33 = arith.subf %22, %32 : vector<16x4xf32>
    %34 = arith.mulf %31, %31 : vector<16x4xf32>
    %cst_16 = arith.constant dense<0.000000e+00> : vector<4xf32>
    %35 = vector.multi_reduction <add>, %34, %cst_16 [0] : vector<16x4xf32> to vector<4xf32>
    %36 = vector.shape_cast %35 : vector<4xf32> to vector<1x4xf32>
    %37 = arith.mulf %33, %33 : vector<16x4xf32>
    %cst_17 = arith.constant dense<0.000000e+00> : vector<4xf32>
    %38 = vector.multi_reduction <add>, %37, %cst_17 [0] : vector<16x4xf32> to vector<4xf32>
    %39 = vector.shape_cast %38 : vector<4xf32> to vector<1x4xf32>
    %40 = arith.addf %36, %39 : vector<1x4xf32>
    %cst_18 = arith.constant 3.200000e+01 : f32
    %41 = vector.broadcast %cst_18 : f32 to vector<1x4xf32>
    %42 = arith.divf %40, %41 : vector<1x4xf32>
    %cst_19 = arith.constant 9.99999974E-6 : f32
    %43 = vector.broadcast %cst_19 : f32 to vector<1x4xf32>
    %44 = arith.addf %42, %43 : vector<1x4xf32>
    %45 = math.rsqrt %44 : vector<1x4xf32>
    %46 = vector.broadcast %45 : vector<1x4xf32> to vector<16x4xf32>
    %47 = arith.mulf %31, %46 : vector<16x4xf32>
    %cst_20 = arith.constant 2.000000e-01 : f32
    %48 = vector.broadcast %cst_20 : f32 to vector<16x4xf32>
    %49 = arith.mulf %48, %47 : vector<16x4xf32>
    %50 = arith.maximumf %47, %49 : vector<16x4xf32>
    %51 = vector.broadcast %45 : vector<1x4xf32> to vector<16x4xf32>
    %52 = arith.mulf %33, %51 : vector<16x4xf32>
    %cst_21 = arith.constant 2.000000e-01 : f32
    %53 = vector.broadcast %cst_21 : f32 to vector<16x4xf32>
    %54 = arith.mulf %53, %52 : vector<16x4xf32>
    %55 = arith.maximumf %52, %54 : vector<16x4xf32>
    %56 = tpu.concatenate %50, %55 in 1 : vector<16x4xf32>, vector<16x4xf32> -> vector<16x8xf32>
    %c0_22 = arith.constant 0 : index
    %c0_23 = arith.constant 0 : index
    %c0_24 = arith.constant 0 : index
    %57 = vector.load %arg6[%c0_22, %c0_23, %c0_24] : memref<1x16x8xf32, #tpu.memory_space<vmem>>, vector<1x16x8xf32>
    %58 = vector.shape_cast %57 : vector<1x16x8xf32> to vector<16x8xf32>
    %59 = vector.shape_cast %56 : vector<16x8xf32> to vector<1x16x8xf32>
    tpu.vector_store %arg6[%c0_22, %c0_23, %c0_24], %59 {strides = array<i32>} : memref<1x16x8xf32, #tpu.memory_space<vmem>>, vector<1x16x8xf32>,
    return
  }
  func.func @transform_0(%arg0: i32) -> (i32, i32, i32) {
    %c0_i32 = arith.constant 0 : i32
    %c0_i32_0 = arith.constant 0 : i32
    %c0_i32_1 = arith.constant 0 : i32
    return %arg0, %c0_i32, %c0_i32_0 : i32, i32, i32
  }
  func.func @transform_1(%arg0: i32) -> (i32, i32, i32) {
    %c0_i32 = arith.constant 0 : i32
    %c0_i32_0 = arith.constant 0 : i32
    %c0_i32_1 = arith.constant 0 : i32
    return %arg0, %c0_i32, %c0_i32_0 : i32, i32, i32
  }
  func.func @transform_2(%arg0: i32) -> (i32, i32) {
    %c0_i32 = arith.constant 0 : i32
    %c0_i32_0 = arith.constant 0 : i32
    %c0_i32_1 = arith.constant 0 : i32
    return %c0_i32, %c0_i32_0 : i32, i32
  }
  func.func @transform_3(%arg0: i32) -> (i32, i32) {
    %c0_i32 = arith.constant 0 : i32
    %c0_i32_0 = arith.constant 0 : i32
    %c0_i32_1 = arith.constant 0 : i32
    return %c0_i32, %c0_i32_0 : i32, i32
  }
  func.func @transform_4(%arg0: i32) -> (i32, i32) {
    %c0_i32 = arith.constant 0 : i32
    %c0_i32_0 = arith.constant 0 : i32
    %c0_i32_1 = arith.constant 0 : i32
    return %c0_i32, %c0_i32_0 : i32, i32
  }
  func.func @transform_5(%arg0: i32) -> (i32, i32, i32) {
    %c0_i32 = arith.constant 0 : i32
    %c0_i32_0 = arith.constant 0 : i32
    %c0_i32_1 = arith.constant 0 : i32
    return %arg0, %c0_i32, %c0_i32_0 : i32, i32, i32
  }
}

module attributes {stable_mosaic.version = 11 : i64} {
  func.func @_up_block_kernel(%arg0: i32, %arg1: memref<1x32x4xf32, #tpu.memory_space<vmem>>, %arg2: memref<1x32x1xf32, #tpu.memory_space<vmem>>, %arg3: memref<4x8xf32, #tpu.memory_space<vmem>>, %arg4: memref<4x4xf32, #tpu.memory_space<vmem>>, %arg5: memref<1x4xf32, #tpu.memory_space<vmem>>, %arg6: memref<1x32x8xf32, #tpu.memory_space<vmem>>) attributes {dimension_semantics = [#tpu.dimension_semantics<parallel>], iteration_bounds = array<i64: 2>, scalar_prefetch = 0 : i64, scratch_operands = 0 : i64, tpu.core_type = #tpu.core_type<tc>, window_params = [{transform_indices = @transform_0, window_bounds = array<i64: 1, 32, 4>}, {transform_indices = @transform_1, window_bounds = array<i64: 1, 32, 1>}, {pipeline_mode = #tpu.pipeline_mode<synchronous>, transform_indices = @transform_2, window_bounds = array<i64: 4, 8>}, {pipeline_mode = #tpu.pipeline_mode<synchronous>, transform_indices = @transform_3, window_bounds = array<i64: 4, 4>}, {pipeline_mode = #tpu.pipeline_mode<synchronous>, transform_indices = @transform_4, window_bounds = array<i64: 1, 4>}, {transform_indices = @transform_5, window_bounds = array<i64: 1, 32, 8>}]} {
    %c0 = arith.constant 0 : index
    %c0_0 = arith.constant 0 : index
    %c0_1 = arith.constant 0 : index
    %0 = vector.load %arg1[%c0, %c0_0, %c0_1] : memref<1x32x4xf32, #tpu.memory_space<vmem>>, vector<1x32x4xf32>
    %1 = vector.shape_cast %0 : vector<1x32x4xf32> to vector<32x4xf32>
    %c0_2 = arith.constant 0 : index
    %c0_3 = arith.constant 0 : index
    %c0_4 = arith.constant 0 : index
    %2 = vector.load %arg2[%c0_2, %c0_3, %c0_4] : memref<1x32x1xf32, #tpu.memory_space<vmem>>, vector<1x32x1xf32>
    %3 = vector.shape_cast %2 : vector<1x32x1xf32> to vector<32x1xf32>
    %c0_5 = arith.constant 0 : index
    %c0_6 = arith.constant 0 : index
    %4 = vector.load %arg5[%c0_5, %c0_6] : memref<1x4xf32, #tpu.memory_space<vmem>>, vector<1x4xf32>
    %c0_7 = arith.constant 0 : index
    %c0_8 = arith.constant 0 : index
    %5 = vector.load %arg3[%c0_7, %c0_8] : memref<4x8xf32, #tpu.memory_space<vmem>>, vector<4x8xf32>
    %cst = arith.constant dense<0.000000e+00> : vector<32x8xf32>
    %6 = tpu.matmul %1, %5, %cst {dimension_numbers = #tpu.dot_dimension_numbers<[1], [0], [0], [1], [0, 0, 1, 1], [], []>, precision = #tpu.contract_precision<fp32>} : vector<32x4xf32>, vector<4x8xf32>, vector<32x8xf32> -> vector<32x8xf32>
    %7 = vector.extract_strided_slice %1 {offsets = [1, 0], sizes = [31, 4], strides = [1, 1]} : vector<32x4xf32> to vector<31x4xf32>
    %cst_9 = arith.constant 0.000000e+00 : f32
    %8 = vector.broadcast %cst_9 : f32 to vector<1x4xf32>
    %9 = tpu.concatenate %7, %8 in 0 : vector<31x4xf32>, vector<1x4xf32> -> vector<32x4xf32>
    %c0_10 = arith.constant 0 : index
    %c0_11 = arith.constant 0 : index
    %10 = vector.load %arg4[%c0_10, %c0_11] : memref<4x4xf32, #tpu.memory_space<vmem>>, vector<4x4xf32>
    %cst_12 = arith.constant dense<0.000000e+00> : vector<32x4xf32>
    %11 = tpu.matmul %9, %10, %cst_12 {dimension_numbers = #tpu.dot_dimension_numbers<[1], [0], [0], [1], [0, 0, 1, 1], [], []>, precision = #tpu.contract_precision<fp32>} : vector<32x4xf32>, vector<4x4xf32>, vector<32x4xf32> -> vector<32x4xf32>
    %12 = vector.extract_strided_slice %6 {offsets = [0, 0], sizes = [32, 4], strides = [1, 1]} : vector<32x8xf32> to vector<32x4xf32>
    %13 = vector.broadcast %4 : vector<1x4xf32> to vector<32x4xf32>
    %14 = arith.addf %12, %13 : vector<32x4xf32>
    %15 = vector.broadcast %3 : vector<32x1xf32> to vector<32x4xf32>
    %16 = arith.mulf %14, %15 : vector<32x4xf32>
    %17 = vector.extract_strided_slice %6 {offsets = [0, 4], sizes = [32, 4], strides = [1, 1]} : vector<32x8xf32> to vector<32x4xf32>
    %18 = arith.addf %17, %11 : vector<32x4xf32>
    %19 = vector.broadcast %4 : vector<1x4xf32> to vector<32x4xf32>
    %20 = arith.addf %18, %19 : vector<32x4xf32>
    %21 = vector.broadcast %3 : vector<32x1xf32> to vector<32x4xf32>
    %22 = arith.mulf %20, %21 : vector<32x4xf32>
    %cst_13 = arith.constant dense<0.000000e+00> : vector<4xf32>
    %23 = vector.multi_reduction <add>, %16, %cst_13 [0] : vector<32x4xf32> to vector<4xf32>
    %24 = vector.shape_cast %23 : vector<4xf32> to vector<1x4xf32>
    %cst_14 = arith.constant dense<0.000000e+00> : vector<4xf32>
    %25 = vector.multi_reduction <add>, %22, %cst_14 [0] : vector<32x4xf32> to vector<4xf32>
    %26 = vector.shape_cast %25 : vector<4xf32> to vector<1x4xf32>
    %27 = arith.addf %24, %26 : vector<1x4xf32>
    %cst_15 = arith.constant 6.400000e+01 : f32
    %28 = vector.broadcast %cst_15 : f32 to vector<1x4xf32>
    %29 = arith.divf %27, %28 : vector<1x4xf32>
    %30 = vector.broadcast %29 : vector<1x4xf32> to vector<32x4xf32>
    %31 = arith.subf %16, %30 : vector<32x4xf32>
    %32 = vector.broadcast %29 : vector<1x4xf32> to vector<32x4xf32>
    %33 = arith.subf %22, %32 : vector<32x4xf32>
    %34 = arith.mulf %31, %31 : vector<32x4xf32>
    %cst_16 = arith.constant dense<0.000000e+00> : vector<4xf32>
    %35 = vector.multi_reduction <add>, %34, %cst_16 [0] : vector<32x4xf32> to vector<4xf32>
    %36 = vector.shape_cast %35 : vector<4xf32> to vector<1x4xf32>
    %37 = arith.mulf %33, %33 : vector<32x4xf32>
    %cst_17 = arith.constant dense<0.000000e+00> : vector<4xf32>
    %38 = vector.multi_reduction <add>, %37, %cst_17 [0] : vector<32x4xf32> to vector<4xf32>
    %39 = vector.shape_cast %38 : vector<4xf32> to vector<1x4xf32>
    %40 = arith.addf %36, %39 : vector<1x4xf32>
    %cst_18 = arith.constant 6.400000e+01 : f32
    %41 = vector.broadcast %cst_18 : f32 to vector<1x4xf32>
    %42 = arith.divf %40, %41 : vector<1x4xf32>
    %cst_19 = arith.constant 9.99999974E-6 : f32
    %43 = vector.broadcast %cst_19 : f32 to vector<1x4xf32>
    %44 = arith.addf %42, %43 : vector<1x4xf32>
    %45 = math.rsqrt %44 : vector<1x4xf32>
    %46 = vector.broadcast %45 : vector<1x4xf32> to vector<32x4xf32>
    %47 = arith.mulf %31, %46 : vector<32x4xf32>
    %cst_20 = arith.constant 2.000000e-01 : f32
    %48 = vector.broadcast %cst_20 : f32 to vector<32x4xf32>
    %49 = arith.mulf %48, %47 : vector<32x4xf32>
    %50 = arith.maximumf %47, %49 : vector<32x4xf32>
    %51 = vector.broadcast %45 : vector<1x4xf32> to vector<32x4xf32>
    %52 = arith.mulf %33, %51 : vector<32x4xf32>
    %cst_21 = arith.constant 2.000000e-01 : f32
    %53 = vector.broadcast %cst_21 : f32 to vector<32x4xf32>
    %54 = arith.mulf %53, %52 : vector<32x4xf32>
    %55 = arith.maximumf %52, %54 : vector<32x4xf32>
    %56 = tpu.concatenate %50, %55 in 1 : vector<32x4xf32>, vector<32x4xf32> -> vector<32x8xf32>
    %c0_22 = arith.constant 0 : index
    %c0_23 = arith.constant 0 : index
    %c0_24 = arith.constant 0 : index
    %57 = vector.load %arg6[%c0_22, %c0_23, %c0_24] : memref<1x32x8xf32, #tpu.memory_space<vmem>>, vector<1x32x8xf32>
    %58 = vector.shape_cast %57 : vector<1x32x8xf32> to vector<32x8xf32>
    %59 = vector.shape_cast %56 : vector<32x8xf32> to vector<1x32x8xf32>
    tpu.vector_store %arg6[%c0_22, %c0_23, %c0_24], %59 {strides = array<i32>} : memref<1x32x8xf32, #tpu.memory_space<vmem>>, vector<1x32x8xf32>,
    return
  }
  func.func @transform_0(%arg0: i32) -> (i32, i32, i32) {
    %c0_i32 = arith.constant 0 : i32
    %c0_i32_0 = arith.constant 0 : i32
    %c0_i32_1 = arith.constant 0 : i32
    return %arg0, %c0_i32, %c0_i32_0 : i32, i32, i32
  }
  func.func @transform_1(%arg0: i32) -> (i32, i32, i32) {
    %c0_i32 = arith.constant 0 : i32
    %c0_i32_0 = arith.constant 0 : i32
    %c0_i32_1 = arith.constant 0 : i32
    return %arg0, %c0_i32, %c0_i32_0 : i32, i32, i32
  }
  func.func @transform_2(%arg0: i32) -> (i32, i32) {
    %c0_i32 = arith.constant 0 : i32
    %c0_i32_0 = arith.constant 0 : i32
    %c0_i32_1 = arith.constant 0 : i32
    return %c0_i32, %c0_i32_0 : i32, i32
  }
  func.func @transform_3(%arg0: i32) -> (i32, i32) {
    %c0_i32 = arith.constant 0 : i32
    %c0_i32_0 = arith.constant 0 : i32
    %c0_i32_1 = arith.constant 0 : i32
    return %c0_i32, %c0_i32_0 : i32, i32
  }
  func.func @transform_4(%arg0: i32) -> (i32, i32) {
    %c0_i32 = arith.constant 0 : i32
    %c0_i32_0 = arith.constant 0 : i32
    %c0_i32_1 = arith.constant 0 : i32
    return %c0_i32, %c0_i32_0 : i32, i32
  }
  func.func @transform_5(%arg0: i32) -> (i32, i32, i32) {
    %c0_i32 = arith.constant 0 : i32
    %c0_i32_0 = arith.constant 0 : i32
    %c0_i32_1 = arith.constant 0 : i32
    return %arg0, %c0_i32, %c0_i32_0 : i32, i32, i32
  }
}

module attributes {stable_mosaic.version = 11 : i64} {
  func.func @_classifier_kernel(%arg0: i32, %arg1: memref<1x2x16xf32, #tpu.memory_space<vmem>>, %arg2: memref<16x16xf32, #tpu.memory_space<vmem>>, %arg3: memref<32x16xf32, #tpu.memory_space<vmem>>, %arg4: memref<1x16xf32, #tpu.memory_space<vmem>>, %arg5: memref<1x16xf32, #tpu.memory_space<vmem>>, %arg6: memref<16x3xf32, #tpu.memory_space<vmem>>, %arg7: memref<1x3xf32, #tpu.memory_space<vmem>>, %arg8: memref<1x1x3xf32, #tpu.memory_space<vmem>>) attributes {dimension_semantics = [#tpu.dimension_semantics<parallel>], iteration_bounds = array<i64: 2>, scalar_prefetch = 0 : i64, scratch_operands = 0 : i64, tpu.core_type = #tpu.core_type<tc>, window_params = [{transform_indices = @transform_0, window_bounds = array<i64: 1, 2, 16>}, {pipeline_mode = #tpu.pipeline_mode<synchronous>, transform_indices = @transform_1, window_bounds = array<i64: 16, 16>}, {pipeline_mode = #tpu.pipeline_mode<synchronous>, transform_indices = @transform_2, window_bounds = array<i64: 32, 16>}, {pipeline_mode = #tpu.pipeline_mode<synchronous>, transform_indices = @transform_3, window_bounds = array<i64: 1, 16>}, {pipeline_mode = #tpu.pipeline_mode<synchronous>, transform_indices = @transform_4, window_bounds = array<i64: 1, 16>}, {pipeline_mode = #tpu.pipeline_mode<synchronous>, transform_indices = @transform_5, window_bounds = array<i64: 16, 3>}, {pipeline_mode = #tpu.pipeline_mode<synchronous>, transform_indices = @transform_6, window_bounds = array<i64: 1, 3>}, {transform_indices = @transform_7, window_bounds = array<i64: 1, 1, 3>}]} {
    %c0 = arith.constant 0 : index
    %c0_0 = arith.constant 0 : index
    %c0_1 = arith.constant 0 : index
    %0 = vector.load %arg1[%c0, %c0_0, %c0_1] : memref<1x2x16xf32, #tpu.memory_space<vmem>>, vector<1x2x16xf32>
    %1 = vector.shape_cast %0 : vector<1x2x16xf32> to vector<2x16xf32>
    %c0_2 = arith.constant 0 : index
    %c0_3 = arith.constant 0 : index
    %2 = vector.load %arg2[%c0_2, %c0_3] : memref<16x16xf32, #tpu.memory_space<vmem>>, vector<16x16xf32>
    %cst = arith.constant dense<0.000000e+00> : vector<2x16xf32>
    %3 = tpu.matmul %1, %2, %cst {dimension_numbers = #tpu.dot_dimension_numbers<[1], [0], [0], [1], [0, 0, 1, 1], [], []>, precision = #tpu.contract_precision<fp32>} : vector<2x16xf32>, vector<16x16xf32>, vector<2x16xf32> -> vector<2x16xf32>
    %cst_4 = arith.constant dense<0.000000e+00> : vector<16xf32>
    %4 = vector.multi_reduction <add>, %3, %cst_4 [0] : vector<2x16xf32> to vector<16xf32>
    %5 = vector.shape_cast %4 : vector<16xf32> to vector<1x16xf32>
    %cst_5 = arith.constant 2.000000e+00 : f32
    %6 = vector.broadcast %cst_5 : f32 to vector<1x16xf32>
    %7 = arith.divf %5, %6 : vector<1x16xf32>
    %8 = vector.broadcast %7 : vector<1x16xf32> to vector<2x16xf32>
    %9 = arith.subf %3, %8 : vector<2x16xf32>
    %10 = arith.mulf %9, %9 : vector<2x16xf32>
    %cst_6 = arith.constant dense<0.000000e+00> : vector<16xf32>
    %11 = vector.multi_reduction <add>, %10, %cst_6 [0] : vector<2x16xf32> to vector<16xf32>
    %12 = vector.shape_cast %11 : vector<16xf32> to vector<1x16xf32>
    %cst_7 = arith.constant 2.000000e+00 : f32
    %13 = vector.broadcast %cst_7 : f32 to vector<1x16xf32>
    %14 = arith.divf %12, %13 : vector<1x16xf32>
    %cst_8 = arith.constant 9.99999974E-6 : f32
    %15 = vector.broadcast %cst_8 : f32 to vector<1x16xf32>
    %16 = arith.addf %14, %15 : vector<1x16xf32>
    %17 = math.rsqrt %16 : vector<1x16xf32>
    %18 = vector.broadcast %17 : vector<1x16xf32> to vector<2x16xf32>
    %19 = arith.mulf %9, %18 : vector<2x16xf32>
    %cst_9 = arith.constant 2.000000e-01 : f32
    %20 = vector.broadcast %cst_9 : f32 to vector<2x16xf32>
    %21 = arith.mulf %20, %19 : vector<2x16xf32>
    %22 = arith.maximumf %19, %21 : vector<2x16xf32>
    %cst_10 = arith.constant dense<0xFF800000> : vector<16xf32>
    %23 = vector.multi_reduction <maximumf>, %22, %cst_10 [0] : vector<2x16xf32> to vector<16xf32>
    %24 = vector.shape_cast %23 : vector<16xf32> to vector<1x16xf32>
    %cst_11 = arith.constant dense<0.000000e+00> : vector<16xf32>
    %25 = vector.multi_reduction <add>, %22, %cst_11 [0] : vector<2x16xf32> to vector<16xf32>
    %26 = vector.shape_cast %25 : vector<16xf32> to vector<1x16xf32>
    %cst_12 = arith.constant 2.000000e+00 : f32
    %27 = vector.broadcast %cst_12 : f32 to vector<1x16xf32>
    %28 = arith.divf %26, %27 : vector<1x16xf32>
    %29 = tpu.concatenate %24, %28 in 1 : vector<1x16xf32>, vector<1x16xf32> -> vector<1x32xf32>
    %c0_13 = arith.constant 0 : index
    %c0_14 = arith.constant 0 : index
    %30 = vector.load %arg3[%c0_13, %c0_14] : memref<32x16xf32, #tpu.memory_space<vmem>>, vector<32x16xf32>
    %cst_15 = arith.constant dense<0.000000e+00> : vector<1x16xf32>
    %31 = tpu.matmul %29, %30, %cst_15 {dimension_numbers = #tpu.dot_dimension_numbers<[1], [0], [0], [1], [0, 0, 1, 1], [], []>, precision = #tpu.contract_precision<fp32>} : vector<1x32xf32>, vector<32x16xf32>, vector<1x16xf32> -> vector<1x16xf32>
    %cst_16 = arith.constant dense<0.000000e+00> : vector<1xf32>
    %32 = vector.multi_reduction <add>, %31, %cst_16 [1] : vector<1x16xf32> to vector<1xf32>
    %33 = vector.shape_cast %32 : vector<1xf32> to vector<1x1xf32>
    %cst_17 = arith.constant 1.600000e+01 : f32
    %34 = vector.broadcast %cst_17 : f32 to vector<1x1xf32>
    %35 = arith.divf %33, %34 : vector<1x1xf32>
    %36 = vector.broadcast %35 : vector<1x1xf32> to vector<1x16xf32>
    %37 = arith.subf %31, %36 : vector<1x16xf32>
    %38 = arith.mulf %37, %37 : vector<1x16xf32>
    %cst_18 = arith.constant dense<0.000000e+00> : vector<1xf32>
    %39 = vector.multi_reduction <add>, %38, %cst_18 [1] : vector<1x16xf32> to vector<1xf32>
    %40 = vector.shape_cast %39 : vector<1xf32> to vector<1x1xf32>
    %cst_19 = arith.constant 1.600000e+01 : f32
    %41 = vector.broadcast %cst_19 : f32 to vector<1x1xf32>
    %42 = arith.divf %40, %41 : vector<1x1xf32>
    %cst_20 = arith.constant 9.99999974E-6 : f32
    %43 = vector.broadcast %cst_20 : f32 to vector<1x1xf32>
    %44 = arith.addf %42, %43 : vector<1x1xf32>
    %45 = math.rsqrt %44 : vector<1x1xf32>
    %46 = vector.broadcast %45 : vector<1x1xf32> to vector<1x16xf32>
    %47 = arith.mulf %37, %46 : vector<1x16xf32>
    %c0_21 = arith.constant 0 : index
    %c0_22 = arith.constant 0 : index
    %48 = vector.load %arg4[%c0_21, %c0_22] : memref<1x16xf32, #tpu.memory_space<vmem>>, vector<1x16xf32>
    %49 = arith.mulf %47, %48 : vector<1x16xf32>
    %c0_23 = arith.constant 0 : index
    %c0_24 = arith.constant 0 : index
    %50 = vector.load %arg5[%c0_23, %c0_24] : memref<1x16xf32, #tpu.memory_space<vmem>>, vector<1x16xf32>
    %51 = arith.addf %49, %50 : vector<1x16xf32>
    %cst_25 = arith.constant 0.000000e+00 : f32
    %52 = vector.broadcast %cst_25 : f32 to vector<1x16xf32>
    %53 = arith.maximumf %51, %52 : vector<1x16xf32>
    %c0_26 = arith.constant 0 : index
    %c0_27 = arith.constant 0 : index
    %54 = vector.load %arg6[%c0_26, %c0_27] : memref<16x3xf32, #tpu.memory_space<vmem>>, vector<16x3xf32>
    %cst_28 = arith.constant dense<0.000000e+00> : vector<1x3xf32>
    %55 = tpu.matmul %53, %54, %cst_28 {dimension_numbers = #tpu.dot_dimension_numbers<[1], [0], [0], [1], [0, 0, 1, 1], [], []>, precision = #tpu.contract_precision<fp32>} : vector<1x16xf32>, vector<16x3xf32>, vector<1x3xf32> -> vector<1x3xf32>
    %c0_29 = arith.constant 0 : index
    %c0_30 = arith.constant 0 : index
    %56 = vector.load %arg7[%c0_29, %c0_30] : memref<1x3xf32, #tpu.memory_space<vmem>>, vector<1x3xf32>
    %57 = arith.addf %55, %56 : vector<1x3xf32>
    %c0_31 = arith.constant 0 : index
    %c0_32 = arith.constant 0 : index
    %c0_33 = arith.constant 0 : index
    %58 = vector.load %arg8[%c0_31, %c0_32, %c0_33] : memref<1x1x3xf32, #tpu.memory_space<vmem>>, vector<1x1x3xf32>
    %59 = vector.shape_cast %58 : vector<1x1x3xf32> to vector<1x3xf32>
    %60 = vector.shape_cast %57 : vector<1x3xf32> to vector<1x1x3xf32>
    tpu.vector_store %arg8[%c0_31, %c0_32, %c0_33], %60 {strides = array<i32>} : memref<1x1x3xf32, #tpu.memory_space<vmem>>, vector<1x1x3xf32>,
    return
  }
  func.func @transform_0(%arg0: i32) -> (i32, i32, i32) {
    %c0_i32 = arith.constant 0 : i32
    %c0_i32_0 = arith.constant 0 : i32
    %c0_i32_1 = arith.constant 0 : i32
    return %arg0, %c0_i32, %c0_i32_0 : i32, i32, i32
  }
  func.func @transform_1(%arg0: i32) -> (i32, i32) {
    %c0_i32 = arith.constant 0 : i32
    %c0_i32_0 = arith.constant 0 : i32
    %c0_i32_1 = arith.constant 0 : i32
    return %c0_i32, %c0_i32_0 : i32, i32
  }
  func.func @transform_2(%arg0: i32) -> (i32, i32) {
    %c0_i32 = arith.constant 0 : i32
    %c0_i32_0 = arith.constant 0 : i32
    %c0_i32_1 = arith.constant 0 : i32
    return %c0_i32, %c0_i32_0 : i32, i32
  }
  func.func @transform_3(%arg0: i32) -> (i32, i32) {
    %c0_i32 = arith.constant 0 : i32
    %c0_i32_0 = arith.constant 0 : i32
    %c0_i32_1 = arith.constant 0 : i32
    return %c0_i32, %c0_i32_0 : i32, i32
  }
  func.func @transform_4(%arg0: i32) -> (i32, i32) {
    %c0_i32 = arith.constant 0 : i32
    %c0_i32_0 = arith.constant 0 : i32
    %c0_i32_1 = arith.constant 0 : i32
    return %c0_i32, %c0_i32_0 : i32, i32
  }
  func.func @transform_5(%arg0: i32) -> (i32, i32) {
    %c0_i32 = arith.constant 0 : i32
    %c0_i32_0 = arith.constant 0 : i32
    %c0_i32_1 = arith.constant 0 : i32
    return %c0_i32, %c0_i32_0 : i32, i32
  }
  func.func @transform_6(%arg0: i32) -> (i32, i32) {
    %c0_i32 = arith.constant 0 : i32
    %c0_i32_0 = arith.constant 0 : i32
    %c0_i32_1 = arith.constant 0 : i32
    return %c0_i32, %c0_i32_0 : i32, i32
  }
  func.func @transform_7(%arg0: i32) -> (i32, i32, i32) {
    %c0_i32 = arith.constant 0 : i32
    %c0_i32_0 = arith.constant 0 : i32
    %c0_i32_1 = arith.constant 0 : i32
    return %arg0, %c0_i32, %c0_i32_0 : i32, i32, i32
  }
}

</mosaic_0001>

<bundles_post_ra>
// kernel: deep_interpolator_forward.11
= control target key start
LH: loop header
LB: loop body
LE: loop exit
PB: predicated region body
PF: predicated region fallthrough
CT: control target
= control target key end

     0   :  { %s1878_s18 = smov 0   ;;  %s2000_s0 = inlined_call_operand.vmem [shape: f32[2,32,8], index: 0, kind: input, shape index: {}]   ;;  %s2001_s1 = inlined_call_operand.vmem [shape: f32[2,32,1], index: 1, kind: input, shape index: {}]   ;;  %s2002_s2 = inlined_call_operand.vmem [shape: f32[8,8], index: 2, kind: input, shape index: {}]   ;;  %s2003_s3 = inlined_call_operand.vmem [shape: f32[4,8], index: 3, kind: input, shape index: {}]   ;;  %s2004_s4 = inlined_call_operand.vmem [shape: f32[1,8], index: 4, kind: input, shape index: {}]   ;;  %s2005_s5 = inlined_call_operand.vmem [shape: f32[2,32,8], index: 5, kind: output, shape index: {}]  }
   0x1 LB: > { %s1607_s19 = sadd.s32 4294967295, %s1844_s18   ;;  %p1611_p0 = scmp.ge.s32.totalorder %s1844_s18, 1  ;;  %s1844_s18 = sphi %s1878_s18, %s15_s18  }
   0x2   : > { %p197_p1 = scmp.lt.s32.totalorder %s1844_s18, 3 }
   0x4   : > { %p198_p2 = pnand %p1611_p0, %p197_p1 }
   0x5   : > { %p230_p3 = scmp.lt.s32.totalorder (!%p198_p2), %s1607_s19, 1  ;;  %v249_v0 = vld [vmem:[%s2002_s2] sm:$0xff] (!%p198_p2)  ;;  %vm862_vm0 = vcmask (!%p198_p2), 64512   ;;  %vm283_vm1 = vcmask (!%p198_p2), 1043456   ;;  %vm254_vm2 = vcmask (!%p198_p2), 1040384   ;;  %s1846_s28 = smov (!%p198_p2), 124  }
   0x6   : > { %201 = sbr.rel (%p198_p2) target bundleno = 477 (0x1dd), region = 40  ;;  %v1889_v1 = vand.u32 (!%p198_p2), 4294901760, %v249_v0  ;;  %v272_v3 = vld [vmem:[%s2003_s3] sm:$0xf] (!%p198_p2)  ;;  %v1847_v48 = vmov (!%p198_p2), 0   ;;  %vm273_vm3 = vcmask (!%p198_p2), 31744  }
   0x7   : > { %v285_v8 = vsel (!%p198_p2), %vm283_vm1, %v272_v3, 0  ;;  %1835 = vset.pattern.permute.xlu1 (!%p198_p2), %v1847_v48  ;;  %1834 = vset.pattern.permute.xlu0 (!%p198_p2), %v1847_v48 }
   0x8   : > { %1732 = vmatprep.subr.mxu0 (!%p198_p2), %v1889_v1  ;;  %v1893_v2 = vsub.f32 (!%p198_p2), %v249_v0, %v1889_v1  ;;  %v1928_v29 = vand.u32 (!%p198_p2), 4294901760, %v285_v8 }
   0x9   : > { %1733 = vmatpush3.msra.mxu0 (!%p198_p2), %v1889_v1 }
   0xa   : > { %v1906_v7 = vand.u32 (!%p198_p2), 4294901760, %v1893_v2  ;;  %1684 = vmatprep.subr.mxu1 (!%p198_p2), %v1928_v29  ;;  %v1933_v35 = vsub.f32 (!%p198_p2), %v285_v8, %v1928_v29 }
   0xb   : > { %1685 = vmatpush3.msra.mxu1 (!%p198_p2), %v1928_v29 }
   0xc   : > { %v981_v25 = vsub.f32 (!%p198_p2), %v1893_v2, %v1906_v7  ;;  %v1937_v40 = vand.u32 (!%p198_p2), 4294901760, %v1933_v35 }
   0xd   : > { %s2007_s19 = smov (!%p230_p3, %s1607_s19), 1 }
   0xe   : > { %s1895_s22 = sshll.u32 %s2007_s19, 5  ;;  %v982_v31 = vand.u32 4294901760, %v981_v25  ;;  %v397_v45 = vsub.f32 %v1933_v35, %v1937_v40 }
   0xf   : > { %s234_s25 = scalar_lea.vmem %s2000_s0, %s1895_s22  ;;  %s239_s6 = scalar_lea.vmem %s2001_s1, %s1895_s22 }
  0x10   : > { %v245_v4 = vld [vmem:[%s234_s25] sm:$0xff]  ;;  %v246_v5 = vld [vmem:[%s234_s25 + $0x8] sm:$0xff]  ;;  %v247_v6 = vld [vmem:[%s234_s25 + $0x10] sm:$0xff]  ;;  %1740 = vmatprep.subr.mxu0 %v982_v31  ;;  %v1941_v47 = vand.u32 4294901760, %v397_v45  ;;  %s244_s11 = scalar_lea.vmem %s2005_s5, %s1895_s22 }
  0x11   : > { %v255_v9 = vrot.slane %v245_v4, 7  ;;  %v863_v10 = vsel %vm862_vm0, %v245_v4, 0  ;;  %v256_v11 = vrot.slane %v246_v5, 7  ;;  %v258_v12 = vrot.slane %v247_v6, 7  ;;  %v248_v13 = vld [vmem:[%s234_s25 + $0x18] sm:$0xff]  ;;  %v1458_v49 = vld [vmem:[%s239_s6 + $0x8] sm:$0xff] }
  0x12   : > { %v1909_v14 = vand.u32 4294901760, %v863_v10  ;;  %v865_v15 = vsel %vm862_vm0, %v246_v5, 0  ;;  %v867_v16 = vsel %vm862_vm0, %v247_v6, 0  ;;  %v260_v17 = vrot.slane %v248_v13, 7  ;;  %1692 = vmatprep.subr.mxu1 %v1941_v47  ;;  %v1457_v50 = vld [vmem:[%s239_s6] sm:$0xff]  ;;  %v1459_v51 = vld [vmem:[%s239_s6 + $0x10] sm:$0xff] }
  0x13   : > { %262 = vrot.lane.b32.xlu0 %v255_v9, %s1846_s28  ;;  %v259_v18 = vsel %vm254_vm2, %v256_v11, %v258_v12  ;;  %v1914_v19 = vand.u32 4294901760, %v865_v15  ;;  %v1916_v20 = vand.u32 4294901760, %v867_v16  ;;  %v257_v21 = vsel %vm254_vm2, %v255_v9, %v256_v11  ;;  %v1460_v52 = vld [vmem:[%s239_s6 + $0x18] sm:$0xff] }
  0x14   : > { %v938_v22 = vsub.f32 %v863_v10, %v1909_v14  ;;  %266 = vrot.lane.b32.xlu1 %v259_v18, %s1846_s28  ;;  %v261_v23 = vsel %vm254_vm2, %v258_v12, %v260_v17  ;;  %v869_v24 = vsel %vm862_vm0, %v248_v13, 0 }
  0x15   : > { %v948_v26 = vsub.f32 %v865_v15, %v1914_v19  ;;  %v958_v27 = vsub.f32 %v867_v16, %v1916_v20  ;;  %v1926_v28 = vand.u32 4294901760, %v869_v24 }
  0x16   : > { %v939_v30 = vand.u32 4294901760, %v938_v22 }
  0x17   : > { %264 = vrot.lane.b32.xlu0 %v257_v21, %s1846_s28  ;;  %v949_v32 = vand.u32 4294901760, %v948_v26  ;;  %v959_v33 = vand.u32 4294901760, %v958_v27  ;;  %v968_v34 = vsub.f32 %v869_v24, %v1926_v28 }
  0x18   : > { %268 = vrot.lane.b32.xlu1 %v261_v23, %s1846_s28  ;;  %v940_v36 = vsub.f32 %v938_v22, %v939_v30  ;;  %v1618_v23 = vld [vmem:[%s2004_s4] ss:$0 sm:$0xff] }
  0x19   : > { %v950_v37 = vsub.f32 %v948_v26, %v949_v32  ;;  %v960_v38 = vsub.f32 %v958_v27, %v959_v33  ;;  %v969_v39 = vand.u32 4294901760, %v968_v34 }
  0x1a   : > { %v941_v41 = vand.u32 4294901760, %v940_v36 }
  0x1b   : > { %v951_v42 = vand.u32 4294901760, %v950_v37  ;;  %v961_v43 = vand.u32 4294901760, %v960_v38  ;;  %v970_v44 = vsub.f32 %v968_v34, %v969_v39  ;;  %1463 = vperm.xlu0 %1834, %v1457_v50  }
  0x1c   : > { %1734 = vmatprep.mubr.f32.mxu0 %v941_v41  ;;  %1468 = vperm.xlu1 %1835, %v1458_v49  }
  0x1d   : > { %1735 = vmatmul.mubr.f32.vlgmr.msra.gmra.mrb[0].mxu0 %v951_v42  ;;  %v971_v46 = vand.u32 4294901760, %v970_v44 }
  0x1e   : > { %1737 = vmatprep.mubr.f32.mxu0 %v961_v43  ;;  %1741 = vmatpush3.msra.mxu0 %v982_v31 }
  0x1f   : > { %1748 = vmatprep.subr.mxu0 %v1893_v2  ;;  %1478 = vperm.xlu0 %1834, %v1460_v52  }
  0x20   : > { %1473 = vperm.xlu1 %1835, %v1459_v51  }
  0x21   : > { %1738 = vmatmul.mubr.f32.gmra.mrb[2].mxu0 %v971_v46 }
  0x22   : > { %1742 = vmatprep.mubr.f32.mxu0 %v1909_v14 }
  0x25   : > { %1743 = vmatmul.mubr.f32.vlgmr.msra.gmra.mrb[0].mxu0 %v1914_v19 }
  0x26   : > { %1745 = vmatprep.mubr.f32.mxu0 %v1916_v20  ;;  %1749 = vmatpush3.msra.mxu0 %v1893_v2 }
  0x27   : > { %1756 = vmatprep.subr.mxu0 %v1889_v1 }
  0x29   : > { %1746 = vmatmul.mubr.f32.gmra.mrb[2].mxu0 %v1926_v28 }
  0x2a   : > { %1750 = vmatprep.mubr.f32.mxu0 %v938_v22 }
  0x2d   : > { %1751 = vmatmul.mubr.f32.vlgmr.msra.gmra.mrb[0].mxu0 %v948_v26 }
  0x2e   : > { %1753 = vmatprep.mubr.f32.mxu0 %v958_v27  ;;  %1757 = vmatpush3.msra.mxu0 %v1889_v1 }
  0x2f   : > { %1764 = vmatprep.subr.mxu0 %v1906_v7 }
  0x31   : > { %1754 = vmatmul.mubr.f32.gmra.mrb[2].mxu0 %v968_v34 }
  0x32   : > { %1758 = vmatprep.mubr.f32.mxu0 %v939_v30 }
  0x35   : > { %1759 = vmatmul.mubr.f32.vlgmr.msra.gmra.mrb[0].mxu0 %v949_v32 }
  0x36   : > { %1761 = vmatprep.mubr.f32.mxu0 %v959_v33  ;;  %1765 = vmatpush3.msra.mxu0 %v1906_v7 }
  0x37   : > { %1772 = vmatprep.subr.mxu0 %v1889_v1 }
  0x39   : > { %1762 = vmatmul.mubr.f32.gmra.mrb[2].mxu0 %v969_v39 }
  0x3a   : > { %1766 = vmatprep.mubr.f32.mxu0 %v1909_v14 }
  0x3d   : > { %1767 = vmatmul.mubr.f32.vlgmr.msra.gmra.mrb[0].mxu0 %v1914_v19 }
  0x3e   : > { %1769 = vmatprep.mubr.f32.mxu0 %v1916_v20  ;;  %1773 = vmatpush3.msra.mxu0 %v1889_v1 }
  0x41   : > { %1770 = vmatmul.mubr.f32.gmra.mrb[2].mxu0 %v1926_v28 }
  0x42   : > { %1774 = vmatprep.mubr.f32.mxu0 %v1909_v14 }
  0x45   : > { %1775 = vmatmul.mubr.f32.vlgmr.msra.gmra.mrb[0].mxu0 %v1914_v19 }
  0x46   : > { %1777 = vmatprep.mubr.f32.mxu0 %v1916_v20 }
  0x49   : > { %1778 = vmatmul.mubr.f32.gmra.mrb[2].mxu0 %v1926_v28 }
  0x85   : > { %v263_v53 = vpop.permute.xlu0 %262 }
  0x86   : > { %v271_v54 = vsel %vm254_vm2, 0.0, %v263_v53  ;;  %v267_v55 = vpop.permute.xlu1 %266 }
  0x87   : > { %v275_v56 = vsel %vm273_vm3, %v271_v54, 0  ;;  %v279_v57 = vsel %vm273_vm3, %v267_v55, 0 }
  0x88   : > { %v353_v58 = vand.u32 4294901760, %v275_v56  ;;  %v373_v59 = vand.u32 4294901760, %v279_v57 }
  0x89   : > { %v265_v60 = vpop.permute.xlu0 %264 }
  0x8a   : > { %v354_v61 = vsub.f32 %v275_v56, %v353_v58  ;;  %v374_v62 = vsub.f32 %v279_v57, %v373_v59  ;;  %v277_v63 = vsel %vm273_vm3, %v265_v60, 0  ;;  %v269_v0 = vpop.permute.xlu1 %268 }
  0x8b   : > { %v363_v1 = vand.u32 4294901760, %v277_v63  ;;  %v281_v2 = vsel %vm273_vm3, %v269_v0, 0 }
  0x8c   : > { %v375_v3 = vand.u32 4294901760, %v374_v62  ;;  %v383_v4 = vand.u32 4294901760, %v281_v2  ;;  %v355_v5 = vand.u32 4294901760, %v354_v61 }
  0x8d   : > { %v364_v6 = vsub.f32 %v277_v63, %v363_v1 }
  0x8e   : > { %v384_v7 = vsub.f32 %v281_v2, %v383_v4  ;;  %v356_v8 = vsub.f32 %v354_v61, %v355_v5  ;;  %v376_v12 = vsub.f32 %v374_v62, %v375_v3 }
  0x8f   : > { %v365_v9 = vand.u32 4294901760, %v364_v6 }
  0x90   : > { %v385_v10 = vand.u32 4294901760, %v384_v7  ;;  %v357_v11 = vand.u32 4294901760, %v356_v8  ;;  %v377_v16 = vand.u32 4294901760, %v376_v12 }
  0x91   : > { %v366_v13 = vsub.f32 %v364_v6, %v365_v9 }
  0x92   : > { %1686 = vmatprep.mubr.f32.mxu1 %v357_v11  ;;  %v386_v15 = vsub.f32 %v384_v7, %v385_v10 }
  0x93   : > { %v367_v14 = vand.u32 4294901760, %v366_v13 }
  0x94   : > { %v387_v17 = vand.u32 4294901760, %v386_v15 }
  0x95   : > { %1687 = vmatmul.mubr.f32.vlgmr.msra.gmra.mrb[0].mxu1 %v367_v14 }
  0x96   : > { %1693 = vmatpush3.msra.mxu1 %v1941_v47  ;;  %1689 = vmatprep.mubr.f32.mxu1 %v377_v16 }
  0x97   : > { %1700 = vmatprep.subr.mxu1 %v1933_v35 }
  0x99   : > { %1690 = vmatmul.mubr.f32.gmra.mrb[2].mxu1 %v387_v17 }
  0x9a   : > { %1694 = vmatprep.mubr.f32.mxu1 %v353_v58  ;;  %v1464_v26 = vpop.permute.xlu0 %1463 }
  0x9b   : > { %v1469_v28 = vpop.permute.xlu1 %1468 }
  0x9d   : > { %1695 = vmatmul.mubr.f32.vlgmr.msra.gmra.mrb[0].mxu1 %v363_v1 }
  0x9e   : > { %1701 = vmatpush3.msra.mxu1 %v1933_v35  ;;  %1697 = vmatprep.mubr.f32.mxu1 %v373_v59  ;;  %v1479_v39 = vpop.permute.xlu0 %1478 }
  0x9f   : > { %1708 = vmatprep.subr.mxu1 %v1928_v29  ;;  %v1474_v43 = vpop.permute.xlu1 %1473 }
  0xa1   : > { %1698 = vmatmul.mubr.f32.gmra.mrb[2].mxu1 %v383_v4 }
  0xa2   : > { %1702 = vmatprep.mubr.f32.mxu1 %v354_v61 }
  0xa5   : > { %1703 = vmatmul.mubr.f32.vlgmr.msra.gmra.mrb[0].mxu1 %v364_v6 }
  0xa6   : > { %1709 = vmatpush3.msra.mxu1 %v1928_v29  ;;  %1705 = vmatprep.mubr.f32.mxu1 %v374_v62 }
  0xa7   : > { %1716 = vmatprep.subr.mxu1 %v1937_v40 }
  0xa9   : > { %1706 = vmatmul.mubr.f32.gmra.mrb[2].mxu1 %v384_v7 }
  0xaa   : > { %1710 = vmatprep.mubr.f32.mxu1 %v355_v5 }
  0xad   : > { %1711 = vmatmul.mubr.f32.vlgmr.msra.gmra.mrb[0].mxu1 %v365_v9 }
  0xae   : > { %1717 = vmatpush3.msra.mxu1 %v1937_v40  ;;  %1713 = vmatprep.mubr.f32.mxu1 %v375_v3 }
  0xaf   : > { %1724 = vmatprep.subr.mxu1 %v1928_v29 }
  0xb1   : > { %1714 = vmatmul.mubr.f32.gmra.mrb[2].mxu1 %v385_v10 }
  0xb2   : > { %1718 = vmatprep.mubr.f32.mxu1 %v353_v58 }
  0xb5   : > { %1719 = vmatmul.mubr.f32.vlgmr.msra.gmra.mrb[0].mxu1 %v363_v1 }
  0xb6   : > { %1725 = vmatpush3.msra.mxu1 %v1928_v29  ;;  %1721 = vmatprep.mubr.f32.mxu1 %v373_v59 }
  0xb9   : > { %1722 = vmatmul.mubr.f32.gmra.mrb[2].mxu1 %v383_v4 }
  0xba   : > { %1726 = vmatprep.mubr.f32.mxu1 %v353_v58 }
  0xbd   : > { %1727 = vmatmul.mubr.f32.vlgmr.msra.gmra.mrb[0].mxu1 %v363_v1 }
  0xbe   : > { %1729 = vmatprep.mubr.f32.mxu1 %v373_v59 }
  0xc1   : > { %1730 = vmatmul.mubr.f32.gmra.mrb[2].mxu1 %v383_v4 }
 0x118   : > { %v1776_v18 = vpop.f32.mrb[0].mxu0 }
 0x119   : > { %v1424_v19 = vpop.f32.mrb[1].mxu0 }
 0x11c   : > { %v1779_v20 = vpop.f32.mrb[2].mxu0 }
 0x11d   : > { %v1436_v21 = vpop.f32.mrb[3].mxu0 }
 0x190   : > { %v1728_v22 = vpop.f32.mrb[0].mxu1 }
 0x191   : > { %v1780_v24 = vadd.f32 %v1776_v18, %v1728_v22  ;;  %v840_v25 = vpop.f32.mrb[1].mxu1 }
 0x192   : > { %v1781_v27 = vadd.f32 %v1424_v19, %v840_v25 }
 0x193   : > { %v1454_v29 = vadd.f32 %v1780_v24, %v1618_v23 }
 0x194   : > { %v1453_v30 = vadd.f32 %v1781_v27, %v1618_v23  ;;  %v1731_v31 = vpop.f32.mrb[2].mxu1 }
 0x195   : > { %v1482_v32 = vmul.f32 %v1469_v28, %v1454_v29  ;;  %v1782_v33 = vadd.f32 %v1779_v20, %v1731_v31  ;;  %v852_v34 = vpop.f32.mrb[3].mxu1 }
 0x196   : > { %v1481_v35 = vmul.f32 %v1464_v26, %v1453_v30  ;;  %v1783_v36 = vadd.f32 %v1436_v21, %v852_v34 }
 0x197   : > { %v1486_v37 = vsel %vm862_vm0, %v1482_v32, 0.0  ;;  %v1456_v38 = vadd.f32 %v1782_v33, %v1618_v23 }
 0x198   : > { %v1485_v40 = vsel %vm862_vm0, %v1481_v35, 0.0  ;;  %v1455_v41 = vadd.f32 %v1783_v36, %v1618_v23 }
 0x199   : > { %v1487_v42 = vadd.f32 %v1486_v37, %v1485_v40  ;;  %v1484_v45 = vmul.f32 %v1479_v39, %v1456_v38 }
 0x19a   : > { %v1483_v44 = vmul.f32 %v1474_v43, %v1455_v41 }
 0x19b   : > { %v1490_v48 = vsel %vm862_vm0, %v1484_v45, 0.0 }
 0x19c   : > { %v1488_v46 = vsel %vm862_vm0, %v1483_v44, 0.0 }
 0x19d   : > { %v1489_v47 = vadd.f32 %v1488_v46, %v1487_v42 }
 0x19f   : > { %v1491_v49 = vadd.f32 %v1490_v48, %v1489_v47 }
 0x1a1   : > { %v1492_v50 = vrot.slane %v1491_v49, 4 }
 0x1a3   : > { %v1493_v51 = vadd.f32 %v1492_v50, %v1491_v49 }
 0x1a5   : > { %v1494_v52 = vrot.slane %v1493_v51, 2 }
 0x1a7   : > { %v1495_v53 = vadd.f32 %v1494_v52, %v1493_v51 }
 0x1a9   : > { %v1496_v54 = vrot.slane %v1495_v53, 1 }
 0x1ab   : > { %v1497_v55 = vadd.f32 %v1496_v54, %v1495_v53 }
 0x1ad   : > { %v1499_v56 = vmul.f32 0.03125, %v1497_v55 }
 0x1af   : > { %v1500_v57 = vsub.f32 %v1481_v35, %v1499_v56  ;;  %v1501_v58 = vsub.f32 %v1482_v32, %v1499_v56  ;;  %v1502_v59 = vsub.f32 %v1483_v44, %v1499_v56  ;;  %v1503_v60 = vsub.f32 %v1484_v45, %v1499_v56 }
 0x1b1   : > { %v1504_v61 = vmul.f32 %v1500_v57, %v1500_v57  ;;  %v1505_v62 = vmul.f32 %v1501_v58, %v1501_v58  ;;  %v1506_v63 = vmul.f32 %v1502_v59, %v1502_v59  ;;  %v1507_v0 = vmul.f32 %v1503_v60, %v1503_v60 }
 0x1b3   : > { %v1508_v1 = vsel %vm862_vm0, %v1504_v61, 0.0  ;;  %v1509_v2 = vsel %vm862_vm0, %v1505_v62, 0.0  ;;  %v1511_v4 = vsel %vm862_vm0, %v1506_v63, 0.0  ;;  %v1513_v6 = vsel %vm862_vm0, %v1507_v0, 0.0 }
 0x1b4   : > { %v1510_v3 = vadd.f32 %v1509_v2, %v1508_v1 }
 0x1b6   : > { %v1512_v5 = vadd.f32 %v1511_v4, %v1510_v3 }
 0x1b8   : > { %v1514_v7 = vadd.f32 %v1513_v6, %v1512_v5 }
 0x1ba   : > { %v1515_v8 = vrot.slane %v1514_v7, 4 }
 0x1bc   : > { %v1516_v9 = vadd.f32 %v1515_v8, %v1514_v7 }
 0x1be   : > { %v1517_v10 = vrot.slane %v1516_v9, 2 }
 0x1c0   : > { %v1518_v11 = vadd.f32 %v1517_v10, %v1516_v9 }
 0x1c2   : > { %v1519_v12 = vrot.slane %v1518_v11, 1 }
 0x1c4   : > { %v1520_v13 = vadd.f32 %v1519_v12, %v1518_v11 }
 0x1c6   : > { %v1521_v14 = vmul.f32 0.03125, %v1520_v13 }
 0x1c8   : > { %v1522_v15 = vadd.f32 1e-05, %v1521_v14 }
 0x1ca   : > { %1836 = vrsqrt.f32 %v1522_v15 }
 0x1d4   : > { %v1837_v16 = vpop.eup %1836 }
 0x1d5   : > { %v1524_v17 = vmul.f32 %v1837_v16, %v1500_v57  ;;  %v1525_v18 = vmul.f32 %v1837_v16, %v1501_v58  ;;  %v1526_v19 = vmul.f32 %v1837_v16, %v1502_v59  ;;  %v1527_v20 = vmul.f32 %v1837_v16, %v1503_v60 }
 0x1d7   : > { %v1528_v21 = vmul.f32 0.2, %v1524_v17  ;;  %v1529_v22 = vmul.f32 0.2, %v1525_v18  ;;  %v1530_v23 = vmul.f32 0.2, %v1526_v19 }
 0x1d8   : > { %v1531_v24 = vmul.f32 0.2, %v1527_v20 }
 0x1d9   : > { %v1532_v25 = vmax.f32 %v1524_v17, %v1528_v21  ;;  %v1533_v26 = vmax.f32 %v1525_v18, %v1529_v22  ;;  %v1534_v27 = vmax.f32 %v1526_v19, %v1530_v23 }
 0x1da   : > { %v1535_v28 = vmax.f32 %v1527_v20, %v1531_v24 }
 0x1db   : > { %1536 = vst.msk [vmem:[%s244_s11] sm:$0xff] %vm862_vm0, %v1532_v25  ;;  %1537 = vst.msk [vmem:[%s244_s11 + $0x8] sm:$0xff] %vm862_vm0, %v1533_v26 }
 0x1dc   : > { %1538 = vst.msk [vmem:[%s244_s11 + $0x10] sm:$0xff] %vm862_vm0, %v1534_v27  ;;  %1539 = vst.msk [vmem:[%s244_s11 + $0x18] sm:$0xff] %vm862_vm0, %v1535_v28 }
 0x1dd PF: > { %s15_s18 = sadd.s32 1, %s1844_s18  }
 0x1de   : > { %p12_p4 = scmp.ge.s32.totalorder %s15_s18, 4  }
 0x1e0   :  { %14 = sbr.rel (!%p12_p4) target bundleno = 1 (0x1), region = 73 }

// kernel: deep_interpolator_forward.12
= control target key start
LH: loop header
LB: loop body
LE: loop exit
PB: predicated region body
PF: predicated region fallthrough
CT: control target
= control target key end

     0   :  { %s1620_s18 = smov 0   ;;  %s1695_s0 = inlined_call_operand.vmem [shape: f32[2,16,16], index: 0, kind: input, shape index: {}]   ;;  %s1696_s1 = inlined_call_operand.vmem [shape: f32[2,16,1], index: 1, kind: input, shape index: {}]   ;;  %s1697_s2 = inlined_call_operand.vmem [shape: f32[16,16], index: 2, kind: input, shape index: {}]   ;;  %s1698_s3 = inlined_call_operand.vmem [shape: f32[8,16], index: 3, kind: input, shape index: {}]   ;;  %s1699_s4 = inlined_call_operand.vmem [shape: f32[1,16], index: 4, kind: input, shape index: {}]   ;;  %s1700_s5 = inlined_call_operand.vmem [shape: f32[2,16,16], index: 5, kind: output, shape index: {}]  }
   0x1 LB: > { %s1389_s19 = sadd.s32 4294967295, %s1586_s18   ;;  %p1393_p0 = scmp.ge.s32.totalorder %s1586_s18, 1  ;;  %s1586_s18 = sphi %s1620_s18, %s15_s18  }
   0x2   : > { %p197_p1 = scmp.lt.s32.totalorder %s1586_s18, 3 }
   0x4   : > { %p198_p2 = pnand %p1393_p0, %p197_p1 }
   0x5   : > { %p230_p3 = scmp.lt.s32.totalorder (!%p198_p2), %s1389_s19, 1  ;;  %v261_v0 = vld [vmem:[%s1698_s3] sm:$0xff] (!%p198_p2)  ;;  %v248_v3 = vld [vmem:[%s1697_s2 + $0x8] sm:$0xff] (!%p198_p2)  ;;  %vm251_vm0 = vcmask (!%p198_p2), 1040384   ;;  %s1588_s30 = smov (!%p198_p2), 120   ;;  %v1589_v27 = vmov (!%p198_p2), 0  }
   0x6   : > { %201 = sbr.rel (%p198_p2) target bundleno = 464 (0x1d0), region = 40  ;;  %v1631_v1 = vand.u32 (!%p198_p2), 4294901760, %v261_v0  ;;  %v247_v2 = vld [vmem:[%s1697_s2] sm:$0xff] (!%p198_p2)  ;;  %v766_v5 = vand.u32 (!%p198_p2), 4294901760, %v248_v3  ;;  %1576 = vset.pattern.permute.xlu1 (!%p198_p2), %v1589_v27  ;;  %1577 = vset.pattern.permute.xlu0 (!%p198_p2), %v1589_v27  ;;  %vm757_vm1 = vcmask (!%p198_p2), 130048   ;;  %vm262_vm2 = vcmask (!%p198_p2), 64512  }
   0x7   : > { %v763_v4 = vand.u32 (!%p198_p2), 4294901760, %v247_v2 }
   0x8   : > { %1473 = vmatprep.subr.mxu0 (!%p198_p2), %v1631_v1  ;;  %1448 = vmatprep.subr.mxu1 (!%p198_p2), %v1631_v1  ;;  %v858_v7 = vsub.f32 (!%p198_p2), %v248_v3, %v766_v5  ;;  %v1652_v17 = vsub.f32 (!%p198_p2), %v261_v0, %v1631_v1 }
   0x9   : > { %1474 = vmatpush3.msra.mxu0 (!%p198_p2), %v1631_v1  ;;  %v851_v6 = vsub.f32 (!%p198_p2), %v247_v2, %v763_v4  ;;  %1449 = vmatpush3.msra.mxu1 (!%p198_p2), %v1631_v1  ;;  %v1649_v8 = vpack.c.bf16 (!%p198_p2), %v766_v5, %v763_v4 }
   0xa   : > { %v859_v12 = vand.u32 (!%p198_p2), 4294901760, %v858_v7  ;;  %v1656_v22 = vand.u32 (!%p198_p2), 4294901760, %v1652_v17 }
   0xb   : > { %v852_v11 = vand.u32 (!%p198_p2), 4294901760, %v851_v6  ;;  %v1528_v18 = vpack.c.bf16 (!%p198_p2), %v858_v7, %v851_v6 }
   0xc   : > { %v860_v16 = vsub.f32 (!%p198_p2), %v858_v7, %v859_v12  ;;  %v358_v24 = vsub.f32 (!%p198_p2), %v1652_v17, %v1656_v22 }
   0xd   : > { %s1702_s19 = smov (!%p230_p3, %s1389_s19), 1  ;;  %v853_v15 = vsub.f32 %v851_v6, %v852_v11  ;;  %v1536_v26 = vpack.c.bf16 %v859_v12, %v852_v11  ;;  %v1400_v6 = vld [vmem:[%s1699_s4] ss:$0 sm:$0xff] }
   0xe   : > { %s1641_s26 = sshll.u32 %s1702_s19, 4  ;;  %v861_v21 = vand.u32 4294901760, %v860_v16  ;;  %v359_v25 = vand.u32 4294901760, %v358_v24 }
   0xf   : > { %s234_s29 = scalar_lea.vmem %s1695_s0, %s1641_s26  ;;  %v854_v20 = vand.u32 4294901760, %v853_v15  ;;  %s239_s8 = scalar_lea.vmem %s1696_s1, %s1641_s26 }
  0x10   : > { %v245_v9 = vld [vmem:[%s234_s29] sm:$0xff]  ;;  %v246_v10 = vld [vmem:[%s234_s29 + $0x8] sm:$0xff]  ;;  %1453 = vmatprep.subr.mxu1 %v359_v25  ;;  %s244_s13 = scalar_lea.vmem %s1700_s5, %s1641_s26 }
  0x11   : > { %v252_v13 = vrot.slane %v245_v9, 7  ;;  %v253_v14 = vrot.slane %v246_v10, 7  ;;  %v1524_v23 = vpack.c.bf16 %v861_v21, %v854_v20  ;;  %v1273_v28 = vld [vmem:[%s239_s8] sm:$0xff]  ;;  %v1274_v29 = vld [vmem:[%s239_s8 + $0x8] sm:$0xff]  ;;  %v758_v32 = vsel %vm757_vm1, %v245_v9, 0 }
  0x12   : > { %1277 = vperm.xlu1 %1576, %v1273_v28   ;;  %v760_v36 = vsel %vm757_vm1, %v246_v10, 0  ;;  %v829_v37 = vand.u32 4294901760, %v758_v32 }
  0x13   : > { %255 = vrot.lane.b32.xlu0 %v252_v13, %s1588_s30  ;;  %v254_v19 = vsel %vm251_vm0, %v252_v13, %v253_v14  ;;  %1525 = vmatprep.subr.bf16.mxu0 %v1524_v23  ;;  %v839_v42 = vand.u32 4294901760, %v760_v36 }
  0x14   : > { %v830_v46 = vsub.f32 %v758_v32, %v829_v37 }
  0x15   : > { %v840_v50 = vsub.f32 %v760_v36, %v839_v42 }
  0x16   : > { %1282 = vperm.xlu1 %1576, %v1274_v29   ;;  %v831_v51 = vand.u32 4294901760, %v830_v46 }
  0x17   : > { %257 = vrot.lane.b32.xlu0 %v254_v19, %s1588_s30  ;;  %v841_v52 = vand.u32 4294901760, %v840_v50 }
  0x18   : > { %v832_v53 = vsub.f32 %v830_v46, %v831_v51 }
  0x19   : > { %v842_v54 = vsub.f32 %v840_v50, %v841_v52 }
  0x1a   : > { %v833_v55 = vand.u32 4294901760, %v832_v53 }
  0x1b   : > { %v843_v56 = vand.u32 4294901760, %v842_v54 }
  0x85   : > { %v256_v30 = vpop.permute.xlu0 %255 }
  0x86   : > { %v260_v31 = vsel %vm251_vm0, 0.0, %v256_v30 }
  0x87   : > { %v264_v33 = vsel %vm262_vm2, %v260_v31, 0 }
  0x88   : > { %v334_v34 = vand.u32 4294901760, %v264_v33 }
  0x89   : > { %v258_v35 = vpop.permute.xlu0 %257 }
  0x8a   : > { %v335_v38 = vsub.f32 %v264_v33, %v334_v34  ;;  %v266_v39 = vsel %vm262_vm2, %v258_v35, 0  ;;  %1475 = vmatprep.mubr.f32.mxu0 %v334_v34 }
  0x8b   : > { %v344_v40 = vand.u32 4294901760, %v266_v39 }
  0x8c   : > { %v336_v41 = vand.u32 4294901760, %v335_v38 }
  0x8d   : > { %v345_v43 = vsub.f32 %v266_v39, %v344_v40  ;;  %1476 = vmatmul.mubr.f32.vlgmr.msra.gmra.mrb[0].mxu0 %v344_v40 }
  0x8e   : > { %1527 = vmatpush3.bf16.msra.mxu0 %v1524_v23  ;;  %1489 = vmatprep.mubr.f32.mxu0 %v829_v37  ;;  %v337_v44 = vsub.f32 %v335_v38, %v336_v41 }
  0x8f   : > { %v346_v45 = vand.u32 4294901760, %v345_v43  ;;  %1529 = vmatprep.subr.bf16.mxu0 %v1528_v18 }
  0x90   : > { %v338_v47 = vand.u32 4294901760, %v337_v44 }
  0x91   : > { %1490 = vmatmul.mubr.f32.vlgmr.msra.gmra.mrb[2].mxu0 %v839_v42  ;;  %v347_v48 = vsub.f32 %v345_v43, %v346_v45 }
  0x92   : > { %1450 = vmatprep.mubr.f32.mxu1 %v338_v47  ;;  %1531 = vmatpush3.bf16.msra.mxu0 %v1528_v18 }
  0x93   : > { %v348_v49 = vand.u32 4294901760, %v347_v48  ;;  %1496 = vmatprep.mubr.f32.mxu0 %v830_v46  ;;  %1533 = vmatprep.subr.bf16.mxu0 %v1649_v8 }
  0x95   : > { %1451 = vmatmul.mubr.f32.vlgmr.msra.gmra.mrb[0].mxu1 %v348_v49 }
  0x96   : > { %1454 = vmatpush3.msra.mxu1 %v359_v25  ;;  %1455 = vmatprep.mubr.f32.mxu1 %v334_v34 }
  0x97   : > { %1458 = vmatprep.subr.mxu1 %v1652_v17 }
  0x99   : > { %1497 = vmatmul.mubr.f32.vlgmr.msra.gmra.mrb[2].mxu0 %v840_v50 }
  0x9a   : > { %1535 = vmatpush3.bf16.msra.mxu0 %v1649_v8  ;;  %1503 = vmatprep.mubr.f32.mxu0 %v831_v51 }
  0x9b   : > { %1537 = vmatprep.subr.bf16.mxu0 %v1536_v26 }
  0x9d   : > { %1456 = vmatmul.mubr.f32.vlgmr.msra.gmra.mrb[0].mxu1 %v344_v40 }
  0x9e   : > { %1459 = vmatpush3.msra.mxu1 %v1652_v17  ;;  %1460 = vmatprep.mubr.f32.mxu1 %v335_v38 }
  0x9f   : > { %1463 = vmatprep.subr.mxu1 %v1631_v1 }
  0xa1   : > { %1504 = vmatmul.mubr.f32.vlgmr.msra.gmra.mrb[2].mxu0 %v841_v52 }
  0xa2   : > { %1539 = vmatpush3.bf16.msra.mxu0 %v1536_v26  ;;  %1510 = vmatprep.mubr.f32.mxu0 %v829_v37 }
  0xa3   : > { %1541 = vmatprep.subr.bf16.mxu0 %v1649_v8 }
  0xa5   : > { %1461 = vmatmul.mubr.f32.vlgmr.msra.gmra.mrb[0].mxu1 %v345_v43 }
  0xa6   : > { %1464 = vmatpush3.msra.mxu1 %v1631_v1  ;;  %1465 = vmatprep.mubr.f32.mxu1 %v336_v41  ;;  %v1278_v1 = vpop.permute.xlu1 %1277 }
  0xa7   : > { %1468 = vmatprep.subr.mxu1 %v1656_v22 }
  0xa9   : > { %1511 = vmatmul.mubr.f32.vlgmr.msra.gmra.mrb[2].mxu0 %v839_v42 }
  0xaa   : > { %1543 = vmatpush3.bf16.msra.mxu0 %v1649_v8  ;;  %1517 = vmatprep.mubr.f32.mxu0 %v829_v37  ;;  %v1283_v10 = vpop.permute.xlu1 %1282 }
  0xad   : > { %1466 = vmatmul.mubr.f32.vlgmr.msra.gmra.mrb[0].mxu1 %v346_v45 }
  0xae   : > { %1469 = vmatpush3.msra.mxu1 %v1656_v22  ;;  %1470 = vmatprep.mubr.f32.mxu1 %v334_v34 }
  0xaf   : > { %1521 = vmatprep.subr.bf16.mxu1 %v1649_v8 }
  0xb1   : > { %1518 = vmatmul.mubr.f32.vlgmr.msra.gmra.mrb[2].mxu0 %v839_v42 }
  0xb5   : > { %1471 = vmatmul.mubr.f32.vlgmr.msra.gmra.mrb[0].mxu1 %v344_v40 }
  0xb6   : > { %1523 = vmatpush3.bf16.msra.mxu1 %v1649_v8  ;;  %1482 = vmatprep.mubr.f32.mxu1 %v833_v55 }
  0xb9   : > { %1483 = vmatmul.mubr.f32.vlgmr.msra.gmra.mrb[2].mxu1 %v843_v56 }
 0x160   : > { %v1477_v57 = vpop.f32.mrb[0].mxu0 }
 0x161   : > { %v747_v58 = vpop.f32.mrb[1].mxu0 }
 0x184   : > { %v1519_v59 = vpop.f32.mrb[2].mxu0 }
 0x185   : > { %v1254_v60 = vpop.f32.mrb[3].mxu0 }
 0x188   : > { %v1472_v61 = vpop.f32.mrb[0].mxu1 }
 0x189   : > { %v1544_v62 = vadd.f32 %v1477_v57, %v1472_v61  ;;  %v669_v63 = vpop.f32.mrb[1].mxu1 }
 0x18a   : > { %v1547_v0 = vadd.f32 %v747_v58, %v669_v63 }
 0x18c   : > { %v1484_v2 = vpop.f32.mrb[2].mxu1 }
 0x18d   : > { %v1545_v3 = vadd.f32 %v1544_v62, %v1484_v2  ;;  %v835_v4 = vpop.f32.mrb[3].mxu1 }
 0x18e   : > { %v1548_v5 = vadd.f32 %v1547_v0, %v835_v4 }
 0x18f   : > { %v1546_v7 = vadd.f32 %v1545_v3, %v1519_v59 }
 0x190   : > { %v1549_v8 = vadd.f32 %v1548_v5, %v1254_v60 }
 0x191   : > { %v1272_v9 = vadd.f32 %v1546_v7, %v1400_v6 }
 0x192   : > { %v1271_v11 = vadd.f32 %v1549_v8, %v1400_v6 }
 0x193   : > { %v1286_v12 = vmul.f32 %v1283_v10, %v1272_v9 }
 0x194   : > { %v1285_v13 = vmul.f32 %v1278_v1, %v1271_v11 }
 0x195   : > { %v1288_v14 = vsel %vm757_vm1, %v1286_v12, 0.0 }
 0x196   : > { %v1287_v15 = vsel %vm757_vm1, %v1285_v13, 0.0 }
 0x197   : > { %v1289_v16 = vadd.f32 %v1288_v14, %v1287_v15 }
 0x199   : > { %v1290_v17 = vrot.slane %v1289_v16, 4 }
 0x19b   : > { %v1291_v18 = vadd.f32 %v1290_v17, %v1289_v16 }
 0x19d   : > { %v1292_v19 = vrot.slane %v1291_v18, 2 }
 0x19f   : > { %v1293_v20 = vadd.f32 %v1292_v19, %v1291_v18 }
 0x1a1   : > { %v1294_v21 = vrot.slane %v1293_v20, 1 }
 0x1a3   : > { %v1295_v22 = vadd.f32 %v1294_v21, %v1293_v20 }
 0x1a5   : > { %v1297_v23 = vmul.f32 0.0625, %v1295_v22 }
 0x1a7   : > { %v1298_v24 = vsub.f32 %v1285_v13, %v1297_v23  ;;  %v1299_v25 = vsub.f32 %v1286_v12, %v1297_v23 }
 0x1a9   : > { %v1300_v26 = vmul.f32 %v1298_v24, %v1298_v24  ;;  %v1301_v27 = vmul.f32 %v1299_v25, %v1299_v25 }
 0x1ab   : > { %v1302_v28 = vsel %vm757_vm1, %v1300_v26, 0.0  ;;  %v1303_v29 = vsel %vm757_vm1, %v1301_v27, 0.0 }
 0x1ac   : > { %v1304_v30 = vadd.f32 %v1303_v29, %v1302_v28 }
 0x1ae   : > { %v1305_v31 = vrot.slane %v1304_v30, 4 }
 0x1b0   : > { %v1306_v32 = vadd.f32 %v1305_v31, %v1304_v30 }
 0x1b2   : > { %v1307_v33 = vrot.slane %v1306_v32, 2 }
 0x1b4   : > { %v1308_v34 = vadd.f32 %v1307_v33, %v1306_v32 }
 0x1b6   : > { %v1309_v35 = vrot.slane %v1308_v34, 1 }
 0x1b8   : > { %v1310_v36 = vadd.f32 %v1309_v35, %v1308_v34 }
 0x1ba   : > { %v1311_v37 = vmul.f32 0.0625, %v1310_v36 }
 0x1bc   : > { %v1312_v38 = vadd.f32 1e-05, %v1311_v37 }
 0x1be   : > { %1578 = vrsqrt.f32 %v1312_v38 }
 0x1c8   : > { %v1579_v39 = vpop.eup %1578 }
 0x1c9   : > { %v1314_v40 = vmul.f32 %v1579_v39, %v1298_v24  ;;  %v1315_v41 = vmul.f32 %v1579_v39, %v1299_v25 }
 0x1cb   : > { %v1316_v42 = vmul.f32 0.2, %v1314_v40  ;;  %v1317_v43 = vmul.f32 0.2, %v1315_v41 }
 0x1cd   : > { %v1318_v44 = vmax.f32 %v1314_v40, %v1316_v42  ;;  %v1319_v45 = vmax.f32 %v1315_v41, %v1317_v43 }
 0x1cf   : > { %1320 = vst.msk [vmem:[%s244_s13] sm:$0xff] %vm757_vm1, %v1318_v44  ;;  %1321 = vst.msk [vmem:[%s244_s13 + $0x8] sm:$0xff] %vm757_vm1, %v1319_v45 }
 0x1d0 PF: > { %s15_s18 = sadd.s32 1, %s1586_s18  }
 0x1d1   : > { %p12_p4 = scmp.ge.s32.totalorder %s15_s18, 4  }
 0x1d3   :  { %14 = sbr.rel (!%p12_p4) target bundleno = 1 (0x1), region = 73 }

// kernel: deep_interpolator_forward.13
= control target key start
LH: loop header
LB: loop body
LE: loop exit
PB: predicated region body
PF: predicated region fallthrough
CT: control target
= control target key end

     0   :  { %s1587_s18 = smov 0   ;;  %s1750_s0 = inlined_call_operand.vmem [shape: f32[2,8,32], index: 0, kind: input, shape index: {}]   ;;  %s1751_s1 = inlined_call_operand.vmem [shape: f32[2,8,1], index: 1, kind: input, shape index: {}]   ;;  %s1752_s2 = inlined_call_operand.vmem [shape: f32[32,32], index: 2, kind: input, shape index: {}]   ;;  %s1753_s3 = inlined_call_operand.vmem [shape: f32[16,32], index: 3, kind: input, shape index: {}]   ;;  %s1754_s4 = inlined_call_operand.vmem [shape: f32[1,32], index: 4, kind: input, shape index: {}]   ;;  %s1755_s5 = inlined_call_operand.vmem [shape: f32[2,8,32], index: 5, kind: output, shape index: {}]  }
   0x1 LB: > { %s1307_s19 = sadd.s32 4294967295, %s1550_s18   ;;  %p1311_p0 = scmp.ge.s32.totalorder %s1550_s18, 1  ;;  %s1550_s18 = sphi %s1587_s18, %s15_s18  }
   0x2   : > { %p195_p1 = scmp.lt.s32.totalorder %s1550_s18, 3 }
   0x4   : > { %p196_p2 = pnand %p1311_p0, %p195_p1 }
   0x5   : > { %p225_p3 = scmp.lt.s32.totalorder (!%p196_p2), %s1307_s19, 1  ;;  %v1552_v0 = vmov (!%p196_p2), 0.0|0.0   ;;  %v249_v1 = vld [vmem:[%s1753_s3] sm:$0xff] (!%p196_p2)  ;;  %v250_v2 = vld [vmem:[%s1753_s3 + $0x8] sm:$0xff] (!%p196_p2)  ;;  %vm1553_vm0 = vmmov (!%p196_p2), 0   ;;  %v1554_v5 = vmov (!%p196_p2), 0.0  }
   0x6   : > { %199 = sbr.rel (%p196_p2) target bundleno = 452 (0x1c4), region = 40  ;;  %1477 = vmatprep.subr.bf16.mxu1 (!%p196_p2), %v1552_v0  ;;  %1474 = vmatprep.subr.bf16.mxu0 (!%p196_p2), %v1552_v0  ;;  %v256_v3 = vand.u32 (!%p196_p2), 4294901760, %v249_v1  ;;  %v259_v4 = vand.u32 (!%p196_p2), 4294901760, %v250_v2  ;;  %s1555_s28 = smov (!%p196_p2), 112   ;;  %v1556_v20 = vmov (!%p196_p2), 0   ;;  %v238_v22 = vld [vmem:[%s1752_s2] sm:$0xff] (!%p196_p2) }
   0x7   : > { %1377 = vmatprep.mubr.msk.f32.mxu1 (!%p196_p2), %vm1553_vm0, %v1554_v5  ;;  %1370 = vmatprep.mubr.msk.f32.mxu0 (!%p196_p2), %vm1553_vm0, %v1554_v5  ;;  %v239_v23 = vld [vmem:[%s1752_s2 + $0x8] sm:$0xff] (!%p196_p2)  ;;  %v718_v24 = vand.u32 (!%p196_p2), 4294901760, %v238_v22  ;;  %v1643_v26 = vld [vmem:[%s1752_s2 + $0x10] sm:$0xff] (!%p196_p2)  ;;  %v1648_v27 = vld [vmem:[%s1752_s2 + $0x18] sm:$0xff] (!%p196_p2)  ;;  %vm247_vm1 = vcmask (!%p196_p2), 1040384   ;;  %vm251_vm2 = vcmask (!%p196_p2), 130048  }
   0x8   : > { %v1609_v6 = vsub.f32 (!%p196_p2), %v249_v1, %v256_v3  ;;  %v1611_v7 = vsub.f32 (!%p196_p2), %v250_v2, %v259_v4  ;;  %v1613_v8 = vpack.c.bf16 (!%p196_p2), %v259_v4, %v256_v3  ;;  %1541 = vset.pattern.permute.xlu0 (!%p196_p2), %v1556_v20  ;;  %v721_v25 = vand.u32 (!%p196_p2), 4294901760, %v239_v23 }
   0x9   : > { %v1650_v28 = vsub.f32 (!%p196_p2), %v238_v22, %v718_v24  ;;  %v724_v30 = vand.u32 (!%p196_p2), 4294901760, %v1643_v26  ;;  %v727_v31 = vand.u32 (!%p196_p2), 4294901760, %v1648_v27  ;;  %vm714_vm3 = vcmask (!%p196_p2), 261120  }
   0xa   : > { %v335_v10 = vand.u32 (!%p196_p2), 4294901760, %v1609_v6  ;;  %v342_v11 = vand.u32 (!%p196_p2), 4294901760, %v1611_v7  ;;  %1476 = vmatpush3.bf16.msra.mxu0 (!%p196_p2), %v1613_v8  ;;  %v1481_v12 = vpack.c.bf16 (!%p196_p2), %v1611_v7, %v1609_v6  ;;  %v1652_v29 = vsub.f32 (!%p196_p2), %v239_v23, %v721_v25 }
   0xb   : > { %1480 = vmatprep.subr.bf16.mxu0 (!%p196_p2), %v1552_v0  ;;  %v799_v32 = vand.u32 (!%p196_p2), 4294901760, %v1650_v28  ;;  %v1659_v34 = vsub.f32 (!%p196_p2), %v1643_v26, %v724_v30  ;;  %v1662_v35 = vsub.f32 (!%p196_p2), %v1648_v27, %v727_v31  ;;  %v1493_v60 = vpack.c.bf16 (!%p196_p2), %v721_v25, %v718_v24 }
   0xc   : > { %v336_v14 = vsub.f32 (!%p196_p2), %v1609_v6, %v335_v10  ;;  %v343_v15 = vsub.f32 (!%p196_p2), %v1611_v7, %v342_v11  ;;  %v1627_v18 = vpack.c.bf16 (!%p196_p2), %v342_v11, %v335_v10  ;;  %v806_v33 = vand.u32 (!%p196_p2), 4294901760, %v1652_v29 }
   0xd   : > { %s1757_s19 = smov (!%p225_p3, %s1307_s19), 1  ;;  %v800_v39 = vsub.f32 %v1650_v28, %v799_v32  ;;  %v813_v42 = vand.u32 4294901760, %v1659_v34  ;;  %v820_v43 = vand.u32 4294901760, %v1662_v35  ;;  %v1496_v62 = vpack.c.bf16 %v727_v31, %v724_v30 }
   0xe   : > { %s1607_s24 = sshll.u32 %s1757_s19, 3  ;;  %v337_v16 = vand.u32 4294901760, %v336_v14  ;;  %v344_v17 = vand.u32 4294901760, %v343_v15  ;;  %v807_v41 = vsub.f32 %v1652_v29, %v806_v33  ;;  %v1505_v1 = vpack.c.bf16 %v1652_v29, %v1650_v28 }
   0xf   : > { %s228_s27 = scalar_lea.vmem %s1750_s0, %s1607_s24  ;;  %s232_s6 = scalar_lea.vmem %s1751_s1, %s1607_s24  ;;  %v801_v46 = vand.u32 4294901760, %v800_v39  ;;  %v814_v49 = vsub.f32 %v1659_v34, %v813_v42  ;;  %v821_v50 = vsub.f32 %v1662_v35, %v820_v43  ;;  %v1508_v2 = vpack.c.bf16 %v1662_v35, %v1659_v34 }
  0x10   : > { %v237_v9 = vld [vmem:[%s228_s27] sm:$0xff]  ;;  %v1478_v19 = vpack.c.bf16 %v344_v17, %v337_v16  ;;  %v808_v48 = vand.u32 4294901760, %v807_v41  ;;  %v1517_v3 = vpack.c.bf16 %v806_v33, %v799_v32  ;;  %v1520_v4 = vpack.c.bf16 %v820_v43, %v813_v42  ;;  %s236_s20 = scalar_lea.vmem %s1755_s5, %s1607_s24 }
  0x11   : > { %v243_v13 = vrot.slane %v237_v9, 7  ;;  %v1210_v21 = vld [vmem:[%s232_s6] sm:$0xff]  ;;  %v715_v45 = vsel %vm714_vm3, %v237_v9, 0  ;;  %v815_v55 = vand.u32 4294901760, %v814_v49  ;;  %v822_v56 = vand.u32 4294901760, %v821_v50 }
  0x12   : > { %1479 = vmatpush3.bf16.msra.mxu1 %v1478_v19  ;;  %v1683_v51 = vand.u32 4294901760, %v715_v45  ;;  %v1499_v54 = vpack.c.bf16 %v808_v48, %v801_v46 }
  0x13   : > { %244 = vrot.lane.b32.xlu0 %v243_v13, %s1555_s28  ;;  %1483 = vmatprep.subr.bf16.mxu1 %v1552_v0  ;;  %v1502_v58 = vpack.c.bf16 %v822_v56, %v815_v55 }
  0x14   : > { %v787_v57 = vsub.f32 %v715_v45, %v1683_v51 }
  0x16   : > { %v788_v59 = vand.u32 4294901760, %v787_v57 }
  0x17   : > { %1213 = vperm.xlu0 %1541, %v1210_v21  }
  0x18   : > { %v789_v61 = vsub.f32 %v787_v57, %v788_v59 }
  0x1a   : > { %v790_v63 = vand.u32 4294901760, %v789_v61 }
  0x85   : > { %v245_v36 = vpop.permute.xlu0 %244 }
  0x86   : > { %v248_v37 = vsel %vm247_vm1, 0.0, %v245_v36 }
  0x87   : > { %v253_v38 = vsel %vm251_vm2, %v248_v37, 0 }
  0x88   : > { %v322_v40 = vand.u32 4294901760, %v253_v38 }
  0x8a   : > { %v323_v44 = vsub.f32 %v253_v38, %v322_v40  ;;  %1378 = vmatmul.mubr.f32.vlgmr.msra.gmra.mrb[0].mxu1 %v322_v40  ;;  %v1315_v38 = vld [vmem:[%s1754_s4] ss:$0 sm:$0xff] }
  0x8b   : > { %1485 = vmatpush3.bf16.msra.mxu1 %v1613_v8  ;;  %1391 = vmatprep.mubr.msk.f32.mxu1 %vm1553_vm0, %v1554_v5 }
  0x8c   : > { %v324_v47 = vand.u32 4294901760, %v323_v44  ;;  %1489 = vmatprep.subr.bf16.mxu1 %v1552_v0 }
  0x8e   : > { %1392 = vmatmul.mubr.f32.vlgmr.msra.gmra.mrb[2].mxu1 %v324_v47  ;;  %v325_v52 = vsub.f32 %v323_v44, %v324_v47 }
  0x8f   : > { %1491 = vmatpush3.bf16.msra.mxu1 %v1613_v8  ;;  %1405 = vmatprep.mubr.msk.f32.mxu1 %vm1553_vm0, %v1554_v5 }
  0x90   : > { %v326_v53 = vand.u32 4294901760, %v325_v52  ;;  %1498 = vmatprep.subr.bf16.mxu1 %v1552_v0 }
  0x92   : > { %1371 = vmatmul.mubr.f32.vlgmr.msra.gmra.mrb[0].mxu0 %v326_v53  ;;  %1406 = vmatmul.mubr.f32.vlgmr.msra.gmra.mrb[4].mxu1 %v322_v40 }
  0x93   : > { %1482 = vmatpush3.bf16.msra.mxu0 %v1481_v12  ;;  %1384 = vmatprep.mubr.msk.f32.mxu0 %vm1553_vm0, %v1554_v5 }
  0x94   : > { %1486 = vmatprep.subr.bf16.mxu0 %v1552_v0  ;;  %1500 = vmatpush3.bf16.msra.mxu1 %v1499_v54 }
  0x95   : > { %1501 = vmatprep.subr.bf16.mxu1 %v1552_v0  ;;  %1427 = vmatprep.mubr.msk.f32.mxu1 %vm1553_vm0, %v1554_v5 }
  0x96   : > { %1385 = vmatmul.mubr.f32.vlgmr.msra.gmra.mrb[2].mxu0 %v323_v44 }
  0x97   : > { %1488 = vmatpush3.bf16.msra.mxu0 %v1627_v18  ;;  %1398 = vmatprep.mubr.msk.f32.mxu0 %vm1553_vm0, %v1554_v5 }
  0x98   : > { %1492 = vmatprep.subr.bf16.mxu0 %v1552_v0  ;;  %1503 = vmatpush3.bf16.msra.mxu1 %v1502_v58 }
  0x99   : > { %1510 = vmatprep.subr.bf16.mxu1 %v1552_v0 }
  0x9a   : > { %1399 = vmatmul.mubr.f32.vlgmr.msra.gmra.mrb[4].mxu0 %v322_v40  ;;  %v1214_v40 = vpop.permute.xlu0 %1213 }
  0x9b   : > { %1494 = vmatpush3.bf16.msra.mxu0 %v1493_v60  ;;  %1416 = vmatprep.mubr.msk.f32.mxu0 %vm1553_vm0, %v1554_v5 }
  0x9c   : > { %1495 = vmatprep.subr.bf16.mxu0 %v1552_v0  ;;  %1428 = vmatmul.mubr.f32.vlgmr.msra.gmra.mrb[6].mxu1 %v1683_v51 }
  0x9d   : > { %1512 = vmatpush3.bf16.msra.mxu1 %v1493_v60  ;;  %1449 = vmatprep.mubr.msk.f32.mxu1 %vm1553_vm0, %v1554_v5 }
  0x9e   : > { %1513 = vmatprep.subr.bf16.mxu1 %v1552_v0 }
  0x9f   : > { %1497 = vmatpush3.bf16.msra.mxu0 %v1496_v62 }
  0xa0   : > { %1504 = vmatprep.subr.bf16.mxu0 %v1552_v0 }
  0xa1   : > { %1515 = vmatpush3.bf16.msra.mxu1 %v1496_v62 }
  0xa2   : > { %1417 = vmatmul.mubr.f32.vlgmr.msra.gmra.mrb[6].mxu0 %v790_v63  ;;  %1522 = vmatprep.subr.bf16.mxu1 %v1552_v0 }
  0xa3   : > { %1506 = vmatpush3.bf16.msra.mxu0 %v1505_v1  ;;  %1438 = vmatprep.mubr.msk.f32.mxu0 %vm1553_vm0, %v1554_v5 }
  0xa4   : > { %1507 = vmatprep.subr.bf16.mxu0 %v1552_v0  ;;  %1450 = vmatmul.mubr.f32.vlgmr.msra.gmra.mrb[8].mxu1 %v788_v59 }
  0xa5   : > { %1524 = vmatpush3.bf16.msra.mxu1 %v1493_v60  ;;  %1471 = vmatprep.mubr.msk.f32.mxu1 %vm1553_vm0, %v1554_v5 }
  0xa6   : > { %1525 = vmatprep.subr.bf16.mxu1 %v1552_v0 }
  0xa7   : > { %1509 = vmatpush3.bf16.msra.mxu0 %v1508_v2 }
  0xa8   : > { %1516 = vmatprep.subr.bf16.mxu0 %v1552_v0 }
  0xa9   : > { %1527 = vmatpush3.bf16.msra.mxu1 %v1496_v62 }
  0xaa   : > { %1439 = vmatmul.mubr.f32.vlgmr.msra.gmra.mrb[8].mxu0 %v787_v57 }
  0xab   : > { %1518 = vmatpush3.bf16.msra.mxu0 %v1517_v3  ;;  %1460 = vmatprep.mubr.msk.f32.mxu0 %vm1553_vm0, %v1554_v5 }
  0xac   : > { %1519 = vmatprep.subr.bf16.mxu0 %v1552_v0  ;;  %1472 = vmatmul.mubr.f32.vlgmr.msra.gmra.mrb[10].mxu1 %v1683_v51 }
  0xaf   : > { %1521 = vmatpush3.bf16.msra.mxu0 %v1520_v4 }
  0xb2   : > { %1461 = vmatmul.mubr.f32.vlgmr.msra.gmra.mrb[10].mxu0 %v1683_v51 }
 0x15d   : > { %v409_v6 = vpop.f32.mrb[0].mxu1 }
 0x15e   : > { %v1379_v7 = vpop.f32.mrb[1].mxu1 }
 0x161   : > { %v560_v8 = vpop.f32.mrb[2].mxu1 }
 0x162   : > { %v1393_v9 = vpop.f32.mrb[3].mxu1 }
 0x165   : > { %v328_v10 = vpop.f32.mrb[0].mxu0  ;;  %v710_v11 = vpop.f32.mrb[4].mxu1 }
 0x166   : > { %v410_v12 = vadd.f32 %v409_v6, %v328_v10  ;;  %v1372_v13 = vpop.f32.mrb[1].mxu0  ;;  %v1407_v14 = vpop.f32.mrb[5].mxu1 }
 0x169   : > { %v485_v15 = vpop.f32.mrb[2].mxu0 }
 0x16a   : > { %v486_v16 = vadd.f32 %v485_v15, %v410_v12  ;;  %v1386_v17 = vpop.f32.mrb[3].mxu0 }
 0x16c   : > { %v561_v5 = vadd.f32 %v560_v8, %v486_v16 }
 0x16d   : > { %v637_v18 = vpop.f32.mrb[4].mxu0 }
 0x16e   : > { %v638_v0 = vadd.f32 %v637_v18, %v561_v5  ;;  %v1400_v19 = vpop.f32.mrb[5].mxu0 }
 0x16f   : > { %v883_v20 = vpop.f32.mrb[6].mxu1 }
 0x170   : > { %v711_v21 = vadd.f32 %v710_v11, %v638_v0  ;;  %v1429_v22 = vpop.f32.mrb[7].mxu1 }
 0x175   : > { %v792_v23 = vpop.f32.mrb[6].mxu0 }
 0x176   : > { %v793_v24 = vadd.f32 %v792_v23, %v711_v21  ;;  %v1418_v25 = vpop.f32.mrb[7].mxu0 }
 0x177   : > { %v1040_v26 = vpop.f32.mrb[8].mxu1 }
 0x178   : > { %v884_v27 = vadd.f32 %v883_v20, %v793_v24  ;;  %v1451_v28 = vpop.f32.mrb[9].mxu1 }
 0x17d   : > { %v963_v29 = vpop.f32.mrb[8].mxu0 }
 0x17e   : > { %v964_v30 = vadd.f32 %v963_v29, %v884_v27  ;;  %v1440_v31 = vpop.f32.mrb[9].mxu0 }
 0x17f   : > { %v1198_v32 = vpop.f32.mrb[10].mxu1 }
 0x180   : > { %v1041_v33 = vadd.f32 %v1040_v26, %v964_v30  ;;  %v1473_v34 = vpop.f32.mrb[11].mxu1 }
 0x185   : > { %v1123_v35 = vpop.f32.mrb[10].mxu0 }
 0x186   : > { %v1124_v36 = vadd.f32 %v1123_v35, %v1041_v33  ;;  %v1462_v37 = vpop.f32.mrb[11].mxu0 }
 0x188   : > { %v1199_v39 = vadd.f32 %v1198_v32, %v1124_v36 }
 0x18a   : > { %v1209_v41 = vadd.f32 %v1315_v38, %v1199_v39 }
 0x18c   : > { %v1216_v42 = vmul.f32 %v1214_v40, %v1209_v41 }
 0x18e   : > { %v1217_v43 = vsel %vm714_vm3, %v1216_v42, 0.0 }
 0x18f   : > { %v1218_v44 = vrot.slane %v1217_v43, 4 }
 0x191   : > { %v1219_v45 = vadd.f32 %v1218_v44, %v1217_v43 }
 0x193   : > { %v1220_v46 = vrot.slane %v1219_v45, 2 }
 0x195   : > { %v1221_v47 = vadd.f32 %v1220_v46, %v1219_v45 }
 0x197   : > { %v1222_v48 = vrot.slane %v1221_v47, 1 }
 0x199   : > { %v1223_v49 = vadd.f32 %v1222_v48, %v1221_v47 }
 0x19b   : > { %v1225_v50 = vmul.f32 0.125, %v1223_v49 }
 0x19d   : > { %v1226_v51 = vsub.f32 %v1216_v42, %v1225_v50 }
 0x19f   : > { %v1227_v52 = vmul.f32 %v1226_v51, %v1226_v51 }
 0x1a1   : > { %v1228_v53 = vsel %vm714_vm3, %v1227_v52, 0.0 }
 0x1a2   : > { %v1229_v54 = vrot.slane %v1228_v53, 4 }
 0x1a4   : > { %v1230_v55 = vadd.f32 %v1229_v54, %v1228_v53 }
 0x1a6   : > { %v1231_v56 = vrot.slane %v1230_v55, 2 }
 0x1a8   : > { %v1232_v57 = vadd.f32 %v1231_v56, %v1230_v55 }
 0x1aa   : > { %v1233_v58 = vrot.slane %v1232_v57, 1 }
 0x1ac   : > { %v1234_v59 = vadd.f32 %v1233_v58, %v1232_v57 }
 0x1ae   : > { %v1235_v60 = vmul.f32 0.125, %v1234_v59 }
 0x1b0   : > { %v1236_v61 = vadd.f32 1e-05, %v1235_v60 }
 0x1b2   : > { %1542 = vrsqrt.f32 %v1236_v61 }
 0x1bc   : > { %v1543_v62 = vpop.eup %1542 }
 0x1bd   : > { %v1238_v63 = vmul.f32 %v1543_v62, %v1226_v51 }
 0x1bf   : > { %v1239_v1 = vmul.f32 0.2, %v1238_v63 }
 0x1c1   : > { %v1240_v2 = vmax.f32 %v1238_v63, %v1239_v1 }
 0x1c3   : > { %1241 = vst.msk [vmem:[%s236_s20] sm:$0xff] %vm714_vm3, %v1240_v2 }
 0x1c4 PF: > { %s15_s18 = sadd.s32 1, %s1550_s18  }
 0x1c5   : > { %p12_p4 = scmp.ge.s32.totalorder %s15_s18, 4  }
 0x1c7   :  { %14 = sbr.rel (!%p12_p4) target bundleno = 1 (0x1), region = 73 }

// kernel: deep_interpolator_forward.14
= control target key start
LH: loop header
LB: loop body
LE: loop exit
PB: predicated region body
PF: predicated region fallthrough
CT: control target
= control target key end

     0   :  { %s1834_s18 = smov 0   ;;  %s2155_s0 = inlined_call_operand.vmem [shape: f32[2,4,64], index: 0, kind: input, shape index: {}]   ;;  %s2156_s1 = inlined_call_operand.vmem [shape: f32[2,4,1], index: 1, kind: input, shape index: {}]   ;;  %s2157_s2 = inlined_call_operand.vmem [shape: f32[64,64], index: 2, kind: input, shape index: {}]   ;;  %s2158_s3 = inlined_call_operand.vmem [shape: f32[32,64], index: 3, kind: input, shape index: {}]   ;;  %s2159_s4 = inlined_call_operand.vmem [shape: f32[1,64], index: 4, kind: input, shape index: {}]   ;;  %s2160_s5 = inlined_call_operand.vmem [shape: f32[2,4,64], index: 5, kind: output, shape index: {}]  }
   0x1 LB: > { %s1392_s19 = sadd.s32 4294967295, %s1797_s18   ;;  %p1396_p0 = scmp.ge.s32.totalorder %s1797_s18, 1  ;;  %s1797_s18 = sphi %s1834_s18, %s15_s18  }
   0x2   : > { %p195_p1 = scmp.lt.s32.totalorder %s1797_s18, 3 }
   0x4   : > { %p196_p2 = pnand %p1396_p0, %p195_p1 }
   0x5   : > { %p225_p3 = scmp.lt.s32.totalorder (!%p196_p2), %s1392_s19, 1  ;;  %v253_v0 = vld [vmem:[%s2158_s3] sm:$0xff] (!%p196_p2)  ;;  %v254_v1 = vld [vmem:[%s2158_s3 + $0x8] sm:$0xff] (!%p196_p2)  ;;  %v1799_v2 = vmov (!%p196_p2), 0.0|0.0   ;;  %v255_v5 = vld [vmem:[%s2158_s3 + $0x10] sm:$0xff] (!%p196_p2)  ;;  %vm1800_vm0 = vmmov (!%p196_p2), 0  }
   0x6   : > { %199 = sbr.rel (%p196_p2) target bundleno = 484 (0x1e4), region = 40  ;;  %1673 = vmatprep.subr.bf16.mxu1 (!%p196_p2), %v1799_v2  ;;  %v262_v3 = vand.u32 (!%p196_p2), 4294901760, %v253_v0  ;;  %v265_v4 = vand.u32 (!%p196_p2), 4294901760, %v254_v1  ;;  %v256_v6 = vld [vmem:[%s2158_s3 + $0x18] sm:$0xff] (!%p196_p2)  ;;  %1667 = vmatprep.subr.bf16.mxu0 (!%p196_p2), %v1799_v2  ;;  %v268_v7 = vand.u32 (!%p196_p2), 4294901760, %v255_v5  ;;  %v1801_v11 = vmov (!%p196_p2), 0.0  }
   0x7   : > { %v271_v8 = vand.u32 (!%p196_p2), 4294901760, %v256_v6  ;;  %1506 = vmatprep.mubr.msk.f32.mxu1 (!%p196_p2), %vm1800_vm0, %v1801_v11  ;;  %1495 = vmatprep.mubr.msk.f32.mxu0 (!%p196_p2), %vm1800_vm0, %v1801_v11  ;;  %s1802_s7 = smov (!%p196_p2), 96   ;;  %v1803_v36 = vmov (!%p196_p2), 0   ;;  %v1910_v38 = vld [vmem:[%s2157_s2] sm:$0xff] (!%p196_p2)  ;;  %v1915_v39 = vld [vmem:[%s2157_s2 + $0x8] sm:$0xff] (!%p196_p2)  ;;  %vm251_vm1 = vcmask (!%p196_p2), 1040384  }
   0x8   : > { %v1856_v9 = vsub.f32 (!%p196_p2), %v253_v0, %v262_v3  ;;  %v1858_v10 = vsub.f32 (!%p196_p2), %v254_v1, %v265_v4  ;;  %v1862_v12 = vpack.c.bf16 (!%p196_p2), %v265_v4, %v262_v3  ;;  %v1868_v13 = vsub.f32 (!%p196_p2), %v255_v5, %v268_v7  ;;  %1788 = vset.pattern.permute.xlu0 (!%p196_p2), %v1803_v36  ;;  %v1922_v42 = vld [vmem:[%s2157_s2 + $0x10] sm:$0xff] (!%p196_p2)  ;;  %v1927_v43 = vld [vmem:[%s2157_s2 + $0x18] sm:$0xff] (!%p196_p2)  ;;  %v1946_v52 = vld [vmem:[%s2157_s2 + $0x20] sm:$0xff] (!%p196_p2) }
   0x9   : > { %v1870_v14 = vsub.f32 (!%p196_p2), %v256_v6, %v271_v8  ;;  %v1879_v17 = vpack.c.bf16 (!%p196_p2), %v271_v8, %v268_v7  ;;  %v750_v40 = vand.u32 (!%p196_p2), 4294901760, %v1910_v38  ;;  %v753_v41 = vand.u32 (!%p196_p2), 4294901760, %v1915_v39  ;;  %v1951_v53 = vld [vmem:[%s2157_s2 + $0x28] sm:$0xff] (!%p196_p2)  ;;  %v1976_v62 = vld [vmem:[%s2157_s2 + $0x30] sm:$0xff] (!%p196_p2)  ;;  %v1981_v63 = vld [vmem:[%s2157_s2 + $0x38] sm:$0xff] (!%p196_p2) }
   0xa   : > { %v343_v15 = vand.u32 (!%p196_p2), 4294901760, %v1856_v9  ;;  %v350_v16 = vand.u32 (!%p196_p2), 4294901760, %v1858_v10  ;;  %1669 = vmatpush3.bf16.msra.mxu0 (!%p196_p2), %v1862_v12  ;;  %v357_v19 = vand.u32 (!%p196_p2), 4294901760, %v1868_v13  ;;  %v1680_v26 = vpack.c.bf16 (!%p196_p2), %v1858_v10, %v1856_v9 }
   0xb   : > { %v364_v20 = vand.u32 (!%p196_p2), 4294901760, %v1870_v14  ;;  %1670 = vmatprep.subr.bf16.mxu0 (!%p196_p2), %v1799_v2  ;;  %v1683_v31 = vpack.c.bf16 (!%p196_p2), %v1870_v14, %v1868_v13  ;;  %vm257_vm2 = vcmask (!%p196_p2), 261120   ;;  %v1932_v46 = vsub.f32 (!%p196_p2), %v1910_v38, %v750_v40 }
   0xc   : > { %v344_v22 = vsub.f32 (!%p196_p2), %v1856_v9, %v343_v15  ;;  %v351_v23 = vsub.f32 (!%p196_p2), %v1858_v10, %v350_v16  ;;  %v358_v24 = vsub.f32 (!%p196_p2), %v1868_v13, %v357_v19  ;;  %v1898_v34 = vpack.c.bf16 (!%p196_p2), %v350_v16, %v343_v15 }
   0xd   : > { %s2162_s19 = smov (!%p225_p3, %s1392_s19), 1  ;;  %v365_v25 = vsub.f32 %v1870_v14, %v364_v20  ;;  %v1901_v35 = vpack.c.bf16 %v364_v20, %v357_v19  ;;  %v1937_v48 = vsub.f32 %v1915_v39, %v753_v41  ;;  %v756_v49 = vand.u32 4294901760, %v1922_v42 }
   0xe   : > { %s1866_s28 = sshll.u32 %s2162_s19, 2  ;;  %v345_v27 = vand.u32 4294901760, %v344_v22  ;;  %v352_v28 = vand.u32 4294901760, %v351_v23  ;;  %1672 = vmatpush3.bf16.msra.mxu0 %v1879_v17  ;;  %v359_v29 = vand.u32 4294901760, %v358_v24  ;;  %v759_v50 = vand.u32 4294901760, %v1927_v43 }
   0xf   : > { %s228_s6 = scalar_lea.vmem %s2155_s0, %s1866_s28  ;;  %v366_v30 = vand.u32 4294901760, %v365_v25  ;;  %1679 = vmatprep.subr.bf16.mxu0 %v1799_v2  ;;  %s232_s10 = scalar_lea.vmem %s2156_s1, %s1866_s28  ;;  %v835_v55 = vand.u32 4294901760, %v1932_v46  ;;  %v842_v56 = vand.u32 4294901760, %v1937_v48  ;;  %v1963_v57 = vsub.f32 %v1922_v42, %v756_v49 }
  0x10   : > { %v1881_v18 = vld [vmem:[%s228_s6] sm:$0xf]  ;;  %v1674_v32 = vpack.c.bf16 %v352_v28, %v345_v27  ;;  %v1968_v58 = vsub.f32 %v1927_v43, %v759_v50  ;;  %v762_v59 = vand.u32 4294901760, %v1946_v52  ;;  %v765_v61 = vand.u32 4294901760, %v1951_v53  ;;  %s236_s8 = scalar_lea.vmem %s2160_s5, %s1866_s28 }
  0x11   : > { %v247_v21 = vrot.slane %v1881_v18, 7  ;;  %v1677_v33 = vpack.c.bf16 %v366_v30, %v359_v29  ;;  %v1294_v37 = vld [vmem:[%s232_s10] sm:$0xf]  ;;  %v836_v1 = vsub.f32 %v1932_v46, %v835_v55  ;;  %v843_v3 = vsub.f32 %v1937_v48, %v842_v56 }
  0x12   : > { %1675 = vmatpush3.bf16.msra.mxu1 %v1674_v32  ;;  %v849_v4 = vand.u32 4294901760, %v1963_v57  ;;  %v856_v5 = vand.u32 4294901760, %v1968_v58  ;;  %v1995_v6 = vsub.f32 %v1946_v52, %v762_v59  ;;  %v2001_v8 = vsub.f32 %v1951_v53, %v765_v61 }
  0x13   : > { %248 = vrot.lane.b32.xlu0 %v247_v21, %s1802_s7  ;;  %1676 = vmatprep.subr.bf16.mxu1 %v1799_v2  ;;  %v768_v15 = vand.u32 4294901760, %v1976_v62  ;;  %v771_v16 = vand.u32 4294901760, %v1981_v63  ;;  %v837_v19 = vand.u32 4294901760, %v836_v1  ;;  %v844_v20 = vand.u32 4294901760, %v843_v3 }
  0x14   : > { %v850_v21 = vsub.f32 %v1963_v57, %v849_v4  ;;  %v857_v22 = vsub.f32 %v1968_v58, %v856_v5  ;;  %v863_v23 = vand.u32 4294901760, %v1995_v6  ;;  %v870_v9 = vand.u32 4294901760, %v2001_v8 }
  0x15   : > { %v2022_v10 = vsub.f32 %v1976_v62, %v768_v15  ;;  %vm746_vm3 = vcmask 523264   ;;  %v1716_v24 = vpack.c.bf16 %v844_v20, %v837_v19  ;;  %v1713_v42 = vpack.c.bf16 %v771_v16, %v768_v15 }
  0x16   : > { %1678 = vmatpush3.bf16.msra.mxu1 %v1677_v33  ;;  %v851_v25 = vand.u32 4294901760, %v850_v21  ;;  %v864_v27 = vsub.f32 %v1995_v6, %v863_v23  ;;  %v871_v28 = vsub.f32 %v2001_v8, %v870_v9  ;;  %v1752_v52 = vpack.c.bf16 %v842_v56, %v835_v55 }
  0x17   : > { %1685 = vmatprep.subr.bf16.mxu1 %v1799_v2  ;;  %1297 = vperm.xlu0 %1788, %v1294_v37   ;;  %v877_v13 = vand.u32 4294901760, %v2022_v10  ;;  %v1755_v53 = vpack.c.bf16 %v856_v5, %v849_v4  ;;  %vm1301_vm4 = vcmask 519168  }
  0x18   : > { %v865_v30 = vand.u32 4294901760, %v864_v27 }
  0x19   : > { %v878_v32 = vsub.f32 %v2022_v10, %v877_v13 }
  0x1b   : > { %v879_v37 = vand.u32 4294901760, %v878_v32 }
  0x85   : > { %v249_v44 = vpop.permute.xlu0 %248 }
  0x86   : > { %v252_v45 = vsel %vm251_vm1, 0.0, %v249_v44 }
  0x87   : > { %v259_v47 = vsel %vm257_vm2, %v252_v45, 0 }
  0x88   : > { %v1941_v51 = vand.u32 4294901760, %v259_v47 }
  0x8a   : > { %v331_v54 = vsub.f32 %v259_v47, %v1941_v51  ;;  %1507 = vmatmul.mubr.f32.vlgmr.msra.gmra.mrb[0].mxu1 %v1941_v51  ;;  %v1728_v47 = vpack.c.bf16 %v1937_v48, %v1932_v46  ;;  %v1758_v46 = vpack.c.bf16 %v870_v9, %v863_v23 }
  0x8b   : > { %1687 = vmatpush3.bf16.msra.mxu1 %v1862_v12  ;;  %1528 = vmatprep.mubr.msk.f32.mxu1 %vm1800_vm0, %v1801_v11 }
  0x8c   : > { %v332_v60 = vand.u32 4294901760, %v331_v54  ;;  %1688 = vmatprep.subr.bf16.mxu1 %v1799_v2 }
  0x8e   : > { %v333_v0 = vsub.f32 %v331_v54, %v332_v60 }
  0x8f   : > { %1690 = vmatpush3.bf16.msra.mxu1 %v1879_v17 }
  0x90   : > { %1697 = vmatprep.subr.bf16.mxu1 %v1799_v2  ;;  %v334_v7 = vand.u32 4294901760, %v333_v0 }
  0x92   : > { %1529 = vmatmul.mubr.f32.vlgmr.msra.gmra.mrb[2].mxu1 %v332_v60  ;;  %1496 = vmatmul.mubr.f32.vlgmr.msra.gmra.mrb[0].mxu0 %v334_v7 }
  0x93   : > { %1681 = vmatpush3.bf16.msra.mxu0 %v1680_v26  ;;  %1699 = vmatpush3.bf16.msra.mxu1 %v1862_v12  ;;  %v2027_v12 = vsub.f32 %v1981_v63, %v771_v16  ;;  %v858_v26 = vand.u32 4294901760, %v857_v22 }
  0x94   : > { %1682 = vmatprep.subr.bf16.mxu0 %v1799_v2  ;;  %1700 = vmatprep.subr.bf16.mxu1 %v1799_v2 }
  0x95   : > { %1517 = vmatprep.mubr.msk.f32.mxu0 %vm1800_vm0, %v1801_v11  ;;  %1550 = vmatprep.mubr.msk.f32.mxu1 %vm1800_vm0, %v1801_v11  ;;  %v884_v14 = vand.u32 4294901760, %v2027_v12  ;;  %v1719_v29 = vpack.c.bf16 %v858_v26, %v851_v25 }
  0x97   : > { %1684 = vmatpush3.bf16.msra.mxu0 %v1683_v31  ;;  %1702 = vmatpush3.bf16.msra.mxu1 %v1879_v17  ;;  %v747_v17 = vsel %vm746_vm3, %v1881_v18, 0  ;;  %v872_v31 = vand.u32 4294901760, %v871_v28  ;;  %v885_v33 = vsub.f32 %v2027_v12, %v884_v14  ;;  %v1400_v28 = vld [vmem:[%s2159_s4] ss:$0 sm:$0xff] }
  0x98   : > { %1691 = vmatprep.subr.bf16.mxu0 %v1799_v2  ;;  %1715 = vmatprep.subr.bf16.mxu1 %v1799_v2  ;;  %v2062_v18 = vand.u32 4294901760, %v747_v17 }
  0x99   : > { %v1722_v36 = vpack.c.bf16 %v872_v31, %v865_v30  ;;  %v886_v44 = vand.u32 4294901760, %v885_v33 }
  0x9a   : > { %1518 = vmatmul.mubr.f32.vlgmr.msra.gmra.mrb[2].mxu0 %v331_v54  ;;  %1551 = vmatmul.mubr.f32.vlgmr.msra.gmra.mrb[4].mxu1 %v1941_v51  ;;  %v823_v45 = vsub.f32 %v747_v17, %v2062_v18 }
  0x9b   : > { %1693 = vmatpush3.bf16.msra.mxu0 %v1898_v34  ;;  %1539 = vmatprep.mubr.msk.f32.mxu0 %vm1800_vm0, %v1801_v11  ;;  %v1704_v34 = vpack.c.bf16 %v753_v41, %v750_v40  ;;  %v1725_v38 = vpack.c.bf16 %v886_v44, %v879_v37  ;;  %v1710_v40 = vpack.c.bf16 %v765_v61, %v762_v59 }
  0x9c   : > { %1694 = vmatprep.subr.bf16.mxu0 %v1799_v2  ;;  %1717 = vmatpush3.bf16.msra.mxu1 %v1716_v24  ;;  %v824_v39 = vand.u32 4294901760, %v823_v45 }
  0x9d   : > { %1718 = vmatprep.subr.bf16.mxu1 %v1799_v2  ;;  %1588 = vmatprep.mubr.msk.f32.mxu1 %vm1800_vm0, %v1801_v11 }
  0x9e   : > { %v825_v41 = vsub.f32 %v823_v45, %v824_v39 }
  0x9f   : > { %1696 = vmatpush3.bf16.msra.mxu0 %v1901_v35  ;;  %v1707_v35 = vpack.c.bf16 %v759_v50, %v756_v49  ;;  %v1731_v49 = vpack.c.bf16 %v1968_v58, %v1963_v57  ;;  %v1734_v50 = vpack.c.bf16 %v2001_v8, %v1995_v6 }
  0xa0   : > { %1703 = vmatprep.subr.bf16.mxu0 %v1799_v2  ;;  %1720 = vmatpush3.bf16.msra.mxu1 %v1719_v29  ;;  %v826_v43 = vand.u32 4294901760, %v825_v41 }
  0xa1   : > { %1721 = vmatprep.subr.bf16.mxu1 %v1799_v2 }
  0xa2   : > { %1540 = vmatmul.mubr.f32.vlgmr.msra.gmra.mrb[4].mxu0 %v1941_v51  ;;  %v1737_v51 = vpack.c.bf16 %v2027_v12, %v2022_v10 }
  0xa3   : > { %1705 = vmatpush3.bf16.msra.mxu0 %v1704_v34  ;;  %1569 = vmatprep.mubr.msk.f32.mxu0 %vm1800_vm0, %v1801_v11 }
  0xa4   : > { %1706 = vmatprep.subr.bf16.mxu0 %v1799_v2  ;;  %1723 = vmatpush3.bf16.msra.mxu1 %v1722_v36 }
  0xa5   : > { %1724 = vmatprep.subr.bf16.mxu1 %v1799_v2 }
  0xa7   : > { %1708 = vmatpush3.bf16.msra.mxu0 %v1707_v35 }
  0xa8   : > { %1709 = vmatprep.subr.bf16.mxu0 %v1799_v2  ;;  %1726 = vmatpush3.bf16.msra.mxu1 %v1725_v38 }
  0xa9   : > { %1739 = vmatprep.subr.bf16.mxu1 %v1799_v2 }
  0xab   : > { %1711 = vmatpush3.bf16.msra.mxu0 %v1710_v40  ;;  %1589 = vmatmul.mubr.f32.vlgmr.msra.gmra.mrb[6].mxu1 %v2062_v18 }
  0xac   : > { %1712 = vmatprep.subr.bf16.mxu0 %v1799_v2  ;;  %1741 = vmatpush3.bf16.msra.mxu1 %v1704_v34 }
  0xad   : > { %1742 = vmatprep.subr.bf16.mxu1 %v1799_v2  ;;  %1626 = vmatprep.mubr.msk.f32.mxu1 %vm1800_vm0, %v1801_v11 }
  0xaf   : > { %1714 = vmatpush3.bf16.msra.mxu0 %v1713_v42 }
  0xb0   : > { %1727 = vmatprep.subr.bf16.mxu0 %v1799_v2  ;;  %1744 = vmatpush3.bf16.msra.mxu1 %v1707_v35 }
  0xb1   : > { %1745 = vmatprep.subr.bf16.mxu1 %v1799_v2 }
  0xb2   : > { %1570 = vmatmul.mubr.f32.vlgmr.msra.gmra.mrb[6].mxu0 %v826_v43 }
  0xb3   : > { %1729 = vmatpush3.bf16.msra.mxu0 %v1728_v47  ;;  %1607 = vmatprep.mubr.msk.f32.mxu0 %vm1800_vm0, %v1801_v11 }
  0xb4   : > { %1730 = vmatprep.subr.bf16.mxu0 %v1799_v2  ;;  %1747 = vmatpush3.bf16.msra.mxu1 %v1710_v40 }
  0xb5   : > { %1748 = vmatprep.subr.bf16.mxu1 %v1799_v2 }
  0xb7   : > { %1732 = vmatpush3.bf16.msra.mxu0 %v1731_v49 }
  0xb8   : > { %1733 = vmatprep.subr.bf16.mxu0 %v1799_v2  ;;  %1750 = vmatpush3.bf16.msra.mxu1 %v1713_v42 }
  0xb9   : > { %1763 = vmatprep.subr.bf16.mxu1 %v1799_v2 }
  0xbb   : > { %1735 = vmatpush3.bf16.msra.mxu0 %v1734_v50  ;;  %1627 = vmatmul.mubr.f32.vlgmr.msra.gmra.mrb[8].mxu1 %v824_v39 }
  0xbc   : > { %1736 = vmatprep.subr.bf16.mxu0 %v1799_v2  ;;  %1765 = vmatpush3.bf16.msra.mxu1 %v1704_v34 }
  0xbd   : > { %1766 = vmatprep.subr.bf16.mxu1 %v1799_v2  ;;  %1664 = vmatprep.mubr.msk.f32.mxu1 %vm1800_vm0, %v1801_v11 }
  0xbf   : > { %1738 = vmatpush3.bf16.msra.mxu0 %v1737_v51 }
  0xc0   : > { %1751 = vmatprep.subr.bf16.mxu0 %v1799_v2  ;;  %1768 = vmatpush3.bf16.msra.mxu1 %v1707_v35 }
  0xc1   : > { %1769 = vmatprep.subr.bf16.mxu1 %v1799_v2 }
  0xc2   : > { %1608 = vmatmul.mubr.f32.vlgmr.msra.gmra.mrb[8].mxu0 %v823_v45 }
  0xc3   : > { %1753 = vmatpush3.bf16.msra.mxu0 %v1752_v52  ;;  %1645 = vmatprep.mubr.msk.f32.mxu0 %vm1800_vm0, %v1801_v11  ;;  %v1761_v11 = vpack.c.bf16 %v884_v14, %v877_v13  ;;  %v1298_v14 = vpop.permute.xlu0 %1297 }
  0xc4   : > { %1754 = vmatprep.subr.bf16.mxu0 %v1799_v2  ;;  %1771 = vmatpush3.bf16.msra.mxu1 %v1710_v40 }
  0xc5   : > { %1772 = vmatprep.subr.bf16.mxu1 %v1799_v2 }
  0xc7   : > { %1756 = vmatpush3.bf16.msra.mxu0 %v1755_v53 }
  0xc8   : > { %1757 = vmatprep.subr.bf16.mxu0 %v1799_v2  ;;  %1774 = vmatpush3.bf16.msra.mxu1 %v1713_v42 }
  0xcb   : > { %1759 = vmatpush3.bf16.msra.mxu0 %v1758_v46  ;;  %1665 = vmatmul.mubr.f32.vlgmr.msra.gmra.mrb[10].mxu1 %v2062_v18 }
  0xcc   : > { %1760 = vmatprep.subr.bf16.mxu0 %v1799_v2 }
  0xcf   : > { %1762 = vmatpush3.bf16.msra.mxu0 %v1761_v11 }
  0xd2   : > { %1646 = vmatmul.mubr.f32.vlgmr.msra.gmra.mrb[10].mxu0 %v2062_v18 }
 0x15d   : > { %v427_v48 = vpop.f32.mrb[0].mxu1 }
 0x15e   : > { %v1508_v54 = vpop.f32.mrb[1].mxu1 }
 0x165   : > { %v584_v55 = vpop.f32.mrb[2].mxu1  ;;  %v336_v56 = vpop.f32.mrb[0].mxu0 }
 0x166   : > { %v428_v57 = vadd.f32 %v427_v48, %v336_v56  ;;  %v1530_v58 = vpop.f32.mrb[3].mxu1  ;;  %v1497_v59 = vpop.f32.mrb[1].mxu0 }
 0x16d   : > { %v507_v60 = vpop.f32.mrb[2].mxu0  ;;  %v742_v61 = vpop.f32.mrb[4].mxu1 }
 0x16e   : > { %v508_v62 = vadd.f32 %v507_v60, %v428_v57  ;;  %v1519_v63 = vpop.f32.mrb[3].mxu0  ;;  %v1552_v0 = vpop.f32.mrb[5].mxu1 }
 0x170   : > { %v585_v1 = vadd.f32 %v584_v55, %v508_v62 }
 0x175   : > { %v667_v3 = vpop.f32.mrb[4].mxu0 }
 0x176   : > { %v668_v4 = vadd.f32 %v667_v3, %v585_v1  ;;  %v1541_v5 = vpop.f32.mrb[5].mxu0 }
 0x178   : > { %v743_v2 = vadd.f32 %v742_v61, %v668_v4 }
 0x17e   : > { %v939_v6 = vpop.f32.mrb[6].mxu1 }
 0x17f   : > { %v1590_v7 = vpop.f32.mrb[7].mxu1 }
 0x185   : > { %v828_v8 = vpop.f32.mrb[6].mxu0 }
 0x186   : > { %v829_v15 = vadd.f32 %v828_v8, %v743_v2  ;;  %v1571_v16 = vpop.f32.mrb[7].mxu0 }
 0x188   : > { %v940_v19 = vadd.f32 %v939_v6, %v829_v15 }
 0x18e   : > { %v1108_v20 = vpop.f32.mrb[8].mxu1 }
 0x18f   : > { %v1628_v21 = vpop.f32.mrb[9].mxu1 }
 0x195   : > { %v1027_v22 = vpop.f32.mrb[8].mxu0 }
 0x196   : > { %v1028_v23 = vadd.f32 %v1027_v22, %v940_v19  ;;  %v1609_v9 = vpop.f32.mrb[9].mxu0 }
 0x198   : > { %v1109_v10 = vadd.f32 %v1108_v20, %v1028_v23 }
 0x19e   : > { %v1282_v12 = vpop.f32.mrb[10].mxu1 }
 0x19f   : > { %v1666_v24 = vpop.f32.mrb[11].mxu1 }
 0x1a5   : > { %v1203_v25 = vpop.f32.mrb[10].mxu0 }
 0x1a6   : > { %v1204_v26 = vadd.f32 %v1203_v25, %v1109_v10  ;;  %v1647_v27 = vpop.f32.mrb[11].mxu0 }
 0x1a8   : > { %v1283_v13 = vadd.f32 %v1282_v12, %v1204_v26 }
 0x1aa   : > { %v1293_v17 = vadd.f32 %v1400_v28, %v1283_v13 }
 0x1ac   : > { %v1300_v29 = vmul.f32 %v1298_v14, %v1293_v17 }
 0x1ae   : > { %v1302_v30 = vsel %vm1301_vm4, %v1300_v29, 0.0 }
 0x1af   : > { %v1303_v31 = vrot.slane %v1302_v30, 4 }
 0x1b1   : > { %v1304_v32 = vadd.f32 %v1303_v31, %v1302_v30 }
 0x1b3   : > { %v1305_v33 = vrot.slane %v1304_v32, 2 }
 0x1b5   : > { %v1306_v18 = vadd.f32 %v1305_v33, %v1304_v32 }
 0x1b7   : > { %v1307_v34 = vrot.slane %v1306_v18, 1 }
 0x1b9   : > { %v1308_v36 = vadd.f32 %v1307_v34, %v1306_v18 }
 0x1bb   : > { %v1310_v37 = vmul.f32 0.25, %v1308_v36 }
 0x1bd   : > { %v1311_v44 = vsub.f32 %v1300_v29, %v1310_v37 }
 0x1bf   : > { %v1312_v45 = vmul.f32 %v1311_v44, %v1311_v44 }
 0x1c1   : > { %v1313_v35 = vsel %vm1301_vm4, %v1312_v45, 0.0 }
 0x1c2   : > { %v1314_v38 = vrot.slane %v1313_v35, 4 }
 0x1c4   : > { %v1315_v39 = vadd.f32 %v1314_v38, %v1313_v35 }
 0x1c6   : > { %v1316_v40 = vrot.slane %v1315_v39, 2 }
 0x1c8   : > { %v1317_v41 = vadd.f32 %v1316_v40, %v1315_v39 }
 0x1ca   : > { %v1318_v42 = vrot.slane %v1317_v41, 1 }
 0x1cc   : > { %v1319_v43 = vadd.f32 %v1318_v42, %v1317_v41 }
 0x1ce   : > { %v1320_v47 = vmul.f32 0.25, %v1319_v43 }
 0x1d0   : > { %v1321_v49 = vadd.f32 1e-05, %v1320_v47 }
 0x1d2   : > { %1789 = vrsqrt.f32 %v1321_v49 }
 0x1dc   : > { %v1790_v50 = vpop.eup %1789 }
 0x1dd   : > { %v1323_v51 = vmul.f32 %v1790_v50, %v1311_v44 }
 0x1df   : > { %v1324_v52 = vmul.f32 0.2, %v1323_v51 }
 0x1e1   : > { %v1325_v53 = vmax.f32 %v1323_v51, %v1324_v52 }
 0x1e3   : > { %1326 = vst.msk [vmem:[%s236_s8] sm:$0xf] %vm1301_vm4, %v1325_v53 }
 0x1e4 PF: > { %s15_s18 = sadd.s32 1, %s1797_s18  }
 0x1e5   : > { %p12_p4 = scmp.ge.s32.totalorder %s15_s18, 4  }
 0x1e7   :  { %14 = sbr.rel (!%p12_p4) target bundleno = 1 (0x1), region = 73 }

// kernel: deep_interpolator_forward.17
= control target key start
LH: loop header
LB: loop body
LE: loop exit
PB: predicated region body
PF: predicated region fallthrough
CT: control target
= control target key end

     0   :  { %s1584_s18 = smov 0   ;;  %s1703_s0 = inlined_call_operand.vmem [shape: f32[2,2,16], index: 0, kind: input, shape index: {}]   ;;  %s1704_s1 = inlined_call_operand.vmem [shape: f32[2,2,1], index: 1, kind: input, shape index: {}]   ;;  %s1705_s2 = inlined_call_operand.vmem [shape: f32[16,64], index: 2, kind: input, shape index: {}]   ;;  %s1706_s3 = inlined_call_operand.vmem [shape: f32[16,32], index: 3, kind: input, shape index: {}]   ;;  %s1707_s4 = inlined_call_operand.vmem [shape: f32[1,32], index: 4, kind: input, shape index: {}]   ;;  %s1708_s5 = inlined_call_operand.vmem [shape: f32[2,2,64], index: 5, kind: output, shape index: {}]  }
   0x1 LB: > { %s1336_s19 = sadd.s32 4294967295, %s1546_s18   ;;  %p1340_p0 = scmp.ge.s32.totalorder %s1546_s18, 1  ;;  %s1546_s18 = sphi %s1584_s18, %s15_s18  }
   0x2   : > { %p195_p1 = scmp.lt.s32.totalorder %s1546_s18, 3 }
   0x4   : > { %p196_p2 = pnand %p1340_p0, %p195_p1 }
   0x5   : > { %v709_v0 = vld [vmem:[%s1706_s3] sm:$0xff] (!%p196_p2)  ;;  %v710_v1 = vld [vmem:[%s1706_s3 + $0x8] sm:$0xff] (!%p196_p2)  ;;  %p225_p3 = scmp.lt.s32.totalorder (!%p196_p2), %s1336_s19, 1  ;;  %v1548_v2 = vmov (!%p196_p2), 0.0|0.0   ;;  %vm1549_vm0 = vmmov (!%p196_p2), 0   ;;  %v1550_v5 = vmov (!%p196_p2), 0.0  }
   0x6   : > { %199 = sbr.rel (%p196_p2) target bundleno = 927 (0x39f), region = 40  ;;  %1485 = vmatprep.subr.bf16.mxu1 (!%p196_p2), %v1548_v2  ;;  %v715_v3 = vand.u32 (!%p196_p2), 4294901760, %v709_v0  ;;  %v718_v4 = vand.u32 (!%p196_p2), 4294901760, %v710_v1  ;;  %1429 = vmatprep.mubr.msk.f32.mxu1 (!%p196_p2), %vm1549_vm0, %v1550_v5  ;;  %v240_v6 = vld [vmem:[%s1705_s2] sm:$0xff] (!%p196_p2)  ;;  %v241_v7 = vld [vmem:[%s1705_s2 + $0x8] sm:$0xff] (!%p196_p2)  ;;  %v1551_v13 = vmov (!%p196_p2), 0  }
   0x7   : > { %1467 = vmatprep.subr.bf16.mxu0 (!%p196_p2), %v1548_v2  ;;  %v247_v8 = vand.u32 (!%p196_p2), 4294901760, %v240_v6  ;;  %v250_v9 = vand.u32 (!%p196_p2), 4294901760, %v241_v7  ;;  %1387 = vmatprep.mubr.msk.f32.mxu0 (!%p196_p2), %vm1549_vm0, %v1550_v5  ;;  %vm707_vm1 = vcmask (!%p196_p2), 1040384   ;;  %vm242_vm2 = vcmask (!%p196_p2), 130048   ;;  %v1344_v51 = vld [vmem:[%s1707_s4] ss:$0 sm:$0xff] (!%p196_p2) }
   0x8   : > { %v1610_v10 = vpack.c.bf16 (!%p196_p2), %v718_v4, %v715_v3  ;;  %v1612_v11 = vsub.f32 (!%p196_p2), %v709_v0, %v715_v3  ;;  %v1614_v12 = vsub.f32 (!%p196_p2), %v710_v1, %v718_v4  ;;  %1537 = vset.pattern.permute.xlu0 (!%p196_p2), %v1551_v13  ;;  %s1552_s12 = smov (!%p196_p2), 32   ;;  %vm1204_vm3 = vcmask (!%p196_p2), 517376   ;;  %s1553_s13 = smov (!%p196_p2), 96  }
   0x9   : > { %v1618_v14 = vpack.c.bf16 (!%p196_p2), %v250_v9, %v247_v8  ;;  %v1620_v15 = vsub.f32 (!%p196_p2), %v240_v6, %v247_v8  ;;  %v1622_v16 = vsub.f32 (!%p196_p2), %v241_v7, %v250_v9  ;;  %1191 = vrot.lane.b32.xlu1 (!%p196_p2), %v1344_v51, %s1552_s12  ;;  %vm1196_vm4 = vcmask (!%p196_p2), 254976  }
   0xa   : > { %1487 = vmatpush3.bf16.msra.mxu1 (!%p196_p2), %v1610_v10  ;;  %v794_v17 = vand.u32 (!%p196_p2), 4294901760, %v1612_v11  ;;  %v801_v18 = vand.u32 (!%p196_p2), 4294901760, %v1614_v12  ;;  %v1492_v48 = vpack.c.bf16 (!%p196_p2), %v1614_v12, %v1612_v11  ;;  %vm1267_vm5 = vcmask (!%p196_p2), 261120  }
   0xb   : > { %1488 = vmatprep.subr.bf16.mxu1 (!%p196_p2), %v1548_v2  ;;  %1469 = vmatpush3.bf16.msra.mxu0 (!%p196_p2), %v1618_v14  ;;  %v326_v20 = vand.u32 (!%p196_p2), 4294901760, %v1620_v15  ;;  %v333_v21 = vand.u32 (!%p196_p2), 4294901760, %v1622_v16  ;;  %v1474_v47 = vpack.c.bf16 (!%p196_p2), %v1622_v16, %v1620_v15  ;;  %vm1269_vm6 = vcmask (!%p196_p2), 517120  }
   0xc   : > { %1470 = vmatprep.subr.bf16.mxu0 (!%p196_p2), %v1548_v2  ;;  %v795_v30 = vsub.f32 (!%p196_p2), %v1612_v11, %v794_v17  ;;  %v802_v31 = vsub.f32 (!%p196_p2), %v1614_v12, %v801_v18  ;;  %v1498_v50 = vpack.c.bf16 (!%p196_p2), %v801_v18, %v794_v17  ;;  %v1219_v12 = vlaneseq (!%p196_p2) }
   0xd   : > { %s1710_s19 = smov (!%p225_p3, %s1336_s19), 1  ;;  %v327_v25 = vsub.f32 %v1620_v15, %v326_v20  ;;  %v334_v26 = vsub.f32 %v1622_v16, %v333_v21  ;;  %v1480_v49 = vpack.c.bf16 %v333_v21, %v326_v20 }
   0xe   : > { %s1616_s28 = sshll.u32 %s1710_s19, 1  ;;  %v796_v38 = vand.u32 4294901760, %v795_v30  ;;  %v803_v39 = vand.u32 4294901760, %v802_v31 }
   0xf   : > { %s228_s6 = scalar_lea.vmem %s1703_s0, %s1616_s28  ;;  %s232_s9 = scalar_lea.vmem %s1704_s1, %s1616_s28  ;;  %v328_v34 = vand.u32 4294901760, %v327_v25  ;;  %v335_v35 = vand.u32 4294901760, %v334_v26 }
  0x10   : > { %v237_v19 = vld [vmem:[%s228_s6] sm:$0x3]  ;;  %v1489_v45 = vpack.c.bf16 %v803_v39, %v796_v38  ;;  %s236_s16 = scalar_lea.vmem %s1708_s5, %s1616_s28 }
  0x11   : > { %v238_v22 = vld [vmem:[%s232_s9] sm:$0x3]  ;;  %v705_v23 = vrot.slane %v237_v19, 1  ;;  %v244_v24 = vsel %vm242_vm2, %v237_v19, 0  ;;  %v1471_v42 = vpack.c.bf16 %v335_v35, %v328_v34 }
  0x12   : > { %1182 = vperm.xlu0 %1537, %v238_v22   ;;  %v313_v28 = vand.u32 4294901760, %v244_v24 }
  0x13   : > { %v708_v27 = vsel %vm707_vm1, %v705_v23, 0.0 }
  0x14   : > { %v712_v29 = vsel %vm242_vm2, %v708_v27, 0  ;;  %v314_v33 = vsub.f32 %v244_v24, %v313_v28 }
  0x15   : > { %v781_v32 = vand.u32 4294901760, %v712_v29 }
  0x16   : > { %v315_v37 = vand.u32 4294901760, %v314_v33 }
  0x17   : > { %v782_v36 = vsub.f32 %v712_v29, %v781_v32 }
  0x18   : > { %v316_v41 = vsub.f32 %v314_v33, %v315_v37 }
  0x19   : > { %v783_v40 = vand.u32 4294901760, %v782_v36 }
  0x1a   : > { %v317_v44 = vand.u32 4294901760, %v316_v41 }
  0x1b   : > { %v784_v43 = vsub.f32 %v782_v36, %v783_v40 }
  0x1c   : > { %1388 = vmatmul.mubr.f32.vlgmr.msra.gmra.mrb[0].mxu0 %v317_v44 }
  0x1d   : > { %v785_v46 = vand.u32 4294901760, %v784_v43  ;;  %1472 = vmatpush3.bf16.msra.mxu0 %v1471_v42  ;;  %1394 = vmatprep.mubr.msk.f32.mxu0 %vm1549_vm0, %v1550_v5 }
  0x1e   : > { %1473 = vmatprep.subr.bf16.mxu0 %v1548_v2 }
  0x1f   : > { %1430 = vmatmul.mubr.f32.vlgmr.msra.gmra.mrb[0].mxu1 %v785_v46 }
  0x20   : > { %1490 = vmatpush3.bf16.msra.mxu1 %v1489_v45  ;;  %1436 = vmatprep.mubr.msk.f32.mxu1 %vm1549_vm0, %v1550_v5 }
  0x21   : > { %1491 = vmatprep.subr.bf16.mxu1 %v1548_v2 }
  0x24   : > { %1395 = vmatmul.mubr.f32.vlgmr.msra.gmra.mrb[0].mxu0 %v313_v28 }
  0x25   : > { %1475 = vmatpush3.bf16.msra.mxu0 %v1474_v47  ;;  %1401 = vmatprep.mubr.msk.f32.mxu0 %vm1549_vm0, %v1550_v5 }
  0x26   : > { %1476 = vmatprep.subr.bf16.mxu0 %v1548_v2 }
  0x27   : > { %1437 = vmatmul.mubr.f32.vlgmr.msra.gmra.mrb[0].mxu1 %v781_v32 }
  0x28   : > { %1493 = vmatpush3.bf16.msra.mxu1 %v1492_v48  ;;  %1443 = vmatprep.mubr.msk.f32.mxu1 %vm1549_vm0, %v1550_v5 }
  0x29   : > { %1494 = vmatprep.subr.bf16.mxu1 %v1548_v2 }
  0x2c   : > { %1402 = vmatmul.mubr.f32.vlgmr.msra.gmra.mrb[0].mxu0 %v314_v33 }
  0x2d   : > { %1478 = vmatpush3.bf16.msra.mxu0 %v1618_v14  ;;  %1408 = vmatprep.mubr.msk.f32.mxu0 %vm1549_vm0, %v1550_v5 }
  0x2e   : > { %1479 = vmatprep.subr.bf16.mxu0 %v1548_v2 }
  0x2f   : > { %1444 = vmatmul.mubr.f32.vlgmr.msra.gmra.mrb[0].mxu1 %v782_v36 }
  0x30   : > { %1496 = vmatpush3.bf16.msra.mxu1 %v1610_v10  ;;  %1450 = vmatprep.mubr.msk.f32.mxu1 %vm1549_vm0, %v1550_v5 }
  0x31   : > { %1497 = vmatprep.subr.bf16.mxu1 %v1548_v2 }
  0x34   : > { %1409 = vmatmul.mubr.f32.vlgmr.msra.gmra.mrb[0].mxu0 %v315_v37 }
  0x35   : > { %1481 = vmatpush3.bf16.msra.mxu0 %v1480_v49  ;;  %1415 = vmatprep.mubr.msk.f32.mxu0 %vm1549_vm0, %v1550_v5 }
  0x36   : > { %1482 = vmatprep.subr.bf16.mxu0 %v1548_v2 }
  0x37   : > { %1451 = vmatmul.mubr.f32.vlgmr.msra.gmra.mrb[0].mxu1 %v783_v40 }
  0x38   : > { %1499 = vmatpush3.bf16.msra.mxu1 %v1498_v50  ;;  %1457 = vmatprep.mubr.msk.f32.mxu1 %vm1549_vm0, %v1550_v5 }
  0x39   : > { %1500 = vmatprep.subr.bf16.mxu1 %v1548_v2 }
  0x3c   : > { %1416 = vmatmul.mubr.f32.vlgmr.msra.gmra.mrb[0].mxu0 %v313_v28 }
  0x3d   : > { %1484 = vmatpush3.bf16.msra.mxu0 %v1618_v14  ;;  %1422 = vmatprep.mubr.msk.f32.mxu0 %vm1549_vm0, %v1550_v5  ;;  %v1220_v14 = vshrl.u32 %v1219_v12, 7 }
  0x3f   : > { %1458 = vmatmul.mubr.f32.vlgmr.msra.gmra.mrb[0].mxu1 %v781_v32  ;;  %v1221_v17 = vsub.s32 0, %v1220_v14 }
  0x40   : > { %1502 = vmatpush3.bf16.msra.mxu1 %v1610_v10  ;;  %1464 = vmatprep.mubr.msk.f32.mxu1 %vm1549_vm0, %v1550_v5 }
  0x44   : > { %1423 = vmatmul.mubr.f32.vlgmr.msra.gmra.mrb[0].mxu0 %v313_v28 }
  0x47   : > { %1465 = vmatmul.mubr.f32.vlgmr.msra.gmra.mrb[0].mxu1 %v781_v32 }
  0x7b   : > { %v1192_v58 = vpop.permute.xlu1 %1191 }
  0x91   : > { %v1183_v56 = vpop.permute.xlu0 %1182 }
 0x117   : > { %v701_v52 = vpop.f32.mrb[0].mxu0 }
 0x118   : > { %v1424_v53 = vpop.f32.mrb[1].mxu0  ;;  %v1179_v5 = vadd.f32 %v1344_v51, %v701_v52 }
 0x11a   : > { %v1169_v54 = vpop.f32.mrb[0].mxu1  ;;  %v1185_v6 = vmul.f32 %v1183_v56, %v1179_v5 }
 0x11b   : > { %1187 = vrot.lane.b32.xlu0 %v1169_v54, %s1552_s12  ;;  %v1466_v55 = vpop.f32.mrb[1].mxu1 }
 0x11c   : > { %v1197_v7 = vsel %vm1196_vm4, %v1185_v6, 0.0 }
 0x11d   : > { %v1198_v8 = vrot.slane %v1197_v7, 4 }
 0x11f   : > { %v1199_v9 = vadd.f32 %v1198_v8, %v1197_v7 }
 0x121   : > { %v1200_v10 = vrot.slane %v1199_v9, 2 }
 0x123   : > { %v1201_v11 = vadd.f32 %v1200_v10, %v1199_v9 }
 0x125   : > { %v1202_v13 = vrot.slane %v1201_v11, 1 }
 0x127   : > { %v1203_v15 = vadd.f32 %v1202_v13, %v1201_v11 }
 0x18d   : > { %v1188_v57 = vpop.permute.xlu0 %1187 }
 0x18e   : > { %v1190_v59 = vadd.f32 %v1188_v57, %v701_v52 }
 0x190   : > { %v1194_v60 = vadd.f32 %v1192_v58, %v1190_v59 }
 0x192   : > { %v1195_v61 = vmul.f32 %v1194_v60, %v1183_v56 }
 0x194   : > { %v1205_v62 = vsel %vm1204_vm3, %v1195_v61, 0.0 }
 0x195   : > { %v1206_v63 = vrot.slane %v1205_v62, 4 }
 0x197   : > { %v1207_v0 = vadd.f32 %v1206_v63, %v1205_v62 }
 0x199   : > { %v1208_v1 = vrot.slane %v1207_v0, 2 }
 0x19b   : > { %v1209_v2 = vadd.f32 %v1208_v1, %v1207_v0 }
 0x19d   : > { %v1210_v3 = vrot.slane %v1209_v2, 1 }
 0x19f   : > { %v1211_v4 = vadd.f32 %v1210_v3, %v1209_v2 }
 0x1a1   : > { %1213 = vrot.lane.b32.xlu1 %v1211_v4, %s1553_s13 }
 0x213   : > { %v1214_v16 = vpop.permute.xlu1 %1213 }
 0x214   : > { %v1216_v18 = vadd.f32 %v1214_v16, %v1203_v15 }
 0x216   : > { %v1218_v19 = vmul.f32 0.25, %v1216_v18 }
 0x218   : > { %v1222_v20 = vrot.slane %v1218_v19, %v1221_v17 }
 0x21a   : > { %1225 = vrot.lane.b32.xlu0 %v1222_v20, %s1552_s12  ;;  %v1223_v31 = vsub.f32 %v1185_v6, %v1222_v20 }
 0x21c   : > { %v1229_v32 = vmul.f32 %v1223_v31, %v1223_v31 }
 0x21e   : > { %v1230_v33 = vsel %vm1196_vm4, %v1229_v32, 0.0 }
 0x21f   : > { %v1231_v34 = vrot.slane %v1230_v33, 4 }
 0x221   : > { %v1232_v35 = vadd.f32 %v1231_v34, %v1230_v33 }
 0x223   : > { %v1233_v36 = vrot.slane %v1232_v35, 2 }
 0x225   : > { %v1234_v37 = vadd.f32 %v1233_v36, %v1232_v35 }
 0x227   : > { %v1235_v38 = vrot.slane %v1234_v37, 1 }
 0x229   : > { %v1236_v39 = vadd.f32 %v1235_v38, %v1234_v37 }
 0x28c   : > { %v1226_v21 = vpop.permute.xlu0 %1225 }
 0x28d   : > { %v1228_v22 = vsub.f32 %v1195_v61, %v1226_v21 }
 0x28f   : > { %v1237_v23 = vmul.f32 %v1228_v22, %v1228_v22 }
 0x291   : > { %v1238_v24 = vsel %vm1204_vm3, %v1237_v23, 0.0 }
 0x292   : > { %v1239_v25 = vrot.slane %v1238_v24, 4 }
 0x294   : > { %v1240_v26 = vadd.f32 %v1239_v25, %v1238_v24 }
 0x296   : > { %v1241_v27 = vrot.slane %v1240_v26, 2 }
 0x298   : > { %v1242_v28 = vadd.f32 %v1241_v27, %v1240_v26 }
 0x29a   : > { %v1243_v29 = vrot.slane %v1242_v28, 1 }
 0x29c   : > { %v1244_v30 = vadd.f32 %v1243_v29, %v1242_v28 }
 0x29e   : > { %1246 = vrot.lane.b32.xlu1 %v1244_v30, %s1553_s13 }
 0x310   : > { %v1247_v40 = vpop.permute.xlu1 %1246 }
 0x311   : > { %v1249_v41 = vadd.f32 %v1247_v40, %v1236_v39 }
 0x313   : > { %v1250_v42 = vmul.f32 0.25, %v1249_v41 }
 0x315   : > { %v1251_v43 = vadd.f32 1e-05, %v1250_v42 }
 0x317   : > { %1538 = vrsqrt.f32 %v1251_v43 }
 0x321   : > { %v1539_v44 = vpop.eup %1538 }
 0x322   : > { %v1256_v45 = vrot.slane %v1539_v44, %v1221_v17 }
 0x324   : > { %1261 = vrot.lane.b32.xlu0 %v1256_v45, %s1552_s12  ;;  %v1257_v46 = vmul.f32 %v1256_v45, %v1223_v31 }
 0x326   : > { %v1258_v48 = vmul.f32 0.2, %v1257_v46 }
 0x328   : > { %v1259_v51 = vmax.f32 %v1257_v46, %v1258_v48 }
 0x396   : > { %v1262_v47 = vpop.permute.xlu0 %1261 }
 0x397   : > { %v1264_v49 = vmul.f32 %v1262_v47, %v1228_v22 }
 0x399   : > { %v1265_v50 = vmul.f32 0.2, %v1264_v49 }
 0x39b   : > { %v1266_v52 = vmax.f32 %v1264_v49, %v1265_v50 }
 0x39d   : > { %v1268_v53 = vsel %vm1267_vm5, %v1259_v51, %v1266_v52 }
 0x39e   : > { %1270 = vst.msk [vmem:[%s236_s16] sm:$0x3] %vm1269_vm6, %v1268_v53 }
 0x39f PF: > { %s15_s18 = sadd.s32 1, %s1546_s18  }
 0x3a0   : > { %p12_p4 = scmp.ge.s32.totalorder %s15_s18, 4  }
 0x3a2   :  { %14 = sbr.rel (!%p12_p4) target bundleno = 1 (0x1), region = 73 }

// kernel: deep_interpolator_forward.15
= control target key start
LH: loop header
LB: loop body
LE: loop exit
PB: predicated region body
PF: predicated region fallthrough
CT: control target
= control target key end

     0   :  { %s2323_s18 = smov 0   ;;  %s2940_s0 = inlined_call_operand.vmem [shape: f32[2,2,128], index: 0, kind: input, shape index: {}]   ;;  %s2941_s1 = inlined_call_operand.vmem [shape: f32[2,2,1], index: 1, kind: input, shape index: {}]   ;;  %s2942_s2 = inlined_call_operand.vmem [shape: f32[128,16], index: 2, kind: input, shape index: {}]   ;;  %s2943_s3 = inlined_call_operand.vmem [shape: f32[64,16], index: 3, kind: input, shape index: {}]   ;;  %s2944_s4 = inlined_call_operand.vmem [shape: f32[1,16], index: 4, kind: input, shape index: {}]   ;;  %s2945_s5 = inlined_call_operand.vmem [shape: f32[2,2,16], index: 5, kind: output, shape index: {}]  }
   0x1 LB: > { %s1557_s19 = sadd.s32 4294967295, %s2286_s18   ;;  %p1561_p0 = scmp.ge.s32.totalorder %s2286_s18, 1  ;;  %s2286_s18 = sphi %s2323_s18, %s15_s18  }
   0x2   : > { %p195_p1 = scmp.lt.s32.totalorder %s2286_s18, 3 }
   0x4   : > { %p196_p2 = pnand %p1561_p0, %p195_p1 }
   0x5   : > { %p225_p3 = scmp.lt.s32.totalorder (!%p196_p2), %s1557_s19, 1  ;;  %v261_v0 = vld [vmem:[%s2943_s3] sm:$0xff] (!%p196_p2)  ;;  %v262_v1 = vld [vmem:[%s2943_s3 + $0x8] sm:$0xff] (!%p196_p2)  ;;  %v263_v2 = vld [vmem:[%s2943_s3 + $0x10] sm:$0xff] (!%p196_p2)  ;;  %v2288_v3 = vmov (!%p196_p2), 0.0|0.0   ;;  %s2289_s15 = smov (!%p196_p2), 64  }
   0x6   : > { %199 = sbr.rel (%p196_p2) target bundleno = 548 (0x224), region = 40  ;;  %2060 = vmatprep.subr.bf16.mxu1 (!%p196_p2), %v2288_v3  ;;  %v274_v4 = vand.u32 (!%p196_p2), 4294901760, %v261_v0  ;;  %v277_v5 = vand.u32 (!%p196_p2), 4294901760, %v262_v1  ;;  %v264_v6 = vld [vmem:[%s2943_s3 + $0x18] sm:$0xff] (!%p196_p2)  ;;  %v280_v7 = vand.u32 (!%p196_p2), 4294901760, %v263_v2  ;;  %2048 = vmatprep.subr.bf16.mxu0 (!%p196_p2), %v2288_v3  ;;  %v265_v8 = vld [vmem:[%s2943_s3 + $0x20] sm:$0xff] (!%p196_p2) }
   0x7   : > { %v266_v9 = vld [vmem:[%s2943_s3 + $0x28] sm:$0xff] (!%p196_p2)  ;;  %v283_v10 = vand.u32 (!%p196_p2), 4294901760, %v264_v6  ;;  %v286_v11 = vand.u32 (!%p196_p2), 4294901760, %v265_v8  ;;  %v267_v20 = vld [vmem:[%s2943_s3 + $0x30] sm:$0xff] (!%p196_p2)  ;;  %v268_v29 = vld [vmem:[%s2943_s3 + $0x38] sm:$0xff] (!%p196_p2)  ;;  %vm2290_vm0 = vmmov (!%p196_p2), 0  }
   0x8   : > { %v289_v12 = vand.u32 (!%p196_p2), 4294901760, %v266_v9  ;;  %v2351_v13 = vsub.f32 (!%p196_p2), %v261_v0, %v274_v4  ;;  %v2353_v14 = vsub.f32 (!%p196_p2), %v262_v1, %v277_v5  ;;  %v2355_v15 = vsub.f32 (!%p196_p2), %v263_v2, %v280_v7 }
   0x9   : > { %v2357_v16 = vpack.c.bf16 (!%p196_p2), %v277_v5, %v274_v4  ;;  %v2361_v17 = vsub.f32 (!%p196_p2), %v264_v6, %v283_v10  ;;  %v2363_v18 = vsub.f32 (!%p196_p2), %v265_v8, %v286_v11  ;;  %v2378_v24 = vpack.c.bf16 (!%p196_p2), %v283_v10, %v280_v7 }
   0xa   : > { %v2365_v19 = vsub.f32 (!%p196_p2), %v266_v9, %v289_v12  ;;  %v359_v21 = vand.u32 (!%p196_p2), 4294901760, %v2351_v13  ;;  %v366_v22 = vand.u32 (!%p196_p2), 4294901760, %v2353_v14  ;;  %v373_v23 = vand.u32 (!%p196_p2), 4294901760, %v2355_v15 }
   0xb   : > { %2050 = vmatpush3.bf16.msra.mxu0 (!%p196_p2), %v2357_v16  ;;  %v380_v26 = vand.u32 (!%p196_p2), 4294901760, %v2361_v17  ;;  %v387_v27 = vand.u32 (!%p196_p2), 4294901760, %v2363_v18  ;;  %v292_v33 = vand.u32 (!%p196_p2), 4294901760, %v267_v20  ;;  %v295_v40 = vand.u32 (!%p196_p2), 4294901760, %v268_v29 }
   0xc   : > { %v394_v28 = vand.u32 (!%p196_p2), 4294901760, %v2365_v19  ;;  %2051 = vmatprep.subr.bf16.mxu0 (!%p196_p2), %v2288_v3  ;;  %v360_v31 = vsub.f32 (!%p196_p2), %v2351_v13, %v359_v21  ;;  %v367_v32 = vsub.f32 (!%p196_p2), %v2353_v14, %v366_v22  ;;  %v374_v34 = vsub.f32 (!%p196_p2), %v2355_v15, %v373_v23 }
   0xd   : > { %s2959_s19 = smov (!%p225_p3, %s1557_s19), 1  ;;  %v381_v35 = vsub.f32 %v2361_v17, %v380_v26  ;;  %v388_v36 = vsub.f32 %v2363_v18, %v387_v27  ;;  %v2400_v44 = vsub.f32 %v267_v20, %v292_v33  ;;  %v2402_v45 = vsub.f32 %v268_v29, %v295_v40  ;;  %v2486_v20 = vld [vmem:[%s2942_s2 + $0x20] sm:$0xff] }
   0xe   : > { %s2359_s7 = sshll.u32 %s2959_s19, 1  ;;  %v395_v37 = vsub.f32 %v2365_v19, %v394_v28  ;;  %v361_v38 = vand.u32 4294901760, %v360_v31  ;;  %v368_v39 = vand.u32 4294901760, %v367_v32  ;;  %v375_v41 = vand.u32 4294901760, %v374_v34  ;;  %v2518_v31 = vld [vmem:[%s2942_s2 + $0x38] sm:$0xff] }
   0xf   : > { %s228_s12 = scalar_lea.vmem %s2940_s0, %s2359_s7  ;;  %2053 = vmatpush3.bf16.msra.mxu0 %v2378_v24  ;;  %v382_v42 = vand.u32 4294901760, %v381_v35  ;;  %v389_v46 = vand.u32 4294901760, %v388_v36  ;;  %v2404_v48 = vpack.c.bf16 %v289_v12, %v286_v11  ;;  %v401_v50 = vand.u32 4294901760, %v2400_v44  ;;  %s232_s28 = scalar_lea.vmem %s2941_s1, %s2359_s7 }
  0x10   : > { %v2380_v25 = vld [vmem:[%s228_s12] sm:$0x3]  ;;  %2054 = vmatprep.subr.bf16.mxu0 %v2288_v3  ;;  %v2061_v43 = vpack.c.bf16 %v368_v39, %v361_v38  ;;  %v396_v47 = vand.u32 4294901760, %v395_v37  ;;  %v408_v51 = vand.u32 4294901760, %v2402_v45  ;;  %v2291_v52 = vmov 0.0   ;;  %s236_s9 = scalar_lea.vmem %s2945_s5, %s2359_s7 }
  0x11   : > { %v255_v30 = vrot.slane %v2380_v25, 7  ;;  %v2064_v49 = vpack.c.bf16 %v382_v42, %v375_v41  ;;  %1759 = vmatprep.mubr.msk.f32.mxu1 %vm2290_vm0, %v2291_v52  ;;  %v2073_v53 = vpack.c.bf16 %v2353_v14, %v2351_v13  ;;  %v2414_v54 = vpack.c.bf16 %v295_v40, %v292_v33  ;;  %1740 = vmatprep.mubr.msk.f32.mxu0 %vm2290_vm0, %v2291_v52  ;;  %v2459_v13 = vld [vmem:[%s2942_s2] sm:$0xff]  ;;  %v2464_v14 = vld [vmem:[%s2942_s2 + $0x8] sm:$0xff] }
  0x12   : > { %2062 = vmatpush3.bf16.msra.mxu1 %v2061_v43  ;;  %v2076_v55 = vpack.c.bf16 %v2361_v17, %v2355_v15  ;;  %v402_v56 = vsub.f32 %v2400_v44, %v401_v50  ;;  %v409_v57 = vsub.f32 %v2402_v45, %v408_v51  ;;  %v2079_v58 = vpack.c.bf16 %v2365_v19, %v2363_v18  ;;  %v2474_v18 = vld [vmem:[%s2942_s2 + $0x10] sm:$0xff]  ;;  %v2479_v19 = vld [vmem:[%s2942_s2 + $0x18] sm:$0xff]  ;;  %v2564_v43 = vld [vmem:[%s2942_s2 + $0x40] sm:$0xff] }
  0x13   : > { %256 = vrot.lane.b32.xlu0 %v255_v30, %s2289_s15  ;;  %2063 = vmatprep.subr.bf16.mxu1 %v2288_v3  ;;  %v2067_v59 = vpack.c.bf16 %v396_v47, %v389_v46  ;;  %v2082_v62 = vpack.c.bf16 %v2402_v45, %v2400_v44  ;;  %v2431_v0 = vpack.c.bf16 %v366_v22, %v359_v21  ;;  %vm259_vm1 = vcmask 1040384   ;;  %v2491_v21 = vld [vmem:[%s2942_s2 + $0x28] sm:$0xff]  ;;  %v2513_v30 = vld [vmem:[%s2942_s2 + $0x30] sm:$0xff] }
  0x14   : > { %2056 = vmatpush3.bf16.msra.mxu0 %v2404_v48  ;;  %v403_v60 = vand.u32 4294901760, %v402_v56  ;;  %v410_v61 = vand.u32 4294901760, %v409_v57  ;;  %v2436_v1 = vpack.c.bf16 %v380_v26, %v373_v23  ;;  %v2438_v2 = vpack.c.bf16 %v394_v28, %v387_v27  ;;  %v2599_v57 = vld [vmem:[%s2942_s2 + $0x50] sm:$0xff] }
  0x15   : > { %2057 = vmatprep.subr.bf16.mxu0 %v2288_v3  ;;  %v2440_v4 = vpack.c.bf16 %v408_v51, %v401_v50  ;;  %vm269_vm2 = vcmask 523264   ;;  %v811_v15 = vand.u32 4294901760, %v2459_v13  ;;  %v814_v17 = vand.u32 4294901760, %v2464_v14 }
  0x16   : > { %2065 = vmatpush3.bf16.msra.mxu1 %v2064_v49  ;;  %v2070_v63 = vpack.c.bf16 %v410_v61, %v403_v60  ;;  %v817_v26 = vand.u32 4294901760, %v2474_v18  ;;  %v820_v27 = vand.u32 4294901760, %v2479_v19  ;;  %v823_v28 = vand.u32 4294901760, %v2486_v20 }
  0x17   : > { %2066 = vmatprep.subr.bf16.mxu1 %v2288_v3  ;;  %v2497_v22 = vsub.f32 %v2459_v13, %v811_v15  ;;  %v2502_v23 = vsub.f32 %v2464_v14, %v814_v17  ;;  %v826_v29 = vand.u32 4294901760, %v2491_v21  ;;  %v829_v37 = vand.u32 4294901760, %v2513_v30 }
  0x18   : > { %2059 = vmatpush3.bf16.msra.mxu0 %v2414_v54  ;;  %v2526_v34 = vsub.f32 %v2474_v18, %v817_v26  ;;  %v2531_v35 = vsub.f32 %v2479_v19, %v820_v27  ;;  %v832_v38 = vand.u32 4294901760, %v2518_v31  ;;  %v835_v49 = vand.u32 4294901760, %v2564_v43 }
  0x19   : > { %2072 = vmatprep.subr.bf16.mxu0 %v2288_v3  ;;  %v904_v32 = vand.u32 4294901760, %v2497_v22  ;;  %v911_v33 = vand.u32 4294901760, %v2502_v23  ;;  %v2545_v36 = vsub.f32 %v2491_v21, %v826_v29  ;;  %v2578_v46 = vsub.f32 %v2513_v30, %v829_v37 }
  0x1a   : > { %2068 = vmatpush3.bf16.msra.mxu1 %v2067_v59  ;;  %v918_v41 = vand.u32 4294901760, %v2526_v34  ;;  %v925_v42 = vand.u32 4294901760, %v2531_v35  ;;  %v2583_v47 = vsub.f32 %v2518_v31, %v832_v38  ;;  %v2772_v30 = vand.u32 4294901760, %v2380_v25 }
  0x1b   : > { %2069 = vmatprep.subr.bf16.mxu1 %v2288_v3  ;;  %v905_v39 = vsub.f32 %v2497_v22, %v904_v32  ;;  %v912_v40 = vsub.f32 %v2502_v23, %v911_v33  ;;  %v2948_v45 = vand.u32 4294901760, %v2545_v36  ;;  %v2947_v60 = vand.u32 4294901760, %v2578_v46 }
  0x1c   : > { %v926_v56 = vsub.f32 %v2531_v35, %v925_v42  ;;  %v2946_v61 = vand.u32 4294901760, %v2583_v47  ;;  %vm1466_vm3 = vcmask 123904  }
  0x1d   : > { %v906_v51 = vand.u32 4294901760, %v905_v39  ;;  %v940_v59 = vsub.f32 %v2545_v36, %v2948_v45 }
  0x1e   : > { %2071 = vmatpush3.bf16.msra.mxu1 %v2070_v63  ;;  %v954_v39 = vsub.f32 %v2583_v47, %v2946_v61  ;;  %v2671_v61 = vld [vmem:[%s2942_s2 + $0x70] sm:$0xff] }
  0x1f   : > { %2084 = vmatprep.subr.bf16.mxu1 %v2288_v3 }
  0x85   : > { %v257_v5 = vpop.permute.xlu0 %256 }
  0x86   : > { %v260_v6 = vsel %vm259_vm1, 0.0, %v257_v5 }
  0x87   : > { %v271_v7 = vsel %vm269_vm2, %v260_v6, 0 }
  0x88   : > { %v2442_v8 = vand.u32 4294901760, %v271_v7 }
  0x8a   : > { %v2445_v9 = vsub.f32 %v271_v7, %v2442_v8  ;;  %1760 = vmatmul.mubr.f32.vlgmr.msra.gmra.mrb[0].mxu1 %v2442_v8 }
  0x8b   : > { %2086 = vmatpush3.bf16.msra.mxu1 %v2357_v16  ;;  %1797 = vmatprep.mubr.msk.f32.mxu1 %vm2290_vm0, %v2291_v52 }
  0x8c   : > { %2087 = vmatprep.subr.bf16.mxu1 %v2288_v3  ;;  %v348_v10 = vand.u32 4294901760, %v2445_v9 }
  0x8e   : > { %v349_v11 = vsub.f32 %v2445_v9, %v348_v10 }
  0x8f   : > { %2089 = vmatpush3.bf16.msra.mxu1 %v2378_v24 }
  0x90   : > { %2090 = vmatprep.subr.bf16.mxu1 %v2288_v3  ;;  %v350_v12 = vand.u32 4294901760, %v349_v11  ;;  %v2642_v11 = vld [vmem:[%s2942_s2 + $0x68] sm:$0xff] }
  0x92   : > { %1741 = vmatmul.mubr.f32.vlgmr.msra.gmra.mrb[0].mxu0 %v350_v12  ;;  %v941_v12 = vand.u32 4294901760, %v940_v59  ;;  %v850_v59 = vand.u32 4294901760, %v2642_v11 }
  0x93   : > { %2074 = vmatpush3.bf16.msra.mxu0 %v2073_v53  ;;  %2092 = vmatpush3.bf16.msra.mxu1 %v2404_v48  ;;  %v913_v53 = vand.u32 4294901760, %v912_v40 }
  0x94   : > { %2075 = vmatprep.subr.bf16.mxu0 %v2288_v3  ;;  %2093 = vmatprep.subr.bf16.mxu1 %v2288_v3 }
  0x95   : > { %1778 = vmatprep.mubr.msk.f32.mxu0 %vm2290_vm0, %v2291_v52  ;;  %v2145_v6 = vpack.c.bf16 %v913_v53, %v906_v51 }
  0x97   : > { %2077 = vmatpush3.bf16.msra.mxu0 %v2076_v55  ;;  %2095 = vmatpush3.bf16.msra.mxu1 %v2414_v54  ;;  %v919_v55 = vsub.f32 %v2526_v34, %v918_v41 }
  0x98   : > { %2078 = vmatprep.subr.bf16.mxu0 %v2288_v3  ;;  %2108 = vmatprep.subr.bf16.mxu1 %v2288_v3 }
  0x99   : > { %v920_v7 = vand.u32 4294901760, %v919_v55 }
  0x9a   : > { %1798 = vmatmul.mubr.f32.vlgmr.msra.gmra.mrb[2].mxu1 %v348_v10  ;;  %v2637_v10 = vld [vmem:[%s2942_s2 + $0x60] sm:$0xff] }
  0x9b   : > { %2080 = vmatpush3.bf16.msra.mxu0 %v2079_v58  ;;  %2110 = vmatpush3.bf16.msra.mxu1 %v2357_v16  ;;  %v2540_v16 = vsub.f32 %v2486_v20, %v823_v28  ;;  %v2604_v58 = vld [vmem:[%s2942_s2 + $0x58] sm:$0xff] }
  0x9c   : > { %2081 = vmatprep.subr.bf16.mxu0 %v2288_v3  ;;  %2111 = vmatprep.subr.bf16.mxu1 %v2288_v3  ;;  %v844_v5 = vand.u32 4294901760, %v2604_v58 }
  0x9d   : > { %1835 = vmatprep.mubr.msk.f32.mxu1 %vm2290_vm0, %v2291_v52  ;;  %v2949_v44 = vand.u32 4294901760, %v2540_v16 }
  0x9e   : > { %v2661_v55 = vsub.f32 %v2604_v58, %v844_v5 }
  0x9f   : > { %2083 = vmatpush3.bf16.msra.mxu0 %v2082_v62  ;;  %2113 = vmatpush3.bf16.msra.mxu1 %v2378_v24  ;;  %v2569_v24 = vld [vmem:[%s2942_s2 + $0x48] sm:$0xff]  ;;  %v2621_v62 = vsub.f32 %v2564_v43, %v835_v49 }
  0xa0   : > { %2096 = vmatprep.subr.bf16.mxu0 %v2288_v3  ;;  %2114 = vmatprep.subr.bf16.mxu1 %v2288_v3  ;;  %v838_v50 = vand.u32 4294901760, %v2569_v24  ;;  %v981_v14 = vand.u32 4294901760, %v2661_v55 }
  0xa1   : > { %v2951_v40 = vand.u32 4294901760, %v2621_v62 }
  0xa2   : > { %1779 = vmatmul.mubr.f32.vlgmr.msra.gmra.mrb[2].mxu0 %v2445_v9  ;;  %v2626_v63 = vsub.f32 %v2569_v24, %v838_v50  ;;  %v927_v9 = vand.u32 4294901760, %v926_v56  ;;  %v2779_v31 = vpack.c.bf16 %v838_v50, %v835_v49 }
  0xa3   : > { %2098 = vmatpush3.bf16.msra.mxu0 %v2431_v0  ;;  %2116 = vmatpush3.bf16.msra.mxu1 %v2404_v48  ;;  %v933_v48 = vsub.f32 %v2540_v16, %v2949_v44  ;;  %v841_v0 = vand.u32 4294901760, %v2599_v57  ;;  %v961_v45 = vsub.f32 %v2621_v62, %v2951_v40  ;;  %v982_v40 = vsub.f32 %v2661_v55, %v981_v14 }
  0xa4   : > { %2099 = vmatprep.subr.bf16.mxu0 %v2288_v3  ;;  %2117 = vmatprep.subr.bf16.mxu1 %v2288_v3  ;;  %v2950_v51 = vand.u32 4294901760, %v2626_v63  ;;  %v2148_v56 = vpack.c.bf16 %v927_v9, %v920_v7  ;;  %v955_v9 = vand.u32 4294901760, %v954_v39 }
  0xa5   : > { %1816 = vmatprep.mubr.msk.f32.mxu0 %vm2290_vm0, %v2291_v52  ;;  %v2656_v53 = vsub.f32 %v2599_v57, %v841_v0  ;;  %v962_v39 = vand.u32 4294901760, %v961_v45  ;;  %v2792_v43 = vpack.c.bf16 %v844_v5, %v841_v0  ;;  %v2169_v0 = vpack.c.bf16 %v2502_v23, %v2497_v22 }
  0xa6   : > { %v968_v44 = vsub.f32 %v2626_v63, %v2950_v51  ;;  %v2178_v5 = vpack.c.bf16 %v2583_v47, %v2578_v46  ;;  %v2952_v22 = vand.u32 4294901760, %v2540_v16  ;;  %v2953_v23 = vand.u32 4294901760, %v2545_v36 }
  0xa7   : > { %2101 = vmatpush3.bf16.msra.mxu0 %v2436_v1  ;;  %2119 = vmatpush3.bf16.msra.mxu1 %v2414_v54  ;;  %v934_v1 = vand.u32 4294901760, %v933_v48  ;;  %v947_v54 = vsub.f32 %v2578_v46, %v2947_v60  ;;  %v847_v48 = vand.u32 4294901760, %v2637_v10  ;;  %v2676_v60 = vld [vmem:[%s2942_s2 + $0x78] sm:$0xff]  ;;  %v974_v13 = vand.u32 4294901760, %v2656_v53 }
  0xa8   : > { %2102 = vmatprep.subr.bf16.mxu0 %v2288_v3  ;;  %2144 = vmatprep.subr.bf16.mxu1 %v2288_v3 }
  0xa9   : > { %v948_v7 = vand.u32 4294901760, %v947_v54  ;;  %v975_v51 = vsub.f32 %v2656_v53, %v974_v13 }
  0xaa   : > { %1836 = vmatmul.mubr.f32.vlgmr.msra.gmra.mrb[4].mxu1 %v2442_v8 }
  0xab   : > { %2104 = vmatpush3.bf16.msra.mxu0 %v2438_v2  ;;  %2146 = vmatpush3.bf16.msra.mxu1 %v2145_v6  ;;  %v2682_v2 = vpack.c.bf16 %v814_v17, %v811_v15  ;;  %v2151_v6 = vpack.c.bf16 %v941_v12, %v934_v1  ;;  %v2698_v15 = vsub.f32 %v2637_v10, %v847_v48  ;;  %v853_v1 = vand.u32 4294901760, %v2671_v61 }
  0xac   : > { %2105 = vmatprep.subr.bf16.mxu0 %v2288_v3  ;;  %2147 = vmatprep.subr.bf16.mxu1 %v2288_v3  ;;  %v2703_v17 = vsub.f32 %v2642_v11, %v850_v59  ;;  %v856_v12 = vand.u32 4294901760, %v2676_v60  ;;  %v2154_v54 = vpack.c.bf16 %v955_v9, %v948_v7  ;;  %v976_v45 = vand.u32 4294901760, %v975_v51 }
  0xad   : > { %1905 = vmatprep.mubr.msk.f32.mxu1 %vm2290_vm0, %v2291_v52  ;;  %v988_v18 = vand.u32 4294901760, %v2698_v15  ;;  %v2181_v10 = vpack.c.bf16 %v2626_v63, %v2621_v62  ;;  %v2184_v11 = vpack.c.bf16 %v2661_v55, %v2656_v53 }
  0xae   : > { %v995_v19 = vand.u32 4294901760, %v2703_v17  ;;  %v2813_v57 = vpack.c.bf16 %v856_v12, %v853_v1 }
  0xaf   : > { %2107 = vmatpush3.bf16.msra.mxu0 %v2440_v4  ;;  %2149 = vmatpush3.bf16.msra.mxu1 %v2148_v56  ;;  %v2713_v4 = vpack.c.bf16 %v820_v27, %v817_v26  ;;  %v969_v56 = vand.u32 4294901760, %v968_v44  ;;  %v2733_v26 = vsub.f32 %v2676_v60, %v856_v12  ;;  %v2743_v27 = vpack.c.bf16 %v826_v29, %v823_v28 }
  0xb0   : > { %2120 = vmatprep.subr.bf16.mxu0 %v2288_v3  ;;  %2150 = vmatprep.subr.bf16.mxu1 %v2288_v3  ;;  %v989_v7 = vsub.f32 %v2698_v15, %v988_v18  ;;  %v996_v9 = vsub.f32 %v2703_v17, %v995_v19  ;;  %v2760_v28 = vpack.c.bf16 %v832_v38, %v829_v37 }
  0xb1   : > { %v2157_v44 = vpack.c.bf16 %v969_v56, %v962_v39  ;;  %v1009_v21 = vand.u32 4294901760, %v2733_v26  ;;  %v2172_v60 = vpack.c.bf16 %v2531_v35, %v2526_v34  ;;  %v2955_v34 = vand.u32 4294901760, %v2583_v47 }
  0xb2   : > { %1817 = vmatmul.mubr.f32.vlgmr.msra.gmra.mrb[4].mxu0 %v2442_v8  ;;  %v2728_v8 = vsub.f32 %v2671_v61, %v853_v1  ;;  %v997_v51 = vand.u32 4294901760, %v996_v9  ;;  %v2175_v61 = vpack.c.bf16 %v2545_v36, %v2540_v16  ;;  %v2292_v1 = vmov 0  }
  0xb3   : > { %2122 = vmatpush3.bf16.msra.mxu0 %v2682_v2  ;;  %2152 = vmatpush3.bf16.msra.mxu1 %v2151_v6  ;;  %v983_v6 = vand.u32 4294901760, %v982_v40  ;;  %v990_v40 = vand.u32 4294901760, %v989_v7  ;;  %v1010_v39 = vsub.f32 %v2733_v26, %v1009_v21  ;;  %v2957_v16 = vand.u32 4294901760, %v2626_v63 }
  0xb4   : > { %2123 = vmatprep.subr.bf16.mxu0 %v2288_v3  ;;  %2153 = vmatprep.subr.bf16.mxu1 %v2288_v3  ;;  %v1002_v20 = vand.u32 4294901760, %v2728_v8  ;;  %v2190_v12 = vpack.c.bf16 %v2733_v26, %v2728_v8 }
  0xb5   : > { %1870 = vmatprep.mubr.msk.f32.mxu0 %vm2290_vm0, %v2291_v52  ;;  %v2160_v29 = vpack.c.bf16 %v983_v6, %v976_v45  ;;  %v2163_v37 = vpack.c.bf16 %v997_v51, %v990_v40  ;;  %v1011_v56 = vand.u32 4294901760, %v1010_v39  ;;  %2277 = vset.pattern.permute.xlu0 %v2292_v1  ;;  %v2217_v45 = vpack.c.bf16 %v911_v33, %v904_v32 }
  0xb6   : > { %v2223_v32 = vpack.c.bf16 %v2953_v23, %v2952_v22  ;;  %v2954_v33 = vand.u32 4294901760, %v2578_v46  ;;  %v2238_v46 = vpack.c.bf16 %v1009_v21, %v1002_v20 }
  0xb7   : > { %2125 = vmatpush3.bf16.msra.mxu0 %v2713_v4  ;;  %2155 = vmatpush3.bf16.msra.mxu1 %v2154_v54  ;;  %v1003_v54 = vsub.f32 %v2728_v8, %v1002_v20 }
  0xb8   : > { %2126 = vmatprep.subr.bf16.mxu0 %v2288_v3  ;;  %2156 = vmatprep.subr.bf16.mxu1 %v2288_v3  ;;  %v2226_v35 = vpack.c.bf16 %v2955_v34, %v2954_v33 }
  0xb9   : > { %v1004_v38 = vand.u32 4294901760, %v1003_v54 }
  0xbb   : > { %2128 = vmatpush3.bf16.msra.mxu0 %v2743_v27  ;;  %2158 = vmatpush3.bf16.msra.mxu1 %v2157_v44  ;;  %v2785_v44 = vsub.f32 %v2380_v25, %v2772_v30  ;;  %v2166_v24 = vpack.c.bf16 %v1011_v56, %v1004_v38  ;;  %v2802_v25 = vpack.c.bf16 %v850_v59, %v847_v48  ;;  %v1459_v59 = vld [vmem:[%s232_s28] sm:$0x3] }
  0xbc   : > { %2129 = vmatprep.subr.bf16.mxu0 %v2288_v3  ;;  %2159 = vmatprep.subr.bf16.mxu1 %v2288_v3  ;;  %v2187_v48 = vpack.c.bf16 %v2703_v17, %v2698_v15 }
  0xbd   : > { %v893_v49 = vand.u32 4294901760, %v2785_v44  ;;  %1462 = vperm.xlu0 %2277, %v1459_v59  }
  0xbf   : > { %2131 = vmatpush3.bf16.msra.mxu0 %v2760_v28  ;;  %2161 = vmatpush3.bf16.msra.mxu1 %v2160_v29  ;;  %v894_v50 = vsub.f32 %v2785_v44, %v893_v49 }
  0xc0   : > { %2132 = vmatprep.subr.bf16.mxu0 %v2288_v3  ;;  %2162 = vmatprep.subr.bf16.mxu1 %v2288_v3 }
  0xc1   : > { %v895_v58 = vand.u32 4294901760, %v894_v50 }
  0xc3   : > { %2134 = vmatpush3.bf16.msra.mxu0 %v2779_v31  ;;  %2164 = vmatpush3.bf16.msra.mxu1 %v2163_v37 }
  0xc4   : > { %2135 = vmatprep.subr.bf16.mxu0 %v2288_v3  ;;  %2165 = vmatprep.subr.bf16.mxu1 %v2288_v3 }
  0xc7   : > { %2137 = vmatpush3.bf16.msra.mxu0 %v2792_v43  ;;  %2167 = vmatpush3.bf16.msra.mxu1 %v2166_v24  ;;  %v1565_v24 = vld [vmem:[%s2944_s4] ss:$0 sm:$0xff] }
  0xc8   : > { %2138 = vmatprep.subr.bf16.mxu0 %v2288_v3  ;;  %2192 = vmatprep.subr.bf16.mxu1 %v2288_v3 }
  0xca   : > { %1906 = vmatmul.mubr.f32.vlgmr.msra.gmra.mrb[6].mxu1 %v2772_v30 }
  0xcb   : > { %2140 = vmatpush3.bf16.msra.mxu0 %v2802_v25  ;;  %2194 = vmatpush3.bf16.msra.mxu1 %v2682_v2 }
  0xcc   : > { %2141 = vmatprep.subr.bf16.mxu0 %v2288_v3  ;;  %2195 = vmatprep.subr.bf16.mxu1 %v2288_v3 }
  0xcd   : > { %1975 = vmatprep.mubr.msk.f32.mxu1 %vm2290_vm0, %v2291_v52 }
  0xcf   : > { %2143 = vmatpush3.bf16.msra.mxu0 %v2813_v57  ;;  %2197 = vmatpush3.bf16.msra.mxu1 %v2713_v4 }
  0xd0   : > { %2168 = vmatprep.subr.bf16.mxu0 %v2288_v3  ;;  %2198 = vmatprep.subr.bf16.mxu1 %v2288_v3 }
  0xd2   : > { %1871 = vmatmul.mubr.f32.vlgmr.msra.gmra.mrb[6].mxu0 %v895_v58 }
  0xd3   : > { %2170 = vmatpush3.bf16.msra.mxu0 %v2169_v0  ;;  %2200 = vmatpush3.bf16.msra.mxu1 %v2743_v27 }
  0xd4   : > { %2171 = vmatprep.subr.bf16.mxu0 %v2288_v3  ;;  %2201 = vmatprep.subr.bf16.mxu1 %v2288_v3 }
  0xd5   : > { %1940 = vmatprep.mubr.msk.f32.mxu0 %vm2290_vm0, %v2291_v52 }
  0xd7   : > { %2173 = vmatpush3.bf16.msra.mxu0 %v2172_v60  ;;  %2203 = vmatpush3.bf16.msra.mxu1 %v2760_v28 }
  0xd8   : > { %2174 = vmatprep.subr.bf16.mxu0 %v2288_v3  ;;  %2204 = vmatprep.subr.bf16.mxu1 %v2288_v3 }
  0xdb   : > { %2176 = vmatpush3.bf16.msra.mxu0 %v2175_v61  ;;  %2206 = vmatpush3.bf16.msra.mxu1 %v2779_v31 }
  0xdc   : > { %2177 = vmatprep.subr.bf16.mxu0 %v2288_v3  ;;  %2207 = vmatprep.subr.bf16.mxu1 %v2288_v3 }
  0xdf   : > { %2179 = vmatpush3.bf16.msra.mxu0 %v2178_v5  ;;  %2209 = vmatpush3.bf16.msra.mxu1 %v2792_v43 }
  0xe0   : > { %2180 = vmatprep.subr.bf16.mxu0 %v2288_v3  ;;  %2210 = vmatprep.subr.bf16.mxu1 %v2288_v3 }
  0xe3   : > { %2182 = vmatpush3.bf16.msra.mxu0 %v2181_v10  ;;  %2212 = vmatpush3.bf16.msra.mxu1 %v2802_v25 }
  0xe4   : > { %2183 = vmatprep.subr.bf16.mxu0 %v2288_v3  ;;  %2213 = vmatprep.subr.bf16.mxu1 %v2288_v3 }
  0xe7   : > { %2185 = vmatpush3.bf16.msra.mxu0 %v2184_v11  ;;  %2215 = vmatpush3.bf16.msra.mxu1 %v2813_v57 }
  0xe8   : > { %2186 = vmatprep.subr.bf16.mxu0 %v2288_v3  ;;  %2240 = vmatprep.subr.bf16.mxu1 %v2288_v3 }
  0xea   : > { %1976 = vmatmul.mubr.f32.vlgmr.msra.gmra.mrb[8].mxu1 %v893_v49 }
  0xeb   : > { %2188 = vmatpush3.bf16.msra.mxu0 %v2187_v48  ;;  %2242 = vmatpush3.bf16.msra.mxu1 %v2682_v2  ;;  %v2220_v2 = vpack.c.bf16 %v925_v42, %v918_v41  ;;  %v2232_v41 = vpack.c.bf16 %v981_v14, %v974_v13  ;;  %v2235_v42 = vpack.c.bf16 %v995_v19, %v988_v18 }
  0xec   : > { %2189 = vmatprep.subr.bf16.mxu0 %v2288_v3  ;;  %2243 = vmatprep.subr.bf16.mxu1 %v2288_v3 }
  0xed   : > { %2045 = vmatprep.mubr.msk.f32.mxu1 %vm2290_vm0, %v2291_v52 }
  0xef   : > { %2191 = vmatpush3.bf16.msra.mxu0 %v2190_v12  ;;  %2245 = vmatpush3.bf16.msra.mxu1 %v2713_v4 }
  0xf0   : > { %2216 = vmatprep.subr.bf16.mxu0 %v2288_v3  ;;  %2246 = vmatprep.subr.bf16.mxu1 %v2288_v3 }
  0xf2   : > { %1941 = vmatmul.mubr.f32.vlgmr.msra.gmra.mrb[8].mxu0 %v2785_v44 }
  0xf3   : > { %2218 = vmatpush3.bf16.msra.mxu0 %v2217_v45  ;;  %2248 = vmatpush3.bf16.msra.mxu1 %v2743_v27 }
  0xf4   : > { %2219 = vmatprep.subr.bf16.mxu0 %v2288_v3  ;;  %2249 = vmatprep.subr.bf16.mxu1 %v2288_v3 }
  0xf5   : > { %2010 = vmatprep.mubr.msk.f32.mxu0 %vm2290_vm0, %v2291_v52  ;;  %v2956_v52 = vand.u32 4294901760, %v2621_v62 }
  0xf7   : > { %2221 = vmatpush3.bf16.msra.mxu0 %v2220_v2  ;;  %2251 = vmatpush3.bf16.msra.mxu1 %v2760_v28  ;;  %v2229_v36 = vpack.c.bf16 %v2957_v16, %v2956_v52 }
  0xf8   : > { %2222 = vmatprep.subr.bf16.mxu0 %v2288_v3  ;;  %2252 = vmatprep.subr.bf16.mxu1 %v2288_v3 }
  0xfb   : > { %2224 = vmatpush3.bf16.msra.mxu0 %v2223_v32  ;;  %2254 = vmatpush3.bf16.msra.mxu1 %v2779_v31 }
  0xfc   : > { %2225 = vmatprep.subr.bf16.mxu0 %v2288_v3  ;;  %2255 = vmatprep.subr.bf16.mxu1 %v2288_v3 }
  0xff   : > { %2227 = vmatpush3.bf16.msra.mxu0 %v2226_v35  ;;  %2257 = vmatpush3.bf16.msra.mxu1 %v2792_v43 }
 0x100   : > { %2228 = vmatprep.subr.bf16.mxu0 %v2288_v3  ;;  %2258 = vmatprep.subr.bf16.mxu1 %v2288_v3 }
 0x103   : > { %2230 = vmatpush3.bf16.msra.mxu0 %v2229_v36  ;;  %2260 = vmatpush3.bf16.msra.mxu1 %v2802_v25 }
 0x104   : > { %2231 = vmatprep.subr.bf16.mxu0 %v2288_v3  ;;  %2261 = vmatprep.subr.bf16.mxu1 %v2288_v3 }
 0x107   : > { %2233 = vmatpush3.bf16.msra.mxu0 %v2232_v41  ;;  %2263 = vmatpush3.bf16.msra.mxu1 %v2813_v57 }
 0x108   : > { %2234 = vmatprep.subr.bf16.mxu0 %v2288_v3 }
 0x10a   : > { %2046 = vmatmul.mubr.f32.vlgmr.msra.gmra.mrb[10].mxu1 %v2772_v30 }
 0x10b   : > { %2236 = vmatpush3.bf16.msra.mxu0 %v2235_v42 }
 0x10c   : > { %2237 = vmatprep.subr.bf16.mxu0 %v2288_v3 }
 0x10f   : > { %2239 = vmatpush3.bf16.msra.mxu0 %v2238_v46 }
 0x112   : > { %2011 = vmatmul.mubr.f32.vlgmr.msra.gmra.mrb[10].mxu0 %v2772_v30 }
 0x13c   : > { %v1463_v25 = vpop.permute.xlu0 %1462 }
 0x15d   : > { %v463_v47 = vpop.f32.mrb[0].mxu1 }
 0x15e   : > { %v1761_v62 = vpop.f32.mrb[1].mxu1 }
 0x165   : > { %v352_v63 = vpop.f32.mrb[0].mxu0 }
 0x166   : > { %v464_v53 = vadd.f32 %v463_v47, %v352_v63  ;;  %v1742_v55 = vpop.f32.mrb[1].mxu0 }
 0x16d   : > { %v632_v13 = vpop.f32.mrb[2].mxu1 }
 0x16e   : > { %v1799_v14 = vpop.f32.mrb[3].mxu1 }
 0x175   : > { %v551_v15 = vpop.f32.mrb[2].mxu0 }
 0x176   : > { %v552_v17 = vadd.f32 %v551_v15, %v464_v53  ;;  %v1780_v4 = vpop.f32.mrb[3].mxu0 }
 0x178   : > { %v633_v18 = vadd.f32 %v632_v13, %v552_v17 }
 0x17d   : > { %v806_v19 = vpop.f32.mrb[4].mxu1 }
 0x17e   : > { %v1837_v8 = vpop.f32.mrb[5].mxu1 }
 0x185   : > { %v727_v26 = vpop.f32.mrb[4].mxu0 }
 0x186   : > { %v728_v27 = vadd.f32 %v727_v26, %v633_v18  ;;  %v1818_v6 = vpop.f32.mrb[5].mxu0 }
 0x188   : > { %v807_v3 = vadd.f32 %v806_v19, %v728_v27 }
 0x19d   : > { %v1048_v7 = vpop.f32.mrb[6].mxu1 }
 0x19e   : > { %v1907_v9 = vpop.f32.mrb[7].mxu1 }
 0x1a5   : > { %v897_v20 = vpop.f32.mrb[6].mxu0 }
 0x1a6   : > { %v898_v21 = vadd.f32 %v897_v20, %v807_v3  ;;  %v1872_v28 = vpop.f32.mrb[7].mxu0 }
 0x1a8   : > { %v1049_v29 = vadd.f32 %v1048_v7, %v898_v21 }
 0x1bd   : > { %v1241_v40 = vpop.f32.mrb[8].mxu1 }
 0x1be   : > { %v1977_v51 = vpop.f32.mrb[9].mxu1 }
 0x1c5   : > { %v1152_v54 = vpop.f32.mrb[8].mxu0 }
 0x1c6   : > { %v1153_v39 = vadd.f32 %v1152_v54, %v1049_v29  ;;  %v1942_v30 = vpop.f32.mrb[9].mxu0 }
 0x1c8   : > { %v1242_v31 = vadd.f32 %v1241_v40, %v1153_v39 }
 0x1dd   : > { %v1447_v37 = vpop.f32.mrb[10].mxu1 }
 0x1de   : > { %v2047_v38 = vpop.f32.mrb[11].mxu1 }
 0x1e5   : > { %v1360_v56 = vpop.f32.mrb[10].mxu0 }
 0x1e6   : > { %v1361_v44 = vadd.f32 %v1360_v56, %v1242_v31  ;;  %v2012_v43 = vpop.f32.mrb[11].mxu0 }
 0x1e8   : > { %v1448_v49 = vadd.f32 %v1447_v37, %v1361_v44 }
 0x1ea   : > { %v1458_v50 = vadd.f32 %v1565_v24, %v1448_v49 }
 0x1ec   : > { %v1465_v57 = vmul.f32 %v1463_v25, %v1458_v50 }
 0x1ee   : > { %v1467_v58 = vsel %vm1466_vm3, %v1465_v57, 0.0 }
 0x1ef   : > { %v1468_v0 = vrot.slane %v1467_v58, 4 }
 0x1f1   : > { %v1469_v60 = vadd.f32 %v1468_v0, %v1467_v58 }
 0x1f3   : > { %v1470_v61 = vrot.slane %v1469_v60, 2 }
 0x1f5   : > { %v1471_v5 = vadd.f32 %v1470_v61, %v1469_v60 }
 0x1f7   : > { %v1472_v10 = vrot.slane %v1471_v5, 1 }
 0x1f9   : > { %v1473_v11 = vadd.f32 %v1472_v10, %v1471_v5 }
 0x1fb   : > { %v1475_v48 = vmul.f32 0.5, %v1473_v11 }
 0x1fd   : > { %v1476_v59 = vsub.f32 %v1465_v57, %v1475_v48 }
 0x1ff   : > { %v1477_v1 = vmul.f32 %v1476_v59, %v1476_v59 }
 0x201   : > { %v1478_v12 = vsel %vm1466_vm3, %v1477_v1, 0.0 }
 0x202   : > { %v1479_v45 = vrot.slane %v1478_v12, 4 }
 0x204   : > { %v1480_v2 = vadd.f32 %v1479_v45, %v1478_v12 }
 0x206   : > { %v1481_v22 = vrot.slane %v1480_v2, 2 }
 0x208   : > { %v1482_v23 = vadd.f32 %v1481_v22, %v1480_v2 }
 0x20a   : > { %v1483_v32 = vrot.slane %v1482_v23, 1 }
 0x20c   : > { %v1484_v33 = vadd.f32 %v1483_v32, %v1482_v23 }
 0x20e   : > { %v1485_v34 = vmul.f32 0.5, %v1484_v33 }
 0x210   : > { %v1486_v35 = vadd.f32 1e-05, %v1485_v34 }
 0x212   : > { %2278 = vrsqrt.f32 %v1486_v35 }
 0x21c   : > { %v2279_v52 = vpop.eup %2278 }
 0x21d   : > { %v1488_v16 = vmul.f32 %v2279_v52, %v1476_v59 }
 0x21f   : > { %v1489_v36 = vmul.f32 0.2, %v1488_v16 }
 0x221   : > { %v1490_v41 = vmax.f32 %v1488_v16, %v1489_v36 }
 0x223   : > { %1491 = vst.msk [vmem:[%s236_s9] sm:$0x3] %vm1466_vm3, %v1490_v41 }
 0x224 PF: > { %s15_s18 = sadd.s32 1, %s2286_s18  }
 0x225   : > { %p12_p4 = scmp.ge.s32.totalorder %s15_s18, 4  }
 0x227   :  { %14 = sbr.rel (!%p12_p4) target bundleno = 1 (0x1), region = 73 }

// kernel: deep_interpolator_forward.18
= control target key start
LH: loop header
LB: loop body
LE: loop exit
PB: predicated region body
PF: predicated region fallthrough
CT: control target
= control target key end

     0   :  { %s1748_s18 = smov 0   ;;  %s1973_s0 = inlined_call_operand.vmem [shape: f32[2,4,32], index: 0, kind: input, shape index: {}]   ;;  %s1974_s1 = inlined_call_operand.vmem [shape: f32[2,4,1], index: 1, kind: input, shape index: {}]   ;;  %s1975_s2 = inlined_call_operand.vmem [shape: f32[32,32], index: 2, kind: input, shape index: {}]   ;;  %s1976_s3 = inlined_call_operand.vmem [shape: f32[32,16], index: 3, kind: input, shape index: {}]   ;;  %s1977_s4 = inlined_call_operand.vmem [shape: f32[1,16], index: 4, kind: input, shape index: {}]   ;;  %s1978_s5 = inlined_call_operand.vmem [shape: f32[2,4,32], index: 5, kind: output, shape index: {}]  }
   0x1 LB: > { %s1392_s19 = sadd.s32 4294967295, %s1710_s18   ;;  %p1396_p0 = scmp.ge.s32.totalorder %s1710_s18, 1  ;;  %s1710_s18 = sphi %s1748_s18, %s15_s18  }
   0x2   : > { %p195_p1 = scmp.lt.s32.totalorder %s1710_s18, 3 }
   0x4   : > { %p196_p2 = pnand %p1396_p0, %p195_p1 }
   0x5   : > { %v737_v0 = vld [vmem:[%s1976_s3] sm:$0xff] (!%p196_p2)  ;;  %v738_v1 = vld [vmem:[%s1976_s3 + $0x8] sm:$0xff] (!%p196_p2)  ;;  %v739_v2 = vld [vmem:[%s1976_s3 + $0x10] sm:$0xff] (!%p196_p2)  ;;  %v1712_v3 = vmov (!%p196_p2), 0.0|0.0   ;;  %vm1713_vm0 = vmmov (!%p196_p2), 0   ;;  %v1714_v8 = vmov (!%p196_p2), 0.0  }
   0x6   : > { %199 = sbr.rel (%p196_p2) target bundleno = 927 (0x39f), region = 40  ;;  %1631 = vmatprep.subr.bf16.mxu1 (!%p196_p2), %v1712_v3  ;;  %v745_v4 = vand.u32 (!%p196_p2), 4294901760, %v737_v0  ;;  %v748_v5 = vand.u32 (!%p196_p2), 4294901760, %v738_v1  ;;  %v740_v6 = vld [vmem:[%s1976_s3 + $0x18] sm:$0xff] (!%p196_p2)  ;;  %v751_v7 = vand.u32 (!%p196_p2), 4294901760, %v739_v2  ;;  %1537 = vmatprep.mubr.msk.f32.mxu1 (!%p196_p2), %vm1713_vm0, %v1714_v8  ;;  %p225_p3 = scmp.lt.s32.totalorder (!%p196_p2), %s1392_s19, 1 }
   0x7   : > { %v754_v9 = vand.u32 (!%p196_p2), 4294901760, %v740_v6  ;;  %1595 = vmatprep.subr.bf16.mxu0 (!%p196_p2), %v1712_v3  ;;  %v240_v10 = vld [vmem:[%s1975_s2] sm:$0xff] (!%p196_p2)  ;;  %v241_v11 = vld [vmem:[%s1975_s2 + $0x8] sm:$0xff] (!%p196_p2)  ;;  %1471 = vmatprep.mubr.msk.f32.mxu0 (!%p196_p2), %vm1713_vm0, %v1714_v8  ;;  %v1715_v16 = vmov (!%p196_p2), 0   ;;  %vm735_vm1 = vcmask (!%p196_p2), 1042432   ;;  %v242_v24 = vld [vmem:[%s1975_s2 + $0x10] sm:$0xff] (!%p196_p2) }
   0x8   : > { %v1780_v12 = vpack.c.bf16 (!%p196_p2), %v748_v5, %v745_v4  ;;  %v1782_v13 = vsub.f32 (!%p196_p2), %v737_v0, %v745_v4  ;;  %v1784_v14 = vsub.f32 (!%p196_p2), %v738_v1, %v748_v5  ;;  %v1786_v15 = vsub.f32 (!%p196_p2), %v739_v2, %v751_v7  ;;  %1701 = vset.pattern.permute.xlu0 (!%p196_p2), %v1715_v16  ;;  %v243_v27 = vld [vmem:[%s1975_s2 + $0x18] sm:$0xff] (!%p196_p2)  ;;  %s1716_s21 = smov (!%p196_p2), 16   ;;  %s1717_s22 = smov (!%p196_p2), 112  }
   0x9   : > { %v1788_v17 = vsub.f32 (!%p196_p2), %v740_v6, %v754_v9  ;;  %v249_v18 = vand.u32 (!%p196_p2), 4294901760, %v240_v10  ;;  %v252_v19 = vand.u32 (!%p196_p2), 4294901760, %v241_v11  ;;  %v1791_v20 = vpack.c.bf16 (!%p196_p2), %v754_v9, %v751_v7 }
   0xa   : > { %1633 = vmatpush3.bf16.msra.mxu1 (!%p196_p2), %v1780_v12  ;;  %v826_v21 = vand.u32 (!%p196_p2), 4294901760, %v1782_v13  ;;  %v833_v22 = vand.u32 (!%p196_p2), 4294901760, %v1784_v14  ;;  %v840_v26 = vand.u32 (!%p196_p2), 4294901760, %v1786_v15  ;;  %vm244_vm2 = vcmask (!%p196_p2), 261120  }
   0xb   : > { %1634 = vmatprep.subr.bf16.mxu1 (!%p196_p2), %v1712_v3  ;;  %v1802_v23 = vpack.c.bf16 (!%p196_p2), %v252_v19, %v249_v18  ;;  %v847_v30 = vand.u32 (!%p196_p2), 4294901760, %v1788_v17  ;;  %v1821_v32 = vsub.f32 (!%p196_p2), %v240_v10, %v249_v18  ;;  %v1823_v33 = vsub.f32 (!%p196_p2), %v241_v11, %v252_v19 }
   0xc   : > { %v827_v31 = vsub.f32 (!%p196_p2), %v1782_v13, %v826_v21  ;;  %v255_v34 = vand.u32 (!%p196_p2), 4294901760, %v242_v24  ;;  %v834_v36 = vsub.f32 (!%p196_p2), %v1784_v14, %v833_v22  ;;  %v258_v37 = vand.u32 (!%p196_p2), 4294901760, %v243_v27 }
   0xd   : > { %s1980_s19 = smov (!%p225_p3, %s1392_s19), 1  ;;  %1597 = vmatpush3.bf16.msra.mxu0 %v1802_v23  ;;  %v841_v40 = vsub.f32 %v1786_v15, %v840_v26  ;;  %v848_v44 = vsub.f32 %v1788_v17, %v847_v30  ;;  %v330_v48 = vand.u32 4294901760, %v1821_v32  ;;  %v337_v49 = vand.u32 4294901760, %v1823_v33 }
   0xe   : > { %s1793_s7 = sshll.u32 %s1980_s19, 2  ;;  %1636 = vmatpush3.bf16.msra.mxu1 %v1791_v20  ;;  %1598 = vmatprep.subr.bf16.mxu0 %v1712_v3  ;;  %v1836_v41 = vsub.f32 %v242_v24, %v255_v34  ;;  %v1845_v45 = vpack.c.bf16 %v258_v37, %v255_v34  ;;  %v1847_v46 = vsub.f32 %v243_v27, %v258_v37  ;;  %v828_v52 = vand.u32 4294901760, %v827_v31 }
   0xf   : > { %s228_s10 = scalar_lea.vmem %s1973_s0, %s1793_s7  ;;  %s232_s15 = scalar_lea.vmem %s1974_s1, %s1793_s7  ;;  %1637 = vmatprep.subr.bf16.mxu1 %v1712_v3  ;;  %v835_v53 = vand.u32 4294901760, %v834_v36  ;;  %v331_v56 = vsub.f32 %v1821_v32, %v330_v48  ;;  %v338_v57 = vsub.f32 %v1823_v33, %v337_v49  ;;  %v842_v1 = vand.u32 4294901760, %v841_v40 }
  0x10   : > { %v237_v25 = vld [vmem:[%s228_s10] sm:$0xf]  ;;  %v344_v50 = vand.u32 4294901760, %v1836_v41  ;;  %v351_v54 = vand.u32 4294901760, %v1847_v46  ;;  %v849_v6 = vand.u32 4294901760, %v848_v44  ;;  %v1608_v18 = vpack.c.bf16 %v1823_v33, %v1821_v32  ;;  %s236_s25 = scalar_lea.vmem %s1978_s5, %s1793_s7 }
  0x11   : > { %v238_v28 = vld [vmem:[%s232_s15] sm:$0xf]  ;;  %v733_v29 = vrot.slane %v237_v25, 1  ;;  %v246_v38 = vsel %vm244_vm2, %v237_v25, 0  ;;  %1600 = vmatpush3.bf16.msra.mxu0 %v1845_v45  ;;  %v332_v62 = vand.u32 4294901760, %v331_v56  ;;  %v339_v63 = vand.u32 4294901760, %v338_v57 }
  0x12   : > { %1238 = vperm.xlu0 %1701, %v238_v28   ;;  %v1838_v42 = vand.u32 4294901760, %v246_v38  ;;  %1601 = vmatprep.subr.bf16.mxu0 %v1712_v3  ;;  %v345_v58 = vsub.f32 %v1836_v41, %v344_v50  ;;  %v352_v60 = vsub.f32 %v1847_v46, %v351_v54  ;;  %v1638_v5 = vpack.c.bf16 %v835_v53, %v828_v52 }
  0x13   : > { %v736_v35 = vsel %vm735_vm1, %v733_v29, 0.0  ;;  %v1602_v9 = vpack.c.bf16 %v339_v63, %v332_v62  ;;  %v1641_v16 = vpack.c.bf16 %v849_v6, %v842_v1  ;;  %v1644_v19 = vpack.c.bf16 %v1784_v14, %v1782_v13 }
  0x14   : > { %v742_v39 = vsel %vm244_vm2, %v736_v35, 0  ;;  %v1850_v47 = vsub.f32 %v246_v38, %v1838_v42  ;;  %v346_v2 = vand.u32 4294901760, %v345_v58  ;;  %v353_v4 = vand.u32 4294901760, %v352_v60 }
  0x15   : > { %v1840_v43 = vand.u32 4294901760, %v742_v39  ;;  %v1611_v24 = vpack.c.bf16 %v1847_v46, %v1836_v41  ;;  %v1647_v25 = vpack.c.bf16 %v1788_v17, %v1786_v15  ;;  %v1620_v27 = vpack.c.bf16 %v337_v49, %v330_v48 }
  0x16   : > { %v319_v55 = vand.u32 4294901760, %v1850_v47  ;;  %v1605_v11 = vpack.c.bf16 %v353_v4, %v346_v2  ;;  %v1656_v28 = vpack.c.bf16 %v833_v22, %v826_v21  ;;  %v1623_v29 = vpack.c.bf16 %v351_v54, %v344_v50 }
  0x17   : > { %v1856_v51 = vsub.f32 %v742_v39, %v1840_v43  ;;  %v1659_v13 = vpack.c.bf16 %v847_v30, %v840_v26  ;;  %vm1260_vm3 = vcmask 257152   ;;  %vm1252_vm4 = vcmask 125952  }
  0x18   : > { %v320_v61 = vsub.f32 %v1850_v47, %v319_v55  ;;  %v1275_v44 = vlaneseq  ;;  %vm1323_vm5 = vcmask 130048   ;;  %vm1325_vm6 = vcmask 257024  }
  0x19   : > { %v815_v59 = vand.u32 4294901760, %v1856_v51 }
  0x1a   : > { %v321_v7 = vand.u32 4294901760, %v320_v61  ;;  %v1276_v46 = vshrl.u32 %v1275_v44, 7 }
  0x1b   : > { %v816_v0 = vsub.f32 %v1856_v51, %v815_v59 }
  0x1c   : > { %1472 = vmatmul.mubr.f32.vlgmr.msra.gmra.mrb[0].mxu0 %v321_v7  ;;  %v1277_v49 = vsub.s32 0, %v1276_v46 }
  0x1d   : > { %v817_v10 = vand.u32 4294901760, %v816_v0  ;;  %1603 = vmatpush3.bf16.msra.mxu0 %v1602_v9  ;;  %1482 = vmatprep.mubr.msk.f32.mxu0 %vm1713_vm0, %v1714_v8 }
  0x1e   : > { %1604 = vmatprep.subr.bf16.mxu0 %v1712_v3 }
  0x1f   : > { %1538 = vmatmul.mubr.f32.vlgmr.msra.gmra.mrb[0].mxu1 %v817_v10 }
  0x20   : > { %1639 = vmatpush3.bf16.msra.mxu1 %v1638_v5  ;;  %1548 = vmatprep.mubr.msk.f32.mxu1 %vm1713_vm0, %v1714_v8 }
  0x21   : > { %1640 = vmatprep.subr.bf16.mxu1 %v1712_v3  ;;  %1606 = vmatpush3.bf16.msra.mxu0 %v1605_v11 }
  0x22   : > { %1607 = vmatprep.subr.bf16.mxu0 %v1712_v3 }
  0x24   : > { %1642 = vmatpush3.bf16.msra.mxu1 %v1641_v16  ;;  %1483 = vmatmul.mubr.f32.vlgmr.msra.gmra.mrb[0].mxu0 %v1838_v42 }
  0x25   : > { %1643 = vmatprep.subr.bf16.mxu1 %v1712_v3  ;;  %1609 = vmatpush3.bf16.msra.mxu0 %v1608_v18 }
  0x26   : > { %1610 = vmatprep.subr.bf16.mxu0 %v1712_v3  ;;  %1493 = vmatprep.mubr.msk.f32.mxu0 %vm1713_vm0, %v1714_v8 }
  0x27   : > { %1549 = vmatmul.mubr.f32.vlgmr.msra.gmra.mrb[0].mxu1 %v1840_v43 }
  0x28   : > { %1645 = vmatpush3.bf16.msra.mxu1 %v1644_v19  ;;  %1559 = vmatprep.mubr.msk.f32.mxu1 %vm1713_vm0, %v1714_v8 }
  0x29   : > { %1646 = vmatprep.subr.bf16.mxu1 %v1712_v3  ;;  %1612 = vmatpush3.bf16.msra.mxu0 %v1611_v24 }
  0x2a   : > { %1613 = vmatprep.subr.bf16.mxu0 %v1712_v3 }
  0x2c   : > { %1648 = vmatpush3.bf16.msra.mxu1 %v1647_v25  ;;  %1494 = vmatmul.mubr.f32.vlgmr.msra.gmra.mrb[0].mxu0 %v1850_v47 }
  0x2d   : > { %1649 = vmatprep.subr.bf16.mxu1 %v1712_v3  ;;  %1615 = vmatpush3.bf16.msra.mxu0 %v1802_v23 }
  0x2e   : > { %1616 = vmatprep.subr.bf16.mxu0 %v1712_v3  ;;  %1504 = vmatprep.mubr.msk.f32.mxu0 %vm1713_vm0, %v1714_v8 }
  0x2f   : > { %1560 = vmatmul.mubr.f32.vlgmr.msra.gmra.mrb[0].mxu1 %v1856_v51 }
  0x30   : > { %1651 = vmatpush3.bf16.msra.mxu1 %v1780_v12  ;;  %1570 = vmatprep.mubr.msk.f32.mxu1 %vm1713_vm0, %v1714_v8 }
  0x31   : > { %1652 = vmatprep.subr.bf16.mxu1 %v1712_v3  ;;  %1618 = vmatpush3.bf16.msra.mxu0 %v1845_v45 }
  0x32   : > { %1619 = vmatprep.subr.bf16.mxu0 %v1712_v3 }
  0x34   : > { %1654 = vmatpush3.bf16.msra.mxu1 %v1791_v20  ;;  %1505 = vmatmul.mubr.f32.vlgmr.msra.gmra.mrb[0].mxu0 %v319_v55 }
  0x35   : > { %1655 = vmatprep.subr.bf16.mxu1 %v1712_v3  ;;  %1621 = vmatpush3.bf16.msra.mxu0 %v1620_v27 }
  0x36   : > { %1622 = vmatprep.subr.bf16.mxu0 %v1712_v3  ;;  %1515 = vmatprep.mubr.msk.f32.mxu0 %vm1713_vm0, %v1714_v8 }
  0x37   : > { %1571 = vmatmul.mubr.f32.vlgmr.msra.gmra.mrb[0].mxu1 %v815_v59 }
  0x38   : > { %1657 = vmatpush3.bf16.msra.mxu1 %v1656_v28  ;;  %1581 = vmatprep.mubr.msk.f32.mxu1 %vm1713_vm0, %v1714_v8 }
  0x39   : > { %1658 = vmatprep.subr.bf16.mxu1 %v1712_v3  ;;  %1624 = vmatpush3.bf16.msra.mxu0 %v1623_v29 }
  0x3a   : > { %1625 = vmatprep.subr.bf16.mxu0 %v1712_v3 }
  0x3c   : > { %1660 = vmatpush3.bf16.msra.mxu1 %v1659_v13  ;;  %1516 = vmatmul.mubr.f32.vlgmr.msra.gmra.mrb[0].mxu0 %v1838_v42 }
  0x3d   : > { %1661 = vmatprep.subr.bf16.mxu1 %v1712_v3  ;;  %1627 = vmatpush3.bf16.msra.mxu0 %v1802_v23 }
  0x3e   : > { %1628 = vmatprep.subr.bf16.mxu0 %v1712_v3  ;;  %1526 = vmatprep.mubr.msk.f32.mxu0 %vm1713_vm0, %v1714_v8 }
  0x3f   : > { %1582 = vmatmul.mubr.f32.vlgmr.msra.gmra.mrb[0].mxu1 %v1840_v43 }
  0x40   : > { %1663 = vmatpush3.bf16.msra.mxu1 %v1780_v12  ;;  %1592 = vmatprep.mubr.msk.f32.mxu1 %vm1713_vm0, %v1714_v8  ;;  %v1400_v12 = vld [vmem:[%s1977_s4] ss:$0 sm:$0xff] }
  0x41   : > { %1664 = vmatprep.subr.bf16.mxu1 %v1712_v3  ;;  %1630 = vmatpush3.bf16.msra.mxu0 %v1845_v45 }
  0x42   : > { %1247 = vrot.lane.b32.xlu1 %v1400_v12, %s1716_s21 }
  0x44   : > { %1666 = vmatpush3.bf16.msra.mxu1 %v1791_v20  ;;  %1527 = vmatmul.mubr.f32.vlgmr.msra.gmra.mrb[0].mxu0 %v1838_v42 }
  0x47   : > { %1593 = vmatmul.mubr.f32.vlgmr.msra.gmra.mrb[0].mxu1 %v1840_v43 }
  0x91   : > { %v1239_v17 = vpop.permute.xlu0 %1238 }
  0xb4   : > { %v1248_v20 = vpop.permute.xlu1 %1247 }
 0x117   : > { %v729_v14 = vpop.f32.mrb[0].mxu0 }
 0x118   : > { %v1528_v15 = vpop.f32.mrb[1].mxu0  ;;  %v1235_v37 = vadd.f32 %v1400_v12, %v729_v14 }
 0x11a   : > { %v1225_v3 = vpop.f32.mrb[0].mxu1  ;;  %v1241_v38 = vmul.f32 %v1239_v17, %v1235_v37 }
 0x11b   : > { %1243 = vrot.lane.b32.xlu0 %v1225_v3, %s1716_s21  ;;  %v1594_v8 = vpop.f32.mrb[1].mxu1 }
 0x11c   : > { %v1253_v39 = vsel %vm1252_vm4, %v1241_v38, 0.0 }
 0x11d   : > { %v1254_v40 = vrot.slane %v1253_v39, 4 }
 0x11f   : > { %v1255_v41 = vadd.f32 %v1254_v40, %v1253_v39 }
 0x121   : > { %v1256_v42 = vrot.slane %v1255_v41, 2 }
 0x123   : > { %v1257_v43 = vadd.f32 %v1256_v42, %v1255_v41 }
 0x125   : > { %v1258_v45 = vrot.slane %v1257_v43, 1 }
 0x127   : > { %v1259_v47 = vadd.f32 %v1258_v45, %v1257_v43 }
 0x18d   : > { %v1244_v21 = vpop.permute.xlu0 %1243 }
 0x18e   : > { %v1246_v22 = vadd.f32 %v1244_v21, %v729_v14 }
 0x190   : > { %v1250_v23 = vadd.f32 %v1248_v20, %v1246_v22 }
 0x192   : > { %v1251_v26 = vmul.f32 %v1250_v23, %v1239_v17 }
 0x194   : > { %v1261_v30 = vsel %vm1260_vm3, %v1251_v26, 0.0 }
 0x195   : > { %v1262_v31 = vrot.slane %v1261_v30, 4 }
 0x197   : > { %v1263_v32 = vadd.f32 %v1262_v31, %v1261_v30 }
 0x199   : > { %v1264_v33 = vrot.slane %v1263_v32, 2 }
 0x19b   : > { %v1265_v34 = vadd.f32 %v1264_v33, %v1263_v32 }
 0x19d   : > { %v1266_v35 = vrot.slane %v1265_v34, 1 }
 0x19f   : > { %v1267_v36 = vadd.f32 %v1266_v35, %v1265_v34 }
 0x1a1   : > { %1269 = vrot.lane.b32.xlu1 %v1267_v36, %s1717_s22 }
 0x213   : > { %v1270_v48 = vpop.permute.xlu1 %1269 }
 0x214   : > { %v1272_v50 = vadd.f32 %v1270_v48, %v1259_v47 }
 0x216   : > { %v1274_v51 = vmul.f32 0.125, %v1272_v50 }
 0x218   : > { %v1278_v52 = vrot.slane %v1274_v51, %v1277_v49 }
 0x21a   : > { %1281 = vrot.lane.b32.xlu0 %v1278_v52, %s1716_s21  ;;  %v1279_v63 = vsub.f32 %v1241_v38, %v1278_v52 }
 0x21c   : > { %v1285_v0 = vmul.f32 %v1279_v63, %v1279_v63 }
 0x21e   : > { %v1286_v1 = vsel %vm1252_vm4, %v1285_v0, 0.0 }
 0x21f   : > { %v1287_v2 = vrot.slane %v1286_v1, 4 }
 0x221   : > { %v1288_v4 = vadd.f32 %v1287_v2, %v1286_v1 }
 0x223   : > { %v1289_v5 = vrot.slane %v1288_v4, 2 }
 0x225   : > { %v1290_v6 = vadd.f32 %v1289_v5, %v1288_v4 }
 0x227   : > { %v1291_v7 = vrot.slane %v1290_v6, 1 }
 0x229   : > { %v1292_v9 = vadd.f32 %v1291_v7, %v1290_v6 }
 0x28c   : > { %v1282_v53 = vpop.permute.xlu0 %1281 }
 0x28d   : > { %v1284_v54 = vsub.f32 %v1251_v26, %v1282_v53 }
 0x28f   : > { %v1293_v55 = vmul.f32 %v1284_v54, %v1284_v54 }
 0x291   : > { %v1294_v56 = vsel %vm1260_vm3, %v1293_v55, 0.0 }
 0x292   : > { %v1295_v57 = vrot.slane %v1294_v56, 4 }
 0x294   : > { %v1296_v58 = vadd.f32 %v1295_v57, %v1294_v56 }
 0x296   : > { %v1297_v59 = vrot.slane %v1296_v58, 2 }
 0x298   : > { %v1298_v60 = vadd.f32 %v1297_v59, %v1296_v58 }
 0x29a   : > { %v1299_v61 = vrot.slane %v1298_v60, 1 }
 0x29c   : > { %v1300_v62 = vadd.f32 %v1299_v61, %v1298_v60 }
 0x29e   : > { %1302 = vrot.lane.b32.xlu1 %v1300_v62, %s1717_s22 }
 0x310   : > { %v1303_v10 = vpop.permute.xlu1 %1302 }
 0x311   : > { %v1305_v11 = vadd.f32 %v1303_v10, %v1292_v9 }
 0x313   : > { %v1306_v16 = vmul.f32 0.125, %v1305_v11 }
 0x315   : > { %v1307_v18 = vadd.f32 1e-05, %v1306_v16 }
 0x317   : > { %1702 = vrsqrt.f32 %v1307_v18 }
 0x321   : > { %v1703_v19 = vpop.eup %1702 }
 0x322   : > { %v1312_v24 = vrot.slane %v1703_v19, %v1277_v49 }
 0x324   : > { %1317 = vrot.lane.b32.xlu0 %v1312_v24, %s1716_s21  ;;  %v1313_v25 = vmul.f32 %v1312_v24, %v1279_v63 }
 0x326   : > { %v1314_v28 = vmul.f32 0.2, %v1313_v25 }
 0x328   : > { %v1315_v12 = vmax.f32 %v1313_v25, %v1314_v28 }
 0x396   : > { %v1318_v27 = vpop.permute.xlu0 %1317 }
 0x397   : > { %v1320_v29 = vmul.f32 %v1318_v27, %v1284_v54 }
 0x399   : > { %v1321_v13 = vmul.f32 0.2, %v1320_v29 }
 0x39b   : > { %v1322_v14 = vmax.f32 %v1320_v29, %v1321_v13 }
 0x39d   : > { %v1324_v3 = vsel %vm1323_vm5, %v1315_v12, %v1322_v14 }
 0x39e   : > { %1326 = vst.msk [vmem:[%s236_s25] sm:$0xf] %vm1325_vm6, %v1324_v3 }
 0x39f PF: > { %s15_s18 = sadd.s32 1, %s1710_s18  }
 0x3a0   : > { %p12_p4 = scmp.ge.s32.totalorder %s15_s18, 4  }
 0x3a2   :  { %14 = sbr.rel (!%p12_p4) target bundleno = 1 (0x1), region = 73 }

// kernel: deep_interpolator_forward.19
= control target key start
LH: loop header
LB: loop body
LE: loop exit
PB: predicated region body
PF: predicated region fallthrough
CT: control target
= control target key end

     0   :  { %s1582_s18 = smov 0   ;;  %s1701_s0 = inlined_call_operand.vmem [shape: f32[2,8,16], index: 0, kind: input, shape index: {}]   ;;  %s1702_s1 = inlined_call_operand.vmem [shape: f32[2,8,1], index: 1, kind: input, shape index: {}]   ;;  %s1703_s2 = inlined_call_operand.vmem [shape: f32[16,16], index: 2, kind: input, shape index: {}]   ;;  %s1704_s3 = inlined_call_operand.vmem [shape: f32[16,8], index: 3, kind: input, shape index: {}]   ;;  %s1705_s4 = inlined_call_operand.vmem [shape: f32[1,8], index: 4, kind: input, shape index: {}]   ;;  %s1706_s5 = inlined_call_operand.vmem [shape: f32[2,8,16], index: 5, kind: output, shape index: {}]  }
   0x1 LB: > { %s1334_s19 = sadd.s32 4294967295, %s1544_s18   ;;  %p1338_p0 = scmp.ge.s32.totalorder %s1544_s18, 1  ;;  %s1544_s18 = sphi %s1582_s18, %s15_s18  }
   0x2   : > { %p195_p1 = scmp.lt.s32.totalorder %s1544_s18, 3 }
   0x4   : > { %p196_p2 = pnand %p1338_p0, %p195_p1 }
   0x5   : > { %v709_v0 = vld [vmem:[%s1704_s3] sm:$0xff] (!%p196_p2)  ;;  %v710_v1 = vld [vmem:[%s1704_s3 + $0x8] sm:$0xff] (!%p196_p2)  ;;  %p225_p3 = scmp.lt.s32.totalorder (!%p196_p2), %s1334_s19, 1  ;;  %v1546_v2 = vmov (!%p196_p2), 0.0|0.0   ;;  %vm1547_vm0 = vmmov (!%p196_p2), 0   ;;  %v1548_v5 = vmov (!%p196_p2), 0.0  }
   0x6   : > { %199 = sbr.rel (%p196_p2) target bundleno = 927 (0x39f), region = 40  ;;  %1483 = vmatprep.subr.bf16.mxu1 (!%p196_p2), %v1546_v2  ;;  %v715_v3 = vand.u32 (!%p196_p2), 4294901760, %v709_v0  ;;  %v718_v4 = vand.u32 (!%p196_p2), 4294901760, %v710_v1  ;;  %1427 = vmatprep.mubr.msk.f32.mxu1 (!%p196_p2), %vm1547_vm0, %v1548_v5  ;;  %v240_v6 = vld [vmem:[%s1703_s2] sm:$0xff] (!%p196_p2)  ;;  %v241_v7 = vld [vmem:[%s1703_s2 + $0x8] sm:$0xff] (!%p196_p2)  ;;  %v1549_v13 = vmov (!%p196_p2), 0  }
   0x7   : > { %1465 = vmatprep.subr.bf16.mxu0 (!%p196_p2), %v1546_v2  ;;  %v247_v8 = vand.u32 (!%p196_p2), 4294901760, %v240_v6  ;;  %v250_v9 = vand.u32 (!%p196_p2), 4294901760, %v241_v7  ;;  %1385 = vmatprep.mubr.msk.f32.mxu0 (!%p196_p2), %vm1547_vm0, %v1548_v5  ;;  %vm707_vm1 = vcmask (!%p196_p2), 1046528   ;;  %vm242_vm2 = vcmask (!%p196_p2), 130048   ;;  %v1342_v51 = vld [vmem:[%s1705_s4] ss:$0 sm:$0xff] (!%p196_p2) }
   0x8   : > { %v1608_v10 = vpack.c.bf16 (!%p196_p2), %v718_v4, %v715_v3  ;;  %v1610_v11 = vsub.f32 (!%p196_p2), %v709_v0, %v715_v3  ;;  %v1612_v12 = vsub.f32 (!%p196_p2), %v710_v1, %v718_v4  ;;  %1535 = vset.pattern.permute.xlu0 (!%p196_p2), %v1549_v13  ;;  %s1550_s12 = smov (!%p196_p2), 8   ;;  %vm1204_vm3 = vcmask (!%p196_p2), 130112   ;;  %s1551_s13 = smov (!%p196_p2), 120  }
   0x9   : > { %v1616_v14 = vpack.c.bf16 (!%p196_p2), %v250_v9, %v247_v8  ;;  %v1618_v15 = vsub.f32 (!%p196_p2), %v240_v6, %v247_v8  ;;  %v1620_v16 = vsub.f32 (!%p196_p2), %v241_v7, %v250_v9  ;;  %1191 = vrot.lane.b32.xlu1 (!%p196_p2), %v1342_v51, %s1550_s12  ;;  %vm1196_vm4 = vcmask (!%p196_p2), 64512  }
   0xa   : > { %1485 = vmatpush3.bf16.msra.mxu1 (!%p196_p2), %v1608_v10  ;;  %v794_v18 = vand.u32 (!%p196_p2), 4294901760, %v1610_v11  ;;  %v801_v19 = vand.u32 (!%p196_p2), 4294901760, %v1612_v12  ;;  %v1490_v48 = vpack.c.bf16 (!%p196_p2), %v1612_v12, %v1610_v11 }
   0xb   : > { %1486 = vmatprep.subr.bf16.mxu1 (!%p196_p2), %v1546_v2  ;;  %1467 = vmatpush3.bf16.msra.mxu0 (!%p196_p2), %v1616_v14  ;;  %v326_v20 = vand.u32 (!%p196_p2), 4294901760, %v1618_v15  ;;  %v333_v21 = vand.u32 (!%p196_p2), 4294901760, %v1620_v16  ;;  %v1472_v47 = vpack.c.bf16 (!%p196_p2), %v1620_v16, %v1618_v15 }
   0xc   : > { %1468 = vmatprep.subr.bf16.mxu0 (!%p196_p2), %v1546_v2  ;;  %v795_v30 = vsub.f32 (!%p196_p2), %v1610_v11, %v794_v18  ;;  %v802_v31 = vsub.f32 (!%p196_p2), %v1612_v12, %v801_v19  ;;  %v1496_v50 = vpack.c.bf16 (!%p196_p2), %v801_v19, %v794_v18  ;;  %v1219_v12 = vlaneseq (!%p196_p2) }
   0xd   : > { %s1708_s19 = smov (!%p225_p3, %s1334_s19), 1  ;;  %v327_v25 = vsub.f32 %v1618_v15, %v326_v20  ;;  %v334_v26 = vsub.f32 %v1620_v16, %v333_v21  ;;  %v1478_v49 = vpack.c.bf16 %v333_v21, %v326_v20 }
   0xe   : > { %s1614_s28 = sshll.u32 %s1708_s19, 3  ;;  %v796_v38 = vand.u32 4294901760, %v795_v30  ;;  %v803_v39 = vand.u32 4294901760, %v802_v31 }
   0xf   : > { %s228_s6 = scalar_lea.vmem %s1701_s0, %s1614_s28  ;;  %s232_s9 = scalar_lea.vmem %s1702_s1, %s1614_s28  ;;  %v328_v34 = vand.u32 4294901760, %v327_v25  ;;  %v335_v35 = vand.u32 4294901760, %v334_v26 }
  0x10   : > { %v237_v17 = vld [vmem:[%s228_s6] sm:$0xff]  ;;  %v1487_v45 = vpack.c.bf16 %v803_v39, %v796_v38  ;;  %s236_s16 = scalar_lea.vmem %s1706_s5, %s1614_s28 }
  0x11   : > { %v238_v22 = vld [vmem:[%s232_s9] sm:$0xff]  ;;  %v705_v23 = vrot.slane %v237_v17, 1  ;;  %v244_v24 = vsel %vm242_vm2, %v237_v17, 0  ;;  %v1469_v42 = vpack.c.bf16 %v335_v35, %v328_v34 }
  0x12   : > { %1182 = vperm.xlu0 %1535, %v238_v22   ;;  %v313_v28 = vand.u32 4294901760, %v244_v24 }
  0x13   : > { %v708_v27 = vsel %vm707_vm1, %v705_v23, 0.0 }
  0x14   : > { %v712_v29 = vsel %vm242_vm2, %v708_v27, 0  ;;  %v314_v33 = vsub.f32 %v244_v24, %v313_v28 }
  0x15   : > { %v781_v32 = vand.u32 4294901760, %v712_v29 }
  0x16   : > { %v315_v37 = vand.u32 4294901760, %v314_v33 }
  0x17   : > { %v782_v36 = vsub.f32 %v712_v29, %v781_v32 }
  0x18   : > { %v316_v41 = vsub.f32 %v314_v33, %v315_v37 }
  0x19   : > { %v783_v40 = vand.u32 4294901760, %v782_v36 }
  0x1a   : > { %v317_v44 = vand.u32 4294901760, %v316_v41 }
  0x1b   : > { %v784_v43 = vsub.f32 %v782_v36, %v783_v40 }
  0x1c   : > { %1386 = vmatmul.mubr.f32.vlgmr.msra.gmra.mrb[0].mxu0 %v317_v44 }
  0x1d   : > { %v785_v46 = vand.u32 4294901760, %v784_v43  ;;  %1470 = vmatpush3.bf16.msra.mxu0 %v1469_v42  ;;  %1392 = vmatprep.mubr.msk.f32.mxu0 %vm1547_vm0, %v1548_v5 }
  0x1e   : > { %1471 = vmatprep.subr.bf16.mxu0 %v1546_v2 }
  0x1f   : > { %1428 = vmatmul.mubr.f32.vlgmr.msra.gmra.mrb[0].mxu1 %v785_v46 }
  0x20   : > { %1488 = vmatpush3.bf16.msra.mxu1 %v1487_v45  ;;  %1434 = vmatprep.mubr.msk.f32.mxu1 %vm1547_vm0, %v1548_v5 }
  0x21   : > { %1489 = vmatprep.subr.bf16.mxu1 %v1546_v2 }
  0x24   : > { %1393 = vmatmul.mubr.f32.vlgmr.msra.gmra.mrb[0].mxu0 %v313_v28 }
  0x25   : > { %1473 = vmatpush3.bf16.msra.mxu0 %v1472_v47  ;;  %1399 = vmatprep.mubr.msk.f32.mxu0 %vm1547_vm0, %v1548_v5 }
  0x26   : > { %1474 = vmatprep.subr.bf16.mxu0 %v1546_v2 }
  0x27   : > { %1435 = vmatmul.mubr.f32.vlgmr.msra.gmra.mrb[0].mxu1 %v781_v32 }
  0x28   : > { %1491 = vmatpush3.bf16.msra.mxu1 %v1490_v48  ;;  %1441 = vmatprep.mubr.msk.f32.mxu1 %vm1547_vm0, %v1548_v5 }
  0x29   : > { %1492 = vmatprep.subr.bf16.mxu1 %v1546_v2 }
  0x2c   : > { %1400 = vmatmul.mubr.f32.vlgmr.msra.gmra.mrb[0].mxu0 %v314_v33 }
  0x2d   : > { %1476 = vmatpush3.bf16.msra.mxu0 %v1616_v14  ;;  %1406 = vmatprep.mubr.msk.f32.mxu0 %vm1547_vm0, %v1548_v5 }
  0x2e   : > { %1477 = vmatprep.subr.bf16.mxu0 %v1546_v2 }
  0x2f   : > { %1442 = vmatmul.mubr.f32.vlgmr.msra.gmra.mrb[0].mxu1 %v782_v36 }
  0x30   : > { %1494 = vmatpush3.bf16.msra.mxu1 %v1608_v10  ;;  %1448 = vmatprep.mubr.msk.f32.mxu1 %vm1547_vm0, %v1548_v5 }
  0x31   : > { %1495 = vmatprep.subr.bf16.mxu1 %v1546_v2 }
  0x34   : > { %1407 = vmatmul.mubr.f32.vlgmr.msra.gmra.mrb[0].mxu0 %v315_v37 }
  0x35   : > { %1479 = vmatpush3.bf16.msra.mxu0 %v1478_v49  ;;  %1413 = vmatprep.mubr.msk.f32.mxu0 %vm1547_vm0, %v1548_v5 }
  0x36   : > { %1480 = vmatprep.subr.bf16.mxu0 %v1546_v2 }
  0x37   : > { %1449 = vmatmul.mubr.f32.vlgmr.msra.gmra.mrb[0].mxu1 %v783_v40 }
  0x38   : > { %1497 = vmatpush3.bf16.msra.mxu1 %v1496_v50  ;;  %1455 = vmatprep.mubr.msk.f32.mxu1 %vm1547_vm0, %v1548_v5 }
  0x39   : > { %1498 = vmatprep.subr.bf16.mxu1 %v1546_v2 }
  0x3c   : > { %1414 = vmatmul.mubr.f32.vlgmr.msra.gmra.mrb[0].mxu0 %v313_v28 }
  0x3d   : > { %1482 = vmatpush3.bf16.msra.mxu0 %v1616_v14  ;;  %1420 = vmatprep.mubr.msk.f32.mxu0 %vm1547_vm0, %v1548_v5  ;;  %v1220_v14 = vshrl.u32 %v1219_v12, 7 }
  0x3f   : > { %1456 = vmatmul.mubr.f32.vlgmr.msra.gmra.mrb[0].mxu1 %v781_v32  ;;  %v1221_v17 = vsub.s32 0, %v1220_v14 }
  0x40   : > { %1500 = vmatpush3.bf16.msra.mxu1 %v1608_v10  ;;  %1462 = vmatprep.mubr.msk.f32.mxu1 %vm1547_vm0, %v1548_v5 }
  0x44   : > { %1421 = vmatmul.mubr.f32.vlgmr.msra.gmra.mrb[0].mxu0 %v313_v28 }
  0x47   : > { %1463 = vmatmul.mubr.f32.vlgmr.msra.gmra.mrb[0].mxu1 %v781_v32 }
  0x7b   : > { %v1192_v58 = vpop.permute.xlu1 %1191 }
  0x91   : > { %v1183_v56 = vpop.permute.xlu0 %1182 }
 0x117   : > { %v701_v52 = vpop.f32.mrb[0].mxu0 }
 0x118   : > { %v1422_v53 = vpop.f32.mrb[1].mxu0  ;;  %v1179_v5 = vadd.f32 %v1342_v51, %v701_v52 }
 0x11a   : > { %v1169_v54 = vpop.f32.mrb[0].mxu1  ;;  %v1185_v6 = vmul.f32 %v1183_v56, %v1179_v5 }
 0x11b   : > { %1187 = vrot.lane.b32.xlu0 %v1169_v54, %s1550_s12  ;;  %v1464_v55 = vpop.f32.mrb[1].mxu1 }
 0x11c   : > { %v1197_v7 = vsel %vm1196_vm4, %v1185_v6, 0.0 }
 0x11d   : > { %v1198_v8 = vrot.slane %v1197_v7, 4 }
 0x11f   : > { %v1199_v9 = vadd.f32 %v1198_v8, %v1197_v7 }
 0x121   : > { %v1200_v10 = vrot.slane %v1199_v9, 2 }
 0x123   : > { %v1201_v11 = vadd.f32 %v1200_v10, %v1199_v9 }
 0x125   : > { %v1202_v13 = vrot.slane %v1201_v11, 1 }
 0x127   : > { %v1203_v15 = vadd.f32 %v1202_v13, %v1201_v11 }
 0x18d   : > { %v1188_v57 = vpop.permute.xlu0 %1187 }
 0x18e   : > { %v1190_v59 = vadd.f32 %v1188_v57, %v701_v52 }
 0x190   : > { %v1194_v60 = vadd.f32 %v1192_v58, %v1190_v59 }
 0x192   : > { %v1195_v61 = vmul.f32 %v1194_v60, %v1183_v56 }
 0x194   : > { %v1205_v62 = vsel %vm1204_vm3, %v1195_v61, 0.0 }
 0x195   : > { %v1206_v63 = vrot.slane %v1205_v62, 4 }
 0x197   : > { %v1207_v0 = vadd.f32 %v1206_v63, %v1205_v62 }
 0x199   : > { %v1208_v1 = vrot.slane %v1207_v0, 2 }
 0x19b   : > { %v1209_v2 = vadd.f32 %v1208_v1, %v1207_v0 }
 0x19d   : > { %v1210_v3 = vrot.slane %v1209_v2, 1 }
 0x19f   : > { %v1211_v4 = vadd.f32 %v1210_v3, %v1209_v2 }
 0x1a1   : > { %1213 = vrot.lane.b32.xlu1 %v1211_v4, %s1551_s13 }
 0x213   : > { %v1214_v16 = vpop.permute.xlu1 %1213 }
 0x214   : > { %v1216_v18 = vadd.f32 %v1214_v16, %v1203_v15 }
 0x216   : > { %v1218_v19 = vmul.f32 0.0625, %v1216_v18 }
 0x218   : > { %v1222_v20 = vrot.slane %v1218_v19, %v1221_v17 }
 0x21a   : > { %1225 = vrot.lane.b32.xlu0 %v1222_v20, %s1550_s12  ;;  %v1223_v31 = vsub.f32 %v1185_v6, %v1222_v20 }
 0x21c   : > { %v1229_v32 = vmul.f32 %v1223_v31, %v1223_v31 }
 0x21e   : > { %v1230_v33 = vsel %vm1196_vm4, %v1229_v32, 0.0 }
 0x21f   : > { %v1231_v34 = vrot.slane %v1230_v33, 4 }
 0x221   : > { %v1232_v35 = vadd.f32 %v1231_v34, %v1230_v33 }
 0x223   : > { %v1233_v36 = vrot.slane %v1232_v35, 2 }
 0x225   : > { %v1234_v37 = vadd.f32 %v1233_v36, %v1232_v35 }
 0x227   : > { %v1235_v38 = vrot.slane %v1234_v37, 1 }
 0x229   : > { %v1236_v39 = vadd.f32 %v1235_v38, %v1234_v37 }
 0x28c   : > { %v1226_v21 = vpop.permute.xlu0 %1225 }
 0x28d   : > { %v1228_v22 = vsub.f32 %v1195_v61, %v1226_v21 }
 0x28f   : > { %v1237_v23 = vmul.f32 %v1228_v22, %v1228_v22 }
 0x291   : > { %v1238_v24 = vsel %vm1204_vm3, %v1237_v23, 0.0 }
 0x292   : > { %v1239_v25 = vrot.slane %v1238_v24, 4 }
 0x294   : > { %v1240_v26 = vadd.f32 %v1239_v25, %v1238_v24 }
 0x296   : > { %v1241_v27 = vrot.slane %v1240_v26, 2 }
 0x298   : > { %v1242_v28 = vadd.f32 %v1241_v27, %v1240_v26 }
 0x29a   : > { %v1243_v29 = vrot.slane %v1242_v28, 1 }
 0x29c   : > { %v1244_v30 = vadd.f32 %v1243_v29, %v1242_v28 }
 0x29e   : > { %1246 = vrot.lane.b32.xlu1 %v1244_v30, %s1551_s13 }
 0x310   : > { %v1247_v40 = vpop.permute.xlu1 %1246 }
 0x311   : > { %v1249_v41 = vadd.f32 %v1247_v40, %v1236_v39 }
 0x313   : > { %v1250_v42 = vmul.f32 0.0625, %v1249_v41 }
 0x315   : > { %v1251_v43 = vadd.f32 1e-05, %v1250_v42 }
 0x317   : > { %1536 = vrsqrt.f32 %v1251_v43 }
 0x321   : > { %v1537_v44 = vpop.eup %1536 }
 0x322   : > { %v1256_v45 = vrot.slane %v1537_v44, %v1221_v17 }
 0x324   : > { %1261 = vrot.lane.b32.xlu0 %v1256_v45, %s1550_s12  ;;  %v1257_v46 = vmul.f32 %v1256_v45, %v1223_v31 }
 0x326   : > { %v1258_v48 = vmul.f32 0.2, %v1257_v46 }
 0x328   : > { %v1259_v51 = vmax.f32 %v1257_v46, %v1258_v48 }
 0x396   : > { %v1262_v47 = vpop.permute.xlu0 %1261 }
 0x397   : > { %v1264_v49 = vmul.f32 %v1262_v47, %v1228_v22 }
 0x399   : > { %v1265_v50 = vmul.f32 0.2, %v1264_v49 }
 0x39b   : > { %v1266_v52 = vmax.f32 %v1264_v49, %v1265_v50 }
 0x39d   : > { %v1267_v53 = vsel %vm1196_vm4, %v1259_v51, %v1266_v52 }
 0x39e   : > { %1268 = vst.msk [vmem:[%s236_s16] sm:$0xff] %vm242_vm2, %v1267_v53 }
 0x39f PF: > { %s15_s18 = sadd.s32 1, %s1544_s18  }
 0x3a0   : > { %p12_p4 = scmp.ge.s32.totalorder %s15_s18, 4  }
 0x3a2   :  { %14 = sbr.rel (!%p12_p4) target bundleno = 1 (0x1), region = 73 }

// kernel: deep_interpolator_forward.20
= control target key start
LH: loop header
LB: loop body
LE: loop exit
PB: predicated region body
PF: predicated region fallthrough
CT: control target
= control target key end

     0   :  { %s1633_s18 = smov 0   ;;  %s1736_s0 = inlined_call_operand.vmem [shape: f32[2,16,8], index: 0, kind: input, shape index: {}]   ;;  %s1737_s1 = inlined_call_operand.vmem [shape: f32[2,16,1], index: 1, kind: input, shape index: {}]   ;;  %s1738_s2 = inlined_call_operand.vmem [shape: f32[8,8], index: 2, kind: input, shape index: {}]   ;;  %s1739_s3 = inlined_call_operand.vmem [shape: f32[8,4], index: 3, kind: input, shape index: {}]   ;;  %s1740_s4 = inlined_call_operand.vmem [shape: f32[1,4], index: 4, kind: input, shape index: {}]   ;;  %s1741_s5 = inlined_call_operand.vmem [shape: f32[2,16,8], index: 5, kind: output, shape index: {}]  }
   0x1 LB: > { %s1445_s19 = sadd.s32 4294967295, %s1598_s18   ;;  %p1449_p0 = scmp.ge.s32.totalorder %s1598_s18, 1  ;;  %s1598_s18 = sphi %s1633_s18, %s15_s18  }
   0x2   : > { %p197_p1 = scmp.lt.s32.totalorder %s1598_s18, 3 }
   0x4   : > { %p198_p2 = pnand %p1449_p0, %p197_p1 }
   0x5   : > { %v753_v0 = vld [vmem:[%s1739_s3] sm:$0xff] (!%p198_p2)  ;;  %p230_p3 = scmp.lt.s32.totalorder (!%p198_p2), %s1445_s19, 1  ;;  %v1600_v4 = vmov (!%p198_p2), 0   ;;  %vm251_vm0 = vcmask (!%p198_p2), 64512   ;;  %vm747_vm1 = vcmask (!%p198_p2), 1046528   ;;  %s1601_s8 = smov (!%p198_p2), 4  }
   0x6   : > { %201 = sbr.rel (%p198_p2) target bundleno = 937 (0x3a9), region = 40  ;;  %v250_v1 = vld [vmem:[%s1738_s2] sm:$0xff] (!%p198_p2)  ;;  %v1647_v2 = vand.u32 (!%p198_p2), 4294901760, %v753_v0  ;;  %1589 = vset.pattern.permute.xlu0 (!%p198_p2), %v1600_v4  ;;  %vm1295_vm2 = vcmask (!%p198_p2), 64544   ;;  %s1602_s9 = smov (!%p198_p2), 124   ;;  %vm1285_vm3 = vcmask (!%p198_p2), 31744  }
   0x7   : > { %v1649_v3 = vand.u32 (!%p198_p2), 4294901760, %v250_v1  ;;  %v1456_v45 = vld [vmem:[%s1740_s4] ss:$0 sm:$0xff] (!%p198_p2) }
   0x8   : > { %1528 = vmatprep.subr.mxu1 (!%p198_p2), %v1647_v2  ;;  %v1653_v5 = vsub.f32 (!%p198_p2), %v753_v0, %v1647_v2 }
   0x9   : > { %1498 = vmatprep.subr.mxu0 (!%p198_p2), %v1649_v3  ;;  %v346_v6 = vsub.f32 (!%p198_p2), %v250_v1, %v1649_v3  ;;  %1529 = vmatpush3.msra.mxu1 (!%p198_p2), %v1647_v2 }
   0xa   : > { %1499 = vmatpush3.msra.mxu0 (!%p198_p2), %v1649_v3  ;;  %v1666_v7 = vand.u32 (!%p198_p2), 4294901760, %v1653_v5 }
   0xb   : > { %v1668_v8 = vand.u32 (!%p198_p2), 4294901760, %v346_v6 }
   0xc   : > { %v849_v14 = vsub.f32 (!%p198_p2), %v1653_v5, %v1666_v7 }
   0xd   : > { %s1743_s19 = smov (!%p230_p3, %s1445_s19), 1  ;;  %v348_v18 = vsub.f32 %v346_v6, %v1668_v8 }
   0xe   : > { %s1658_s24 = sshll.u32 %s1743_s19, 4  ;;  %v850_v22 = vand.u32 4294901760, %v849_v14 }
   0xf   : > { %s234_s27 = scalar_lea.vmem %s1736_s0, %s1658_s24  ;;  %s239_s30 = scalar_lea.vmem %s1737_s1, %s1658_s24  ;;  %v349_v27 = vand.u32 4294901760, %v348_v18 }
  0x10   : > { %v245_v9 = vld [vmem:[%s234_s27] sm:$0xff]  ;;  %v246_v10 = vld [vmem:[%s234_s27 + $0x8] sm:$0xff]  ;;  %1533 = vmatprep.subr.mxu1 %v850_v22  ;;  %s244_s12 = scalar_lea.vmem %s1741_s5, %s1658_s24 }
  0x11   : > { %v247_v11 = vld [vmem:[%s239_s30] sm:$0xff]  ;;  %v748_v12 = vrot.slane %v245_v9, 1  ;;  %v749_v13 = vrot.slane %v246_v10, 1  ;;  %v253_v15 = vsel %vm251_vm0, %v245_v9, 0  ;;  %v256_v17 = vsel %vm251_vm0, %v246_v10, 0  ;;  %v248_v19 = vld [vmem:[%s239_s30 + $0x8] sm:$0xff]  ;;  %1503 = vmatprep.subr.mxu0 %v349_v27 }
  0x12   : > { %1258 = vperm.xlu0 %1589, %v247_v11   ;;  %v1677_v16 = vand.u32 4294901760, %v253_v15  ;;  %v1681_v23 = vand.u32 4294901760, %v256_v17 }
  0x13   : > { %v750_v20 = vsel %vm747_vm1, %v748_v12, %v749_v13  ;;  %v752_v21 = vsel %vm747_vm1, %v749_v13, 0.0 }
  0x14   : > { %v754_v24 = vsel %vm251_vm0, %v750_v20, 0  ;;  %v757_v25 = vsel %vm251_vm0, %v752_v21, 0  ;;  %v325_v26 = vsub.f32 %v253_v15, %v1677_v16  ;;  %v335_v30 = vsub.f32 %v256_v17, %v1681_v23 }
  0x15   : > { %v825_v28 = vand.u32 4294901760, %v754_v24  ;;  %v835_v29 = vand.u32 4294901760, %v757_v25  ;;  %v1312_v17 = vlaneseq }
  0x16   : > { %1263 = vperm.xlu0 %1589, %v248_v19   ;;  %v326_v31 = vand.u32 4294901760, %v325_v26  ;;  %v336_v34 = vand.u32 4294901760, %v335_v30 }
  0x17   : > { %v826_v32 = vsub.f32 %v754_v24, %v825_v28  ;;  %v836_v33 = vsub.f32 %v757_v25, %v835_v29  ;;  %v1313_v19 = vshrl.u32 %v1312_v17, 7 }
  0x18   : > { %v327_v35 = vsub.f32 %v325_v26, %v326_v31  ;;  %v337_v38 = vsub.f32 %v335_v30, %v336_v34 }
  0x19   : > { %v827_v36 = vand.u32 4294901760, %v826_v32  ;;  %v837_v37 = vand.u32 4294901760, %v836_v33 }
  0x1a   : > { %v328_v39 = vand.u32 4294901760, %v327_v35  ;;  %v338_v42 = vand.u32 4294901760, %v337_v38  ;;  %1278 = vrot.lane.b32.xlu0 %v1456_v45, %s1601_s8 }
  0x1b   : > { %v828_v40 = vsub.f32 %v826_v32, %v827_v36  ;;  %v838_v41 = vsub.f32 %v836_v33, %v837_v37 }
  0x1c   : > { %1500 = vmatprep.mubr.f32.mxu0 %v328_v39 }
  0x1d   : > { %v829_v43 = vand.u32 4294901760, %v828_v40  ;;  %v839_v44 = vand.u32 4294901760, %v838_v41  ;;  %1501 = vmatmul.mubr.f32.vlgmr.msra.gmra.mrb[0].mxu0 %v338_v42 }
  0x1e   : > { %1504 = vmatpush3.msra.mxu0 %v349_v27  ;;  %1505 = vmatprep.mubr.f32.mxu0 %v1677_v16 }
  0x1f   : > { %1530 = vmatprep.mubr.f32.mxu1 %v829_v43  ;;  %1508 = vmatprep.subr.mxu0 %v346_v6 }
  0x20   : > { %1531 = vmatmul.mubr.f32.vlgmr.msra.gmra.mrb[0].mxu1 %v839_v44 }
  0x21   : > { %1534 = vmatpush3.msra.mxu1 %v850_v22  ;;  %1535 = vmatprep.mubr.f32.mxu1 %v825_v28  ;;  %v1314_v22 = vsub.s32 0, %v1313_v19 }
  0x22   : > { %1538 = vmatprep.subr.mxu1 %v1653_v5 }
  0x25   : > { %1506 = vmatmul.mubr.f32.vlgmr.msra.gmra.mrb[0].mxu0 %v1681_v23 }
  0x26   : > { %1509 = vmatpush3.msra.mxu0 %v346_v6  ;;  %1510 = vmatprep.mubr.f32.mxu0 %v325_v26 }
  0x27   : > { %1513 = vmatprep.subr.mxu0 %v1649_v3 }
  0x28   : > { %1536 = vmatmul.mubr.f32.vlgmr.msra.gmra.mrb[0].mxu1 %v835_v29 }
  0x29   : > { %1539 = vmatpush3.msra.mxu1 %v1653_v5  ;;  %1540 = vmatprep.mubr.f32.mxu1 %v826_v32 }
  0x2a   : > { %1543 = vmatprep.subr.mxu1 %v1647_v2 }
  0x2d   : > { %1511 = vmatmul.mubr.f32.vlgmr.msra.gmra.mrb[0].mxu0 %v335_v30 }
  0x2e   : > { %1514 = vmatpush3.msra.mxu0 %v1649_v3  ;;  %1515 = vmatprep.mubr.f32.mxu0 %v326_v31 }
  0x2f   : > { %1518 = vmatprep.subr.mxu0 %v1668_v8 }
  0x30   : > { %1541 = vmatmul.mubr.f32.vlgmr.msra.gmra.mrb[0].mxu1 %v836_v33 }
  0x31   : > { %1544 = vmatpush3.msra.mxu1 %v1647_v2  ;;  %1545 = vmatprep.mubr.f32.mxu1 %v827_v36 }
  0x32   : > { %1548 = vmatprep.subr.mxu1 %v1666_v7 }
  0x35   : > { %1516 = vmatmul.mubr.f32.vlgmr.msra.gmra.mrb[0].mxu0 %v336_v34 }
  0x36   : > { %1519 = vmatpush3.msra.mxu0 %v1668_v8  ;;  %1520 = vmatprep.mubr.f32.mxu0 %v1677_v16 }
  0x37   : > { %1523 = vmatprep.subr.mxu0 %v1649_v3 }
  0x38   : > { %1546 = vmatmul.mubr.f32.vlgmr.msra.gmra.mrb[0].mxu1 %v837_v37 }
  0x39   : > { %1549 = vmatpush3.msra.mxu1 %v1666_v7  ;;  %1550 = vmatprep.mubr.f32.mxu1 %v825_v28 }
  0x3a   : > { %1553 = vmatprep.subr.mxu1 %v1647_v2 }
  0x3d   : > { %1521 = vmatmul.mubr.f32.vlgmr.msra.gmra.mrb[0].mxu0 %v1681_v23 }
  0x3e   : > { %1524 = vmatpush3.msra.mxu0 %v1649_v3  ;;  %1525 = vmatprep.mubr.f32.mxu0 %v1677_v16 }
  0x40   : > { %1551 = vmatmul.mubr.f32.vlgmr.msra.gmra.mrb[0].mxu1 %v835_v29 }
  0x41   : > { %1554 = vmatpush3.msra.mxu1 %v1647_v2  ;;  %1555 = vmatprep.mubr.f32.mxu1 %v825_v28 }
  0x45   : > { %1526 = vmatmul.mubr.f32.vlgmr.msra.gmra.mrb[0].mxu0 %v1681_v23 }
  0x48   : > { %1556 = vmatmul.mubr.f32.vlgmr.msra.gmra.mrb[0].mxu1 %v835_v29 }
  0x91   : > { %v1259_v50 = vpop.permute.xlu0 %1258 }
  0x95   : > { %v1264_v51 = vpop.permute.xlu0 %1263 }
  0x99   : > { %v1279_v53 = vpop.permute.xlu0 %1278 }
 0x118   : > { %v1527_v46 = vpop.f32.mrb[0].mxu0 }
 0x119   : > { %v737_v47 = vpop.f32.mrb[1].mxu0  ;;  %v1255_v6 = vadd.f32 %v1527_v46, %v1456_v45 }
 0x11a   : > { %v1254_v7 = vadd.f32 %v1456_v45, %v737_v47 }
 0x11b   : > { %v1557_v48 = vpop.f32.mrb[0].mxu1  ;;  %v1267_v9 = vmul.f32 %v1264_v51, %v1255_v6 }
 0x11c   : > { %v1238_v49 = vpop.f32.mrb[1].mxu1  ;;  %v1266_v8 = vmul.f32 %v1259_v50, %v1254_v7 }
 0x11d   : > { %1270 = vrot.lane.b32.xlu1 %v1238_v49, %s1601_s8  ;;  %v1287_v11 = vsel %vm1285_vm3, %v1267_v9, 0.0 }
 0x11e   : > { %v1286_v10 = vsel %vm1285_vm3, %v1266_v8, 0.0 }
 0x11f   : > { %v1288_v12 = vadd.f32 %v1287_v11, %v1286_v10 }
 0x121   : > { %1272 = vrot.lane.b32.xlu1 %v1557_v48, %s1601_s8  ;;  %v1289_v13 = vrot.slane %v1288_v12, 4 }
 0x123   : > { %v1290_v14 = vadd.f32 %v1289_v13, %v1288_v12 }
 0x125   : > { %v1291_v15 = vrot.slane %v1290_v14, 2 }
 0x127   : > { %v1292_v16 = vadd.f32 %v1291_v15, %v1290_v14 }
 0x129   : > { %v1293_v18 = vrot.slane %v1292_v16, 1 }
 0x12b   : > { %v1294_v20 = vadd.f32 %v1293_v18, %v1292_v16 }
 0x18f   : > { %v1271_v52 = vpop.permute.xlu1 %1270 }
 0x190   : > { %v1276_v54 = vadd.f32 %v1271_v52, %v737_v47 }
 0x192   : > { %v1281_v55 = vadd.f32 %v1279_v53, %v1276_v54 }
 0x193   : > { %v1273_v56 = vpop.permute.xlu1 %1272 }
 0x194   : > { %v1277_v57 = vadd.f32 %v1527_v46, %v1273_v56  ;;  %v1283_v58 = vmul.f32 %v1281_v55, %v1259_v50 }
 0x196   : > { %v1282_v59 = vadd.f32 %v1279_v53, %v1277_v57  ;;  %v1296_v61 = vsel %vm1295_vm2, %v1283_v58, 0.0 }
 0x198   : > { %v1284_v60 = vmul.f32 %v1282_v59, %v1264_v51 }
 0x19a   : > { %v1297_v62 = vsel %vm1295_vm2, %v1284_v60, 0.0 }
 0x19b   : > { %v1298_v63 = vadd.f32 %v1297_v62, %v1296_v61 }
 0x19d   : > { %v1299_v0 = vrot.slane %v1298_v63, 4 }
 0x19f   : > { %v1300_v1 = vadd.f32 %v1299_v0, %v1298_v63 }
 0x1a1   : > { %v1301_v2 = vrot.slane %v1300_v1, 2 }
 0x1a3   : > { %v1302_v3 = vadd.f32 %v1301_v2, %v1300_v1 }
 0x1a5   : > { %v1303_v4 = vrot.slane %v1302_v3, 1 }
 0x1a7   : > { %v1304_v5 = vadd.f32 %v1303_v4, %v1302_v3 }
 0x1a9   : > { %1306 = vrot.lane.b32.xlu1 %v1304_v5, %s1602_s9 }
 0x21b   : > { %v1307_v21 = vpop.permute.xlu1 %1306 }
 0x21c   : > { %v1309_v23 = vadd.f32 %v1307_v21, %v1294_v20 }
 0x21e   : > { %v1311_v24 = vmul.f32 0.03125, %v1309_v23 }
 0x220   : > { %v1315_v25 = vrot.slane %v1311_v24, %v1314_v22 }
 0x222   : > { %1319 = vrot.lane.b32.xlu0 %v1315_v25, %s1601_s8  ;;  %v1316_v40 = vsub.f32 %v1266_v8, %v1315_v25  ;;  %v1317_v41 = vsub.f32 %v1267_v9, %v1315_v25 }
 0x224   : > { %v1324_v42 = vmul.f32 %v1316_v40, %v1316_v40  ;;  %v1325_v43 = vmul.f32 %v1317_v41, %v1317_v41 }
 0x226   : > { %v1326_v44 = vsel %vm1285_vm3, %v1324_v42, 0.0  ;;  %v1327_v45 = vsel %vm1285_vm3, %v1325_v43, 0.0 }
 0x227   : > { %v1328_v46 = vadd.f32 %v1327_v45, %v1326_v44 }
 0x229   : > { %v1329_v47 = vrot.slane %v1328_v46, 4 }
 0x22b   : > { %v1330_v48 = vadd.f32 %v1329_v47, %v1328_v46 }
 0x22d   : > { %v1331_v49 = vrot.slane %v1330_v48, 2 }
 0x22f   : > { %v1332_v50 = vadd.f32 %v1331_v49, %v1330_v48 }
 0x231   : > { %v1333_v51 = vrot.slane %v1332_v50, 1 }
 0x233   : > { %v1334_v52 = vadd.f32 %v1333_v51, %v1332_v50 }
 0x294   : > { %v1320_v26 = vpop.permute.xlu0 %1319 }
 0x295   : > { %v1322_v27 = vsub.f32 %v1283_v58, %v1320_v26  ;;  %v1323_v28 = vsub.f32 %v1284_v60, %v1320_v26 }
 0x297   : > { %v1335_v29 = vmul.f32 %v1322_v27, %v1322_v27  ;;  %v1336_v30 = vmul.f32 %v1323_v28, %v1323_v28 }
 0x299   : > { %v1337_v31 = vsel %vm1295_vm2, %v1335_v29, 0.0  ;;  %v1338_v32 = vsel %vm1295_vm2, %v1336_v30, 0.0 }
 0x29a   : > { %v1339_v33 = vadd.f32 %v1338_v32, %v1337_v31 }
 0x29c   : > { %v1340_v34 = vrot.slane %v1339_v33, 4 }
 0x29e   : > { %v1341_v35 = vadd.f32 %v1340_v34, %v1339_v33 }
 0x2a0   : > { %v1342_v36 = vrot.slane %v1341_v35, 2 }
 0x2a2   : > { %v1343_v37 = vadd.f32 %v1342_v36, %v1341_v35 }
 0x2a4   : > { %v1344_v38 = vrot.slane %v1343_v37, 1 }
 0x2a6   : > { %v1345_v39 = vadd.f32 %v1344_v38, %v1343_v37 }
 0x2a8   : > { %1347 = vrot.lane.b32.xlu1 %v1345_v39, %s1602_s9 }
 0x31a   : > { %v1348_v53 = vpop.permute.xlu1 %1347 }
 0x31b   : > { %v1350_v54 = vadd.f32 %v1348_v53, %v1334_v52 }
 0x31d   : > { %v1351_v55 = vmul.f32 0.03125, %v1350_v54 }
 0x31f   : > { %v1352_v56 = vadd.f32 1e-05, %v1351_v55 }
 0x321   : > { %1590 = vrsqrt.f32 %v1352_v56 }
 0x32b   : > { %v1591_v57 = vpop.eup %1590 }
 0x32c   : > { %v1357_v58 = vrot.slane %v1591_v57, %v1314_v22 }
 0x32e   : > { %1365 = vrot.lane.b32.xlu0 %v1357_v58, %s1601_s8  ;;  %v1358_v59 = vmul.f32 %v1357_v58, %v1316_v40  ;;  %v1359_v60 = vmul.f32 %v1357_v58, %v1317_v41 }
 0x330   : > { %v1360_v62 = vmul.f32 0.2, %v1358_v59  ;;  %v1361_v63 = vmul.f32 0.2, %v1359_v60 }
 0x332   : > { %v1362_v4 = vmax.f32 %v1358_v59, %v1360_v62  ;;  %v1363_v5 = vmax.f32 %v1359_v60, %v1361_v63 }
 0x3a0   : > { %v1366_v61 = vpop.permute.xlu0 %1365 }
 0x3a1   : > { %v1368_v0 = vmul.f32 %v1366_v61, %v1322_v27  ;;  %v1369_v1 = vmul.f32 %v1366_v61, %v1323_v28 }
 0x3a3   : > { %v1370_v2 = vmul.f32 0.2, %v1368_v0  ;;  %v1371_v3 = vmul.f32 0.2, %v1369_v1 }
 0x3a5   : > { %v1372_v6 = vmax.f32 %v1368_v0, %v1370_v2  ;;  %v1373_v7 = vmax.f32 %v1369_v1, %v1371_v3 }
 0x3a7   : > { %v1374_v8 = vsel %vm1285_vm3, %v1362_v4, %v1372_v6  ;;  %v1375_v9 = vsel %vm1285_vm3, %v1363_v5, %v1373_v7 }
 0x3a8   : > { %1376 = vst.msk [vmem:[%s244_s12] sm:$0xff] %vm251_vm0, %v1374_v8  ;;  %1377 = vst.msk [vmem:[%s244_s12 + $0x8] sm:$0xff] %vm251_vm0, %v1375_v9 }
 0x3a9 PF: > { %s15_s18 = sadd.s32 1, %s1598_s18  }
 0x3aa   : > { %p12_p4 = scmp.ge.s32.totalorder %s15_s18, 4  }
 0x3ac   :  { %14 = sbr.rel (!%p12_p4) target bundleno = 1 (0x1), region = 73 }

// kernel: deep_interpolator_forward.21
= control target key start
LH: loop header
LB: loop body
LE: loop exit
PB: predicated region body
PF: predicated region fallthrough
CT: control target
= control target key end

     0   :  { %s1979_s18 = smov 0   ;;  %s2206_s0 = inlined_call_operand.vmem [shape: f32[2,32,4], index: 0, kind: input, shape index: {}]   ;;  %s2207_s1 = inlined_call_operand.vmem [shape: f32[2,32,1], index: 1, kind: input, shape index: {}]   ;;  %s2208_s2 = inlined_call_operand.vmem [shape: f32[4,8], index: 2, kind: input, shape index: {}]   ;;  %s2209_s3 = inlined_call_operand.vmem [shape: f32[4,4], index: 3, kind: input, shape index: {}]   ;;  %s2210_s4 = inlined_call_operand.vmem [shape: f32[1,4], index: 4, kind: input, shape index: {}]   ;;  %s2211_s5 = inlined_call_operand.vmem [shape: f32[2,32,8], index: 5, kind: output, shape index: {}]  }
   0x1 LB: > { %s1710_s19 = sadd.s32 4294967295, %s1944_s18   ;;  %p1714_p0 = scmp.ge.s32.totalorder %s1944_s18, 1  ;;  %s1944_s18 = sphi %s1979_s18, %s15_s18  }
   0x2   : > { %p197_p1 = scmp.lt.s32.totalorder %s1944_s18, 3 }
   0x4   : > { %p198_p2 = pnand %p1714_p0, %p197_p1 }
   0x5   : > { %vm268_vm0 = vcmask (!%p198_p2), 1043456   ;;  %v857_v0 = vld [vmem:[%s2209_s3] sm:$0xf] (!%p198_p2)  ;;  %p230_p3 = scmp.lt.s32.totalorder (!%p198_p2), %s1710_s19, 1  ;;  %v1946_v5 = vmov (!%p198_p2), 0   ;;  %vm255_vm1 = vcmask (!%p198_p2), 31744  }
   0x6   : > { %201 = sbr.rel (%p198_p2) target bundleno = 946 (0x3b2), region = 40  ;;  %v868_v1 = vsel (!%p198_p2), %vm268_vm0, %v857_v0, 0  ;;  %v254_v2 = vld [vmem:[%s2208_s2] sm:$0xf] (!%p198_p2)  ;;  %1934 = vset.pattern.permute.xlu0 (!%p198_p2), %v1946_v5  ;;  %1935 = vset.pattern.permute.xlu1 (!%p198_p2), %v1946_v5  ;;  %vm847_vm2 = vcmask (!%p198_p2), 1046528   ;;  %s1947_s8 = smov (!%p198_p2), 4  }
   0x7   : > { %v1993_v3 = vand.u32 (!%p198_p2), 4294901760, %v868_v1  ;;  %v270_v4 = vsel (!%p198_p2), %vm268_vm0, %v254_v2, 0  ;;  %vm1523_vm3 = vcmask (!%p198_p2), 64544   ;;  %s1948_s9 = smov (!%p198_p2), 124   ;;  %vm1638_vm4 = vcmask (!%p198_p2), 64512  }
   0x8   : > { %v1995_v6 = vand.u32 (!%p198_p2), 4294901760, %v270_v4 }
   0x9   : > { %1835 = vmatprep.subr.mxu1 (!%p198_p2), %v1993_v3  ;;  %v2001_v7 = vsub.f32 (!%p198_p2), %v868_v1, %v1993_v3 }
   0xa   : > { %1836 = vmatpush3.msra.mxu1 (!%p198_p2), %v1993_v3  ;;  %1787 = vmatprep.subr.mxu0 (!%p198_p2), %v1995_v6  ;;  %v2020_v12 = vsub.f32 (!%p198_p2), %v270_v4, %v1995_v6 }
   0xb   : > { %v2016_v10 = vand.u32 (!%p198_p2), 4294901760, %v2001_v7  ;;  %1788 = vmatpush3.msra.mxu0 (!%p198_p2), %v1995_v6 }
   0xd   : > { %s2213_s19 = smov (!%p230_p3, %s1710_s19), 1  ;;  %v980_v19 = vsub.f32 %v2001_v7, %v2016_v10 }
   0xe   : > { %s1998_s24 = sshll.u32 %s2213_s19, 5 }
   0xf   : > { %s234_s27 = scalar_lea.vmem %s2206_s0, %s1998_s24  ;;  %s2013_s30 = scalar_lea.vmem %s2207_s1, %s1998_s24  ;;  %v981_v30 = vand.u32 4294901760, %v980_v19 }
  0x10   : > { %v245_v8 = vld [vmem:[%s234_s27] sm:$0xff]  ;;  %v246_v9 = vld [vmem:[%s234_s27 + $0x8] sm:$0xff]  ;;  %v247_v11 = vld [vmem:[%s234_s27 + $0x10] sm:$0xff]  ;;  %s244_s12 = scalar_lea.vmem %s2211_s5, %s1998_s24 }
  0x11   : > { %v848_v13 = vrot.slane %v245_v8, 1  ;;  %v849_v14 = vrot.slane %v246_v9, 1  ;;  %v851_v15 = vrot.slane %v247_v11, 1  ;;  %v248_v16 = vld [vmem:[%s234_s27 + $0x18] sm:$0xff]  ;;  %v257_v17 = vsel %vm255_vm1, %v245_v8, 0  ;;  %v249_v18 = vld [vmem:[%s2013_s30] sm:$0xff]  ;;  %1843 = vmatprep.subr.mxu1 %v981_v30 }
  0x12   : > { %v853_v20 = vrot.slane %v248_v16, 1  ;;  %v2026_v21 = vand.u32 4294901760, %v257_v17  ;;  %v260_v22 = vsel %vm255_vm1, %v246_v9, 0  ;;  %1457 = vperm.xlu0 %1934, %v249_v18   ;;  %v251_v23 = vld [vmem:[%s2013_s30 + $0x10] sm:$0xff]  ;;  %v263_v27 = vsel %vm255_vm1, %v247_v11, 0  ;;  %v250_v28 = vld [vmem:[%s2013_s30 + $0x8] sm:$0xff] }
  0x13   : > { %v850_v24 = vsel %vm847_vm2, %v848_v13, %v849_v14  ;;  %v852_v25 = vsel %vm847_vm2, %v849_v14, %v851_v15  ;;  %v2032_v26 = vand.u32 4294901760, %v260_v22  ;;  %1467 = vperm.xlu1 %1935, %v251_v23   ;;  %v252_v33 = vld [vmem:[%s2013_s30 + $0x18] sm:$0xff]  ;;  %v2063_v45 = vand.u32 4294901760, %v263_v27 }
  0x14   : > { %v858_v29 = vsel %vm255_vm1, %v850_v24, 0  ;;  %v860_v31 = vsel %vm255_vm1, %v852_v25, 0  ;;  %v854_v32 = vsel %vm847_vm2, %v851_v15, %v853_v20  ;;  %v856_v37 = vsel %vm847_vm2, %v853_v20, 0.0 }
  0x15   : > { %v2040_v34 = vand.u32 4294901760, %v858_v29  ;;  %v2042_v35 = vand.u32 4294901760, %v860_v31  ;;  %v862_v36 = vsel %vm255_vm1, %v854_v32, 0  ;;  %v865_v39 = vsel %vm255_vm1, %v856_v37, 0 }
  0x16   : > { %v2046_v38 = vand.u32 4294901760, %v862_v36  ;;  %v2050_v40 = vsub.f32 %v257_v17, %v2026_v21  ;;  %v2053_v41 = vsub.f32 %v260_v22, %v2032_v26  ;;  %1462 = vperm.xlu0 %1934, %v250_v28   ;;  %v2061_v44 = vand.u32 4294901760, %v865_v39 }
  0x17   : > { %v2056_v42 = vsub.f32 %v858_v29, %v2040_v34  ;;  %v2059_v43 = vsub.f32 %v860_v31, %v2042_v35  ;;  %1472 = vperm.xlu1 %1935, %v252_v33   ;;  %v266_v49 = vsel %vm255_vm1, %v248_v16, 0  ;;  %v2077_v53 = vsub.f32 %v263_v27, %v2063_v45 }
  0x18   : > { %v2066_v46 = vsub.f32 %v862_v36, %v2046_v38  ;;  %v340_v47 = vand.u32 4294901760, %v2050_v40  ;;  %v350_v48 = vand.u32 4294901760, %v2053_v41  ;;  %v2074_v52 = vsub.f32 %v865_v39, %v2061_v44 }
  0x19   : > { %v938_v50 = vand.u32 4294901760, %v2056_v42  ;;  %v948_v51 = vand.u32 4294901760, %v2059_v43  ;;  %v2086_v57 = vand.u32 4294901760, %v266_v49  ;;  %v360_v61 = vand.u32 4294901760, %v2077_v53 }
  0x1a   : > { %v958_v54 = vand.u32 4294901760, %v2066_v46  ;;  %v341_v55 = vsub.f32 %v2050_v40, %v340_v47  ;;  %v351_v56 = vsub.f32 %v2053_v41, %v350_v48  ;;  %v968_v60 = vand.u32 4294901760, %v2074_v52 }
  0x1b   : > { %v939_v58 = vsub.f32 %v2056_v42, %v938_v50  ;;  %v949_v59 = vsub.f32 %v2059_v43, %v948_v51  ;;  %v369_v1 = vsub.f32 %v266_v49, %v2086_v57  ;;  %v361_v8 = vsub.f32 %v2077_v53, %v360_v61 }
  0x1c   : > { %v959_v62 = vsub.f32 %v2066_v46, %v958_v54  ;;  %v342_v63 = vand.u32 4294901760, %v341_v55  ;;  %v352_v0 = vand.u32 4294901760, %v351_v56  ;;  %v969_v5 = vsub.f32 %v2074_v52, %v968_v60 }
  0x1d   : > { %v940_v2 = vand.u32 4294901760, %v939_v58  ;;  %v950_v4 = vand.u32 4294901760, %v949_v59  ;;  %v370_v11 = vand.u32 4294901760, %v369_v1  ;;  %v381_v13 = vand.u32 4294901760, %v2020_v12 }
  0x1e   : > { %v960_v9 = vand.u32 4294901760, %v959_v62  ;;  %1789 = vmatprep.mubr.f32.mxu0 %v342_v63  ;;  %v362_v14 = vand.u32 4294901760, %v361_v8  ;;  %v970_v15 = vand.u32 4294901760, %v969_v5 }
  0x1f   : > { %1837 = vmatprep.mubr.f32.mxu1 %v940_v2  ;;  %1790 = vmatmul.mubr.f32.vlgmr.msra.gmra.mrb[0].mxu0 %v352_v0  ;;  %v371_v16 = vsub.f32 %v369_v1, %v370_v11  ;;  %v382_v17 = vsub.f32 %v2020_v12, %v381_v13 }
  0x20   : > { %1838 = vmatmul.mubr.f32.vlgmr.msra.gmra.mrb[0].mxu1 %v950_v4  ;;  %1792 = vmatprep.mubr.f32.mxu0 %v362_v14 }
  0x21   : > { %1844 = vmatpush3.msra.mxu1 %v981_v30  ;;  %1840 = vmatprep.mubr.f32.mxu1 %v960_v9  ;;  %v372_v18 = vand.u32 4294901760, %v371_v16  ;;  %v383_v19 = vand.u32 4294901760, %v382_v17 }
  0x22   : > { %1851 = vmatprep.subr.mxu1 %v2001_v7 }
  0x23   : > { %1793 = vmatmul.mubr.f32.gmra.mrb[2].mxu0 %v372_v18  ;;  %1795 = vmatprep.subr.mxu0 %v383_v19  ;;  %v1544_v18 = vlaneseq }
  0x24   : > { %1841 = vmatmul.mubr.f32.gmra.mrb[2].mxu1 %v970_v15  ;;  %1796 = vmatpush3.msra.mxu0 %v383_v19 }
  0x25   : > { %1845 = vmatprep.mubr.f32.mxu1 %v2040_v34  ;;  %1797 = vmatprep.mubr.f32.mxu0 %v2026_v21 }
  0x26   : > { %1803 = vmatprep.subr.mxu0 %v2020_v12 }
  0x27   : > { %1798 = vmatmul.mubr.f32.vlgmr.msra.gmra.mrb[0].mxu0 %v2032_v26 }
  0x28   : > { %1846 = vmatmul.mubr.f32.vlgmr.msra.gmra.mrb[0].mxu1 %v2042_v35  ;;  %1800 = vmatprep.mubr.f32.mxu0 %v2063_v45 }
  0x29   : > { %1852 = vmatpush3.msra.mxu1 %v2001_v7  ;;  %1848 = vmatprep.mubr.f32.mxu1 %v2046_v38 }
  0x2a   : > { %1859 = vmatprep.subr.mxu1 %v1993_v3  ;;  %1804 = vmatpush3.msra.mxu0 %v2020_v12 }
  0x2b   : > { %1801 = vmatmul.mubr.f32.gmra.mrb[2].mxu0 %v2086_v57  ;;  %1811 = vmatprep.subr.mxu0 %v1995_v6 }
  0x2c   : > { %1849 = vmatmul.mubr.f32.gmra.mrb[2].mxu1 %v2061_v44  ;;  %1805 = vmatprep.mubr.f32.mxu0 %v2050_v40 }
  0x2d   : > { %1853 = vmatprep.mubr.f32.mxu1 %v2056_v42 }
  0x2f   : > { %1806 = vmatmul.mubr.f32.vlgmr.msra.gmra.mrb[0].mxu0 %v2053_v41 }
  0x30   : > { %1854 = vmatmul.mubr.f32.vlgmr.msra.gmra.mrb[0].mxu1 %v2059_v43  ;;  %1808 = vmatprep.mubr.f32.mxu0 %v2077_v53 }
  0x31   : > { %1860 = vmatpush3.msra.mxu1 %v1993_v3  ;;  %1856 = vmatprep.mubr.f32.mxu1 %v2066_v46 }
  0x32   : > { %1867 = vmatprep.subr.mxu1 %v2016_v10  ;;  %1812 = vmatpush3.msra.mxu0 %v1995_v6 }
  0x33   : > { %1809 = vmatmul.mubr.f32.gmra.mrb[2].mxu0 %v369_v1  ;;  %1819 = vmatprep.subr.mxu0 %v381_v13 }
  0x34   : > { %1857 = vmatmul.mubr.f32.gmra.mrb[2].mxu1 %v2074_v52  ;;  %1813 = vmatprep.mubr.f32.mxu0 %v340_v47 }
  0x35   : > { %1861 = vmatprep.mubr.f32.mxu1 %v938_v50 }
  0x37   : > { %1814 = vmatmul.mubr.f32.vlgmr.msra.gmra.mrb[0].mxu0 %v350_v48 }
  0x38   : > { %1862 = vmatmul.mubr.f32.vlgmr.msra.gmra.mrb[0].mxu1 %v948_v51  ;;  %1816 = vmatprep.mubr.f32.mxu0 %v360_v61 }
  0x39   : > { %1868 = vmatpush3.msra.mxu1 %v2016_v10  ;;  %1864 = vmatprep.mubr.f32.mxu1 %v958_v54 }
  0x3a   : > { %1875 = vmatprep.subr.mxu1 %v1993_v3  ;;  %1820 = vmatpush3.msra.mxu0 %v381_v13 }
  0x3b   : > { %1817 = vmatmul.mubr.f32.gmra.mrb[2].mxu0 %v370_v11  ;;  %1827 = vmatprep.subr.mxu0 %v1995_v6 }
  0x3c   : > { %1865 = vmatmul.mubr.f32.gmra.mrb[2].mxu1 %v968_v60  ;;  %1821 = vmatprep.mubr.f32.mxu0 %v2026_v21 }
  0x3d   : > { %1869 = vmatprep.mubr.f32.mxu1 %v2040_v34 }
  0x3f   : > { %1822 = vmatmul.mubr.f32.vlgmr.msra.gmra.mrb[0].mxu0 %v2032_v26 }
  0x40   : > { %1870 = vmatmul.mubr.f32.vlgmr.msra.gmra.mrb[0].mxu1 %v2042_v35  ;;  %1824 = vmatprep.mubr.f32.mxu0 %v2063_v45 }
  0x41   : > { %1876 = vmatpush3.msra.mxu1 %v1993_v3  ;;  %1872 = vmatprep.mubr.f32.mxu1 %v2046_v38 }
  0x42   : > { %1828 = vmatpush3.msra.mxu0 %v1995_v6  ;;  %v1721_v6 = vld [vmem:[%s2210_s4] ss:$0 sm:$0xff] }
  0x43   : > { %1825 = vmatmul.mubr.f32.gmra.mrb[2].mxu0 %v2086_v57 }
  0x44   : > { %1873 = vmatmul.mubr.f32.gmra.mrb[2].mxu1 %v2061_v44  ;;  %1829 = vmatprep.mubr.f32.mxu0 %v2026_v21 }
  0x45   : > { %1877 = vmatprep.mubr.f32.mxu1 %v2040_v34 }
  0x47   : > { %1830 = vmatmul.mubr.f32.vlgmr.msra.gmra.mrb[0].mxu0 %v2032_v26 }
  0x48   : > { %1878 = vmatmul.mubr.f32.vlgmr.msra.gmra.mrb[0].mxu1 %v2042_v35  ;;  %1832 = vmatprep.mubr.f32.mxu0 %v2063_v45 }
  0x49   : > { %1880 = vmatprep.mubr.f32.mxu1 %v2046_v38 }
  0x4b   : > { %1833 = vmatmul.mubr.f32.gmra.mrb[2].mxu0 %v2086_v57 }
  0x4c   : > { %1881 = vmatmul.mubr.f32.gmra.mrb[2].mxu1 %v2061_v44 }
  0x91   : > { %v1458_v28 = vpop.permute.xlu0 %1457 }
  0x92   : > { %v1468_v29 = vpop.permute.xlu1 %1467 }
  0x95   : > { %v1463_v30 = vpop.permute.xlu0 %1462 }
  0x96   : > { %v1473_v31 = vpop.permute.xlu1 %1472 }
 0x11a   : > { %v1831_v7 = vpop.f32.mrb[0].mxu0 }
 0x11b   : > { %v1879_v3 = vpop.f32.mrb[0].mxu1  ;;  %v1452_v12 = vadd.f32 %v1831_v7, %v1721_v6  ;;  %v825_v20 = vpop.f32.mrb[1].mxu0 }
 0x11c   : > { %1485 = vrot.lane.b32.xlu0 %v1879_v3, %s1947_s8  ;;  %v1423_v10 = vpop.f32.mrb[1].mxu1  ;;  %v1451_v21 = vadd.f32 %v1721_v6, %v825_v20  ;;  %v1545_v3 = vshrl.u32 %v1544_v18, 7 }
 0x11d   : > { %1483 = vrot.lane.b32.xlu1 %v1423_v10, %s1947_s8  ;;  %v1476_v63 = vmul.f32 %v1463_v30, %v1452_v12 }
 0x11e   : > { %v1834_v23 = vpop.f32.mrb[2].mxu0  ;;  %v1475_v62 = vmul.f32 %v1458_v28, %v1451_v21  ;;  %v1546_v10 = vsub.s32 0, %v1545_v3 }
 0x11f   : > { %v1882_v22 = vpop.f32.mrb[2].mxu1  ;;  %v1454_v25 = vadd.f32 %v1834_v23, %v1721_v6  ;;  %v837_v26 = vpop.f32.mrb[3].mxu0  ;;  %v1511_v1 = vsel %vm255_vm1, %v1476_v63, 0.0 }
 0x120   : > { %v1435_v24 = vpop.f32.mrb[3].mxu1  ;;  %v1453_v27 = vadd.f32 %v1721_v6, %v837_v26  ;;  %v1510_v0 = vsel %vm255_vm1, %v1475_v62, 0.0 }
 0x121   : > { %1499 = vrot.lane.b32.xlu1 %v1721_v6, %s1947_s8  ;;  %1487 = vrot.lane.b32.xlu0 %v1435_v24, %s1947_s8  ;;  %v1512_v4 = vadd.f32 %v1511_v1, %v1510_v0  ;;  %v1478_v8 = vmul.f32 %v1473_v31, %v1454_v25 }
 0x122   : > { %v1477_v2 = vmul.f32 %v1468_v29, %v1453_v27 }
 0x123   : > { %v1515_v11 = vsel %vm255_vm1, %v1478_v8, 0.0 }
 0x124   : > { %v1513_v5 = vsel %vm255_vm1, %v1477_v2, 0.0 }
 0x125   : > { %1489 = vrot.lane.b32.xlu0 %v1882_v22, %s1947_s8  ;;  %v1514_v9 = vadd.f32 %v1513_v5, %v1512_v4 }
 0x127   : > { %v1516_v13 = vadd.f32 %v1515_v11, %v1514_v9 }
 0x129   : > { %v1517_v14 = vrot.slane %v1516_v13, 4 }
 0x12b   : > { %v1518_v15 = vadd.f32 %v1517_v14, %v1516_v13 }
 0x12d   : > { %v1519_v16 = vrot.slane %v1518_v15, 2 }
 0x12f   : > { %v1520_v17 = vadd.f32 %v1519_v16, %v1518_v15 }
 0x131   : > { %v1521_v19 = vrot.slane %v1520_v17, 1 }
 0x133   : > { %v1522_v6 = vadd.f32 %v1521_v19, %v1520_v17 }
 0x18e   : > { %v1486_v32 = vpop.permute.xlu0 %1485 }
 0x18f   : > { %v1484_v33 = vpop.permute.xlu1 %1483  ;;  %v1496_v34 = vadd.f32 %v1831_v7, %v1486_v32 }
 0x190   : > { %v1495_v35 = vadd.f32 %v1484_v33, %v825_v20 }
 0x193   : > { %v1500_v36 = vpop.permute.xlu1 %1499  ;;  %v1488_v37 = vpop.permute.xlu0 %1487 }
 0x194   : > { %v1502_v38 = vadd.f32 %v1500_v36, %v1495_v35  ;;  %v1503_v39 = vadd.f32 %v1500_v36, %v1496_v34  ;;  %v1497_v40 = vadd.f32 %v1488_v37, %v837_v26 }
 0x196   : > { %v1506_v41 = vmul.f32 %v1502_v38, %v1458_v28  ;;  %v1507_v42 = vmul.f32 %v1503_v39, %v1463_v30  ;;  %v1504_v43 = vadd.f32 %v1500_v36, %v1497_v40 }
 0x197   : > { %v1490_v44 = vpop.permute.xlu0 %1489 }
 0x198   : > { %v1524_v45 = vsel %vm1523_vm3, %v1506_v41, 0.0  ;;  %v1525_v46 = vsel %vm1523_vm3, %v1507_v42, 0.0  ;;  %v1508_v47 = vmul.f32 %v1504_v43, %v1468_v29  ;;  %v1498_v48 = vadd.f32 %v1834_v23, %v1490_v44 }
 0x199   : > { %v1526_v49 = vadd.f32 %v1525_v46, %v1524_v45 }
 0x19a   : > { %v1527_v50 = vsel %vm1523_vm3, %v1508_v47, 0.0  ;;  %v1505_v51 = vadd.f32 %v1500_v36, %v1498_v48 }
 0x19b   : > { %v1528_v53 = vadd.f32 %v1527_v50, %v1526_v49 }
 0x19c   : > { %v1509_v52 = vmul.f32 %v1505_v51, %v1473_v31 }
 0x19e   : > { %v1529_v54 = vsel %vm1523_vm3, %v1509_v52, 0.0 }
 0x19f   : > { %v1530_v55 = vadd.f32 %v1529_v54, %v1528_v53 }
 0x1a1   : > { %v1531_v56 = vrot.slane %v1530_v55, 4 }
 0x1a3   : > { %v1532_v57 = vadd.f32 %v1531_v56, %v1530_v55 }
 0x1a5   : > { %v1533_v58 = vrot.slane %v1532_v57, 2 }
 0x1a7   : > { %v1534_v59 = vadd.f32 %v1533_v58, %v1532_v57 }
 0x1a9   : > { %v1535_v60 = vrot.slane %v1534_v59, 1 }
 0x1ab   : > { %v1536_v61 = vadd.f32 %v1535_v60, %v1534_v59 }
 0x1ad   : > { %1538 = vrot.lane.b32.xlu1 %v1536_v61, %s1948_s9 }
 0x21f   : > { %v1539_v7 = vpop.permute.xlu1 %1538 }
 0x220   : > { %v1541_v12 = vadd.f32 %v1539_v7, %v1522_v6 }
 0x222   : > { %v1543_v20 = vmul.f32 0.015625, %v1541_v12 }
 0x224   : > { %v1547_v21 = vrot.slane %v1543_v20, %v1546_v10 }
 0x226   : > { %1553 = vrot.lane.b32.xlu0 %v1547_v21, %s1947_s8  ;;  %v1548_v44 = vsub.f32 %v1475_v62, %v1547_v21  ;;  %v1549_v45 = vsub.f32 %v1476_v63, %v1547_v21  ;;  %v1550_v48 = vsub.f32 %v1477_v2, %v1547_v21  ;;  %v1551_v51 = vsub.f32 %v1478_v8, %v1547_v21 }
 0x228   : > { %v1560_v46 = vmul.f32 %v1548_v44, %v1548_v44  ;;  %v1563_v54 = vmul.f32 %v1551_v51, %v1551_v51 }
 0x22a   : > { %v1564_v49 = vsel %vm255_vm1, %v1560_v46, 0.0  ;;  %v1569_v57 = vsel %vm255_vm1, %v1563_v54, 0.0 }
 0x298   : > { %v1554_v22 = vpop.permute.xlu0 %1553 }
 0x299   : > { %v1556_v23 = vsub.f32 %v1506_v41, %v1554_v22  ;;  %v1557_v24 = vsub.f32 %v1507_v42, %v1554_v22  ;;  %v1558_v25 = vsub.f32 %v1508_v47, %v1554_v22  ;;  %v1559_v26 = vsub.f32 %v1509_v52, %v1554_v22 }
 0x29a   : > { %v1561_v47 = vmul.f32 %v1549_v45, %v1549_v45  ;;  %v1562_v52 = vmul.f32 %v1550_v48, %v1550_v48 }
 0x29b   : > { %v1577_v27 = vmul.f32 %v1556_v23, %v1556_v23  ;;  %v1578_v28 = vmul.f32 %v1557_v24, %v1557_v24  ;;  %v1579_v29 = vmul.f32 %v1558_v25, %v1558_v25  ;;  %v1580_v30 = vmul.f32 %v1559_v26, %v1559_v26 }
 0x29c   : > { %v1565_v50 = vsel %vm255_vm1, %v1561_v47, 0.0  ;;  %v1567_v55 = vsel %vm255_vm1, %v1562_v52, 0.0 }
 0x29d   : > { %v1581_v31 = vsel %vm1523_vm3, %v1577_v27, 0.0  ;;  %v1582_v32 = vsel %vm1523_vm3, %v1578_v28, 0.0  ;;  %v1584_v34 = vsel %vm1523_vm3, %v1579_v29, 0.0  ;;  %v1586_v36 = vsel %vm1523_vm3, %v1580_v30, 0.0 }
 0x29e   : > { %v1583_v33 = vadd.f32 %v1582_v32, %v1581_v31  ;;  %v1566_v53 = vadd.f32 %v1565_v50, %v1564_v49 }
 0x2a0   : > { %v1585_v35 = vadd.f32 %v1584_v34, %v1583_v33  ;;  %v1568_v56 = vadd.f32 %v1567_v55, %v1566_v53 }
 0x2a2   : > { %v1587_v37 = vadd.f32 %v1586_v36, %v1585_v35  ;;  %v1570_v58 = vadd.f32 %v1569_v57, %v1568_v56 }
 0x2a4   : > { %v1588_v38 = vrot.slane %v1587_v37, 4  ;;  %v1571_v59 = vrot.slane %v1570_v58, 4 }
 0x2a6   : > { %v1589_v39 = vadd.f32 %v1588_v38, %v1587_v37  ;;  %v1572_v60 = vadd.f32 %v1571_v59, %v1570_v58 }
 0x2a8   : > { %v1590_v40 = vrot.slane %v1589_v39, 2  ;;  %v1573_v61 = vrot.slane %v1572_v60, 2 }
 0x2aa   : > { %v1591_v41 = vadd.f32 %v1590_v40, %v1589_v39  ;;  %v1574_v62 = vadd.f32 %v1573_v61, %v1572_v60 }
 0x2ac   : > { %v1592_v42 = vrot.slane %v1591_v41, 1  ;;  %v1575_v63 = vrot.slane %v1574_v62, 1 }
 0x2ae   : > { %v1593_v43 = vadd.f32 %v1592_v42, %v1591_v41  ;;  %v1576_v0 = vadd.f32 %v1575_v63, %v1574_v62 }
 0x2b0   : > { %1595 = vrot.lane.b32.xlu1 %v1593_v43, %s1948_s9 }
 0x322   : > { %v1596_v1 = vpop.permute.xlu1 %1595 }
 0x323   : > { %v1598_v2 = vadd.f32 %v1596_v1, %v1576_v0 }
 0x325   : > { %v1599_v4 = vmul.f32 0.015625, %v1598_v2 }
 0x327   : > { %v1600_v5 = vadd.f32 1e-05, %v1599_v4 }
 0x329   : > { %1936 = vrsqrt.f32 %v1600_v5 }
 0x333   : > { %v1937_v8 = vpop.eup %1936 }
 0x334   : > { %v1605_v9 = vrot.slane %v1937_v8, %v1546_v10 }
 0x336   : > { %1619 = vrot.lane.b32.xlu0 %v1605_v9, %s1947_s8  ;;  %v1606_v11 = vmul.f32 %v1605_v9, %v1548_v44  ;;  %v1607_v13 = vmul.f32 %v1605_v9, %v1549_v45  ;;  %v1608_v14 = vmul.f32 %v1605_v9, %v1550_v48  ;;  %v1609_v15 = vmul.f32 %v1605_v9, %v1551_v51 }
 0x338   : > { %v1610_v17 = vmul.f32 0.2, %v1606_v11  ;;  %v1611_v18 = vmul.f32 0.2, %v1607_v13  ;;  %v1612_v19 = vmul.f32 0.2, %v1608_v14 }
 0x339   : > { %v1613_v20 = vmul.f32 0.2, %v1609_v15 }
 0x33a   : > { %v1614_v10 = vmax.f32 %v1606_v11, %v1610_v17  ;;  %v1615_v28 = vmax.f32 %v1607_v13, %v1611_v18  ;;  %v1616_v30 = vmax.f32 %v1608_v14, %v1612_v19 }
 0x3a8   : > { %v1620_v16 = vpop.permute.xlu0 %1619 }
 0x3a9   : > { %v1622_v3 = vmul.f32 %v1620_v16, %v1556_v23  ;;  %v1623_v6 = vmul.f32 %v1620_v16, %v1557_v24  ;;  %v1624_v7 = vmul.f32 %v1620_v16, %v1558_v25  ;;  %v1625_v12 = vmul.f32 %v1620_v16, %v1559_v26 }
 0x3aa   : > { %v1617_v23 = vmax.f32 %v1609_v15, %v1613_v20 }
 0x3ab   : > { %v1626_v21 = vmul.f32 0.2, %v1622_v3  ;;  %v1627_v22 = vmul.f32 0.2, %v1623_v6  ;;  %v1628_v27 = vmul.f32 0.2, %v1624_v7 }
 0x3ac   : > { %v1629_v29 = vmul.f32 0.2, %v1625_v12 }
 0x3ad   : > { %v1630_v31 = vmax.f32 %v1622_v3, %v1626_v21  ;;  %v1631_v32 = vmax.f32 %v1623_v6, %v1627_v22  ;;  %v1632_v33 = vmax.f32 %v1624_v7, %v1628_v27 }
 0x3ae   : > { %v1633_v24 = vmax.f32 %v1625_v12, %v1629_v29 }
 0x3af   : > { %v1634_v25 = vsel %vm255_vm1, %v1614_v10, %v1630_v31  ;;  %v1635_v26 = vsel %vm255_vm1, %v1615_v28, %v1631_v32  ;;  %v1636_v34 = vsel %vm255_vm1, %v1616_v30, %v1632_v33 }
 0x3b0   : > { %v1637_v35 = vsel %vm255_vm1, %v1617_v23, %v1633_v24  ;;  %1639 = vst.msk [vmem:[%s244_s12] sm:$0xff] %vm1638_vm4, %v1634_v25  ;;  %1640 = vst.msk [vmem:[%s244_s12 + $0x8] sm:$0xff] %vm1638_vm4, %v1635_v26 }
 0x3b1   : > { %1641 = vst.msk [vmem:[%s244_s12 + $0x10] sm:$0xff] %vm1638_vm4, %v1636_v34  ;;  %1642 = vst.msk [vmem:[%s244_s12 + $0x18] sm:$0xff] %vm1638_vm4, %v1637_v35 }
 0x3b2 PF: > { %s15_s18 = sadd.s32 1, %s1944_s18  }
 0x3b3   : > { %p12_p4 = scmp.ge.s32.totalorder %s15_s18, 4  }
 0x3b5   :  { %14 = sbr.rel (!%p12_p4) target bundleno = 1 (0x1), region = 73 }

// kernel: deep_interpolator_forward.16
= control target key start
LH: loop header
LB: loop body
LE: loop exit
PB: predicated region body
PF: predicated region fallthrough
CT: control target
= control target key end

     0   :  { %12 = vsyncpa [#allocation3], 0  ;;  %s2525_s0 = inlined_call_operand.vmem [shape: f32[2,2,16], index: 0, kind: input, shape index: {}]   ;;  %s2526_s1 = inlined_call_operand.vmem [shape: f32[16,16], index: 1, kind: input, shape index: {}]   ;;  %s2527_s2 = inlined_call_operand.vmem [shape: f32[32,16], index: 2, kind: input, shape index: {}]   ;;  %s2528_s3 = inlined_call_operand.vmem [shape: f32[1,16], index: 3, kind: input, shape index: {}]   ;;  %s2529_s4 = inlined_call_operand.vmem [shape: f32[1,16], index: 4, kind: input, shape index: {}]   ;;  %s2530_s5 = inlined_call_operand.vmem [shape: f32[16,3], index: 5, kind: input, shape index: {}]   ;;  %s2531_s6 = inlined_call_operand.vmem [shape: f32[1,3], index: 6, kind: input, shape index: {}]   ;;  %s2532_s7 = inlined_call_operand.hbm [shape: f32[2,1,3], index: 7, kind: output, shape index: {}]  }
   0x1   :  { %14 = vsyncpa [#allocation3 + $0x1], 0  ;;  %s2315_s24 = smov 0   ;;  %s2317_s25 = smov 0  }
   0x2   :  { %s2319_s26 = smov 0   ;;  %s2321_s27 = smov 0  }
   0x3 LB: > { %s2336_s28 = sadd.s32 4294967295, %s2268_s27   ;;  %s1832_s29 = sadd.s32 4294967294, %s2268_s27   ;;  %s2268_s27 = sphi %s2321_s27, %s2538_s27   ;;  %s2264_s26 = sphi %s2319_s26, %s2537_s26   ;;  %s2260_s25 = sphi %s2317_s25, %s2536_s25   ;;  %s2256_s24 = sphi %s2315_s24, %s2535_s24  }
   0x4   : > { %s2340_s30 = sadd.s32 1, %s2268_s27   ;;  %s179_s8 = sadd.s32 1, %s2264_s26 }
   0x5   : > { %s176_s9 = ssub.s32 %s2268_s27, %s2340_s30  ;;  %p189_p0 = scmp.ne.s32.totalorder %s2264_s26, %s2260_s25 }
   0x6   : > { %p177_p1 = scmp.eq.s32.totalorder %s176_s9, 0  ;;  %p190_p2 = scmp.eq.s32.totalorder %s2336_s28, 1 }
   0x7   : > { %p195_p3 = scmp.ne.s32.totalorder %s2260_s25, %s2256_s24  ;;  %p196_p4 = scmp.eq.s32.totalorder %s1832_s29, 1 }
   0x8   : > { %s2351_s10 = scalar_select %p177_p1, %s2264_s26, %s179_s8  }
   0x9   : > { %p2353_p5 = por %p190_p2, %p189_p0  ;;  %p2357_p6 = por %p196_p4, %p195_p3 }
   0xa   : > { %p1835_p7 = scmp.ge.s32.totalorder %s2268_s27, 1  ;;  %p239_p8 = scmp.lt.s32.totalorder %s2268_s27, 3 }
   0xc   : > { %p240_p9 = pnand %p1835_p7, %p239_p8 }
   0xd   : > { %v274_v0 = vld [vmem:[%s2526_s1] sm:$0xff] (!%p240_p9)  ;;  %v275_v1 = vld [vmem:[%s2526_s1 + $0x8] sm:$0xff] (!%p240_p9)  ;;  %p269_p10 = scmp.lt.s32.totalorder (!%p240_p9), %s2336_s28, 1  ;;  %v2270_v2 = vmov (!%p240_p9), 0.0|0.0   ;;  %vm2271_vm0 = vmmov (!%p240_p9), 0   ;;  %v2272_v5 = vmov (!%p240_p9), 0.0  }
   0xe   : > { %243 = sbr.rel (%p240_p9) target bundleno = 1330 (0x532), region = 48  ;;  %2056 = vmatprep.subr.bf16.mxu0 (!%p240_p9), %v2270_v2  ;;  %v281_v3 = vand.u32 (!%p240_p9), 4294901760, %v274_v0  ;;  %v284_v4 = vand.u32 (!%p240_p9), 4294901760, %v275_v1  ;;  %1910 = vmatprep.mubr.msk.f32.mxu0 (!%p240_p9), %vm2271_vm0, %v2272_v5  ;;  %vm276_vm1 = vcmask (!%p240_p9), 130048   ;;  %vm739_vm2 = vcmask (!%p240_p9), 123904   ;;  %v784_v53 = vld [vmem:[%s2527_s2] sm:$0xff] (!%p240_p9) }
   0xf   : > { %2074 = vmatprep.subr.bf16.mxu1 (!%p240_p9), %v2270_v2  ;;  %1956 = vmatprep.mubr.msk.f32.mxu1 (!%p240_p9), %vm2271_vm0, %v2272_v5  ;;  %v785_v54 = vld [vmem:[%s2527_s2 + $0x8] sm:$0xff] (!%p240_p9)  ;;  %v793_v56 = vand.u32 (!%p240_p9), 4294901760, %v784_v53  ;;  %v786_v62 = vld [vmem:[%s2527_s2 + $0x10] sm:$0xff] (!%p240_p9)  ;;  %v787_v63 = vld [vmem:[%s2527_s2 + $0x18] sm:$0xff] (!%p240_p9)  ;;  %s2273_s16 = smov (!%p240_p9), 16   ;;  %vm788_vm3 = vcmask (!%p240_p9), 261120  }
  0x10   : > { %v2057_v6 = vpack.c.bf16 (!%p240_p9), %v284_v4, %v281_v3  ;;  %v359_v7 = vsub.f32 (!%p240_p9), %v274_v0, %v281_v3  ;;  %v366_v8 = vsub.f32 (!%p240_p9), %v275_v1, %v284_v4  ;;  %v796_v57 = vand.u32 (!%p240_p9), 4294901760, %v785_v54  ;;  %s267_s8 = sand.u32 (!%p240_p9), 1, %s2260_s25   ;;  %s1837_s14 = sshll.u32 (!%p240_p9), %s2336_s28, 4 }
  0x11   : > { %v873_v60 = vsub.f32 (!%p240_p9), %v784_v53, %v793_v56  ;;  %v799_v1 = vand.u32 (!%p240_p9), 4294901760, %v786_v62  ;;  %v802_v3 = vand.u32 (!%p240_p9), 4294901760, %v787_v63  ;;  %vm1277_vm4 = vcmask (!%p240_p9), 122880   ;;  %s268_s15 = scalar_lea.vmem (!%p240_p9), [#allocation2], %s267_s8  ;;  %s2483_s19 = scalar_lea.hbm (!%p240_p9), %s2532_s7, %s1837_s14 }
  0x12   : > { %2058 = vmatpush3.bf16.msra.mxu0 (!%p240_p9), %v2057_v6  ;;  %v360_v9 = vand.u32 (!%p240_p9), 4294901760, %v359_v7  ;;  %v367_v10 = vand.u32 (!%p240_p9), 4294901760, %v366_v8  ;;  %v2063_v23 = vpack.c.bf16 (!%p240_p9), %v366_v8, %v359_v7  ;;  %v2409_v59 = vpack.c.bf16 (!%p240_p9), %v796_v57, %v793_v56  ;;  %s1765_s20 = scalar_lea.sflag (!%p240_p9), [#allocation3], %s267_s8 }
  0x13   : > { %2059 = vmatprep.subr.bf16.mxu0 (!%p240_p9), %v2270_v2  ;;  %v880_v61 = vsub.f32 (!%p240_p9), %v785_v54, %v796_v57  ;;  %v874_v4 = vand.u32 (!%p240_p9), 4294901760, %v873_v60  ;;  %vm1762_vm5 = vcmask (!%p240_p9), 16384  }
  0x14   : > { %v361_v13 = vsub.f32 (!%p240_p9), %v359_v7, %v360_v9  ;;  %v368_v14 = vsub.f32 (!%p240_p9), %v366_v8, %v367_v10  ;;  %v2069_v24 = vpack.c.bf16 (!%p240_p9), %v367_v10, %v360_v9  ;;  %2076 = vmatpush3.bf16.msra.mxu1 (!%p240_p9), %v2409_v59  ;;  %v2419_v8 = vpack.c.bf16 (!%p240_p9), %v802_v3, %v799_v1 }
  0x15   : > { %s270_s17 = scalar_select %p269_p10, %s2336_s28, 1  ;;  %2077 = vmatprep.subr.bf16.mxu1 %v2270_v2  ;;  %v887_v9 = vsub.f32 %v786_v62, %v799_v1  ;;  %v894_v10 = vsub.f32 %v787_v63, %v802_v3 }
  0x16   : > { %v362_v17 = vand.u32 4294901760, %v361_v13  ;;  %v369_v18 = vand.u32 4294901760, %v368_v14  ;;  %s2274_s28 = smov [#allocation2]  }
  0x17   : > { %s1836_s18 = sshll.u32 %s270_s17, 1  ;;  %v888_v14 = vand.u32 4294901760, %v887_v9  ;;  %s2210_s22 = sshll.u32 %s2274_s28, 4  ;;  %s2211_s22 = int_to_ptr.vmem [resolvable:$false] %s2210_s22 }
  0x18   : > { %s272_s21 = scalar_lea.vmem %s2525_s0, %s1836_s18  ;;  %v2060_v21 = vpack.c.bf16 %v369_v18, %v362_v17  ;;  %2079 = vmatpush3.bf16.msra.mxu1 %v2419_v8  ;;  %v895_v17 = vand.u32 4294901760, %v894_v10  ;;  %s2212_s23 = scalar_lea.vmem %s2211_s22, 32 }
  0x19   : > { %v273_v11 = vld [vmem:[%s272_s21] sm:$0x3]  ;;  %2080 = vmatprep.subr.bf16.mxu1 %v2270_v2 }
  0x1a   : > { %v278_v12 = vsel %vm276_vm1, %v273_v11, 0  ;;  %v875_v11 = vsub.f32 %v873_v60, %v874_v4 }
  0x1b   : > { %v347_v15 = vand.u32 4294901760, %v278_v12 }
  0x1d   : > { %v348_v16 = vsub.f32 %v278_v12, %v347_v15 }
  0x1f   : > { %v349_v19 = vand.u32 4294901760, %v348_v16 }
  0x21   : > { %v350_v20 = vsub.f32 %v348_v16, %v349_v19 }
  0x23   : > { %v351_v22 = vand.u32 4294901760, %v350_v20 }
  0x25   : > { %1911 = vmatmul.mubr.f32.vlgmr.msra.gmra.mrb[0].mxu0 %v351_v22 }
  0x26   : > { %2061 = vmatpush3.bf16.msra.mxu0 %v2060_v21  ;;  %1917 = vmatprep.mubr.msk.f32.mxu0 %vm2271_vm0, %v2272_v5  ;;  %v896_v21 = vsub.f32 %v894_v10, %v895_v17 }
  0x27   : > { %2062 = vmatprep.subr.bf16.mxu0 %v2270_v2 }
  0x2d   : > { %1918 = vmatmul.mubr.f32.vlgmr.msra.gmra.mrb[0].mxu0 %v347_v15 }
  0x2e   : > { %2064 = vmatpush3.bf16.msra.mxu0 %v2063_v23  ;;  %1924 = vmatprep.mubr.msk.f32.mxu0 %vm2271_vm0, %v2272_v5  ;;  %v897_v23 = vand.u32 4294901760, %v896_v21  ;;  %v1299_v21 = vld [vmem:[%s2531_s6] sm:$0x1] }
  0x2f   : > { %2065 = vmatprep.subr.bf16.mxu0 %v2270_v2 }
  0x35   : > { %1925 = vmatmul.mubr.f32.vlgmr.msra.gmra.mrb[0].mxu0 %v348_v16 }
  0x36   : > { %2067 = vmatpush3.bf16.msra.mxu0 %v2057_v6  ;;  %1931 = vmatprep.mubr.msk.f32.mxu0 %vm2271_vm0, %v2272_v5 }
  0x37   : > { %2068 = vmatprep.subr.bf16.mxu0 %v2270_v2 }
  0x3d   : > { %1932 = vmatmul.mubr.f32.vlgmr.msra.gmra.mrb[0].mxu0 %v349_v19  ;;  %v889_v19 = vsub.f32 %v887_v9, %v888_v14 }
  0x3e   : > { %2070 = vmatpush3.bf16.msra.mxu0 %v2069_v24  ;;  %1938 = vmatprep.mubr.msk.f32.mxu0 %vm2271_vm0, %v2272_v5 }
  0x3f   : > { %2071 = vmatprep.subr.bf16.mxu0 %v2270_v2  ;;  %v890_v22 = vand.u32 4294901760, %v889_v19 }
  0x41   : > { %v2084_v24 = vpack.c.bf16 %v897_v23, %v890_v22 }
  0x45   : > { %1939 = vmatmul.mubr.f32.vlgmr.msra.gmra.mrb[0].mxu0 %v347_v15 }
  0x46   : > { %2073 = vmatpush3.bf16.msra.mxu0 %v2057_v6  ;;  %1945 = vmatprep.mubr.msk.f32.mxu0 %vm2271_vm0, %v2272_v5  ;;  %v881_v6 = vand.u32 4294901760, %v880_v61 }
  0x47   : > { %2110 = vmatprep.subr.bf16.mxu0 %v2270_v2 }
  0x48   : > { %v882_v12 = vsub.f32 %v880_v61, %v881_v6 }
  0x4a   : > { %v883_v16 = vand.u32 4294901760, %v882_v12 }
  0x4d   : > { %1946 = vmatmul.mubr.f32.vlgmr.msra.gmra.mrb[0].mxu0 %v347_v15  ;;  %v876_v15 = vand.u32 4294901760, %v875_v11  ;;  %v1294_v11 = vld [vmem:[%s2529_s4] sm:$0x1] }
  0x4e   : > { %2018 = vmatprep.mubr.msk.f32.mxu0 %vm2271_vm0, %v2272_v5 }
  0x4f   : > { %v2081_v20 = vpack.c.bf16 %v883_v16, %v876_v15 }
 0x120   : > { %v735_v25 = vpop.f32.mrb[0].mxu0 }
 0x121   : > { %v740_v26 = vsel %vm739_vm2, %v735_v25, 0.0  ;;  %v1947_v27 = vpop.f32.mrb[1].mxu0 }
 0x122   : > { %v741_v28 = vrot.slane %v740_v26, 4  ;;  %v2099_v27 = vpack.c.bf16 %v881_v6, %v874_v4 }
 0x124   : > { %v742_v29 = vadd.f32 %v741_v28, %v740_v26  ;;  %v2090_v26 = vpack.c.bf16 %v894_v10, %v887_v9  ;;  %v2102_v28 = vpack.c.bf16 %v895_v17, %v888_v14  ;;  %v1292_v9 = vld [vmem:[%s2528_s3] sm:$0x1] }
 0x126   : > { %v743_v30 = vrot.slane %v742_v29, 2 }
 0x128   : > { %v744_v31 = vadd.f32 %v743_v30, %v742_v29 }
 0x12a   : > { %v745_v32 = vrot.slane %v744_v31, 1 }
 0x12c   : > { %v746_v33 = vadd.f32 %v745_v32, %v744_v31 }
 0x12e   : > { %v748_v34 = vmul.f32 0.5, %v746_v33 }
 0x130   : > { %v749_v35 = vsub.f32 %v735_v25, %v748_v34  ;;  %v2087_v25 = vpack.c.bf16 %v880_v61, %v873_v60 }
 0x132   : > { %v750_v36 = vmul.f32 %v749_v35, %v749_v35 }
 0x134   : > { %v751_v37 = vsel %vm739_vm2, %v750_v36, 0.0 }
 0x135   : > { %v752_v38 = vrot.slane %v751_v37, 4 }
 0x137   : > { %v753_v39 = vadd.f32 %v752_v38, %v751_v37 }
 0x139   : > { %v754_v40 = vrot.slane %v753_v39, 2 }
 0x13b   : > { %v755_v41 = vadd.f32 %v754_v40, %v753_v39 }
 0x13d   : > { %v756_v42 = vrot.slane %v755_v41, 1 }
 0x13f   : > { %v757_v43 = vadd.f32 %v756_v42, %v755_v41 }
 0x141   : > { %v758_v44 = vmul.f32 0.5, %v757_v43 }
 0x143   : > { %v759_v45 = vadd.f32 1e-05, %v758_v44 }
 0x145   : > { %2202 = vrsqrt.f32 %v759_v45 }
 0x14f   : > { %v2203_v46 = vpop.eup %2202 }
 0x150   : > { %v761_v47 = vmul.f32 %v2203_v46, %v749_v35 }
 0x152   : > { %v762_v48 = vmul.f32 0.2, %v761_v47 }
 0x154   : > { %v763_v49 = vmax.f32 %v761_v47, %v762_v48 }
 0x156   : > { %v764_v50 = vsel %vm739_vm2, %v763_v49, -inf  ;;  %v771_v51 = vsel %vm739_vm2, %v763_v49, 0.0 }
 0x157   : > { %v772_v52 = vrot.slane %v771_v51, 4  ;;  %v765_v29 = vrot.slane %v764_v50, 4 }
 0x159   : > { %v773_v55 = vadd.f32 %v772_v52, %v771_v51  ;;  %v766_v30 = vmax.f32 %v764_v50, %v765_v29  ;;  %v1297_v51 = vld [vmem:[%s2530_s5] sm:$0xff]  ;;  %v1298_v52 = vld [vmem:[%s2530_s5 + $0x8] sm:$0xff] }
 0x15a   : > { %v1304_v53 = vand.u32 4294901760, %v1297_v51  ;;  %v1307_v54 = vand.u32 4294901760, %v1298_v52 }
 0x15b   : > { %v774_v58 = vrot.slane %v773_v55, 2  ;;  %v767_v31 = vrot.slane %v766_v30, 2 }
 0x15c   : > { %v1382_v56 = vsub.f32 %v1297_v51, %v1304_v53  ;;  %v1389_v57 = vsub.f32 %v1298_v52, %v1307_v54 }
 0x15d   : > { %v775_v0 = vadd.f32 %v774_v58, %v773_v55  ;;  %v768_v32 = vmax.f32 %v766_v30, %v767_v31  ;;  %v2111_v55 = vpack.c.bf16 %v1307_v54, %v1304_v53 }
 0x15e   : > { %v1383_v58 = vand.u32 4294901760, %v1382_v56  ;;  %v2117_v1 = vpack.c.bf16 %v1389_v57, %v1382_v56 }
 0x15f   : > { %v776_v7 = vrot.slane %v775_v0, 1  ;;  %v769_v33 = vrot.slane %v768_v32, 1  ;;  %2112 = vmatpush3.bf16.msra.mxu0 %v2111_v55 }
 0x160   : > { %2113 = vmatprep.subr.bf16.mxu0 %v2270_v2  ;;  %v1384_v60 = vsub.f32 %v1382_v56, %v1383_v58 }
 0x161   : > { %v777_v13 = vadd.f32 %v776_v7, %v775_v0  ;;  %v770_v34 = vmax.f32 %v768_v32, %v769_v33 }
 0x162   : > { %v1385_v62 = vand.u32 4294901760, %v1384_v60 }
 0x163   : > { %v778_v18 = vmul.f32 0.5, %v777_v13 }
 0x165   : > { %780 = vrot.lane.b32.xlu0 %v778_v18, %s2273_s16  ;;  %s1777_s16 = sshll.u32 %s268_s15, 4  ;;  %s2485_s16 = int_to_ptr.vmem [resolvable:$true] %s1777_s16 }
 0x166   : > { %s2206_s21 = scalar_lea.vmem %s2485_s16, 16  ;;  %p2213_p0 = scmp.lt.s32.totalorder %s2485_s16, %s2211_s22 }
 0x167   : > { %p2207_p11 = scmp.ne.s32.totalorder %s2485_s16, %s2206_s21  ;;  %p2214_p1 = scmp.lt.s32.totalorder %s2212_s23, %s2206_s21 }
 0x169   : > { %p2208_p12 = pnand %p2207_p11, %p2353_p5  ;;  %p2215_p2 = por %p2214_p1, %p2213_p0 }
 0x16b   : > { %p2209_p13 = pneg %p2208_p12 }
 0x16d   : > { %p2216_p3 = pnand %p2215_p2, %p2209_p13 }
 0x1d7   : > { %v781_v35 = vpop.permute.xlu0 %780 }
 0x1d8   : > { %v783_v36 = vsel %vm276_vm1, %v770_v34, %v781_v35 }
 0x1d9   : > { %v790_v37 = vsel %vm788_vm3, %v783_v36, 0 }
 0x1da   : > { %v861_v38 = vand.u32 4294901760, %v790_v37 }
 0x1dc   : > { %v862_v39 = vsub.f32 %v790_v37, %v861_v38 }
 0x1de   : > { %v863_v40 = vand.u32 4294901760, %v862_v39 }
 0x1e0   : > { %v864_v41 = vsub.f32 %v862_v39, %v863_v40 }
 0x1e2   : > { %v865_v42 = vand.u32 4294901760, %v864_v41 }
 0x1e4   : > { %1957 = vmatmul.mubr.f32.vlgmr.msra.gmra.mrb[0].mxu1 %v865_v42 }
 0x1e5   : > { %2082 = vmatpush3.bf16.msra.mxu1 %v2081_v20  ;;  %1967 = vmatprep.mubr.msk.f32.mxu1 %vm2271_vm0, %v2272_v5 }
 0x1e6   : > { %2083 = vmatprep.subr.bf16.mxu1 %v2270_v2 }
 0x1e9   : > { %2085 = vmatpush3.bf16.msra.mxu1 %v2084_v24 }
 0x1ea   : > { %2086 = vmatprep.subr.bf16.mxu1 %v2270_v2 }
 0x1ec   : > { %1968 = vmatmul.mubr.f32.vlgmr.msra.gmra.mrb[0].mxu1 %v861_v38 }
 0x1ed   : > { %2088 = vmatpush3.bf16.msra.mxu1 %v2087_v25  ;;  %1978 = vmatprep.mubr.msk.f32.mxu1 %vm2271_vm0, %v2272_v5 }
 0x1ee   : > { %2089 = vmatprep.subr.bf16.mxu1 %v2270_v2 }
 0x1f1   : > { %2091 = vmatpush3.bf16.msra.mxu1 %v2090_v26 }
 0x1f2   : > { %2092 = vmatprep.subr.bf16.mxu1 %v2270_v2 }
 0x1f4   : > { %1979 = vmatmul.mubr.f32.vlgmr.msra.gmra.mrb[0].mxu1 %v862_v39 }
 0x1f5   : > { %2094 = vmatpush3.bf16.msra.mxu1 %v2409_v59  ;;  %1989 = vmatprep.mubr.msk.f32.mxu1 %vm2271_vm0, %v2272_v5 }
 0x1f6   : > { %2095 = vmatprep.subr.bf16.mxu1 %v2270_v2 }
 0x1f9   : > { %2097 = vmatpush3.bf16.msra.mxu1 %v2419_v8 }
 0x1fa   : > { %2098 = vmatprep.subr.bf16.mxu1 %v2270_v2 }
 0x1fc   : > { %1990 = vmatmul.mubr.f32.vlgmr.msra.gmra.mrb[0].mxu1 %v863_v40 }
 0x1fd   : > { %2100 = vmatpush3.bf16.msra.mxu1 %v2099_v27  ;;  %2000 = vmatprep.mubr.msk.f32.mxu1 %vm2271_vm0, %v2272_v5 }
 0x1fe   : > { %2101 = vmatprep.subr.bf16.mxu1 %v2270_v2 }
 0x201   : > { %2103 = vmatpush3.bf16.msra.mxu1 %v2102_v28 }
 0x202   : > { %2104 = vmatprep.subr.bf16.mxu1 %v2270_v2 }
 0x204   : > { %2001 = vmatmul.mubr.f32.vlgmr.msra.gmra.mrb[0].mxu1 %v861_v38 }
 0x205   : > { %2106 = vmatpush3.bf16.msra.mxu1 %v2409_v59  ;;  %2011 = vmatprep.mubr.msk.f32.mxu1 %vm2271_vm0, %v2272_v5  ;;  %v1390_v59 = vand.u32 4294901760, %v1389_v57 }
 0x206   : > { %2107 = vmatprep.subr.bf16.mxu1 %v2270_v2 }
 0x207   : > { %v1391_v61 = vsub.f32 %v1389_v57, %v1390_v59  ;;  %v2123_v3 = vpack.c.bf16 %v1390_v59, %v1383_v58 }
 0x209   : > { %2109 = vmatpush3.bf16.msra.mxu1 %v2419_v8  ;;  %v1392_v63 = vand.u32 4294901760, %v1391_v61 }
 0x20b   : > { %v2114_v0 = vpack.c.bf16 %v1392_v63, %v1385_v62 }
 0x20c   : > { %2012 = vmatmul.mubr.f32.vlgmr.msra.gmra.mrb[0].mxu1 %v861_v38 }
 0x2df   : > { %v1273_v43 = vpop.f32.mrb[0].mxu1 }
 0x2e0   : > { %v2013_v44 = vpop.f32.mrb[1].mxu1  ;;  %v1278_v45 = vsel %vm1277_vm4, %v1273_v43, 0.0 }
 0x2e1   : > { %1279 = vadd.xlane.f32.xlu0 %v1278_v45 }
 0x36e   : > { %v1280_v46 = vpop.xlane.xlu0 %1279 }
 0x36f   : > { %v1282_v47 = vmul.f32 0.0625, %v1280_v46 }
 0x371   : > { %v1283_v48 = vsub.f32 %v1273_v43, %v1282_v47 }
 0x373   : > { %v1284_v49 = vmul.f32 %v1283_v48, %v1283_v48 }
 0x375   : > { %v1285_v50 = vsel %vm1277_vm4, %v1284_v49, 0.0 }
 0x376   : > { %1286 = vadd.xlane.f32.xlu1 %v1285_v50 }
 0x403   : > { %v1287_v4 = vpop.xlane.xlu1 %1286 }
 0x404   : > { %v1288_v6 = vmul.f32 0.0625, %v1287_v4 }
 0x406   : > { %v1289_v7 = vadd.f32 1e-05, %v1288_v6 }
 0x408   : > { %2204 = vrsqrt.f32 %v1289_v7 }
 0x412   : > { %v2205_v8 = vpop.eup %2204 }
 0x413   : > { %v1291_v10 = vmul.f32 %v2205_v8, %v1283_v48 }
 0x415   : > { %v1293_v12 = vmul.f32 %v1292_v9, %v1291_v10 }
 0x417   : > { %v1295_v13 = vadd.f32 %v1294_v11, %v1293_v12 }
 0x419   : > { %v1296_v14 = vmax.f32 %v1295_v13, 0.0 }
 0x41b   : > { %v1301_v15 = vsel %vm276_vm1, %v1296_v14, 0 }
 0x41c   : > { %v1370_v16 = vand.u32 4294901760, %v1301_v15 }
 0x41e   : > { %v1371_v17 = vsub.f32 %v1301_v15, %v1370_v16 }
 0x420   : > { %v1372_v18 = vand.u32 4294901760, %v1371_v17 }
 0x422   : > { %v1373_v19 = vsub.f32 %v1371_v17, %v1372_v18 }
 0x424   : > { %v1374_v20 = vand.u32 4294901760, %v1373_v19 }
 0x426   : > { %2019 = vmatmul.mubr.f32.vlgmr.msra.gmra.mrb[2].mxu0 %v1374_v20 }
 0x427   : > { %2115 = vmatpush3.bf16.msra.mxu0 %v2114_v0  ;;  %2025 = vmatprep.mubr.msk.f32.mxu0 %vm2271_vm0, %v2272_v5 }
 0x428   : > { %2116 = vmatprep.subr.bf16.mxu0 %v2270_v2 }
 0x42e   : > { %2026 = vmatmul.mubr.f32.vlgmr.msra.gmra.mrb[2].mxu0 %v1370_v16 }
 0x42f   : > { %2118 = vmatpush3.bf16.msra.mxu0 %v2117_v1  ;;  %2032 = vmatprep.mubr.msk.f32.mxu0 %vm2271_vm0, %v2272_v5 }
 0x430   : > { %2119 = vmatprep.subr.bf16.mxu0 %v2270_v2 }
 0x436   : > { %2033 = vmatmul.mubr.f32.vlgmr.msra.gmra.mrb[2].mxu0 %v1371_v17 }
 0x437   : > { %2121 = vmatpush3.bf16.msra.mxu0 %v2111_v55  ;;  %2039 = vmatprep.mubr.msk.f32.mxu0 %vm2271_vm0, %v2272_v5 }
 0x438   : > { %2122 = vmatprep.subr.bf16.mxu0 %v2270_v2 }
 0x43e   : > { %2040 = vmatmul.mubr.f32.vlgmr.msra.gmra.mrb[2].mxu0 %v1372_v18 }
 0x43f   : > { %2124 = vmatpush3.bf16.msra.mxu0 %v2123_v3  ;;  %2046 = vmatprep.mubr.msk.f32.mxu0 %vm2271_vm0, %v2272_v5 }
 0x440   : > { %2125 = vmatprep.subr.bf16.mxu0 %v2270_v2 }
 0x446   : > { %2047 = vmatmul.mubr.f32.vlgmr.msra.gmra.mrb[2].mxu0 %v1370_v16 }
 0x447   : > { %2127 = vmatpush3.bf16.msra.mxu0 %v2111_v55  ;;  %2053 = vmatprep.mubr.msk.f32.mxu0 %vm2271_vm0, %v2272_v5 }
 0x44e   : > { %2054 = vmatmul.mubr.f32.vlgmr.msra.gmra.mrb[2].mxu0 %v1370_v16 }
 0x521   : > { %v1758_v22 = vpop.f32.mrb[2].mxu0 }
 0x522   : > { %v2128_v23 = vadd.f32 %v1758_v22, %v1299_v21  ;;  %v2055_v24 = vpop.f32.mrb[3].mxu0 }
 0x524   : > { %1763 = vst.msk [vmem:[%s268_s15] sm:$0x1] %vm1762_vm5, %v2128_v23 }
 0x525   : > { %2219 = shalt.err (!%p2216_p3)
}
 0x526   : > { %s2220_s29 = scalar_lea.hbm %s2483_s19, 16  ;;  %s2224_s13 = scalar_lea.hbm %s2532_s7, 32 }
 0x527   : > { %p2221_p4 = scmp.ne.s32.totalorder %s2483_s19, %s2220_s29  ;;  %p2225_p9 = scmp.lt.u32.totalorder %s2483_s19, %s2532_s7 }
 0x528   : > { %p2226_p10 = scmp.lt.u32.totalorder %s2224_s13, %s2220_s29  ;;  %p2228_p12 = scmp.lt.u32.totalorder %s2220_s29, %s2483_s19 }
 0x529   : > { %p2222_p7 = pnand %p2221_p4, %p2353_p5 }
 0x52a   : > { %p2227_p11 = por %p2226_p10, %p2225_p9 }
 0x52b   : > { %p2223_p8 = pneg %p2222_p7 }
 0x52c   : > { %p2229_p13 = por %p2228_p12, %p2227_p11 }
 0x52e   : > { %p2230_p0 = pnand %p2229_p13, %p2223_p8 }
 0x530   : > { %2233 = shalt.err (!%p2230_p0)
}
 0x531   : > { %2159 = dma.vmem_to_hbm [thread:$0]  (%p2353_p5), %s2485_s16, 16, %s2483_s19, %s1765_s20  }
 0x532 PF: > { %p2165_p1 = scmp.ge.s32.totalorder %s2268_s27, 2  ;;  %s1789_s17 = sand.u32 1, %s2256_s24  }
 0x533   : > { %s1790_s18 = scalar_lea.sflag [#allocation3], %s1789_s17 }
 0x534   : > { %p2162_p2 = pnand %p2165_p1, %p2357_p6 }
 0x536   : > { %2251 = dma.done.wait (!%p2162_p2), %s1790_s18, 16  }
 0x537   : > { %2253 = vsyncadd (!%p2162_p2), %s1790_s18, 4294967280  ;;  %p17_p3 = scmp.ge.s32.totalorder %s2340_s30, 4   ;;  %s2535_s24 = smov %s2260_s25 }
 0x538   : > { %s2536_s25 = smov %s2264_s26  ;;  %s2537_s26 = smov %s2351_s10 }
 0x539   : > { %s2538_s27 = smov %s2340_s30  ;;  %19 = sbr.rel (!%p17_p3) target bundleno = 3 (0x3), region = 83 }
 0x540   :  { %1794 = vsyncpa [#allocation3], 1 }
 0x541   :  { %1796 = vsyncpa [#allocation3 + $0x1], 1 }

</bundles_post_ra>
